<compile_context>
chip_gen: v5e
topology: v5e:2x2
jax: 0.10.0
libtpu: 0.0.40
codegen_flags: <defaults>
</compile_context>

<pallas_src>
import jax
import jax.numpy as jnp
from jax.experimental import pallas as pl
from jax.experimental.pallas import tpu as pltpu


def _pick_strip_height(H, requested):
    """Largest multiple-of-16 divisor of H that is <= requested, else the full H."""
    requested = min(requested, H)
    cands = [d for d in range(16, requested + 1, 16) if H % d == 0]
    th = max(cands) if cands else H
    assert H % th == 0 and th % 2 == 0, (H, th)
    return th


# --------------------------------------------------------------------------
# Fused Conv3x3 (stride 1, pad 1) + bias + ReLU + MaxPool2x2 (stride 2).
# Grid = (batch, row-strip).  The padded image (pre-split into even/odd columns) stays
# resident in VMEM across the strip axis.  Each step runs 2 x 9 per-tap MXU matmuls
# (even / odd output columns) accumulated in vregs, applies bias + ReLU, and the 2x2
# max-pool: horizontal = elementwise max(even, odd), vertical = leading-axis pair max.
# --------------------------------------------------------------------------
def conv3x3_relu_pool(x_nhwc, w, b, *, th=16):
    N, H, W, Cin = x_nhwc.shape
    Cout = w.shape[-1]
    assert H % 2 == 0 and W % 2 == 0 and W % 16 == 0, (H, W)
    Hp, Wp = H // 2, W // 2

    th = _pick_strip_height(H, th)     # at 224 scale pass th=112 (fewer grid steps)
    n_strips = H // th

    xp = jnp.pad(x_nhwc, ((0, 0), (1, 1), (1, 1), (0, 0)))      # conv padding = 1
    # One-time column split so horizontal pooling is elementwise inside the kernel.
    x_even = xp[:, :, 0::2, :]                                  # padded cols 0,2,...,W
    x_odd = xp[:, :, 1::2, :]                                   # padded cols 1,3,...,W+1
    b2 = b.reshape(1, Cout)

    def kernel(xe_ref, xo_ref, w_ref, b_ref, o_ref):
        s = pl.program_id(1)
        row0 = pl.multiple_of(s * th, th)

        acc_e = None   # conv output for even output columns, (th*Wp, Cout) f32 in vregs
        acc_o = None   # conv output for odd output columns
        for dh in range(3):
            for dw in range(3):
                # output column j reads padded input column j + dw:
                #   even outputs j=2m   -> padded col 2m + dw
                #   odd  outputs j=2m+1 -> padded col 2m + 1 + dw
                if dw % 2 == 0:
                    pe = xe_ref[0, pl.ds(row0 + dh, th), dw // 2:dw // 2 + Wp, :]
                    po = xo_ref[0, pl.ds(row0 + dh, th), dw // 2:dw // 2 + Wp, :]
                else:
                    pe = xo_ref[0, pl.ds(row0 + dh, th), 0:Wp, :]
                    po = xe_ref[0, pl.ds(row0 + dh, th), 1:1 + Wp, :]
                wt = w_ref[dh, dw]
                de = jnp.dot(pe.reshape(th * Wp, Cin), wt,
                             preferred_element_type=jnp.float32)
                do = jnp.dot(po.reshape(th * Wp, Cin), wt,
                             preferred_element_type=jnp.float32)
                acc_e = de if acc_e is None else acc_e + de      # first tap: plain assign
                acc_o = do if acc_o is None else acc_o + do

        # Horizontal pool half + bias + ReLU:  relu(max(a,b)+c) == max(relu(a+c), relu(b+c)).
        h = jnp.maximum(jnp.maximum(acc_e, acc_o) + b_ref[...], 0.0)   # (th*Wp, Cout)
        # Vertical pool half: pair adjacent output rows along a leading axis.
        h = h.reshape(th // 2, 2, Wp, Cout)
        o_ref[0] = jnp.maximum(h[:, 0], h[:, 1])                       # (th//2, Wp, Cout)

    return pl.pallas_call(
        kernel,
        out_shape=jax.ShapeDtypeStruct((N, Hp, Wp, Cout), jnp.float32),
        grid_spec=pltpu.PrefetchScalarGridSpec(
            num_scalar_prefetch=0,
            grid=(N, n_strips),
            in_specs=[
                # even/odd-column images: resident across the strip axis (index ignores s)
                pl.BlockSpec((1, H + 2, Wp + 1, Cin), lambda n, s: (n, 0, 0, 0)),
                pl.BlockSpec((1, H + 2, Wp + 1, Cin), lambda n, s: (n, 0, 0, 0)),
                pl.BlockSpec((3, 3, Cin, Cout), lambda n, s: (0, 0, 0, 0)),
                pl.BlockSpec((1, Cout), lambda n, s: (0, 0)),
            ],
            out_specs=pl.BlockSpec((1, th // 2, Wp, Cout), lambda n, s: (n, s, 0, 0)),
        ),
        # batch axis parallel only: avoids duplicating the resident-image DMA per core
        # when v7x shards the grid across its two TensorCores.
        compiler_params=pltpu.CompilerParams(
            dimension_semantics=("parallel", "arbitrary")),
    )(x_even, x_odd, w, b2)


# --------------------------------------------------------------------------
# MLP head: fc1 (K-tiled, bf16 weight stream) + ReLU + fc2 fused.
# Grid = (hidden-column-block j, K-tile k); j is 'parallel' (v7x: each TC streams a
# disjoint half of w_fc1), k is the sequential reduction with a per-j f32 accumulator.
# Each j writes a disjoint partial-logits block; partials + b2 are combined in the wrapper.
# --------------------------------------------------------------------------
def mlp_head(x, w1, b1, w2, b2, *, tk=2048, hidden_splits=2):
    N, K = x.shape
    Hdim = w1.shape[1]
    O = w2.shape[1]

    nj = hidden_splits if (Hdim % hidden_splits == 0 and
                           (Hdim // hidden_splits) % 128 == 0) else 1
    hj = Hdim // nj

    tk = min(tk, K)
    while K % tk:
        tk //= 2
    assert tk == K or tk % 128 == 0, (K, tk)
    nk = K // tk

    x = x.astype(jnp.bfloat16)     # bf16 activations x bf16 weights, f32 MXU accumulate

    def kernel(x_ref, w1_ref, b1_ref, w2_ref, o_ref, acc_ref):
        k = pl.program_id(1)

        @pl.when(k == 0)
        def _():
            acc_ref[...] = jnp.zeros_like(acc_ref)

        acc_ref[...] += jnp.dot(x_ref[...], w1_ref[...],
                                preferred_element_type=jnp.float32)

        @pl.when(k == pl.num_programs(1) - 1)
        def _():
            h = jnp.maximum(acc_ref[...] + b1_ref[...], 0.0)     # fc1 bias + ReLU
            o_ref[0] = jnp.dot(h, w2_ref[...], preferred_element_type=jnp.float32)

    flops = 2 * N * K * Hdim + 2 * N * Hdim * O
    bytes_accessed = N * K * 2 + K * Hdim * 2 + Hdim * O * 4 + nj * N * O * 4

    partial = pl.pallas_call(
        kernel,
        out_shape=jax.ShapeDtypeStruct((nj, N, O), jnp.float32),
        grid_spec=pltpu.PrefetchScalarGridSpec(
            num_scalar_prefetch=0,
            grid=(nj, nk),
            in_specs=[
                pl.BlockSpec((N, tk), lambda j, k: (0, k)),      # activation K-tile
                pl.BlockSpec((tk, hj), lambda j, k: (k, j)),     # fc1 bf16 weight K-tile (streamed)
                pl.BlockSpec((1, hj), lambda j, k: (0, j)),      # b1 column block (resident)
                pl.BlockSpec((hj, O), lambda j, k: (j, 0)),      # fc2 row block (resident)
            ],
            out_specs=pl.BlockSpec((1, N, O), lambda j, k: (j, 0, 0)),
            scratch_shapes=[pltpu.VMEM((N, hj), jnp.float32)],
        ),
        # At 224 scale: tk=4096-8192 + vmem_limit_bytes ~64-96 MiB on v5e/v6e; cap tk at
        # ~2048-4096 on v7x (64 MiB VMEM).  Defaults here fit every generation's default
        # scoped VMEM, so no vmem_limit_bytes is set.
        compiler_params=pltpu.CompilerParams(
            dimension_semantics=("parallel", "arbitrary")),
        cost_estimate=pl.CostEstimate(flops=flops, transcendentals=0,
                                      bytes_accessed=bytes_accessed),
    )(x, w1, b1.reshape(1, Hdim), w2)

    return jnp.sum(partial, axis=0) + b2.reshape(1, O)


# --------------------------------------------------------------------------
# Host-side, one-time weight row permutation: PyTorch flattens NCHW (c, h, w); our
# activations flatten NHWC (h, w, c).  Permuting w_fc1 rows once keeps the runtime
# flatten a free reshape (no per-forward NCHW transpose).
# --------------------------------------------------------------------------
def permute_fc1_rows_nchw_to_nhwc(w_fc1, C, Hq, Wq):
    return (w_fc1.reshape(C, Hq, Wq, -1)
                 .transpose(1, 2, 0, 3)
                 .reshape(C * Hq * Wq, -1))


# --------------------------------------------------------------------------
# Full forward pass (mirrors MushroomCNN.forward).
# --------------------------------------------------------------------------
def mushroom_cnn_forward(x_nchw, params):
    x = jnp.transpose(x_nchw, (0, 2, 3, 1))                          # NCHW -> NHWC (input only)
    y = conv3x3_relu_pool(x, params["w_conv1"], params["b_conv1"])   # conv1 + ReLU + pool
    y = conv3x3_relu_pool(y, params["w_conv2"], params["b_conv2"])   # conv2 + ReLU + pool
    y = y.reshape(y.shape[0], -1)        # NHWC flatten (w_fc1 rows pre-permuted to match)
    return mlp_head(y, params["w_fc1"], params["b_fc1"],
                    params["w_fc2"], params["b_fc2"])


def init_params(key, H, W):
    Hq, Wq = H // 4, W // 4
    f_in = 32 * Hq * Wq                  # == 32*56*56 for the 224x224 case
    ks = jax.random.split(key, 8)
    # fc1 generated in PyTorch NCHW-flatten row order, then permuted once to NHWC-flatten
    # order (as when converting a torch checkpoint), and stored bf16 (HBM-bound stream).
    w_fc1_nchw = jax.random.normal(ks[4], (f_in, 512), jnp.float32) * 0.02
    w_fc1 = permute_fc1_rows_nchw_to_nhwc(w_fc1_nchw, 32, Hq, Wq)
    return {
        "w_conv1": jax.random.normal(ks[0], (3, 3, 3, 16), jnp.float32) * 0.1,
        "b_conv1": jax.random.normal(ks[1], (16,), jnp.float32) * 0.01,
        "w_conv2": jax.random.normal(ks[2], (3, 3, 16, 32), jnp.float32) * 0.05,
        "b_conv2": jax.random.normal(ks[3], (32,), jnp.float32) * 0.01,
        "w_fc1": w_fc1.astype(jnp.bfloat16),
        "b_fc1": jax.random.normal(ks[5], (512,), jnp.float32) * 0.01,
        "w_fc2": jax.random.normal(ks[6], (512, 10), jnp.float32) * 0.05,
        "b_fc2": jax.random.normal(ks[7], (10,), jnp.float32) * 0.01,
    }


# Pure-JAX reference (same bf16 fc1 weights) used as a numerical self-check.
def reference_forward(x_nchw, params):
    x = jnp.transpose(x_nchw, (0, 2, 3, 1))

    def block(y, w, b):
        y = jax.lax.conv_general_dilated(
            y, w, window_strides=(1, 1), padding="SAME",
            dimension_numbers=("NHWC", "HWIO", "NHWC"))
        y = jnp.maximum(y + b, 0.0)
        return jax.lax.reduce_window(y, -jnp.inf, jax.lax.max,
                                     (1, 2, 2, 1), (1, 2, 2, 1), "VALID")

    y = block(x, params["w_conv1"], params["b_conv1"])
    y = block(y, params["w_conv2"], params["b_conv2"])
    y = y.reshape(y.shape[0], -1)
    h = jnp.dot(y.astype(jnp.bfloat16).astype(jnp.float32),
                params["w_fc1"].astype(jnp.float32)) + params["b_fc1"]
    h = jnp.maximum(h, 0.0)
    return jnp.dot(h, params["w_fc2"]) + params["b_fc2"]


if __name__ == "__main__":
    key = jax.random.PRNGKey(0)
    k_x, k_p = jax.random.split(key)

    N, C, H, W = 2, 3, 32, 32                # small stand-in for (N, 3, 224, 224)
    x = jax.random.normal(k_x, (N, C, H, W), jnp.float32)
    params = init_params(k_p, H, W)

    logits = jax.jit(mushroom_cnn_forward)(x, params)
    logits = jax.block_until_ready(logits)
    assert logits.shape == (N, 10) and logits.dtype == jnp.float32

    ref = reference_forward(x, params)
    err = float(jnp.max(jnp.abs(logits - ref)))
    assert err < 3e-2, f"max|logits - reference| = {err}"
    print("KERNEL_OK")
</pallas_src>

<mosaic_0001>
module attributes {stable_mosaic.version = 11 : i64} {
  func.func @kernel(%arg0: i32, %arg1: i32, %arg2: memref<1x34x17x3xf32, #tpu.memory_space<vmem>>, %arg3: memref<1x34x17x3xf32, #tpu.memory_space<vmem>>, %arg4: memref<3x3x3x16xf32, #tpu.memory_space<vmem>>, %arg5: memref<1x16xf32, #tpu.memory_space<vmem>>, %arg6: memref<1x8x16x16xf32, #tpu.memory_space<vmem>>) attributes {dimension_semantics = [#tpu.dimension_semantics<parallel>, #tpu.dimension_semantics<arbitrary>], iteration_bounds = array<i64: 2, 2>, scalar_prefetch = 0 : i64, scratch_operands = 0 : i64, tpu.core_type = #tpu.core_type<tc>, window_params = [{transform_indices = @transform_0, window_bounds = array<i64: 1, 34, 17, 3>}, {transform_indices = @transform_1, window_bounds = array<i64: 1, 34, 17, 3>}, {pipeline_mode = #tpu.pipeline_mode<synchronous>, transform_indices = @transform_2, window_bounds = array<i64: 3, 3, 3, 16>}, {pipeline_mode = #tpu.pipeline_mode<synchronous>, transform_indices = @transform_3, window_bounds = array<i64: 1, 16>}, {transform_indices = @transform_4, window_bounds = array<i64: 1, 8, 16, 16>}]} {
    %c16_i32 = arith.constant 16 : i32
    %0 = arith.muli %arg1, %c16_i32 : i32
    %1 = tpu.assume_multiple %0, 16 : i32
    %c0_i32 = arith.constant 0 : i32
    %2 = arith.addi %1, %c0_i32 : i32
    %c0 = arith.constant 0 : index
    %3 = arith.index_cast %2 : i32 to index
    %c0_0 = arith.constant 0 : index
    %c0_1 = arith.constant 0 : index
    %4 = vector.load %arg2[%c0, %3, %c0_0, %c0_1] : memref<1x34x17x3xf32, #tpu.memory_space<vmem>>, vector<1x16x16x3xf32>
    %5 = vector.shape_cast %4 : vector<1x16x16x3xf32> to vector<16x16x3xf32>
    %c0_i32_2 = arith.constant 0 : i32
    %6 = arith.addi %1, %c0_i32_2 : i32
    %c0_3 = arith.constant 0 : index
    %7 = arith.index_cast %6 : i32 to index
    %c0_4 = arith.constant 0 : index
    %c0_5 = arith.constant 0 : index
    %8 = vector.load %arg3[%c0_3, %7, %c0_4, %c0_5] : memref<1x34x17x3xf32, #tpu.memory_space<vmem>>, vector<1x16x16x3xf32>
    %9 = vector.shape_cast %8 : vector<1x16x16x3xf32> to vector<16x16x3xf32>
    %c0_6 = arith.constant 0 : index
    %c0_7 = arith.constant 0 : index
    %c0_8 = arith.constant 0 : index
    %c0_9 = arith.constant 0 : index
    %10 = vector.load %arg4[%c0_6, %c0_7, %c0_8, %c0_9] : memref<3x3x3x16xf32, #tpu.memory_space<vmem>>, vector<1x1x3x16xf32>
    %11 = vector.shape_cast %10 : vector<1x1x3x16xf32> to vector<3x16xf32>
    %12 = vector.shape_cast %5 : vector<16x16x3xf32> to vector<256x3xf32>
    %cst = arith.constant dense<0.000000e+00> : vector<256x16xf32>
    %13 = tpu.matmul %12, %11, %cst {dimension_numbers = #tpu.dot_dimension_numbers<[1], [0], [0], [1], [0, 0, 1, 1], [], []>} : vector<256x3xf32>, vector<3x16xf32>, vector<256x16xf32> -> vector<256x16xf32>
    %14 = vector.shape_cast %9 : vector<16x16x3xf32> to vector<256x3xf32>
    %cst_10 = arith.constant dense<0.000000e+00> : vector<256x16xf32>
    %15 = tpu.matmul %14, %11, %cst_10 {dimension_numbers = #tpu.dot_dimension_numbers<[1], [0], [0], [1], [0, 0, 1, 1], [], []>} : vector<256x3xf32>, vector<3x16xf32>, vector<256x16xf32> -> vector<256x16xf32>
    %c0_i32_11 = arith.constant 0 : i32
    %16 = arith.addi %1, %c0_i32_11 : i32
    %c0_12 = arith.constant 0 : index
    %17 = arith.index_cast %16 : i32 to index
    %c0_13 = arith.constant 0 : index
    %c0_14 = arith.constant 0 : index
    %18 = vector.load %arg3[%c0_12, %17, %c0_13, %c0_14] : memref<1x34x17x3xf32, #tpu.memory_space<vmem>>, vector<1x16x16x3xf32>
    %19 = vector.shape_cast %18 : vector<1x16x16x3xf32> to vector<16x16x3xf32>
    %c0_i32_15 = arith.constant 0 : i32
    %20 = arith.addi %1, %c0_i32_15 : i32
    %c0_16 = arith.constant 0 : index
    %21 = arith.index_cast %20 : i32 to index
    %c1 = arith.constant 1 : index
    %c0_17 = arith.constant 0 : index
    %22 = vector.load %arg2[%c0_16, %21, %c1, %c0_17] : memref<1x34x17x3xf32, #tpu.memory_space<vmem>>, vector<1x16x16x3xf32>
    %23 = vector.shape_cast %22 : vector<1x16x16x3xf32> to vector<16x16x3xf32>
    %c0_18 = arith.constant 0 : index
    %c1_19 = arith.constant 1 : index
    %c0_20 = arith.constant 0 : index
    %c0_21 = arith.constant 0 : index
    %24 = vector.load %arg4[%c0_18, %c1_19, %c0_20, %c0_21] : memref<3x3x3x16xf32, #tpu.memory_space<vmem>>, vector<1x1x3x16xf32>
    %25 = vector.shape_cast %24 : vector<1x1x3x16xf32> to vector<3x16xf32>
    %26 = vector.shape_cast %19 : vector<16x16x3xf32> to vector<256x3xf32>
    %cst_22 = arith.constant dense<0.000000e+00> : vector<256x16xf32>
    %27 = tpu.matmul %26, %25, %cst_22 {dimension_numbers = #tpu.dot_dimension_numbers<[1], [0], [0], [1], [0, 0, 1, 1], [], []>} : vector<256x3xf32>, vector<3x16xf32>, vector<256x16xf32> -> vector<256x16xf32>
    %28 = vector.shape_cast %23 : vector<16x16x3xf32> to vector<256x3xf32>
    %cst_23 = arith.constant dense<0.000000e+00> : vector<256x16xf32>
    %29 = tpu.matmul %28, %25, %cst_23 {dimension_numbers = #tpu.dot_dimension_numbers<[1], [0], [0], [1], [0, 0, 1, 1], [], []>} : vector<256x3xf32>, vector<3x16xf32>, vector<256x16xf32> -> vector<256x16xf32>
    %30 = arith.addf %13, %27 : vector<256x16xf32>
    %31 = arith.addf %15, %29 : vector<256x16xf32>
    %c0_i32_24 = arith.constant 0 : i32
    %32 = arith.addi %1, %c0_i32_24 : i32
    %c0_25 = arith.constant 0 : index
    %33 = arith.index_cast %32 : i32 to index
    %c1_26 = arith.constant 1 : index
    %c0_27 = arith.constant 0 : index
    %34 = vector.load %arg2[%c0_25, %33, %c1_26, %c0_27] : memref<1x34x17x3xf32, #tpu.memory_space<vmem>>, vector<1x16x16x3xf32>
    %35 = vector.shape_cast %34 : vector<1x16x16x3xf32> to vector<16x16x3xf32>
    %c0_i32_28 = arith.constant 0 : i32
    %36 = arith.addi %1, %c0_i32_28 : i32
    %c0_29 = arith.constant 0 : index
    %37 = arith.index_cast %36 : i32 to index
    %c1_30 = arith.constant 1 : index
    %c0_31 = arith.constant 0 : index
    %38 = vector.load %arg3[%c0_29, %37, %c1_30, %c0_31] : memref<1x34x17x3xf32, #tpu.memory_space<vmem>>, vector<1x16x16x3xf32>
    %39 = vector.shape_cast %38 : vector<1x16x16x3xf32> to vector<16x16x3xf32>
    %c0_32 = arith.constant 0 : index
    %c2 = arith.constant 2 : index
    %c0_33 = arith.constant 0 : index
    %c0_34 = arith.constant 0 : index
    %40 = vector.load %arg4[%c0_32, %c2, %c0_33, %c0_34] : memref<3x3x3x16xf32, #tpu.memory_space<vmem>>, vector<1x1x3x16xf32>
    %41 = vector.shape_cast %40 : vector<1x1x3x16xf32> to vector<3x16xf32>
    %42 = vector.shape_cast %35 : vector<16x16x3xf32> to vector<256x3xf32>
    %cst_35 = arith.constant dense<0.000000e+00> : vector<256x16xf32>
    %43 = tpu.matmul %42, %41, %cst_35 {dimension_numbers = #tpu.dot_dimension_numbers<[1], [0], [0], [1], [0, 0, 1, 1], [], []>} : vector<256x3xf32>, vector<3x16xf32>, vector<256x16xf32> -> vector<256x16xf32>
    %44 = vector.shape_cast %39 : vector<16x16x3xf32> to vector<256x3xf32>
    %cst_36 = arith.constant dense<0.000000e+00> : vector<256x16xf32>
    %45 = tpu.matmul %44, %41, %cst_36 {dimension_numbers = #tpu.dot_dimension_numbers<[1], [0], [0], [1], [0, 0, 1, 1], [], []>} : vector<256x3xf32>, vector<3x16xf32>, vector<256x16xf32> -> vector<256x16xf32>
    %46 = arith.addf %30, %43 : vector<256x16xf32>
    %47 = arith.addf %31, %45 : vector<256x16xf32>
    %c1_i32 = arith.constant 1 : i32
    %48 = arith.addi %1, %c1_i32 : i32
    %c0_37 = arith.constant 0 : index
    %49 = arith.index_cast %48 : i32 to index
    %c0_38 = arith.constant 0 : index
    %c0_39 = arith.constant 0 : index
    %50 = vector.load %arg2[%c0_37, %49, %c0_38, %c0_39] : memref<1x34x17x3xf32, #tpu.memory_space<vmem>>, vector<1x16x16x3xf32>
    %51 = vector.shape_cast %50 : vector<1x16x16x3xf32> to vector<16x16x3xf32>
    %c1_i32_40 = arith.constant 1 : i32
    %52 = arith.addi %1, %c1_i32_40 : i32
    %c0_41 = arith.constant 0 : index
    %53 = arith.index_cast %52 : i32 to index
    %c0_42 = arith.constant 0 : index
    %c0_43 = arith.constant 0 : index
    %54 = vector.load %arg3[%c0_41, %53, %c0_42, %c0_43] : memref<1x34x17x3xf32, #tpu.memory_space<vmem>>, vector<1x16x16x3xf32>
    %55 = vector.shape_cast %54 : vector<1x16x16x3xf32> to vector<16x16x3xf32>
    %c1_44 = arith.constant 1 : index
    %c0_45 = arith.constant 0 : index
    %c0_46 = arith.constant 0 : index
    %c0_47 = arith.constant 0 : index
    %56 = vector.load %arg4[%c1_44, %c0_45, %c0_46, %c0_47] : memref<3x3x3x16xf32, #tpu.memory_space<vmem>>, vector<1x1x3x16xf32>
    %57 = vector.shape_cast %56 : vector<1x1x3x16xf32> to vector<3x16xf32>
    %58 = vector.shape_cast %51 : vector<16x16x3xf32> to vector<256x3xf32>
    %cst_48 = arith.constant dense<0.000000e+00> : vector<256x16xf32>
    %59 = tpu.matmul %58, %57, %cst_48 {dimension_numbers = #tpu.dot_dimension_numbers<[1], [0], [0], [1], [0, 0, 1, 1], [], []>} : vector<256x3xf32>, vector<3x16xf32>, vector<256x16xf32> -> vector<256x16xf32>
    %60 = vector.shape_cast %55 : vector<16x16x3xf32> to vector<256x3xf32>
    %cst_49 = arith.constant dense<0.000000e+00> : vector<256x16xf32>
    %61 = tpu.matmul %60, %57, %cst_49 {dimension_numbers = #tpu.dot_dimension_numbers<[1], [0], [0], [1], [0, 0, 1, 1], [], []>} : vector<256x3xf32>, vector<3x16xf32>, vector<256x16xf32> -> vector<256x16xf32>
    %62 = arith.addf %46, %59 : vector<256x16xf32>
    %63 = arith.addf %47, %61 : vector<256x16xf32>
    %c1_i32_50 = arith.constant 1 : i32
    %64 = arith.addi %1, %c1_i32_50 : i32
    %c0_51 = arith.constant 0 : index
    %65 = arith.index_cast %64 : i32 to index
    %c0_52 = arith.constant 0 : index
    %c0_53 = arith.constant 0 : index
    %66 = vector.load %arg3[%c0_51, %65, %c0_52, %c0_53] : memref<1x34x17x3xf32, #tpu.memory_space<vmem>>, vector<1x16x16x3xf32>
    %67 = vector.shape_cast %66 : vector<1x16x16x3xf32> to vector<16x16x3xf32>
    %c1_i32_54 = arith.constant 1 : i32
    %68 = arith.addi %1, %c1_i32_54 : i32
    %c0_55 = arith.constant 0 : index
    %69 = arith.index_cast %68 : i32 to index
    %c1_56 = arith.constant 1 : index
    %c0_57 = arith.constant 0 : index
    %70 = vector.load %arg2[%c0_55, %69, %c1_56, %c0_57] : memref<1x34x17x3xf32, #tpu.memory_space<vmem>>, vector<1x16x16x3xf32>
    %71 = vector.shape_cast %70 : vector<1x16x16x3xf32> to vector<16x16x3xf32>
    %c1_58 = arith.constant 1 : index
    %c1_59 = arith.constant 1 : index
    %c0_60 = arith.constant 0 : index
    %c0_61 = arith.constant 0 : index
    %72 = vector.load %arg4[%c1_58, %c1_59, %c0_60, %c0_61] : memref<3x3x3x16xf32, #tpu.memory_space<vmem>>, vector<1x1x3x16xf32>
    %73 = vector.shape_cast %72 : vector<1x1x3x16xf32> to vector<3x16xf32>
    %74 = vector.shape_cast %67 : vector<16x16x3xf32> to vector<256x3xf32>
    %cst_62 = arith.constant dense<0.000000e+00> : vector<256x16xf32>
    %75 = tpu.matmul %74, %73, %cst_62 {dimension_numbers = #tpu.dot_dimension_numbers<[1], [0], [0], [1], [0, 0, 1, 1], [], []>} : vector<256x3xf32>, vector<3x16xf32>, vector<256x16xf32> -> vector<256x16xf32>
    %76 = vector.shape_cast %71 : vector<16x16x3xf32> to vector<256x3xf32>
    %cst_63 = arith.constant dense<0.000000e+00> : vector<256x16xf32>
    %77 = tpu.matmul %76, %73, %cst_63 {dimension_numbers = #tpu.dot_dimension_numbers<[1], [0], [0], [1], [0, 0, 1, 1], [], []>} : vector<256x3xf32>, vector<3x16xf32>, vector<256x16xf32> -> vector<256x16xf32>
    %78 = arith.addf %62, %75 : vector<256x16xf32>
    %79 = arith.addf %63, %77 : vector<256x16xf32>
    %c1_i32_64 = arith.constant 1 : i32
    %80 = arith.addi %1, %c1_i32_64 : i32
    %c0_65 = arith.constant 0 : index
    %81 = arith.index_cast %80 : i32 to index
    %c1_66 = arith.constant 1 : index
    %c0_67 = arith.constant 0 : index
    %82 = vector.load %arg2[%c0_65, %81, %c1_66, %c0_67] : memref<1x34x17x3xf32, #tpu.memory_space<vmem>>, vector<1x16x16x3xf32>
    %83 = vector.shape_cast %82 : vector<1x16x16x3xf32> to vector<16x16x3xf32>
    %c1_i32_68 = arith.constant 1 : i32
    %84 = arith.addi %1, %c1_i32_68 : i32
    %c0_69 = arith.constant 0 : index
    %85 = arith.index_cast %84 : i32 to index
    %c1_70 = arith.constant 1 : index
    %c0_71 = arith.constant 0 : index
    %86 = vector.load %arg3[%c0_69, %85, %c1_70, %c0_71] : memref<1x34x17x3xf32, #tpu.memory_space<vmem>>, vector<1x16x16x3xf32>
    %87 = vector.shape_cast %86 : vector<1x16x16x3xf32> to vector<16x16x3xf32>
    %c1_72 = arith.constant 1 : index
    %c2_73 = arith.constant 2 : index
    %c0_74 = arith.constant 0 : index
    %c0_75 = arith.constant 0 : index
    %88 = vector.load %arg4[%c1_72, %c2_73, %c0_74, %c0_75] : memref<3x3x3x16xf32, #tpu.memory_space<vmem>>, vector<1x1x3x16xf32>
    %89 = vector.shape_cast %88 : vector<1x1x3x16xf32> to vector<3x16xf32>
    %90 = vector.shape_cast %83 : vector<16x16x3xf32> to vector<256x3xf32>
    %cst_76 = arith.constant dense<0.000000e+00> : vector<256x16xf32>
    %91 = tpu.matmul %90, %89, %cst_76 {dimension_numbers = #tpu.dot_dimension_numbers<[1], [0], [0], [1], [0, 0, 1, 1], [], []>} : vector<256x3xf32>, vector<3x16xf32>, vector<256x16xf32> -> vector<256x16xf32>
    %92 = vector.shape_cast %87 : vector<16x16x3xf32> to vector<256x3xf32>
    %cst_77 = arith.constant dense<0.000000e+00> : vector<256x16xf32>
    %93 = tpu.matmul %92, %89, %cst_77 {dimension_numbers = #tpu.dot_dimension_numbers<[1], [0], [0], [1], [0, 0, 1, 1], [], []>} : vector<256x3xf32>, vector<3x16xf32>, vector<256x16xf32> -> vector<256x16xf32>
    %94 = arith.addf %78, %91 : vector<256x16xf32>
    %95 = arith.addf %79, %93 : vector<256x16xf32>
    %c2_i32 = arith.constant 2 : i32
    %96 = arith.addi %1, %c2_i32 : i32
    %c0_78 = arith.constant 0 : index
    %97 = arith.index_cast %96 : i32 to index
    %c0_79 = arith.constant 0 : index
    %c0_80 = arith.constant 0 : index
    %98 = vector.load %arg2[%c0_78, %97, %c0_79, %c0_80] : memref<1x34x17x3xf32, #tpu.memory_space<vmem>>, vector<1x16x16x3xf32>
    %99 = vector.shape_cast %98 : vector<1x16x16x3xf32> to vector<16x16x3xf32>
    %c2_i32_81 = arith.constant 2 : i32
    %100 = arith.addi %1, %c2_i32_81 : i32
    %c0_82 = arith.constant 0 : index
    %101 = arith.index_cast %100 : i32 to index
    %c0_83 = arith.constant 0 : index
    %c0_84 = arith.constant 0 : index
    %102 = vector.load %arg3[%c0_82, %101, %c0_83, %c0_84] : memref<1x34x17x3xf32, #tpu.memory_space<vmem>>, vector<1x16x16x3xf32>
    %103 = vector.shape_cast %102 : vector<1x16x16x3xf32> to vector<16x16x3xf32>
    %c2_85 = arith.constant 2 : index
    %c0_86 = arith.constant 0 : index
    %c0_87 = arith.constant 0 : index
    %c0_88 = arith.constant 0 : index
    %104 = vector.load %arg4[%c2_85, %c0_86, %c0_87, %c0_88] : memref<3x3x3x16xf32, #tpu.memory_space<vmem>>, vector<1x1x3x16xf32>
    %105 = vector.shape_cast %104 : vector<1x1x3x16xf32> to vector<3x16xf32>
    %106 = vector.shape_cast %99 : vector<16x16x3xf32> to vector<256x3xf32>
    %cst_89 = arith.constant dense<0.000000e+00> : vector<256x16xf32>
    %107 = tpu.matmul %106, %105, %cst_89 {dimension_numbers = #tpu.dot_dimension_numbers<[1], [0], [0], [1], [0, 0, 1, 1], [], []>} : vector<256x3xf32>, vector<3x16xf32>, vector<256x16xf32> -> vector<256x16xf32>
    %108 = vector.shape_cast %103 : vector<16x16x3xf32> to vector<256x3xf32>
    %cst_90 = arith.constant dense<0.000000e+00> : vector<256x16xf32>
    %109 = tpu.matmul %108, %105, %cst_90 {dimension_numbers = #tpu.dot_dimension_numbers<[1], [0], [0], [1], [0, 0, 1, 1], [], []>} : vector<256x3xf32>, vector<3x16xf32>, vector<256x16xf32> -> vector<256x16xf32>
    %110 = arith.addf %94, %107 : vector<256x16xf32>
    %111 = arith.addf %95, %109 : vector<256x16xf32>
    %c2_i32_91 = arith.constant 2 : i32
    %112 = arith.addi %1, %c2_i32_91 : i32
    %c0_92 = arith.constant 0 : index
    %113 = arith.index_cast %112 : i32 to index
    %c0_93 = arith.constant 0 : index
    %c0_94 = arith.constant 0 : index
    %114 = vector.load %arg3[%c0_92, %113, %c0_93, %c0_94] : memref<1x34x17x3xf32, #tpu.memory_space<vmem>>, vector<1x16x16x3xf32>
    %115 = vector.shape_cast %114 : vector<1x16x16x3xf32> to vector<16x16x3xf32>
    %c2_i32_95 = arith.constant 2 : i32
    %116 = arith.addi %1, %c2_i32_95 : i32
    %c0_96 = arith.constant 0 : index
    %117 = arith.index_cast %116 : i32 to index
    %c1_97 = arith.constant 1 : index
    %c0_98 = arith.constant 0 : index
    %118 = vector.load %arg2[%c0_96, %117, %c1_97, %c0_98] : memref<1x34x17x3xf32, #tpu.memory_space<vmem>>, vector<1x16x16x3xf32>
    %119 = vector.shape_cast %118 : vector<1x16x16x3xf32> to vector<16x16x3xf32>
    %c2_99 = arith.constant 2 : index
    %c1_100 = arith.constant 1 : index
    %c0_101 = arith.constant 0 : index
    %c0_102 = arith.constant 0 : index
    %120 = vector.load %arg4[%c2_99, %c1_100, %c0_101, %c0_102] : memref<3x3x3x16xf32, #tpu.memory_space<vmem>>, vector<1x1x3x16xf32>
    %121 = vector.shape_cast %120 : vector<1x1x3x16xf32> to vector<3x16xf32>
    %122 = vector.shape_cast %115 : vector<16x16x3xf32> to vector<256x3xf32>
    %cst_103 = arith.constant dense<0.000000e+00> : vector<256x16xf32>
    %123 = tpu.matmul %122, %121, %cst_103 {dimension_numbers = #tpu.dot_dimension_numbers<[1], [0], [0], [1], [0, 0, 1, 1], [], []>} : vector<256x3xf32>, vector<3x16xf32>, vector<256x16xf32> -> vector<256x16xf32>
    %124 = vector.shape_cast %119 : vector<16x16x3xf32> to vector<256x3xf32>
    %cst_104 = arith.constant dense<0.000000e+00> : vector<256x16xf32>
    %125 = tpu.matmul %124, %121, %cst_104 {dimension_numbers = #tpu.dot_dimension_numbers<[1], [0], [0], [1], [0, 0, 1, 1], [], []>} : vector<256x3xf32>, vector<3x16xf32>, vector<256x16xf32> -> vector<256x16xf32>
    %126 = arith.addf %110, %123 : vector<256x16xf32>
    %127 = arith.addf %111, %125 : vector<256x16xf32>
    %c2_i32_105 = arith.constant 2 : i32
    %128 = arith.addi %1, %c2_i32_105 : i32
    %c0_106 = arith.constant 0 : index
    %129 = arith.index_cast %128 : i32 to index
    %c1_107 = arith.constant 1 : index
    %c0_108 = arith.constant 0 : index
    %130 = vector.load %arg2[%c0_106, %129, %c1_107, %c0_108] : memref<1x34x17x3xf32, #tpu.memory_space<vmem>>, vector<1x16x16x3xf32>
    %131 = vector.shape_cast %130 : vector<1x16x16x3xf32> to vector<16x16x3xf32>
    %c2_i32_109 = arith.constant 2 : i32
    %132 = arith.addi %1, %c2_i32_109 : i32
    %c0_110 = arith.constant 0 : index
    %133 = arith.index_cast %132 : i32 to index
    %c1_111 = arith.constant 1 : index
    %c0_112 = arith.constant 0 : index
    %134 = vector.load %arg3[%c0_110, %133, %c1_111, %c0_112] : memref<1x34x17x3xf32, #tpu.memory_space<vmem>>, vector<1x16x16x3xf32>
    %135 = vector.shape_cast %134 : vector<1x16x16x3xf32> to vector<16x16x3xf32>
    %c2_113 = arith.constant 2 : index
    %c2_114 = arith.constant 2 : index
    %c0_115 = arith.constant 0 : index
    %c0_116 = arith.constant 0 : index
    %136 = vector.load %arg4[%c2_113, %c2_114, %c0_115, %c0_116] : memref<3x3x3x16xf32, #tpu.memory_space<vmem>>, vector<1x1x3x16xf32>
    %137 = vector.shape_cast %136 : vector<1x1x3x16xf32> to vector<3x16xf32>
    %138 = vector.shape_cast %131 : vector<16x16x3xf32> to vector<256x3xf32>
    %cst_117 = arith.constant dense<0.000000e+00> : vector<256x16xf32>
    %139 = tpu.matmul %138, %137, %cst_117 {dimension_numbers = #tpu.dot_dimension_numbers<[1], [0], [0], [1], [0, 0, 1, 1], [], []>} : vector<256x3xf32>, vector<3x16xf32>, vector<256x16xf32> -> vector<256x16xf32>
    %140 = vector.shape_cast %135 : vector<16x16x3xf32> to vector<256x3xf32>
    %cst_118 = arith.constant dense<0.000000e+00> : vector<256x16xf32>
    %141 = tpu.matmul %140, %137, %cst_118 {dimension_numbers = #tpu.dot_dimension_numbers<[1], [0], [0], [1], [0, 0, 1, 1], [], []>} : vector<256x3xf32>, vector<3x16xf32>, vector<256x16xf32> -> vector<256x16xf32>
    %142 = arith.addf %126, %139 : vector<256x16xf32>
    %143 = arith.addf %127, %141 : vector<256x16xf32>
    %144 = arith.maximumf %142, %143 : vector<256x16xf32>
    %c0_119 = arith.constant 0 : index
    %c0_120 = arith.constant 0 : index
    %145 = vector.load %arg5[%c0_119, %c0_120] : memref<1x16xf32, #tpu.memory_space<vmem>>, vector<1x16xf32>
    %146 = vector.broadcast %145 : vector<1x16xf32> to vector<256x16xf32>
    %147 = arith.addf %144, %146 : vector<256x16xf32>
    %cst_121 = arith.constant 0.000000e+00 : f32
    %148 = vector.broadcast %cst_121 : f32 to vector<256x16xf32>
    %149 = arith.maximumf %147, %148 : vector<256x16xf32>
    %150 = vector.shape_cast %149 : vector<256x16xf32> to vector<8x2x16x16xf32>
    %151 = vector.extract_strided_slice %150 {offsets = [0, 0, 0, 0], sizes = [8, 1, 16, 16], strides = [1, 1, 1, 1]} : vector<8x2x16x16xf32> to vector<8x1x16x16xf32>
    %152 = vector.shape_cast %151 : vector<8x1x16x16xf32> to vector<8x16x16xf32>
    %153 = vector.extract_strided_slice %150 {offsets = [0, 1, 0, 0], sizes = [8, 1, 16, 16], strides = [1, 1, 1, 1]} : vector<8x2x16x16xf32> to vector<8x1x16x16xf32>
    %154 = vector.shape_cast %153 : vector<8x1x16x16xf32> to vector<8x16x16xf32>
    %155 = arith.maximumf %152, %154 : vector<8x16x16xf32>
    %c0_122 = arith.constant 0 : index
    %c0_123 = arith.constant 0 : index
    %c0_124 = arith.constant 0 : index
    %c0_125 = arith.constant 0 : index
    %156 = vector.load %arg6[%c0_122, %c0_123, %c0_124, %c0_125] : memref<1x8x16x16xf32, #tpu.memory_space<vmem>>, vector<1x8x16x16xf32>
    %157 = vector.shape_cast %156 : vector<1x8x16x16xf32> to vector<8x16x16xf32>
    %158 = vector.shape_cast %155 : vector<8x16x16xf32> to vector<1x8x16x16xf32>
    tpu.vector_store %arg6[%c0_122, %c0_123, %c0_124, %c0_125], %158 {strides = array<i32>} : memref<1x8x16x16xf32, #tpu.memory_space<vmem>>, vector<1x8x16x16xf32>,
    return
  }
  func.func @transform_0(%arg0: i32, %arg1: i32) -> (i32, i32, i32, i32) {
    %c0_i32 = arith.constant 0 : i32
    %c0_i32_0 = arith.constant 0 : i32
    %c0_i32_1 = arith.constant 0 : i32
    %c0_i32_2 = arith.constant 0 : i32
    return %arg0, %c0_i32, %c0_i32_0, %c0_i32_1 : i32, i32, i32, i32
  }
  func.func @transform_1(%arg0: i32, %arg1: i32) -> (i32, i32, i32, i32) {
    %c0_i32 = arith.constant 0 : i32
    %c0_i32_0 = arith.constant 0 : i32
    %c0_i32_1 = arith.constant 0 : i32
    %c0_i32_2 = arith.constant 0 : i32
    return %arg0, %c0_i32, %c0_i32_0, %c0_i32_1 : i32, i32, i32, i32
  }
  func.func @transform_2(%arg0: i32, %arg1: i32) -> (i32, i32, i32, i32) {
    %c0_i32 = arith.constant 0 : i32
    %c0_i32_0 = arith.constant 0 : i32
    %c0_i32_1 = arith.constant 0 : i32
    %c0_i32_2 = arith.constant 0 : i32
    %c0_i32_3 = arith.constant 0 : i32
    return %c0_i32, %c0_i32_0, %c0_i32_1, %c0_i32_2 : i32, i32, i32, i32
  }
  func.func @transform_3(%arg0: i32, %arg1: i32) -> (i32, i32) {
    %c0_i32 = arith.constant 0 : i32
    %c0_i32_0 = arith.constant 0 : i32
    %c0_i32_1 = arith.constant 0 : i32
    return %c0_i32, %c0_i32_0 : i32, i32
  }
  func.func @transform_4(%arg0: i32, %arg1: i32) -> (i32, i32, i32, i32) {
    %c0_i32 = arith.constant 0 : i32
    %c0_i32_0 = arith.constant 0 : i32
    %c0_i32_1 = arith.constant 0 : i32
    return %arg0, %arg1, %c0_i32, %c0_i32_0 : i32, i32, i32, i32
  }
}

module attributes {stable_mosaic.version = 11 : i64} {
  func.func @kernel(%arg0: i32, %arg1: i32, %arg2: memref<1x18x9x16xf32, #tpu.memory_space<vmem>>, %arg3: memref<1x18x9x16xf32, #tpu.memory_space<vmem>>, %arg4: memref<3x3x16x32xf32, #tpu.memory_space<vmem>>, %arg5: memref<1x32xf32, #tpu.memory_space<vmem>>, %arg6: memref<1x8x8x32xf32, #tpu.memory_space<vmem>>) attributes {dimension_semantics = [#tpu.dimension_semantics<parallel>, #tpu.dimension_semantics<arbitrary>], iteration_bounds = array<i64: 2, 1>, scalar_prefetch = 0 : i64, scratch_operands = 0 : i64, tpu.core_type = #tpu.core_type<tc>, window_params = [{transform_indices = @transform_0, window_bounds = array<i64: 1, 18, 9, 16>}, {transform_indices = @transform_1, window_bounds = array<i64: 1, 18, 9, 16>}, {pipeline_mode = #tpu.pipeline_mode<synchronous>, transform_indices = @transform_2, window_bounds = array<i64: 3, 3, 16, 32>}, {pipeline_mode = #tpu.pipeline_mode<synchronous>, transform_indices = @transform_3, window_bounds = array<i64: 1, 32>}, {transform_indices = @transform_4, window_bounds = array<i64: 1, 8, 8, 32>}]} {
    %c16_i32 = arith.constant 16 : i32
    %0 = arith.muli %arg1, %c16_i32 : i32
    %1 = tpu.assume_multiple %0, 16 : i32
    %c0_i32 = arith.constant 0 : i32
    %2 = arith.addi %1, %c0_i32 : i32
    %c0 = arith.constant 0 : index
    %3 = arith.index_cast %2 : i32 to index
    %c0_0 = arith.constant 0 : index
    %c0_1 = arith.constant 0 : index
    %4 = vector.load %arg2[%c0, %3, %c0_0, %c0_1] : memref<1x18x9x16xf32, #tpu.memory_space<vmem>>, vector<1x16x8x16xf32>
    %5 = vector.shape_cast %4 : vector<1x16x8x16xf32> to vector<16x8x16xf32>
    %c0_i32_2 = arith.constant 0 : i32
    %6 = arith.addi %1, %c0_i32_2 : i32
    %c0_3 = arith.constant 0 : index
    %7 = arith.index_cast %6 : i32 to index
    %c0_4 = arith.constant 0 : index
    %c0_5 = arith.constant 0 : index
    %8 = vector.load %arg3[%c0_3, %7, %c0_4, %c0_5] : memref<1x18x9x16xf32, #tpu.memory_space<vmem>>, vector<1x16x8x16xf32>
    %9 = vector.shape_cast %8 : vector<1x16x8x16xf32> to vector<16x8x16xf32>
    %c0_6 = arith.constant 0 : index
    %c0_7 = arith.constant 0 : index
    %c0_8 = arith.constant 0 : index
    %c0_9 = arith.constant 0 : index
    %10 = vector.load %arg4[%c0_6, %c0_7, %c0_8, %c0_9] : memref<3x3x16x32xf32, #tpu.memory_space<vmem>>, vector<1x1x16x32xf32>
    %11 = vector.shape_cast %10 : vector<1x1x16x32xf32> to vector<16x32xf32>
    %12 = vector.shape_cast %5 : vector<16x8x16xf32> to vector<128x16xf32>
    %cst = arith.constant dense<0.000000e+00> : vector<128x32xf32>
    %13 = tpu.matmul %12, %11, %cst {dimension_numbers = #tpu.dot_dimension_numbers<[1], [0], [0], [1], [0, 0, 1, 1], [], []>} : vector<128x16xf32>, vector<16x32xf32>, vector<128x32xf32> -> vector<128x32xf32>
    %14 = vector.shape_cast %9 : vector<16x8x16xf32> to vector<128x16xf32>
    %cst_10 = arith.constant dense<0.000000e+00> : vector<128x32xf32>
    %15 = tpu.matmul %14, %11, %cst_10 {dimension_numbers = #tpu.dot_dimension_numbers<[1], [0], [0], [1], [0, 0, 1, 1], [], []>} : vector<128x16xf32>, vector<16x32xf32>, vector<128x32xf32> -> vector<128x32xf32>
    %c0_i32_11 = arith.constant 0 : i32
    %16 = arith.addi %1, %c0_i32_11 : i32
    %c0_12 = arith.constant 0 : index
    %17 = arith.index_cast %16 : i32 to index
    %c0_13 = arith.constant 0 : index
    %c0_14 = arith.constant 0 : index
    %18 = vector.load %arg3[%c0_12, %17, %c0_13, %c0_14] : memref<1x18x9x16xf32, #tpu.memory_space<vmem>>, vector<1x16x8x16xf32>
    %19 = vector.shape_cast %18 : vector<1x16x8x16xf32> to vector<16x8x16xf32>
    %c0_i32_15 = arith.constant 0 : i32
    %20 = arith.addi %1, %c0_i32_15 : i32
    %c0_16 = arith.constant 0 : index
    %21 = arith.index_cast %20 : i32 to index
    %c1 = arith.constant 1 : index
    %c0_17 = arith.constant 0 : index
    %22 = vector.load %arg2[%c0_16, %21, %c1, %c0_17] : memref<1x18x9x16xf32, #tpu.memory_space<vmem>>, vector<1x16x8x16xf32>
    %23 = vector.shape_cast %22 : vector<1x16x8x16xf32> to vector<16x8x16xf32>
    %c0_18 = arith.constant 0 : index
    %c1_19 = arith.constant 1 : index
    %c0_20 = arith.constant 0 : index
    %c0_21 = arith.constant 0 : index
    %24 = vector.load %arg4[%c0_18, %c1_19, %c0_20, %c0_21] : memref<3x3x16x32xf32, #tpu.memory_space<vmem>>, vector<1x1x16x32xf32>
    %25 = vector.shape_cast %24 : vector<1x1x16x32xf32> to vector<16x32xf32>
    %26 = vector.shape_cast %19 : vector<16x8x16xf32> to vector<128x16xf32>
    %cst_22 = arith.constant dense<0.000000e+00> : vector<128x32xf32>
    %27 = tpu.matmul %26, %25, %cst_22 {dimension_numbers = #tpu.dot_dimension_numbers<[1], [0], [0], [1], [0, 0, 1, 1], [], []>} : vector<128x16xf32>, vector<16x32xf32>, vector<128x32xf32> -> vector<128x32xf32>
    %28 = vector.shape_cast %23 : vector<16x8x16xf32> to vector<128x16xf32>
    %cst_23 = arith.constant dense<0.000000e+00> : vector<128x32xf32>
    %29 = tpu.matmul %28, %25, %cst_23 {dimension_numbers = #tpu.dot_dimension_numbers<[1], [0], [0], [1], [0, 0, 1, 1], [], []>} : vector<128x16xf32>, vector<16x32xf32>, vector<128x32xf32> -> vector<128x32xf32>
    %30 = arith.addf %13, %27 : vector<128x32xf32>
    %31 = arith.addf %15, %29 : vector<128x32xf32>
    %c0_i32_24 = arith.constant 0 : i32
    %32 = arith.addi %1, %c0_i32_24 : i32
    %c0_25 = arith.constant 0 : index
    %33 = arith.index_cast %32 : i32 to index
    %c1_26 = arith.constant 1 : index
    %c0_27 = arith.constant 0 : index
    %34 = vector.load %arg2[%c0_25, %33, %c1_26, %c0_27] : memref<1x18x9x16xf32, #tpu.memory_space<vmem>>, vector<1x16x8x16xf32>
    %35 = vector.shape_cast %34 : vector<1x16x8x16xf32> to vector<16x8x16xf32>
    %c0_i32_28 = arith.constant 0 : i32
    %36 = arith.addi %1, %c0_i32_28 : i32
    %c0_29 = arith.constant 0 : index
    %37 = arith.index_cast %36 : i32 to index
    %c1_30 = arith.constant 1 : index
    %c0_31 = arith.constant 0 : index
    %38 = vector.load %arg3[%c0_29, %37, %c1_30, %c0_31] : memref<1x18x9x16xf32, #tpu.memory_space<vmem>>, vector<1x16x8x16xf32>
    %39 = vector.shape_cast %38 : vector<1x16x8x16xf32> to vector<16x8x16xf32>
    %c0_32 = arith.constant 0 : index
    %c2 = arith.constant 2 : index
    %c0_33 = arith.constant 0 : index
    %c0_34 = arith.constant 0 : index
    %40 = vector.load %arg4[%c0_32, %c2, %c0_33, %c0_34] : memref<3x3x16x32xf32, #tpu.memory_space<vmem>>, vector<1x1x16x32xf32>
    %41 = vector.shape_cast %40 : vector<1x1x16x32xf32> to vector<16x32xf32>
    %42 = vector.shape_cast %35 : vector<16x8x16xf32> to vector<128x16xf32>
    %cst_35 = arith.constant dense<0.000000e+00> : vector<128x32xf32>
    %43 = tpu.matmul %42, %41, %cst_35 {dimension_numbers = #tpu.dot_dimension_numbers<[1], [0], [0], [1], [0, 0, 1, 1], [], []>} : vector<128x16xf32>, vector<16x32xf32>, vector<128x32xf32> -> vector<128x32xf32>
    %44 = vector.shape_cast %39 : vector<16x8x16xf32> to vector<128x16xf32>
    %cst_36 = arith.constant dense<0.000000e+00> : vector<128x32xf32>
    %45 = tpu.matmul %44, %41, %cst_36 {dimension_numbers = #tpu.dot_dimension_numbers<[1], [0], [0], [1], [0, 0, 1, 1], [], []>} : vector<128x16xf32>, vector<16x32xf32>, vector<128x32xf32> -> vector<128x32xf32>
    %46 = arith.addf %30, %43 : vector<128x32xf32>
    %47 = arith.addf %31, %45 : vector<128x32xf32>
    %c1_i32 = arith.constant 1 : i32
    %48 = arith.addi %1, %c1_i32 : i32
    %c0_37 = arith.constant 0 : index
    %49 = arith.index_cast %48 : i32 to index
    %c0_38 = arith.constant 0 : index
    %c0_39 = arith.constant 0 : index
    %50 = vector.load %arg2[%c0_37, %49, %c0_38, %c0_39] : memref<1x18x9x16xf32, #tpu.memory_space<vmem>>, vector<1x16x8x16xf32>
    %51 = vector.shape_cast %50 : vector<1x16x8x16xf32> to vector<16x8x16xf32>
    %c1_i32_40 = arith.constant 1 : i32
    %52 = arith.addi %1, %c1_i32_40 : i32
    %c0_41 = arith.constant 0 : index
    %53 = arith.index_cast %52 : i32 to index
    %c0_42 = arith.constant 0 : index
    %c0_43 = arith.constant 0 : index
    %54 = vector.load %arg3[%c0_41, %53, %c0_42, %c0_43] : memref<1x18x9x16xf32, #tpu.memory_space<vmem>>, vector<1x16x8x16xf32>
    %55 = vector.shape_cast %54 : vector<1x16x8x16xf32> to vector<16x8x16xf32>
    %c1_44 = arith.constant 1 : index
    %c0_45 = arith.constant 0 : index
    %c0_46 = arith.constant 0 : index
    %c0_47 = arith.constant 0 : index
    %56 = vector.load %arg4[%c1_44, %c0_45, %c0_46, %c0_47] : memref<3x3x16x32xf32, #tpu.memory_space<vmem>>, vector<1x1x16x32xf32>
    %57 = vector.shape_cast %56 : vector<1x1x16x32xf32> to vector<16x32xf32>
    %58 = vector.shape_cast %51 : vector<16x8x16xf32> to vector<128x16xf32>
    %cst_48 = arith.constant dense<0.000000e+00> : vector<128x32xf32>
    %59 = tpu.matmul %58, %57, %cst_48 {dimension_numbers = #tpu.dot_dimension_numbers<[1], [0], [0], [1], [0, 0, 1, 1], [], []>} : vector<128x16xf32>, vector<16x32xf32>, vector<128x32xf32> -> vector<128x32xf32>
    %60 = vector.shape_cast %55 : vector<16x8x16xf32> to vector<128x16xf32>
    %cst_49 = arith.constant dense<0.000000e+00> : vector<128x32xf32>
    %61 = tpu.matmul %60, %57, %cst_49 {dimension_numbers = #tpu.dot_dimension_numbers<[1], [0], [0], [1], [0, 0, 1, 1], [], []>} : vector<128x16xf32>, vector<16x32xf32>, vector<128x32xf32> -> vector<128x32xf32>
    %62 = arith.addf %46, %59 : vector<128x32xf32>
    %63 = arith.addf %47, %61 : vector<128x32xf32>
    %c1_i32_50 = arith.constant 1 : i32
    %64 = arith.addi %1, %c1_i32_50 : i32
    %c0_51 = arith.constant 0 : index
    %65 = arith.index_cast %64 : i32 to index
    %c0_52 = arith.constant 0 : index
    %c0_53 = arith.constant 0 : index
    %66 = vector.load %arg3[%c0_51, %65, %c0_52, %c0_53] : memref<1x18x9x16xf32, #tpu.memory_space<vmem>>, vector<1x16x8x16xf32>
    %67 = vector.shape_cast %66 : vector<1x16x8x16xf32> to vector<16x8x16xf32>
    %c1_i32_54 = arith.constant 1 : i32
    %68 = arith.addi %1, %c1_i32_54 : i32
    %c0_55 = arith.constant 0 : index
    %69 = arith.index_cast %68 : i32 to index
    %c1_56 = arith.constant 1 : index
    %c0_57 = arith.constant 0 : index
    %70 = vector.load %arg2[%c0_55, %69, %c1_56, %c0_57] : memref<1x18x9x16xf32, #tpu.memory_space<vmem>>, vector<1x16x8x16xf32>
    %71 = vector.shape_cast %70 : vector<1x16x8x16xf32> to vector<16x8x16xf32>
    %c1_58 = arith.constant 1 : index
    %c1_59 = arith.constant 1 : index
    %c0_60 = arith.constant 0 : index
    %c0_61 = arith.constant 0 : index
    %72 = vector.load %arg4[%c1_58, %c1_59, %c0_60, %c0_61] : memref<3x3x16x32xf32, #tpu.memory_space<vmem>>, vector<1x1x16x32xf32>
    %73 = vector.shape_cast %72 : vector<1x1x16x32xf32> to vector<16x32xf32>
    %74 = vector.shape_cast %67 : vector<16x8x16xf32> to vector<128x16xf32>
    %cst_62 = arith.constant dense<0.000000e+00> : vector<128x32xf32>
    %75 = tpu.matmul %74, %73, %cst_62 {dimension_numbers = #tpu.dot_dimension_numbers<[1], [0], [0], [1], [0, 0, 1, 1], [], []>} : vector<128x16xf32>, vector<16x32xf32>, vector<128x32xf32> -> vector<128x32xf32>
    %76 = vector.shape_cast %71 : vector<16x8x16xf32> to vector<128x16xf32>
    %cst_63 = arith.constant dense<0.000000e+00> : vector<128x32xf32>
    %77 = tpu.matmul %76, %73, %cst_63 {dimension_numbers = #tpu.dot_dimension_numbers<[1], [0], [0], [1], [0, 0, 1, 1], [], []>} : vector<128x16xf32>, vector<16x32xf32>, vector<128x32xf32> -> vector<128x32xf32>
    %78 = arith.addf %62, %75 : vector<128x32xf32>
    %79 = arith.addf %63, %77 : vector<128x32xf32>
    %c1_i32_64 = arith.constant 1 : i32
    %80 = arith.addi %1, %c1_i32_64 : i32
    %c0_65 = arith.constant 0 : index
    %81 = arith.index_cast %80 : i32 to index
    %c1_66 = arith.constant 1 : index
    %c0_67 = arith.constant 0 : index
    %82 = vector.load %arg2[%c0_65, %81, %c1_66, %c0_67] : memref<1x18x9x16xf32, #tpu.memory_space<vmem>>, vector<1x16x8x16xf32>
    %83 = vector.shape_cast %82 : vector<1x16x8x16xf32> to vector<16x8x16xf32>
    %c1_i32_68 = arith.constant 1 : i32
    %84 = arith.addi %1, %c1_i32_68 : i32
    %c0_69 = arith.constant 0 : index
    %85 = arith.index_cast %84 : i32 to index
    %c1_70 = arith.constant 1 : index
    %c0_71 = arith.constant 0 : index
    %86 = vector.load %arg3[%c0_69, %85, %c1_70, %c0_71] : memref<1x18x9x16xf32, #tpu.memory_space<vmem>>, vector<1x16x8x16xf32>
    %87 = vector.shape_cast %86 : vector<1x16x8x16xf32> to vector<16x8x16xf32>
    %c1_72 = arith.constant 1 : index
    %c2_73 = arith.constant 2 : index
    %c0_74 = arith.constant 0 : index
    %c0_75 = arith.constant 0 : index
    %88 = vector.load %arg4[%c1_72, %c2_73, %c0_74, %c0_75] : memref<3x3x16x32xf32, #tpu.memory_space<vmem>>, vector<1x1x16x32xf32>
    %89 = vector.shape_cast %88 : vector<1x1x16x32xf32> to vector<16x32xf32>
    %90 = vector.shape_cast %83 : vector<16x8x16xf32> to vector<128x16xf32>
    %cst_76 = arith.constant dense<0.000000e+00> : vector<128x32xf32>
    %91 = tpu.matmul %90, %89, %cst_76 {dimension_numbers = #tpu.dot_dimension_numbers<[1], [0], [0], [1], [0, 0, 1, 1], [], []>} : vector<128x16xf32>, vector<16x32xf32>, vector<128x32xf32> -> vector<128x32xf32>
    %92 = vector.shape_cast %87 : vector<16x8x16xf32> to vector<128x16xf32>
    %cst_77 = arith.constant dense<0.000000e+00> : vector<128x32xf32>
    %93 = tpu.matmul %92, %89, %cst_77 {dimension_numbers = #tpu.dot_dimension_numbers<[1], [0], [0], [1], [0, 0, 1, 1], [], []>} : vector<128x16xf32>, vector<16x32xf32>, vector<128x32xf32> -> vector<128x32xf32>
    %94 = arith.addf %78, %91 : vector<128x32xf32>
    %95 = arith.addf %79, %93 : vector<128x32xf32>
    %c2_i32 = arith.constant 2 : i32
    %96 = arith.addi %1, %c2_i32 : i32
    %c0_78 = arith.constant 0 : index
    %97 = arith.index_cast %96 : i32 to index
    %c0_79 = arith.constant 0 : index
    %c0_80 = arith.constant 0 : index
    %98 = vector.load %arg2[%c0_78, %97, %c0_79, %c0_80] : memref<1x18x9x16xf32, #tpu.memory_space<vmem>>, vector<1x16x8x16xf32>
    %99 = vector.shape_cast %98 : vector<1x16x8x16xf32> to vector<16x8x16xf32>
    %c2_i32_81 = arith.constant 2 : i32
    %100 = arith.addi %1, %c2_i32_81 : i32
    %c0_82 = arith.constant 0 : index
    %101 = arith.index_cast %100 : i32 to index
    %c0_83 = arith.constant 0 : index
    %c0_84 = arith.constant 0 : index
    %102 = vector.load %arg3[%c0_82, %101, %c0_83, %c0_84] : memref<1x18x9x16xf32, #tpu.memory_space<vmem>>, vector<1x16x8x16xf32>
    %103 = vector.shape_cast %102 : vector<1x16x8x16xf32> to vector<16x8x16xf32>
    %c2_85 = arith.constant 2 : index
    %c0_86 = arith.constant 0 : index
    %c0_87 = arith.constant 0 : index
    %c0_88 = arith.constant 0 : index
    %104 = vector.load %arg4[%c2_85, %c0_86, %c0_87, %c0_88] : memref<3x3x16x32xf32, #tpu.memory_space<vmem>>, vector<1x1x16x32xf32>
    %105 = vector.shape_cast %104 : vector<1x1x16x32xf32> to vector<16x32xf32>
    %106 = vector.shape_cast %99 : vector<16x8x16xf32> to vector<128x16xf32>
    %cst_89 = arith.constant dense<0.000000e+00> : vector<128x32xf32>
    %107 = tpu.matmul %106, %105, %cst_89 {dimension_numbers = #tpu.dot_dimension_numbers<[1], [0], [0], [1], [0, 0, 1, 1], [], []>} : vector<128x16xf32>, vector<16x32xf32>, vector<128x32xf32> -> vector<128x32xf32>
    %108 = vector.shape_cast %103 : vector<16x8x16xf32> to vector<128x16xf32>
    %cst_90 = arith.constant dense<0.000000e+00> : vector<128x32xf32>
    %109 = tpu.matmul %108, %105, %cst_90 {dimension_numbers = #tpu.dot_dimension_numbers<[1], [0], [0], [1], [0, 0, 1, 1], [], []>} : vector<128x16xf32>, vector<16x32xf32>, vector<128x32xf32> -> vector<128x32xf32>
    %110 = arith.addf %94, %107 : vector<128x32xf32>
    %111 = arith.addf %95, %109 : vector<128x32xf32>
    %c2_i32_91 = arith.constant 2 : i32
    %112 = arith.addi %1, %c2_i32_91 : i32
    %c0_92 = arith.constant 0 : index
    %113 = arith.index_cast %112 : i32 to index
    %c0_93 = arith.constant 0 : index
    %c0_94 = arith.constant 0 : index
    %114 = vector.load %arg3[%c0_92, %113, %c0_93, %c0_94] : memref<1x18x9x16xf32, #tpu.memory_space<vmem>>, vector<1x16x8x16xf32>
    %115 = vector.shape_cast %114 : vector<1x16x8x16xf32> to vector<16x8x16xf32>
    %c2_i32_95 = arith.constant 2 : i32
    %116 = arith.addi %1, %c2_i32_95 : i32
    %c0_96 = arith.constant 0 : index
    %117 = arith.index_cast %116 : i32 to index
    %c1_97 = arith.constant 1 : index
    %c0_98 = arith.constant 0 : index
    %118 = vector.load %arg2[%c0_96, %117, %c1_97, %c0_98] : memref<1x18x9x16xf32, #tpu.memory_space<vmem>>, vector<1x16x8x16xf32>
    %119 = vector.shape_cast %118 : vector<1x16x8x16xf32> to vector<16x8x16xf32>
    %c2_99 = arith.constant 2 : index
    %c1_100 = arith.constant 1 : index
    %c0_101 = arith.constant 0 : index
    %c0_102 = arith.constant 0 : index
    %120 = vector.load %arg4[%c2_99, %c1_100, %c0_101, %c0_102] : memref<3x3x16x32xf32, #tpu.memory_space<vmem>>, vector<1x1x16x32xf32>
    %121 = vector.shape_cast %120 : vector<1x1x16x32xf32> to vector<16x32xf32>
    %122 = vector.shape_cast %115 : vector<16x8x16xf32> to vector<128x16xf32>
    %cst_103 = arith.constant dense<0.000000e+00> : vector<128x32xf32>
    %123 = tpu.matmul %122, %121, %cst_103 {dimension_numbers = #tpu.dot_dimension_numbers<[1], [0], [0], [1], [0, 0, 1, 1], [], []>} : vector<128x16xf32>, vector<16x32xf32>, vector<128x32xf32> -> vector<128x32xf32>
    %124 = vector.shape_cast %119 : vector<16x8x16xf32> to vector<128x16xf32>
    %cst_104 = arith.constant dense<0.000000e+00> : vector<128x32xf32>
    %125 = tpu.matmul %124, %121, %cst_104 {dimension_numbers = #tpu.dot_dimension_numbers<[1], [0], [0], [1], [0, 0, 1, 1], [], []>} : vector<128x16xf32>, vector<16x32xf32>, vector<128x32xf32> -> vector<128x32xf32>
    %126 = arith.addf %110, %123 : vector<128x32xf32>
    %127 = arith.addf %111, %125 : vector<128x32xf32>
    %c2_i32_105 = arith.constant 2 : i32
    %128 = arith.addi %1, %c2_i32_105 : i32
    %c0_106 = arith.constant 0 : index
    %129 = arith.index_cast %128 : i32 to index
    %c1_107 = arith.constant 1 : index
    %c0_108 = arith.constant 0 : index
    %130 = vector.load %arg2[%c0_106, %129, %c1_107, %c0_108] : memref<1x18x9x16xf32, #tpu.memory_space<vmem>>, vector<1x16x8x16xf32>
    %131 = vector.shape_cast %130 : vector<1x16x8x16xf32> to vector<16x8x16xf32>
    %c2_i32_109 = arith.constant 2 : i32
    %132 = arith.addi %1, %c2_i32_109 : i32
    %c0_110 = arith.constant 0 : index
    %133 = arith.index_cast %132 : i32 to index
    %c1_111 = arith.constant 1 : index
    %c0_112 = arith.constant 0 : index
    %134 = vector.load %arg3[%c0_110, %133, %c1_111, %c0_112] : memref<1x18x9x16xf32, #tpu.memory_space<vmem>>, vector<1x16x8x16xf32>
    %135 = vector.shape_cast %134 : vector<1x16x8x16xf32> to vector<16x8x16xf32>
    %c2_113 = arith.constant 2 : index
    %c2_114 = arith.constant 2 : index
    %c0_115 = arith.constant 0 : index
    %c0_116 = arith.constant 0 : index
    %136 = vector.load %arg4[%c2_113, %c2_114, %c0_115, %c0_116] : memref<3x3x16x32xf32, #tpu.memory_space<vmem>>, vector<1x1x16x32xf32>
    %137 = vector.shape_cast %136 : vector<1x1x16x32xf32> to vector<16x32xf32>
    %138 = vector.shape_cast %131 : vector<16x8x16xf32> to vector<128x16xf32>
    %cst_117 = arith.constant dense<0.000000e+00> : vector<128x32xf32>
    %139 = tpu.matmul %138, %137, %cst_117 {dimension_numbers = #tpu.dot_dimension_numbers<[1], [0], [0], [1], [0, 0, 1, 1], [], []>} : vector<128x16xf32>, vector<16x32xf32>, vector<128x32xf32> -> vector<128x32xf32>
    %140 = vector.shape_cast %135 : vector<16x8x16xf32> to vector<128x16xf32>
    %cst_118 = arith.constant dense<0.000000e+00> : vector<128x32xf32>
    %141 = tpu.matmul %140, %137, %cst_118 {dimension_numbers = #tpu.dot_dimension_numbers<[1], [0], [0], [1], [0, 0, 1, 1], [], []>} : vector<128x16xf32>, vector<16x32xf32>, vector<128x32xf32> -> vector<128x32xf32>
    %142 = arith.addf %126, %139 : vector<128x32xf32>
    %143 = arith.addf %127, %141 : vector<128x32xf32>
    %144 = arith.maximumf %142, %143 : vector<128x32xf32>
    %c0_119 = arith.constant 0 : index
    %c0_120 = arith.constant 0 : index
    %145 = vector.load %arg5[%c0_119, %c0_120] : memref<1x32xf32, #tpu.memory_space<vmem>>, vector<1x32xf32>
    %146 = vector.broadcast %145 : vector<1x32xf32> to vector<128x32xf32>
    %147 = arith.addf %144, %146 : vector<128x32xf32>
    %cst_121 = arith.constant 0.000000e+00 : f32
    %148 = vector.broadcast %cst_121 : f32 to vector<128x32xf32>
    %149 = arith.maximumf %147, %148 : vector<128x32xf32>
    %150 = vector.shape_cast %149 : vector<128x32xf32> to vector<8x2x8x32xf32>
    %151 = vector.extract_strided_slice %150 {offsets = [0, 0, 0, 0], sizes = [8, 1, 8, 32], strides = [1, 1, 1, 1]} : vector<8x2x8x32xf32> to vector<8x1x8x32xf32>
    %152 = vector.shape_cast %151 : vector<8x1x8x32xf32> to vector<8x8x32xf32>
    %153 = vector.extract_strided_slice %150 {offsets = [0, 1, 0, 0], sizes = [8, 1, 8, 32], strides = [1, 1, 1, 1]} : vector<8x2x8x32xf32> to vector<8x1x8x32xf32>
    %154 = vector.shape_cast %153 : vector<8x1x8x32xf32> to vector<8x8x32xf32>
    %155 = arith.maximumf %152, %154 : vector<8x8x32xf32>
    %c0_122 = arith.constant 0 : index
    %c0_123 = arith.constant 0 : index
    %c0_124 = arith.constant 0 : index
    %c0_125 = arith.constant 0 : index
    %156 = vector.load %arg6[%c0_122, %c0_123, %c0_124, %c0_125] : memref<1x8x8x32xf32, #tpu.memory_space<vmem>>, vector<1x8x8x32xf32>
    %157 = vector.shape_cast %156 : vector<1x8x8x32xf32> to vector<8x8x32xf32>
    %158 = vector.shape_cast %155 : vector<8x8x32xf32> to vector<1x8x8x32xf32>
    tpu.vector_store %arg6[%c0_122, %c0_123, %c0_124, %c0_125], %158 {strides = array<i32>} : memref<1x8x8x32xf32, #tpu.memory_space<vmem>>, vector<1x8x8x32xf32>,
    return
  }
  func.func @transform_0(%arg0: i32, %arg1: i32) -> (i32, i32, i32, i32) {
    %c0_i32 = arith.constant 0 : i32
    %c0_i32_0 = arith.constant 0 : i32
    %c0_i32_1 = arith.constant 0 : i32
    %c0_i32_2 = arith.constant 0 : i32
    return %arg0, %c0_i32, %c0_i32_0, %c0_i32_1 : i32, i32, i32, i32
  }
  func.func @transform_1(%arg0: i32, %arg1: i32) -> (i32, i32, i32, i32) {
    %c0_i32 = arith.constant 0 : i32
    %c0_i32_0 = arith.constant 0 : i32
    %c0_i32_1 = arith.constant 0 : i32
    %c0_i32_2 = arith.constant 0 : i32
    return %arg0, %c0_i32, %c0_i32_0, %c0_i32_1 : i32, i32, i32, i32
  }
  func.func @transform_2(%arg0: i32, %arg1: i32) -> (i32, i32, i32, i32) {
    %c0_i32 = arith.constant 0 : i32
    %c0_i32_0 = arith.constant 0 : i32
    %c0_i32_1 = arith.constant 0 : i32
    %c0_i32_2 = arith.constant 0 : i32
    %c0_i32_3 = arith.constant 0 : i32
    return %c0_i32, %c0_i32_0, %c0_i32_1, %c0_i32_2 : i32, i32, i32, i32
  }
  func.func @transform_3(%arg0: i32, %arg1: i32) -> (i32, i32) {
    %c0_i32 = arith.constant 0 : i32
    %c0_i32_0 = arith.constant 0 : i32
    %c0_i32_1 = arith.constant 0 : i32
    return %c0_i32, %c0_i32_0 : i32, i32
  }
  func.func @transform_4(%arg0: i32, %arg1: i32) -> (i32, i32, i32, i32) {
    %c0_i32 = arith.constant 0 : i32
    %c0_i32_0 = arith.constant 0 : i32
    %c0_i32_1 = arith.constant 0 : i32
    return %arg0, %arg1, %c0_i32, %c0_i32_0 : i32, i32, i32, i32
  }
}

module attributes {stable_mosaic.version = 11 : i64} {
  func.func @kernel(%arg0: i32, %arg1: i32, %arg2: memref<2x2048xbf16, #tpu.memory_space<vmem>>, %arg3: memref<2048x256xbf16, #tpu.memory_space<vmem>>, %arg4: memref<1x256xf32, #tpu.memory_space<vmem>>, %arg5: memref<256x10xf32, #tpu.memory_space<vmem>>, %arg6: memref<1x2x10xf32, #tpu.memory_space<vmem>>, %arg7: memref<2x256xf32, #tpu.memory_space<vmem>>) attributes {dimension_semantics = [#tpu.dimension_semantics<parallel>, #tpu.dimension_semantics<arbitrary>], iteration_bounds = array<i64: 2, 1>, scalar_prefetch = 0 : i64, scratch_operands = 1 : i64, tpu.core_type = #tpu.core_type<tc>, window_params = [{transform_indices = @transform_0, window_bounds = array<i64: 2, 2048>}, {transform_indices = @transform_1, window_bounds = array<i64: 2048, 256>}, {transform_indices = @transform_2, window_bounds = array<i64: 1, 256>}, {transform_indices = @transform_3, window_bounds = array<i64: 256, 10>}, {transform_indices = @transform_4, window_bounds = array<i64: 1, 2, 10>}]} {
    %c0_i32 = arith.constant 0 : i32
    %0 = arith.cmpi eq, %arg1, %c0_i32 : i32
    %1 = arith.extui %0 : i1 to i32
    %c0_i32_0 = arith.constant 0 : i32
    %2 = arith.cmpi ne, %1, %c0_i32_0 : i32
    scf.if %2 {
      %cst_10 = arith.constant 0.000000e+00 : f32
      %12 = vector.broadcast %cst_10 : f32 to vector<2x256xf32>
      %c0_11 = arith.constant 0 : index
      %c0_12 = arith.constant 0 : index
      %13 = vector.load %arg7[%c0_11, %c0_12] : memref<2x256xf32, #tpu.memory_space<vmem>>, vector<2x256xf32>
      tpu.vector_store %arg7[%c0_11, %c0_12], %12 {strides = array<i32>} : memref<2x256xf32, #tpu.memory_space<vmem>>, vector<2x256xf32>,
    } else {
    }
    %c0 = arith.constant 0 : index
    %c0_1 = arith.constant 0 : index
    %3 = vector.load %arg7[%c0, %c0_1] : memref<2x256xf32, #tpu.memory_space<vmem>>, vector<2x256xf32>
    %c0_2 = arith.constant 0 : index
    %c0_3 = arith.constant 0 : index
    %4 = vector.load %arg2[%c0_2, %c0_3] : memref<2x2048xbf16, #tpu.memory_space<vmem>>, vector<2x2048xbf16>
    %c0_4 = arith.constant 0 : index
    %c0_5 = arith.constant 0 : index
    %5 = vector.load %arg3[%c0_4, %c0_5] : memref<2048x256xbf16, #tpu.memory_space<vmem>>, vector<2048x256xbf16>
    %cst = arith.constant dense<0.000000e+00> : vector<2x256xf32>
    %6 = tpu.matmul %4, %5, %cst {dimension_numbers = #tpu.dot_dimension_numbers<[1], [0], [0], [1], [0, 0, 1, 1], [], []>} : vector<2x2048xbf16>, vector<2048x256xbf16>, vector<2x256xf32> -> vector<2x256xf32>
    %7 = arith.addf %3, %6 : vector<2x256xf32>
    %c0_6 = arith.constant 0 : index
    %c0_7 = arith.constant 0 : index
    %8 = vector.load %arg7[%c0_6, %c0_7] : memref<2x256xf32, #tpu.memory_space<vmem>>, vector<2x256xf32>
    tpu.vector_store %arg7[%c0_6, %c0_7], %7 {strides = array<i32>} : memref<2x256xf32, #tpu.memory_space<vmem>>, vector<2x256xf32>,
    %c0_i32_8 = arith.constant 0 : i32
    %9 = arith.cmpi eq, %arg1, %c0_i32_8 : i32
    %10 = arith.extui %9 : i1 to i32
    %c0_i32_9 = arith.constant 0 : i32
    %11 = arith.cmpi ne, %10, %c0_i32_9 : i32
    scf.if %11 {
      %c0_10 = arith.constant 0 : index
      %c0_11 = arith.constant 0 : index
      %12 = vector.load %arg7[%c0_10, %c0_11] : memref<2x256xf32, #tpu.memory_space<vmem>>, vector<2x256xf32>
      %c0_12 = arith.constant 0 : index
      %c0_13 = arith.constant 0 : index
      %13 = vector.load %arg4[%c0_12, %c0_13] : memref<1x256xf32, #tpu.memory_space<vmem>>, vector<1x256xf32>
      %14 = vector.broadcast %13 : vector<1x256xf32> to vector<2x256xf32>
      %15 = arith.addf %12, %14 : vector<2x256xf32>
      %cst_14 = arith.constant 0.000000e+00 : f32
      %16 = vector.broadcast %cst_14 : f32 to vector<2x256xf32>
      %17 = arith.maximumf %15, %16 : vector<2x256xf32>
      %c0_15 = arith.constant 0 : index
      %c0_16 = arith.constant 0 : index
      %18 = vector.load %arg5[%c0_15, %c0_16] : memref<256x10xf32, #tpu.memory_space<vmem>>, vector<256x10xf32>
      %cst_17 = arith.constant dense<0.000000e+00> : vector<2x10xf32>
      %19 = tpu.matmul %17, %18, %cst_17 {dimension_numbers = #tpu.dot_dimension_numbers<[1], [0], [0], [1], [0, 0, 1, 1], [], []>} : vector<2x256xf32>, vector<256x10xf32>, vector<2x10xf32> -> vector<2x10xf32>
      %c0_18 = arith.constant 0 : index
      %c0_19 = arith.constant 0 : index
      %c0_20 = arith.constant 0 : index
      %20 = vector.load %arg6[%c0_18, %c0_19, %c0_20] : memref<1x2x10xf32, #tpu.memory_space<vmem>>, vector<1x2x10xf32>
      %21 = vector.shape_cast %20 : vector<1x2x10xf32> to vector<2x10xf32>
      %22 = vector.shape_cast %19 : vector<2x10xf32> to vector<1x2x10xf32>
      tpu.vector_store %arg6[%c0_18, %c0_19, %c0_20], %22 {strides = array<i32>} : memref<1x2x10xf32, #tpu.memory_space<vmem>>, vector<1x2x10xf32>,
    } else {
    }
    return
  }
  func.func @transform_0(%arg0: i32, %arg1: i32) -> (i32, i32) {
    %c0_i32 = arith.constant 0 : i32
    %c0_i32_0 = arith.constant 0 : i32
    return %c0_i32, %arg1 : i32, i32
  }
  func.func @transform_1(%arg0: i32, %arg1: i32) -> (i32, i32) {
    %c0_i32 = arith.constant 0 : i32
    return %arg1, %arg0 : i32, i32
  }
  func.func @transform_2(%arg0: i32, %arg1: i32) -> (i32, i32) {
    %c0_i32 = arith.constant 0 : i32
    %c0_i32_0 = arith.constant 0 : i32
    return %c0_i32, %arg0 : i32, i32
  }
  func.func @transform_3(%arg0: i32, %arg1: i32) -> (i32, i32) {
    %c0_i32 = arith.constant 0 : i32
    %c0_i32_0 = arith.constant 0 : i32
    return %arg0, %c0_i32 : i32, i32
  }
  func.func @transform_4(%arg0: i32, %arg1: i32) -> (i32, i32, i32) {
    %c0_i32 = arith.constant 0 : i32
    %c0_i32_0 = arith.constant 0 : i32
    %c0_i32_1 = arith.constant 0 : i32
    return %arg0, %c0_i32, %c0_i32_0 : i32, i32, i32
  }
}

</mosaic_0001>

<bundles_post_ra>
// kernel: mushroom_cnn_forward.4
= control target key start
LH: loop header
LB: loop body
LE: loop exit
PB: predicated region body
PF: predicated region fallthrough
CT: control target
= control target key end

     0   :  { %s3161_s15 = smov 0   ;;  %s3163_s16 = smov 0   ;;  %s4468_s0 = inlined_call_operand.vmem [shape: f32[2,18,9,16], index: 0, kind: input, shape index: {}]   ;;  %s4469_s1 = inlined_call_operand.vmem [shape: f32[2,18,9,16], index: 1, kind: input, shape index: {}]   ;;  %s4470_s2 = inlined_call_operand.vmem [shape: f32[3,3,16,32], index: 2, kind: input, shape index: {}]   ;;  %s4471_s3 = inlined_call_operand.vmem [shape: f32[1,32], index: 3, kind: input, shape index: {}]   ;;  %s4472_s4 = inlined_call_operand.vmem [shape: f32[2,8,8,32], index: 4, kind: output, shape index: {}]  }
   0x1   :  { %s3165_s17 = smov 0  }
   0x2 LB: > { %s26_s18 = sadd.s32 1, %s3130_s16  ;;  %p2628_p0 = scmp.ge.s32.totalorder %s3134_s17, 1  ;;  %s3134_s17 = sphi %s3165_s17, %s14_s17   ;;  %s3130_s16 = sphi %s3163_s16, %s4599_s16   ;;  %s3126_s15 = sphi %s3161_s15, %s4598_s15  }
   0x3   : > { %p28_p1 = scmp.ge.s32.totalorder %s26_s18, 2  ;;  %p186_p2 = scmp.lt.s32.totalorder %s3134_s17, 3 }
   0x5   : > { %s4601_s18 = smov (%p28_p1, %s26_s18), 0  ;;  %p187_p3 = pnand %p2628_p0, %p186_p2 }
   0x7   : > { %190 = sbr.rel (%p187_p3) target bundleno = 733 (0x2dd), region = 36 }
   0xc   : > { %v2634_v0 = vld [vmem:[%s4470_s2 + $0x18] sm:$0xff]  ;;  %v2633_v1 = vld [vmem:[%s4470_s2 + $0x10] sm:$0xff]  ;;  %p221_p4 = scmp.lt.s32.totalorder %s3126_s15, 1  ;;  %v278_v2 = vld [vmem:[%s4470_s2 + $0x8] sm:$0xff]  ;;  %vm298_vm0 = vcmask 130048   ;;  %vm2502_vm1 = vcmask 261120  }
   0xd   : > { %3068 = vmatpush.msra.mxu2 %v2634_v0  ;;  %3070 = vmatpush.msra.mxu3 %v2634_v0  ;;  %v2700_v3 = vld [vmem:[%s4470_s2 + $0x28] sm:$0xff]  ;;  %v277_v10 = vld [vmem:[%s4470_s2] sm:$0xff]  ;;  %v2766_v26 = vld [vmem:[%s4470_s2 + $0x38] sm:$0xff] }
   0xe   : > { %s4603_s15 = smov (!%p221_p4, %s3126_s15), 1  ;;  %361 = vmatpush.msra.mxu0 %v2634_v0  ;;  %474 = vmatpush.msra.mxu1 %v2634_v0  ;;  %v2699_v13 = vld [vmem:[%s4470_s2 + $0x20] sm:$0xff]  ;;  %v2816_v31 = vld [vmem:[%s4470_s2 + $0x48] sm:$0xff]  ;;  %v2765_v50 = vld [vmem:[%s4470_s2 + $0x30] sm:$0xff] }
   0xf   : > { %3069 = vmatpush.msra.mxu2 %v2633_v1  ;;  %3071 = vmatpush.msra.mxu3 %v2633_v1  ;;  %s3072_s27 = smul.u32 288, %s4603_s15  ;;  %v2815_v53 = vld [vmem:[%s4470_s2 + $0x40] sm:$0xff]  ;;  %s3067_s20 = sshll.u32 %s4603_s15, 6 }
  0x10   : > { %362 = vmatpush.msra.mxu0 %v2633_v1  ;;  %475 = vmatpush.msra.mxu1 %v2633_v1  ;;  %s4401_s23 = scalar_lea.vmem %s4472_s4, %s3067_s20 }
  0x11   : > { %587 = vmatpush.msrb.mxu2 %v278_v2  ;;  %652 = vmatpush.msrb.mxu3 %v278_v2  ;;  %s3197_s30 = scalar_lea.vmem %s4469_s1, %s3072_s27  ;;  %s3202_s7 = scalar_lea.vmem %s4468_s0, %s3072_s27 }
  0x12   : > { %736 = vmatpush.msrb.mxu0 %v2700_v3  ;;  %849 = vmatpush.msrb.mxu1 %v2700_v3  ;;  %v3205_v4 = vld [vmem:[%s3197_s30 + $0x80] sm:$0xff]  ;;  %v3225_v8 = vld [vmem:[%s3197_s30 + $0x90] sm:$0xff] }
  0x13   : > { %v3208_v5 = vld [vmem:[%s3202_s7 + $0x81] sm:$0xff]  ;;  %2643 = vmatmul.msk.f32.vlgmr.msra.gmra.mxu2 %vm298_vm0, %v3205_v4  ;;  %v3228_v9 = vld [vmem:[%s3202_s7 + $0x91] sm:$0xff]  ;;  %653 = vmatpush.msrb.mxu3 %v277_v10 }
  0x14   : > { %v3211_v6 = vld [vmem:[%s3197_s30] sm:$0xff]  ;;  %2659 = vmatmul.msk.f32.vlgmr.msra.gmra.mxu3 %vm298_vm0, %v3208_v5  ;;  %v3234_v11 = vld [vmem:[%s3197_s30 + $0x10] sm:$0xff]  ;;  %588 = vmatpush.msrb.mxu2 %v277_v10 }
  0x15   : > { %v3218_v7 = vld [vmem:[%s3202_s7 + $0x1] sm:$0xff]  ;;  %2635 = vmatmul.msk.f32.vlgmr.msra.gmra.mxu0 %vm298_vm0, %v3211_v6  ;;  %v3237_v12 = vld [vmem:[%s3202_s7 + $0x11] sm:$0xff]  ;;  %850 = vmatpush.msrb.mxu1 %v2699_v13 }
  0x16   : > { %2651 = vmatmul.msk.f32.vlgmr.msra.gmra.mxu1 %vm298_vm0, %v3218_v7  ;;  %737 = vmatpush.msrb.mxu0 %v2699_v13  ;;  %v3251_v14 = vld [vmem:[%s3197_s30 + $0xa0] sm:$0xff]  ;;  %v3271_v18 = vld [vmem:[%s3197_s30 + $0xb0] sm:$0xff] }
  0x17   : > { %v3254_v15 = vld [vmem:[%s3202_s7 + $0xa1] sm:$0xff]  ;;  %v3274_v19 = vld [vmem:[%s3202_s7 + $0xb1] sm:$0xff]  ;;  %1033 = vmatpush.msra.mxu2 %v2766_v26  ;;  %1146 = vmatpush.msra.mxu3 %v2766_v26 }
  0x18   : > { %v3257_v16 = vld [vmem:[%s3197_s30 + $0x20] sm:$0xff]  ;;  %v3277_v20 = vld [vmem:[%s3197_s30 + $0x30] sm:$0xff]  ;;  %1262 = vmatpush.msra.mxu0 %v2816_v31  ;;  %1375 = vmatpush.msra.mxu1 %v2816_v31 }
  0x19   : > { %v3260_v17 = vld [vmem:[%s3202_s7 + $0x21] sm:$0xff]  ;;  %v3280_v21 = vld [vmem:[%s3202_s7 + $0x31] sm:$0xff]  ;;  %1034 = vmatpush.msra.mxu2 %v2765_v50  ;;  %1147 = vmatpush.msra.mxu3 %v2765_v50 }
  0x1a   : > { %v3291_v22 = vld [vmem:[%s3197_s30 + $0xc0] sm:$0xff]  ;;  %v3314_v27 = vld [vmem:[%s3197_s30 + $0xd0] sm:$0xff]  ;;  %1263 = vmatpush.msra.mxu0 %v2815_v53  ;;  %1376 = vmatpush.msra.mxu1 %v2815_v53 }
  0x1b   : > { %2644 = vmatmul.msk.f32.gmra.mxu2 %vm298_vm0, %v3225_v8  ;;  %4508 = vst [vmem:[#allocation2_spill] sm:$0xff] %v3291_v22  ;;  %v3294_v23 = vld [vmem:[%s3202_s7 + $0xc1] sm:$0xff]  ;;  %v3317_v28 = vld [vmem:[%s3202_s7 + $0xd1] sm:$0xff] }
  0x1c   : > { %2660 = vmatmul.msk.f32.gmra.mxu3 %vm298_vm0, %v3228_v9  ;;  %4509 = vst [vmem:[#allocation3_spill] sm:$0xff] %v3294_v23  ;;  %v3297_v24 = vld [vmem:[%s3197_s30 + $0x40] sm:$0xff]  ;;  %v3320_v29 = vld [vmem:[%s3197_s30 + $0x50] sm:$0xff] }
  0x1d   : > { %2636 = vmatmul.msk.f32.gmra.mxu0 %vm298_vm0, %v3234_v11  ;;  %v3300_v25 = vld [vmem:[%s3202_s7 + $0x41] sm:$0xff]  ;;  %4510 = vst [vmem:[#allocation4_spill] sm:$0xff] %v3314_v27  ;;  %v3323_v30 = vld [vmem:[%s3202_s7 + $0x51] sm:$0xff] }
  0x1e   : > { %2652 = vmatmul.msk.f32.gmra.mxu1 %vm298_vm0, %v3237_v12  ;;  %4511 = vst [vmem:[#allocation5_spill] sm:$0xff] %v3317_v28  ;;  %v3337_v32 = vld [vmem:[%s3197_s30 + $0xe0] sm:$0xff]  ;;  %v3357_v36 = vld [vmem:[%s3197_s30 + $0xf0] sm:$0xff] }
  0x1f   : > { %4512 = vst [vmem:[#allocation6_spill] sm:$0xff] %v3337_v32  ;;  %v3340_v33 = vld [vmem:[%s3202_s7 + $0xe1] sm:$0xff]  ;;  %v3360_v37 = vld [vmem:[%s3202_s7 + $0xf1] sm:$0xff] }
  0x20   : > { %4513 = vst [vmem:[#allocation7_spill] sm:$0xff] %v3340_v33  ;;  %v3343_v34 = vld [vmem:[%s3197_s30 + $0x60] sm:$0xff]  ;;  %v3363_v38 = vld [vmem:[%s3197_s30 + $0x70] sm:$0xff] }
  0x21   : > { %v3346_v35 = vld [vmem:[%s3202_s7 + $0x61] sm:$0xff]  ;;  %4514 = vst [vmem:[#allocation8_spill] sm:$0xff] %v3357_v36  ;;  %v3366_v39 = vld [vmem:[%s3202_s7 + $0x71] sm:$0xff] }
  0x22   : > { %4515 = vst [vmem:[#allocation9_spill] sm:$0xff] %v3360_v37  ;;  %v244_v40 = vld [vmem:[%s3202_s7] sm:$0xff]  ;;  %v3385_v42 = vld [vmem:[%s3202_s7 + $0x10] sm:$0xff] }
  0x23   : > { %2645 = vmatmul.msk.f32.gmra.mxu2 %vm298_vm0, %v3251_v14  ;;  %v703_v41 = vld [vmem:[%s3197_s30 + $0x1] sm:$0xff]  ;;  %v3388_v43 = vld [vmem:[%s3197_s30 + $0x11] sm:$0xff] }
  0x24   : > { %2661 = vmatmul.msk.f32.gmra.mxu3 %vm298_vm0, %v3254_v15  ;;  %4516 = vst [vmem:[#allocation10_spill] sm:$0xff] %v3388_v43  ;;  %v3399_v44 = vld [vmem:[%s3202_s7 + $0x20] sm:$0xff]  ;;  %v3413_v46 = vld [vmem:[%s3202_s7 + $0x30] sm:$0xff] }
  0x25   : > { %2637 = vmatmul.msk.f32.gmra.mxu0 %vm298_vm0, %v3257_v16  ;;  %v3402_v45 = vld [vmem:[%s3197_s30 + $0x21] sm:$0xff]  ;;  %v3416_v47 = vld [vmem:[%s3197_s30 + $0x31] sm:$0xff] }
  0x26   : > { %2653 = vmatmul.msk.f32.gmra.mxu1 %vm298_vm0, %v3260_v17  ;;  %4517 = vst [vmem:[#allocation11_spill] sm:$0xff] %v3402_v45  ;;  %v3427_v48 = vld [vmem:[%s3202_s7 + $0x40] sm:$0xff]  ;;  %v3444_v51 = vld [vmem:[%s3202_s7 + $0x50] sm:$0xff] }
  0x27   : > { %4518 = vst [vmem:[#allocation12_spill] sm:$0xff] %v3416_v47  ;;  %v3430_v49 = vld [vmem:[%s3197_s30 + $0x41] sm:$0xff]  ;;  %v3447_v52 = vld [vmem:[%s3197_s30 + $0x51] sm:$0xff] }
  0x28   : > { %4519 = vst [vmem:[#allocation13_spill] sm:$0xff] %v3430_v49  ;;  %v3461_v54 = vld [vmem:[%s3202_s7 + $0x60] sm:$0xff]  ;;  %v3475_v56 = vld [vmem:[%s3202_s7 + $0x70] sm:$0xff] }
  0x29   : > { %4520 = vst [vmem:[#allocation14_spill] sm:$0xff] %v3447_v52  ;;  %v3464_v55 = vld [vmem:[%s3197_s30 + $0x61] sm:$0xff]  ;;  %v3478_v57 = vld [vmem:[%s3197_s30 + $0x71] sm:$0xff] }
  0x2a   : > { %4521 = vst [vmem:[#allocation15_spill] sm:$0xff] %v3464_v55  ;;  %v3489_v58 = vld [vmem:[%s3202_s7 + $0x80] sm:$0xff]  ;;  %v3511_v0 = vld [vmem:[%s3202_s7 + $0x90] sm:$0xff] }
  0x2b   : > { %2646 = vmatmul.msk.f32.gmra.mxu2 %vm298_vm0, %v3271_v18  ;;  %4522 = vst [vmem:[#allocation16_spill] sm:$0xff] %v3478_v57  ;;  %v3496_v61 = vld [vmem:[%s3197_s30 + $0x81] sm:$0xff]  ;;  %v3518_v3 = vld [vmem:[%s3197_s30 + $0x91] sm:$0xff] }
  0x2c   : > { %2662 = vmatmul.msk.f32.gmra.mxu3 %vm298_vm0, %v3274_v19  ;;  %4523 = vst [vmem:[#allocation17_spill] sm:$0xff] %v3496_v61  ;;  %v3533_v10 = vld [vmem:[%s3202_s7 + $0xa0] sm:$0xff]  ;;  %v3555_v50 = vld [vmem:[%s3202_s7 + $0xb0] sm:$0xff] }
  0x2d   : > { %2638 = vmatmul.msk.f32.gmra.mxu0 %vm298_vm0, %v3277_v20  ;;  %4524 = vst [vmem:[#allocation18_spill] sm:$0xff] %v3518_v3  ;;  %v3540_v31 = vld [vmem:[%s3197_s30 + $0xa1] sm:$0xff] }
  0x2e   : > { %2654 = vmatmul.msk.f32.gmra.mxu1 %vm298_vm0, %v3280_v21  ;;  %4525 = vst [vmem:[#allocation19_spill] sm:$0xff] %v3540_v31 }
  0x33   : > { %2647 = vmatmul.msk.f32.gmra.mxu2 %vm298_vm0, %v3291_v22 }
  0x34   : > { %2663 = vmatmul.msk.f32.gmra.mxu3 %vm298_vm0, %v3294_v23 }
  0x35   : > { %2639 = vmatmul.msk.f32.gmra.mxu0 %vm298_vm0, %v3297_v24 }
  0x36   : > { %2655 = vmatmul.msk.f32.gmra.mxu1 %vm298_vm0, %v3300_v25 }
  0x3b   : > { %2648 = vmatmul.msk.f32.gmra.mxu2 %vm298_vm0, %v3314_v27 }
  0x3c   : > { %2664 = vmatmul.msk.f32.gmra.mxu3 %vm298_vm0, %v3317_v28 }
  0x3d   : > { %2640 = vmatmul.msk.f32.gmra.mxu0 %vm298_vm0, %v3320_v29 }
  0x3e   : > { %2656 = vmatmul.msk.f32.gmra.mxu1 %vm298_vm0, %v3323_v30 }
  0x43   : > { %2649 = vmatmul.msk.f32.gmra.mxu2 %vm298_vm0, %v3337_v32 }
  0x44   : > { %2665 = vmatmul.msk.f32.gmra.mxu3 %vm298_vm0, %v3340_v33 }
  0x45   : > { %2641 = vmatmul.msk.f32.gmra.mxu0 %vm298_vm0, %v3343_v34 }
  0x46   : > { %2657 = vmatmul.msk.f32.gmra.mxu1 %vm298_vm0, %v3346_v35 }
  0x4b   : > { %2650 = vmatmul.msk.f32.gmra.mxu2 %vm298_vm0, %v3357_v36 }
  0x4c   : > { %2666 = vmatmul.msk.f32.gmra.mxu3 %vm298_vm0, %v3360_v37 }
  0x4d   : > { %2642 = vmatmul.msk.f32.gmra.mxu0 %vm298_vm0, %v3363_v38 }
  0x4e   : > { %2658 = vmatmul.msk.f32.gmra.mxu1 %vm298_vm0, %v3366_v39 }
  0x53   : > { %2667 = vmatmul.msk.f32.vlgmr.msrb.gmra.mxu2 %vm298_vm0, %v244_v40 }
  0x54   : > { %2683 = vmatmul.msk.f32.vlgmr.msrb.gmra.mxu3 %vm298_vm0, %v3211_v6 }
  0x55   : > { %2701 = vmatmul.msk.f32.vlgmr.msrb.gmra.mxu0 %vm298_vm0, %v3218_v7 }
  0x56   : > { %2717 = vmatmul.msk.f32.vlgmr.msrb.gmra.mxu1 %vm298_vm0, %v703_v41 }
  0x5b   : > { %2668 = vmatmul.msk.f32.gmra.mxu2 %vm298_vm0, %v3385_v42 }
  0x5c   : > { %2684 = vmatmul.msk.f32.gmra.mxu3 %vm298_vm0, %v3234_v11 }
  0x5d   : > { %2702 = vmatmul.msk.f32.gmra.mxu0 %vm298_vm0, %v3237_v12 }
  0x5e   : > { %2718 = vmatmul.msk.f32.gmra.mxu1 %vm298_vm0, %v3388_v43 }
  0x63   : > { %2669 = vmatmul.msk.f32.gmra.mxu2 %vm298_vm0, %v3399_v44 }
  0x64   : > { %2685 = vmatmul.msk.f32.gmra.mxu3 %vm298_vm0, %v3257_v16 }
  0x65   : > { %2703 = vmatmul.msk.f32.gmra.mxu0 %vm298_vm0, %v3260_v17 }
  0x66   : > { %2719 = vmatmul.msk.f32.gmra.mxu1 %vm298_vm0, %v3402_v45 }
  0x6b   : > { %2670 = vmatmul.msk.f32.gmra.mxu2 %vm298_vm0, %v3413_v46 }
  0x6c   : > { %2686 = vmatmul.msk.f32.gmra.mxu3 %vm298_vm0, %v3277_v20 }
  0x6d   : > { %2704 = vmatmul.msk.f32.gmra.mxu0 %vm298_vm0, %v3280_v21 }
  0x6e   : > { %2720 = vmatmul.msk.f32.gmra.mxu1 %vm298_vm0, %v3416_v47  ;;  %v3584_v47 = vld [vmem:[%s3197_s30 + $0xc1] sm:$0xff] }
  0x6f   : > { %4530 = vst [vmem:[#allocation24_spill] sm:$0xff] %v3584_v47 }
  0x73   : > { %2671 = vmatmul.msk.f32.gmra.mxu2 %vm298_vm0, %v3427_v48 }
  0x74   : > { %2687 = vmatmul.msk.f32.gmra.mxu3 %vm298_vm0, %v3297_v24 }
  0x75   : > { %2705 = vmatmul.msk.f32.gmra.mxu0 %vm298_vm0, %v3300_v25 }
  0x76   : > { %2721 = vmatmul.msk.f32.gmra.mxu1 %vm298_vm0, %v3430_v49 }
  0x7b   : > { %2672 = vmatmul.msk.f32.gmra.mxu2 %vm298_vm0, %v3444_v51 }
  0x7c   : > { %2688 = vmatmul.msk.f32.gmra.mxu3 %vm298_vm0, %v3320_v29 }
  0x7d   : > { %2706 = vmatmul.msk.f32.gmra.mxu0 %vm298_vm0, %v3323_v30 }
  0x7e   : > { %2722 = vmatmul.msk.f32.gmra.mxu1 %vm298_vm0, %v3447_v52 }
  0x83   : > { %2673 = vmatmul.msk.f32.gmra.mxu2 %vm298_vm0, %v3461_v54 }
  0x84   : > { %2689 = vmatmul.msk.f32.gmra.mxu3 %vm298_vm0, %v3343_v34 }
  0x85   : > { %2707 = vmatmul.msk.f32.gmra.mxu0 %vm298_vm0, %v3346_v35 }
  0x86   : > { %2723 = vmatmul.msk.f32.gmra.mxu1 %vm298_vm0, %v3464_v55  ;;  %v3577_v55 = vld [vmem:[%s3202_s7 + $0xc0] sm:$0xff] }
  0x87   : > { %4529 = vst [vmem:[#allocation23_spill] sm:$0xff] %v3577_v55 }
  0x8b   : > { %2674 = vmatmul.msk.f32.gmra.mxu2 %vm298_vm0, %v3475_v56 }
  0x8c   : > { %2690 = vmatmul.msk.f32.gmra.mxu3 %vm298_vm0, %v3363_v38 }
  0x8d   : > { %2708 = vmatmul.msk.f32.gmra.mxu0 %vm298_vm0, %v3366_v39 }
  0x8e   : > { %2724 = vmatmul.msk.f32.gmra.mxu1 %vm298_vm0, %v3478_v57 }
  0x92   : > { %v3491_v59 = vpop.f32.mrf.mxu0 }
  0x93   : > { %v3493_v60 = vpop.f32.mrf.mxu1  ;;  %2675 = vmatmul.msk.f32.gmra.mxu2 %vm298_vm0, %v3489_v58 }
  0x94   : > { %2691 = vmatmul.msk.f32.gmra.mxu3 %vm298_vm0, %v3205_v4 }
  0x95   : > { %2709 = vmatmul.msk.f32.gmra.mxu0 %vm298_vm0, %v3208_v5 }
  0x96   : > { %2725 = vmatmul.msk.f32.gmra.mxu1 %vm298_vm0, %v3496_v61  ;;  %v3506_v62 = vpop.f32.mrf.mxu2  ;;  %v3562_v61 = vld [vmem:[%s3197_s30 + $0xb1] sm:$0xff] }
  0x97   : > { %v3508_v63 = vpop.f32.mrf.mxu3  ;;  %4526 = vst [vmem:[#allocation20_spill] sm:$0xff] %v3562_v61 }
  0x9a   : > { %v3513_v1 = vpop.f32.mrf.mxu0 }
  0x9b   : > { %v3515_v2 = vpop.f32.mrf.mxu1  ;;  %2676 = vmatmul.msk.f32.gmra.mxu2 %vm298_vm0, %v3511_v0 }
  0x9c   : > { %2692 = vmatmul.msk.f32.gmra.mxu3 %vm298_vm0, %v3225_v8 }
  0x9d   : > { %2710 = vmatmul.msk.f32.gmra.mxu0 %vm298_vm0, %v3228_v9 }
  0x9e   : > { %2726 = vmatmul.msk.f32.gmra.mxu1 %vm298_vm0, %v3518_v3  ;;  %v3528_v6 = vpop.f32.mrf.mxu2 }
  0x9f   : > { %v3530_v7 = vpop.f32.mrf.mxu3 }
  0xa2   : > { %v3535_v13 = vpop.f32.mrf.mxu0 }
  0xa3   : > { %v3537_v26 = vpop.f32.mrf.mxu1  ;;  %2677 = vmatmul.msk.f32.gmra.mxu2 %vm298_vm0, %v3533_v10 }
  0xa4   : > { %2693 = vmatmul.msk.f32.gmra.mxu3 %vm298_vm0, %v3251_v14 }
  0xa5   : > { %2711 = vmatmul.msk.f32.gmra.mxu0 %vm298_vm0, %v3254_v15 }
  0xa6   : > { %2727 = vmatmul.msk.f32.gmra.mxu1 %vm298_vm0, %v3540_v31  ;;  %v3550_v40 = vpop.f32.mrf.mxu2 }
  0xa7   : > { %v3552_v41 = vpop.f32.mrf.mxu3 }
  0xaa   : > { %v3557_v53 = vpop.f32.mrf.mxu0 }
  0xab   : > { %v3559_v3 = vpop.f32.mrf.mxu1  ;;  %2678 = vmatmul.msk.f32.gmra.mxu2 %vm298_vm0, %v3555_v50 }
  0xac   : > { %2694 = vmatmul.msk.f32.gmra.mxu3 %vm298_vm0, %v3271_v18 }
  0xad   : > { %2712 = vmatmul.msk.f32.gmra.mxu0 %vm298_vm0, %v3274_v19 }
  0xae   : > { %2728 = vmatmul.msk.f32.gmra.mxu1 %vm298_vm0, %v3562_v61  ;;  %v3572_v31 = vpop.f32.mrf.mxu2  ;;  %v2866_v61 = vld [vmem:[%s4470_s2 + $0x58] sm:$0xff] }
  0xaf   : > { %4527 = vst [vmem:[#allocation21_spill] sm:$0xff] %v3572_v31  ;;  %v3574_v57 = vpop.f32.mrf.mxu3  ;;  %1491 = vmatpush.msrb.mxu2 %v2866_v61  ;;  %1604 = vmatpush.msrb.mxu3 %v2866_v61  ;;  %v2932_v61 = vld [vmem:[%s4470_s2 + $0x68] sm:$0xff] }
  0xb0   : > { %4528 = vst [vmem:[#allocation22_spill] sm:$0xff] %v3574_v57  ;;  %v3602_v57 = vld [vmem:[%s3202_s7 + $0xd0] sm:$0xff]  ;;  %1788 = vmatpush.msrb.mxu0 %v2932_v61  ;;  %1901 = vmatpush.msrb.mxu1 %v2932_v61 }
  0xb1   : > { %4533 = vst [vmem:[#allocation27_spill] sm:$0xff] %v3602_v57 }
  0xb2   : > { %v3579_v52 = vpop.f32.mrf.mxu0 }
  0xb3   : > { %v3581_v49 = vpop.f32.mrf.mxu1  ;;  %2679 = vmatmul.msk.f32.gmra.mxu2 %vm298_vm0, %v3577_v55  ;;  %v3609_v55 = vld [vmem:[%s3197_s30 + $0xd1] sm:$0xff] }
  0xb4   : > { %2695 = vmatmul.msk.f32.gmra.mxu3 %vm298_vm0, %v3291_v22  ;;  %4534 = vst [vmem:[#allocation28_spill] sm:$0xff] %v3609_v55 }
  0xb5   : > { %2713 = vmatmul.msk.f32.gmra.mxu0 %vm298_vm0, %v3294_v23  ;;  %v3634_v23 = vld [vmem:[%s3197_s30 + $0xe1] sm:$0xff] }
  0xb6   : > { %2729 = vmatmul.msk.f32.gmra.mxu1 %vm298_vm0, %v3584_v47  ;;  %v3597_v45 = vpop.f32.mrf.mxu2  ;;  %4538 = vst [vmem:[#allocation32_spill] sm:$0xff] %v3634_v23 }
  0xb7   : > { %4531 = vst [vmem:[#allocation25_spill] sm:$0xff] %v3597_v45  ;;  %v3599_v43 = vpop.f32.mrf.mxu3  ;;  %v3627_v45 = vld [vmem:[%s3202_s7 + $0xe0] sm:$0xff] }
  0xb8   : > { %4532 = vst [vmem:[#allocation26_spill] sm:$0xff] %v3599_v43 }
  0xb9   : > { %4537 = vst [vmem:[#allocation31_spill] sm:$0xff] %v3627_v45 }
  0xba   : > { %v3604_v31 = vpop.f32.mrf.mxu0 }
  0xbb   : > { %v3606_v22 = vpop.f32.mrf.mxu1  ;;  %2680 = vmatmul.msk.f32.gmra.mxu2 %vm298_vm0, %v3602_v57 }
  0xbc   : > { %2696 = vmatmul.msk.f32.gmra.mxu3 %vm298_vm0, %v3314_v27 }
  0xbd   : > { %2714 = vmatmul.msk.f32.gmra.mxu0 %vm298_vm0, %v3317_v28 }
  0xbe   : > { %2730 = vmatmul.msk.f32.gmra.mxu1 %vm298_vm0, %v3609_v55  ;;  %v3622_v47 = vpop.f32.mrf.mxu2 }
  0xbf   : > { %4535 = vst [vmem:[#allocation29_spill] sm:$0xff] %v3622_v47  ;;  %v3624_v43 = vpop.f32.mrf.mxu3 }
  0xc0   : > { %4536 = vst [vmem:[#allocation30_spill] sm:$0xff] %v3624_v43  ;;  %v3649_v43 = vld [vmem:[%s3202_s7 + $0xf0] sm:$0xff] }
  0xc1   : > { %4541 = vst [vmem:[#allocation35_spill] sm:$0xff] %v3649_v43 }
  0xc2   : > { %v3629_v27 = vpop.f32.mrf.mxu0 }
  0xc3   : > { %v3631_v57 = vpop.f32.mrf.mxu1  ;;  %2681 = vmatmul.msk.f32.gmra.mxu2 %vm298_vm0, %v3627_v45  ;;  %v3656_v45 = vld [vmem:[%s3197_s30 + $0xf1] sm:$0xff] }
  0xc4   : > { %2697 = vmatmul.msk.f32.gmra.mxu3 %vm298_vm0, %v3337_v32  ;;  %4542 = vst [vmem:[#allocation36_spill] sm:$0xff] %v3656_v45 }
  0xc5   : > { %2715 = vmatmul.msk.f32.gmra.mxu0 %vm298_vm0, %v3340_v33 }
  0xc6   : > { %2731 = vmatmul.msk.f32.gmra.mxu1 %vm298_vm0, %v3634_v23  ;;  %v3644_v61 = vpop.f32.mrf.mxu2 }
  0xc7   : > { %4539 = vst [vmem:[#allocation33_spill] sm:$0xff] %v3644_v61  ;;  %v3646_v55 = vpop.f32.mrf.mxu3 }
  0xc8   : > { %4540 = vst [vmem:[#allocation34_spill] sm:$0xff] %v3646_v55 }
  0xca   : > { %v3651_v47 = vpop.f32.mrf.mxu0 }
  0xcb   : > { %v3653_v28 = vpop.f32.mrf.mxu1  ;;  %2682 = vmatmul.msk.f32.gmra.mxu2 %vm298_vm0, %v3649_v43 }
  0xcc   : > { %2698 = vmatmul.msk.f32.gmra.mxu3 %vm298_vm0, %v3357_v36 }
  0xcd   : > { %2716 = vmatmul.msk.f32.gmra.mxu0 %vm298_vm0, %v3360_v37 }
  0xce   : > { %2732 = vmatmul.msk.f32.gmra.mxu1 %vm298_vm0, %v3656_v45  ;;  %v3666_v23 = vpop.f32.mrf.mxu2 }
  0xcf   : > { %4543 = vst [vmem:[#allocation37_spill] sm:$0xff] %v3666_v23  ;;  %v3668_v55 = vpop.f32.mrf.mxu3 }
  0xd0   : > { %4544 = vst [vmem:[#allocation38_spill] sm:$0xff] %v3668_v55 }
  0xd2   : > { %v739_v61 = vpop.f32.mrf.mxu0 }
  0xd3   : > { %v852_v33 = vpop.f32.mrf.mxu1  ;;  %2767 = vmatmul.msk.f32.vlgmr.msra.gmra.mxu2 %vm298_vm0, %v3385_v42 }
  0xd4   : > { %2783 = vmatmul.msk.f32.vlgmr.msra.gmra.mxu3 %vm298_vm0, %v3234_v11 }
  0xd5   : > { %2817 = vmatmul.msk.f32.vlgmr.msra.gmra.mxu0 %vm298_vm0, %v3234_v11 }
  0xd6   : > { %2833 = vmatmul.msk.f32.vlgmr.msra.gmra.mxu1 %vm298_vm0, %v3237_v12  ;;  %v590_v37 = vpop.f32.mrf.mxu2 }
  0xd7   : > { %v655_v45 = vpop.f32.mrf.mxu3  ;;  %v591_v23 = vadd.f32 %v590_v37, %v3491_v59 }
  0xd8   : > { %v656_v55 = vadd.f32 %v655_v45, %v3493_v60 }
  0xd9   : > { %v3680_v36 = vadd.f32 %v739_v61, %v591_v23 }
  0xda   : > { %v3682_v43 = vadd.f32 %v852_v33, %v656_v55  ;;  %v742_v42 = vpop.f32.mrf.mxu0 }
  0xdb   : > { %v855_v32 = vpop.f32.mrf.mxu1  ;;  %2768 = vmatmul.msk.f32.gmra.mxu2 %vm298_vm0, %v3399_v44 }
  0xdc   : > { %2784 = vmatmul.msk.f32.gmra.mxu3 %vm298_vm0, %v3257_v16 }
  0xdd   : > { %2818 = vmatmul.msk.f32.gmra.mxu0 %vm298_vm0, %v3257_v16 }
  0xde   : > { %2834 = vmatmul.msk.f32.gmra.mxu1 %vm298_vm0, %v3260_v17  ;;  %v593_v11 = vpop.f32.mrf.mxu2 }
  0xdf   : > { %v658_v37 = vpop.f32.mrf.mxu3  ;;  %v594_v23 = vadd.f32 %v593_v11, %v3513_v1 }
  0xe0   : > { %v659_v33 = vadd.f32 %v658_v37, %v3515_v2 }
  0xe1   : > { %v3694_v45 = vadd.f32 %v742_v42, %v594_v23 }
  0xe2   : > { %v3696_v55 = vadd.f32 %v855_v32, %v659_v33  ;;  %v745_v59 = vpop.f32.mrf.mxu0 }
  0xe3   : > { %v858_v60 = vpop.f32.mrf.mxu1  ;;  %2769 = vmatmul.msk.f32.gmra.mxu2 %vm298_vm0, %v3413_v46 }
  0xe4   : > { %2785 = vmatmul.msk.f32.gmra.mxu3 %vm298_vm0, %v3277_v20 }
  0xe5   : > { %2819 = vmatmul.msk.f32.gmra.mxu0 %vm298_vm0, %v3277_v20 }
  0xe6   : > { %2835 = vmatmul.msk.f32.gmra.mxu1 %vm298_vm0, %v3280_v21  ;;  %v596_v1 = vpop.f32.mrf.mxu2 }
  0xe7   : > { %v661_v2 = vpop.f32.mrf.mxu3  ;;  %v597_v61 = vadd.f32 %v596_v1, %v3535_v13 }
  0xe8   : > { %v662_v32 = vadd.f32 %v661_v2, %v3537_v26 }
  0xe9   : > { %v3708_v42 = vadd.f32 %v745_v59, %v597_v61 }
  0xea   : > { %v3710_v11 = vadd.f32 %v858_v60, %v662_v32  ;;  %v748_v37 = vpop.f32.mrf.mxu0  ;;  %v2865_v32 = vld [vmem:[%s4470_s2 + $0x50] sm:$0xff] }
  0xeb   : > { %v861_v23 = vpop.f32.mrf.mxu1  ;;  %2770 = vmatmul.msk.f32.gmra.mxu2 %vm298_vm0, %v3427_v48  ;;  %1605 = vmatpush.msrb.mxu3 %v2865_v32 }
  0xec   : > { %2786 = vmatmul.msk.f32.gmra.mxu3 %vm298_vm0, %v3297_v24  ;;  %1492 = vmatpush.msrb.mxu2 %v2865_v32  ;;  %v2931_v32 = vld [vmem:[%s4470_s2 + $0x60] sm:$0xff] }
  0xed   : > { %2820 = vmatmul.msk.f32.gmra.mxu0 %vm298_vm0, %v3297_v24  ;;  %1902 = vmatpush.msrb.mxu1 %v2931_v32 }
  0xee   : > { %2836 = vmatmul.msk.f32.gmra.mxu1 %vm298_vm0, %v3300_v25  ;;  %v599_v13 = vpop.f32.mrf.mxu2  ;;  %1789 = vmatpush.msrb.mxu0 %v2931_v32 }
  0xef   : > { %v664_v26 = vpop.f32.mrf.mxu3  ;;  %v600_v33 = vadd.f32 %v599_v13, %v3557_v53 }
  0xf0   : > { %v665_v59 = vadd.f32 %v664_v26, %v3559_v3 }
  0xf1   : > { %v3722_v60 = vadd.f32 %v748_v37, %v600_v33 }
  0xf2   : > { %v3724_v1 = vadd.f32 %v861_v23, %v665_v59  ;;  %v751_v2 = vpop.f32.mrf.mxu0 }
  0xf3   : > { %v864_v61 = vpop.f32.mrf.mxu1  ;;  %2771 = vmatmul.msk.f32.gmra.mxu2 %vm298_vm0, %v3444_v51 }
  0xf4   : > { %2787 = vmatmul.msk.f32.gmra.mxu3 %vm298_vm0, %v3320_v29 }
  0xf5   : > { %2821 = vmatmul.msk.f32.gmra.mxu0 %vm298_vm0, %v3320_v29 }
  0xf6   : > { %2837 = vmatmul.msk.f32.gmra.mxu1 %vm298_vm0, %v3323_v30  ;;  %v602_v3 = vpop.f32.mrf.mxu2 }
  0xf7   : > { %v667_v53 = vpop.f32.mrf.mxu3  ;;  %v603_v37 = vadd.f32 %v602_v3, %v3579_v52 }
  0xf8   : > { %v668_v23 = vadd.f32 %v667_v53, %v3581_v49 }
  0xf9   : > { %v3739_v13 = vadd.f32 %v751_v2, %v603_v37 }
  0xfa   : > { %v3741_v26 = vadd.f32 %v864_v61, %v668_v23  ;;  %v754_v33 = vpop.f32.mrf.mxu0 }
  0xfb   : > { %v867_v59 = vpop.f32.mrf.mxu1  ;;  %2772 = vmatmul.msk.f32.gmra.mxu2 %vm298_vm0, %v3461_v54 }
  0xfc   : > { %2788 = vmatmul.msk.f32.gmra.mxu3 %vm298_vm0, %v3343_v34 }
  0xfd   : > { %2822 = vmatmul.msk.f32.gmra.mxu0 %vm298_vm0, %v3343_v34 }
  0xfe   : > { %2838 = vmatmul.msk.f32.gmra.mxu1 %vm298_vm0, %v3346_v35  ;;  %v605_v49 = vpop.f32.mrf.mxu2 }
  0xff   : > { %v670_v52 = vpop.f32.mrf.mxu3  ;;  %v606_v2 = vadd.f32 %v605_v49, %v3604_v31 }
 0x100   : > { %v671_v61 = vadd.f32 %v670_v52, %v3606_v22 }
 0x101   : > { %v3756_v3 = vadd.f32 %v754_v33, %v606_v2 }
 0x102   : > { %v3758_v53 = vadd.f32 %v867_v59, %v671_v61  ;;  %v757_v37 = vpop.f32.mrf.mxu0 }
 0x103   : > { %v870_v23 = vpop.f32.mrf.mxu1  ;;  %2773 = vmatmul.msk.f32.gmra.mxu2 %vm298_vm0, %v3475_v56 }
 0x104   : > { %2789 = vmatmul.msk.f32.gmra.mxu3 %vm298_vm0, %v3363_v38 }
 0x105   : > { %2823 = vmatmul.msk.f32.gmra.mxu0 %vm298_vm0, %v3363_v38 }
 0x106   : > { %2839 = vmatmul.msk.f32.gmra.mxu1 %vm298_vm0, %v3366_v39  ;;  %v608_v31 = vpop.f32.mrf.mxu2 }
 0x107   : > { %v673_v22 = vpop.f32.mrf.mxu3  ;;  %v609_v33 = vadd.f32 %v608_v31, %v3629_v27 }
 0x108   : > { %v674_v59 = vadd.f32 %v673_v22, %v3631_v57 }
 0x109   : > { %v3770_v32 = vadd.f32 %v757_v37, %v609_v33 }
 0x10a   : > { %v3772_v49 = vadd.f32 %v870_v23, %v674_v59  ;;  %v760_v52 = vpop.f32.mrf.mxu0 }
 0x10b   : > { %v873_v2 = vpop.f32.mrf.mxu1  ;;  %2774 = vmatmul.msk.f32.gmra.mxu2 %vm298_vm0, %v3489_v58 }
 0x10c   : > { %2790 = vmatmul.msk.f32.gmra.mxu3 %vm298_vm0, %v3205_v4 }
 0x10d   : > { %2824 = vmatmul.msk.f32.gmra.mxu0 %vm298_vm0, %v3205_v4 }
 0x10e   : > { %2840 = vmatmul.msk.f32.gmra.mxu1 %vm298_vm0, %v3208_v5  ;;  %v611_v27 = vpop.f32.mrf.mxu2 }
 0x10f   : > { %v676_v57 = vpop.f32.mrf.mxu3  ;;  %v612_v61 = vadd.f32 %v611_v27, %v3651_v47 }
 0x110   : > { %v677_v37 = vadd.f32 %v676_v57, %v3653_v28 }
 0x111   : > { %v3784_v23 = vadd.f32 %v760_v52, %v612_v61 }
 0x112   : > { %v3786_v31 = vadd.f32 %v873_v2, %v677_v37  ;;  %v763_v22 = vpop.f32.mrf.mxu0 }
 0x113   : > { %v876_v33 = vpop.f32.mrf.mxu1  ;;  %2775 = vmatmul.msk.f32.gmra.mxu2 %vm298_vm0, %v3511_v0 }
 0x114   : > { %2791 = vmatmul.msk.f32.gmra.mxu3 %vm298_vm0, %v3225_v8 }
 0x115   : > { %2825 = vmatmul.msk.f32.gmra.mxu0 %vm298_vm0, %v3225_v8 }
 0x116   : > { %2841 = vmatmul.msk.f32.gmra.mxu1 %vm298_vm0, %v3228_v9  ;;  %v614_v4 = vpop.f32.mrf.mxu2 }
 0x117   : > { %v679_v5 = vpop.f32.mrf.mxu3  ;;  %v615_v28 = vadd.f32 %v614_v4, %v3506_v62 }
 0x118   : > { %v680_v47 = vadd.f32 %v679_v5, %v3508_v63 }
 0x119   : > { %v3798_v59 = vadd.f32 %v763_v22, %v615_v28 }
 0x11a   : > { %v3800_v52 = vadd.f32 %v876_v33, %v680_v47  ;;  %v766_v2 = vpop.f32.mrf.mxu0  ;;  %v4545_v47 = vld [vmem:[#allocation23_spill] sm:$0xff] }
 0x11b   : > { %v879_v27 = vpop.f32.mrf.mxu1  ;;  %2776 = vmatmul.msk.f32.gmra.mxu2 %vm298_vm0, %v3533_v10 }
 0x11c   : > { %2792 = vmatmul.msk.f32.gmra.mxu3 %vm298_vm0, %v3251_v14 }
 0x11d   : > { %2826 = vmatmul.msk.f32.gmra.mxu0 %vm298_vm0, %v3251_v14 }
 0x11e   : > { %2842 = vmatmul.msk.f32.gmra.mxu1 %vm298_vm0, %v3254_v15  ;;  %v617_v8 = vpop.f32.mrf.mxu2 }
 0x11f   : > { %v682_v9 = vpop.f32.mrf.mxu3  ;;  %v618_v62 = vadd.f32 %v617_v8, %v3528_v6  ;;  %v4549_v8 = vld [vmem:[#allocation22_spill] sm:$0xff] }
 0x120   : > { %v683_v63 = vadd.f32 %v682_v9, %v3530_v7 }
 0x121   : > { %v3812_v57 = vadd.f32 %v766_v2, %v618_v62  ;;  %v4546_v2 = vld [vmem:[#allocation2_spill] sm:$0xff] }
 0x122   : > { %v3814_v61 = vadd.f32 %v879_v27, %v683_v63  ;;  %v769_v37 = vpop.f32.mrf.mxu0 }
 0x123   : > { %v882_v22 = vpop.f32.mrf.mxu1  ;;  %2777 = vmatmul.msk.f32.gmra.mxu2 %vm298_vm0, %v3555_v50 }
 0x124   : > { %2793 = vmatmul.msk.f32.gmra.mxu3 %vm298_vm0, %v3271_v18 }
 0x125   : > { %2827 = vmatmul.msk.f32.gmra.mxu0 %vm298_vm0, %v3271_v18  ;;  %v4547_v18 = vld [vmem:[#allocation3_spill] sm:$0xff] }
 0x126   : > { %2843 = vmatmul.msk.f32.gmra.mxu1 %vm298_vm0, %v3274_v19  ;;  %v620_v14 = vpop.f32.mrf.mxu2 }
 0x127   : > { %v685_v15 = vpop.f32.mrf.mxu3  ;;  %v621_v6 = vadd.f32 %v620_v14, %v3550_v40  ;;  %v4551_v14 = vld [vmem:[#allocation27_spill] sm:$0xff] }
 0x128   : > { %v686_v7 = vadd.f32 %v685_v15, %v3552_v41  ;;  %v4548_v41 = vld [vmem:[#allocation21_spill] sm:$0xff]  ;;  %v4552_v15 = vld [vmem:[#allocation4_spill] sm:$0xff] }
 0x129   : > { %v3826_v33 = vadd.f32 %v769_v37, %v621_v6  ;;  %v2982_v6 = vld [vmem:[%s4470_s2 + $0x78] sm:$0xff] }
 0x12a   : > { %v3828_v4 = vadd.f32 %v882_v22, %v686_v7  ;;  %v772_v5 = vpop.f32.mrf.mxu0  ;;  %v4553_v7 = vld [vmem:[#allocation5_spill] sm:$0xff]  ;;  %2017 = vmatpush.msra.mxu2 %v2982_v6  ;;  %2130 = vmatpush.msra.mxu3 %v2982_v6  ;;  %v3032_v6 = vld [vmem:[%s4470_s2 + $0x88] sm:$0xff] }
 0x12b   : > { %v885_v28 = vpop.f32.mrf.mxu1  ;;  %2778 = vmatmul.msk.f32.gmra.mxu2 %vm298_vm0, %v4545_v47  ;;  %2246 = vmatpush.msra.mxu0 %v3032_v6 }
 0x12c   : > { %2794 = vmatmul.msk.f32.gmra.mxu3 %vm298_vm0, %v4546_v2  ;;  %2359 = vmatpush.msra.mxu1 %v3032_v6  ;;  %v4567_v6 = vld [vmem:[#allocation9_spill] sm:$0xff] }
 0x12d   : > { %2828 = vmatmul.msk.f32.gmra.mxu0 %vm298_vm0, %v4546_v2  ;;  %v4554_v2 = vld [vmem:[#allocation25_spill] sm:$0xff] }
 0x12e   : > { %2844 = vmatmul.msk.f32.gmra.mxu1 %vm298_vm0, %v4547_v18  ;;  %v623_v19 = vpop.f32.mrf.mxu2 }
 0x12f   : > { %v688_v40 = vpop.f32.mrf.mxu3  ;;  %v624_v27 = vadd.f32 %v623_v19, %v4548_v41  ;;  %v4555_v19 = vld [vmem:[#allocation26_spill] sm:$0xff] }
 0x130   : > { %v689_v9 = vadd.f32 %v688_v40, %v4549_v8 }
 0x131   : > { %v3840_v62 = vadd.f32 %v772_v5, %v624_v27 }
 0x132   : > { %v3842_v63 = vadd.f32 %v885_v28, %v689_v9  ;;  %v775_v37 = vpop.f32.mrf.mxu0 }
 0x133   : > { %v888_v22 = vpop.f32.mrf.mxu1  ;;  %2779 = vmatmul.msk.f32.gmra.mxu2 %vm298_vm0, %v4551_v14 }
 0x134   : > { %4550 = vst [vmem:[#allocation23_spill] sm:$0xff] %v3842_v63  ;;  %2795 = vmatmul.msk.f32.gmra.mxu3 %vm298_vm0, %v4552_v15  ;;  %v4558_v63 = vld [vmem:[#allocation31_spill] sm:$0xff] }
 0x135   : > { %2829 = vmatmul.msk.f32.gmra.mxu0 %vm298_vm0, %v4552_v15  ;;  %v4559_v15 = vld [vmem:[#allocation6_spill] sm:$0xff] }
 0x136   : > { %2845 = vmatmul.msk.f32.gmra.mxu1 %vm298_vm0, %v4553_v7  ;;  %v626_v5 = vpop.f32.mrf.mxu2  ;;  %v4560_v7 = vld [vmem:[#allocation7_spill] sm:$0xff] }
 0x137   : > { %v691_v28 = vpop.f32.mrf.mxu3  ;;  %v627_v18 = vadd.f32 %v626_v5, %v4554_v2  ;;  %v4561_v5 = vld [vmem:[#allocation29_spill] sm:$0xff]  ;;  %v4562_v2 = vld [vmem:[#allocation30_spill] sm:$0xff] }
 0x138   : > { %v692_v40 = vadd.f32 %v691_v28, %v4555_v19 }
 0x139   : > { %v3857_v41 = vadd.f32 %v775_v37, %v627_v18 }
 0x13a   : > { %v3859_v27 = vadd.f32 %v888_v22, %v692_v40  ;;  %v778_v8 = vpop.f32.mrf.mxu0 }
 0x13b   : > { %4556 = vst [vmem:[#allocation2_spill] sm:$0xff] %v3857_v41  ;;  %v891_v9 = vpop.f32.mrf.mxu1  ;;  %2780 = vmatmul.msk.f32.gmra.mxu2 %vm298_vm0, %v4558_v63  ;;  %v4565_v41 = vld [vmem:[#allocation35_spill] sm:$0xff] }
 0x13c   : > { %4557 = vst [vmem:[#allocation3_spill] sm:$0xff] %v3859_v27  ;;  %2796 = vmatmul.msk.f32.gmra.mxu3 %vm298_vm0, %v4559_v15 }
 0x13d   : > { %2830 = vmatmul.msk.f32.gmra.mxu0 %vm298_vm0, %v4559_v15 }
 0x13e   : > { %2846 = vmatmul.msk.f32.gmra.mxu1 %vm298_vm0, %v4560_v7  ;;  %v629_v37 = vpop.f32.mrf.mxu2  ;;  %v4566_v7 = vld [vmem:[#allocation8_spill] sm:$0xff] }
 0x13f   : > { %v694_v22 = vpop.f32.mrf.mxu3  ;;  %v630_v28 = vadd.f32 %v629_v37, %v4561_v5  ;;  %v4569_v5 = vld [vmem:[#allocation34_spill] sm:$0xff] }
 0x140   : > { %v695_v18 = vadd.f32 %v694_v22, %v4562_v2  ;;  %v4568_v22 = vld [vmem:[#allocation33_spill] sm:$0xff]  ;;  %v3889_v2 = vld [vmem:[%s3202_s7 + $0x100] sm:$0xff] }
 0x141   : > { %v3874_v19 = vadd.f32 %v778_v8, %v630_v28 }
 0x142   : > { %v3876_v40 = vadd.f32 %v891_v9, %v695_v18  ;;  %v781_v27 = vpop.f32.mrf.mxu0  ;;  %v3892_v18 = vld [vmem:[%s3197_s30 + $0x100] sm:$0xff] }
 0x143   : > { %4563 = vst [vmem:[#allocation21_spill] sm:$0xff] %v3874_v19  ;;  %v894_v15 = vpop.f32.mrf.mxu1  ;;  %2781 = vmatmul.msk.f32.gmra.mxu2 %vm298_vm0, %v4565_v41 }
 0x144   : > { %4564 = vst [vmem:[#allocation22_spill] sm:$0xff] %v3876_v40  ;;  %2797 = vmatmul.msk.f32.gmra.mxu3 %vm298_vm0, %v4566_v7 }
 0x145   : > { %2831 = vmatmul.msk.f32.gmra.mxu0 %vm298_vm0, %v4566_v7  ;;  %v3899_v7 = vld [vmem:[%s3202_s7 + $0x101] sm:$0xff] }
 0x146   : > { %2847 = vmatmul.msk.f32.gmra.mxu1 %vm298_vm0, %v4567_v6  ;;  %v632_v37 = vpop.f32.mrf.mxu2 }
 0x147   : > { %v697_v8 = vpop.f32.mrf.mxu3  ;;  %v633_v9 = vadd.f32 %v632_v37, %v4568_v22 }
 0x148   : > { %v698_v28 = vadd.f32 %v697_v8, %v4569_v5  ;;  %v4573_v8 = vld [vmem:[#allocation38_spill] sm:$0xff] }
 0x149   : > { %v3894_v40 = vadd.f32 %v781_v27, %v633_v9 }
 0x14a   : > { %v3896_v19 = vadd.f32 %v894_v15, %v698_v28  ;;  %v784_v41 = vpop.f32.mrf.mxu0  ;;  %v4572_v15 = vld [vmem:[#allocation37_spill] sm:$0xff] }
 0x14b   : > { %4570 = vst [vmem:[#allocation27_spill] sm:$0xff] %v3894_v40  ;;  %v897_v63 = vpop.f32.mrf.mxu1  ;;  %2782 = vmatmul.msk.f32.gmra.mxu2 %vm298_vm0, %v3889_v2  ;;  %v4574_v40 = vld [vmem:[#allocation10_spill] sm:$0xff] }
 0x14c   : > { %4571 = vst [vmem:[#allocation4_spill] sm:$0xff] %v3896_v19  ;;  %2798 = vmatmul.msk.f32.gmra.mxu3 %vm298_vm0, %v3892_v18 }
 0x14d   : > { %2832 = vmatmul.msk.f32.gmra.mxu0 %vm298_vm0, %v3892_v18 }
 0x14e   : > { %2848 = vmatmul.msk.f32.gmra.mxu1 %vm298_vm0, %v3899_v7  ;;  %v635_v27 = vpop.f32.mrf.mxu2 }
 0x14f   : > { %v700_v6 = vpop.f32.mrf.mxu3  ;;  %v636_v37 = vadd.f32 %v635_v27, %v4572_v15 }
 0x150   : > { %v701_v22 = vadd.f32 %v700_v6, %v4573_v8 }
 0x151   : > { %v3911_v9 = vadd.f32 %v784_v41, %v636_v37 }
 0x152   : > { %v3913_v5 = vadd.f32 %v897_v63, %v701_v22  ;;  %v1265_v28 = vpop.f32.mrf.mxu0 }
 0x153   : > { %v1378_v19 = vpop.f32.mrf.mxu1  ;;  %2867 = vmatmul.msk.f32.vlgmr.msrb.gmra.mxu2 %vm298_vm0, %v3237_v12 }
 0x154   : > { %2883 = vmatmul.msk.f32.vlgmr.msrb.gmra.mxu3 %vm298_vm0, %v4574_v40  ;;  %v4575_v40 = vld [vmem:[#allocation11_spill] sm:$0xff] }
 0x155   : > { %2933 = vmatmul.msk.f32.vlgmr.msrb.gmra.mxu0 %vm298_vm0, %v3399_v44 }
 0x156   : > { %2949 = vmatmul.msk.f32.vlgmr.msrb.gmra.mxu1 %vm298_vm0, %v3257_v16  ;;  %v1036_v27 = vpop.f32.mrf.mxu2 }
 0x157   : > { %v1149_v6 = vpop.f32.mrf.mxu3  ;;  %v1197_v41 = vadd.f32 %v1036_v27, %v3680_v36  ;;  %v4576_v27 = vld [vmem:[#allocation12_spill] sm:$0xff] }
 0x158   : > { %v1213_v63 = vadd.f32 %v1149_v6, %v3682_v43 }
 0x159   : > { %v3925_v15 = vadd.f32 %v1265_v28, %v1197_v41 }
 0x15a   : > { %v3927_v37 = vadd.f32 %v1378_v19, %v1213_v63  ;;  %v1268_v12 = vpop.f32.mrf.mxu0 }
 0x15b   : > { %v1381_v8 = vpop.f32.mrf.mxu1  ;;  %2868 = vmatmul.msk.f32.gmra.mxu2 %vm298_vm0, %v3260_v17 }
 0x15c   : > { %2884 = vmatmul.msk.f32.gmra.mxu3 %vm298_vm0, %v4575_v40 }
 0x15d   : > { %2934 = vmatmul.msk.f32.gmra.mxu0 %vm298_vm0, %v3413_v46 }
 0x15e   : > { %2950 = vmatmul.msk.f32.gmra.mxu1 %vm298_vm0, %v3277_v20  ;;  %v1039_v16 = vpop.f32.mrf.mxu2 }
 0x15f   : > { %v1152_v36 = vpop.f32.mrf.mxu3  ;;  %v1198_v43 = vadd.f32 %v1039_v16, %v3694_v45 }
 0x160   : > { %v1214_v44 = vadd.f32 %v1152_v36, %v3696_v55  ;;  %v4578_v36 = vld [vmem:[#allocation14_spill] sm:$0xff] }
 0x161   : > { %v3939_v19 = vadd.f32 %v1268_v12, %v1198_v43  ;;  %v4577_v12 = vld [vmem:[#allocation13_spill] sm:$0xff] }
 0x162   : > { %v3941_v22 = vadd.f32 %v1381_v8, %v1214_v44  ;;  %v1271_v17 = vpop.f32.mrf.mxu0 }
 0x163   : > { %v1384_v28 = vpop.f32.mrf.mxu1  ;;  %2869 = vmatmul.msk.f32.gmra.mxu2 %vm298_vm0, %v3280_v21 }
 0x164   : > { %2885 = vmatmul.msk.f32.gmra.mxu3 %vm298_vm0, %v4576_v27 }
 0x165   : > { %2935 = vmatmul.msk.f32.gmra.mxu0 %vm298_vm0, %v3427_v48 }
 0x166   : > { %2951 = vmatmul.msk.f32.gmra.mxu1 %vm298_vm0, %v3297_v24  ;;  %v1042_v20 = vpop.f32.mrf.mxu2 }
 0x167   : > { %v1155_v46 = vpop.f32.mrf.mxu3  ;;  %v1199_v45 = vadd.f32 %v1042_v20, %v3708_v42 }
 0x168   : > { %v1215_v55 = vadd.f32 %v1155_v46, %v3710_v11 }
 0x169   : > { %v3953_v6 = vadd.f32 %v1271_v17, %v1199_v45 }
 0x16a   : > { %v3955_v41 = vadd.f32 %v1384_v28, %v1215_v55  ;;  %v1274_v21 = vpop.f32.mrf.mxu0 }
 0x16b   : > { %v1387_v63 = vpop.f32.mrf.mxu1  ;;  %2870 = vmatmul.msk.f32.gmra.mxu2 %vm298_vm0, %v3300_v25 }
 0x16c   : > { %2886 = vmatmul.msk.f32.gmra.mxu3 %vm298_vm0, %v4577_v12 }
 0x16d   : > { %2936 = vmatmul.msk.f32.gmra.mxu0 %vm298_vm0, %v3444_v51 }
 0x16e   : > { %2952 = vmatmul.msk.f32.gmra.mxu1 %vm298_vm0, %v3320_v29  ;;  %v1045_v24 = vpop.f32.mrf.mxu2  ;;  %v2981_v29 = vld [vmem:[%s4470_s2 + $0x70] sm:$0xff] }
 0x16f   : > { %v1158_v48 = vpop.f32.mrf.mxu3  ;;  %v1200_v42 = vadd.f32 %v1045_v24, %v3722_v60  ;;  %2018 = vmatpush.msra.mxu2 %v2981_v29  ;;  %2131 = vmatpush.msra.mxu3 %v2981_v29 }
 0x170   : > { %v1216_v11 = vadd.f32 %v1158_v48, %v3724_v1 }
 0x171   : > { %v3967_v8 = vadd.f32 %v1274_v21, %v1200_v42  ;;  %v4023_v42 = vld [vmem:[%s3197_s30 + $0x90] sm:$0xff] }
 0x172   : > { %v3969_v40 = vadd.f32 %v1387_v63, %v1216_v11  ;;  %v1277_v25 = vpop.f32.mrf.mxu0  ;;  %v4581_v11 = vld [vmem:[#allocation17_spill] sm:$0xff] }
 0x173   : > { %v1390_v16 = vpop.f32.mrf.mxu1  ;;  %2871 = vmatmul.msk.f32.gmra.mxu2 %vm298_vm0, %v3323_v30 }
 0x174   : > { %2887 = vmatmul.msk.f32.gmra.mxu3 %vm298_vm0, %v4578_v36 }
 0x175   : > { %2937 = vmatmul.msk.f32.gmra.mxu0 %vm298_vm0, %v3461_v54  ;;  %v4579_v54 = vld [vmem:[#allocation15_spill] sm:$0xff] }
 0x176   : > { %2953 = vmatmul.msk.f32.gmra.mxu1 %vm298_vm0, %v3343_v34  ;;  %v1048_v51 = vpop.f32.mrf.mxu2  ;;  %v3031_v34 = vld [vmem:[%s4470_s2 + $0x80] sm:$0xff] }
 0x177   : > { %v1161_v60 = vpop.f32.mrf.mxu3  ;;  %v1201_v1 = vadd.f32 %v1048_v51, %v3739_v13  ;;  %2247 = vmatpush.msra.mxu0 %v3031_v34  ;;  %2360 = vmatpush.msra.mxu1 %v3031_v34 }
 0x178   : > { %v1217_v30 = vadd.f32 %v1161_v60, %v3741_v26 }
 0x179   : > { %v3984_v43 = vadd.f32 %v1277_v25, %v1201_v1  ;;  %v4040_v1 = vld [vmem:[%s3197_s30 + $0xa0] sm:$0xff] }
 0x17a   : > { %v3986_v44 = vadd.f32 %v1390_v16, %v1217_v30  ;;  %v1280_v17 = vpop.f32.mrf.mxu0  ;;  %v4582_v30 = vld [vmem:[#allocation18_spill] sm:$0xff] }
 0x17b   : > { %v1393_v28 = vpop.f32.mrf.mxu1  ;;  %2872 = vmatmul.msk.f32.gmra.mxu2 %vm298_vm0, %v3346_v35 }
 0x17c   : > { %2888 = vmatmul.msk.f32.gmra.mxu3 %vm298_vm0, %v4579_v54 }
 0x17d   : > { %2938 = vmatmul.msk.f32.gmra.mxu0 %vm298_vm0, %v3475_v56  ;;  %v4006_v56 = vld [vmem:[%s3197_s30 + $0x80] sm:$0xff] }
 0x17e   : > { %2954 = vmatmul.msk.f32.gmra.mxu1 %vm298_vm0, %v3363_v38  ;;  %v1051_v13 = vpop.f32.mrf.mxu2  ;;  %v4580_v38 = vld [vmem:[#allocation16_spill] sm:$0xff] }
 0x17f   : > { %v1164_v26 = vpop.f32.mrf.mxu3  ;;  %v1202_v27 = vadd.f32 %v1051_v13, %v3756_v3 }
 0x180   : > { %v1218_v35 = vadd.f32 %v1164_v26, %v3758_v53 }
 0x181   : > { %v4001_v20 = vadd.f32 %v1280_v17, %v1202_v27  ;;  %v4057_v27 = vld [vmem:[%s3197_s30 + $0xb0] sm:$0xff] }
 0x182   : > { %v4003_v46 = vadd.f32 %v1393_v28, %v1218_v35  ;;  %v1283_v45 = vpop.f32.mrf.mxu0  ;;  %v4583_v35 = vld [vmem:[#allocation19_spill] sm:$0xff] }
 0x183   : > { %v1396_v55 = vpop.f32.mrf.mxu1  ;;  %2873 = vmatmul.msk.f32.gmra.mxu2 %vm298_vm0, %v3366_v39 }
 0x184   : > { %2889 = vmatmul.msk.f32.gmra.mxu3 %vm298_vm0, %v4580_v38 }
 0x185   : > { %2939 = vmatmul.msk.f32.gmra.mxu0 %vm298_vm0, %v3489_v58  ;;  %v3098_v58 = vld [vmem:[%s3202_s7 + $0x81] sm:$0xff] }
 0x186   : > { %2955 = vmatmul.msk.f32.gmra.mxu1 %vm298_vm0, %v4006_v56  ;;  %v1054_v3 = vpop.f32.mrf.mxu2 }
 0x187   : > { %v1167_v53 = vpop.f32.mrf.mxu3  ;;  %v1203_v21 = vadd.f32 %v1054_v3, %v3770_v32 }
 0x188   : > { %v1219_v63 = vadd.f32 %v1167_v53, %v3772_v49 }
 0x189   : > { %v4018_v12 = vadd.f32 %v1283_v45, %v1203_v21 }
 0x18a   : > { %v4020_v24 = vadd.f32 %v1396_v55, %v1219_v63  ;;  %v1286_v39 = vpop.f32.mrf.mxu0  ;;  %v4074_v63 = vld [vmem:[%s3197_s30 + $0xc0] sm:$0xff] }
 0x18b   : > { %v1399_v48 = vpop.f32.mrf.mxu1  ;;  %2874 = vmatmul.msk.f32.gmra.mxu2 %vm298_vm0, %v3098_v58 }
 0x18c   : > { %2890 = vmatmul.msk.f32.gmra.mxu3 %vm298_vm0, %v4581_v11 }
 0x18d   : > { %2940 = vmatmul.msk.f32.gmra.mxu0 %vm298_vm0, %v3511_v0  ;;  %v3099_v0 = vld [vmem:[%s3202_s7 + $0x91] sm:$0xff] }
 0x18e   : > { %2956 = vmatmul.msk.f32.gmra.mxu1 %vm298_vm0, %v4023_v42  ;;  %v1057_v32 = vpop.f32.mrf.mxu2 }
 0x18f   : > { %v1170_v49 = vpop.f32.mrf.mxu3  ;;  %v1204_v25 = vadd.f32 %v1057_v32, %v3784_v23 }
 0x190   : > { %v1220_v16 = vadd.f32 %v1170_v49, %v3786_v31 }
 0x191   : > { %v4035_v36 = vadd.f32 %v1286_v39, %v1204_v25  ;;  %v4584_v39 = vld [vmem:[#allocation20_spill] sm:$0xff] }
 0x192   : > { %v4037_v29 = vadd.f32 %v1399_v48, %v1220_v16  ;;  %v1289_v51 = vpop.f32.mrf.mxu0  ;;  %v4091_v16 = vld [vmem:[%s3197_s30 + $0xd0] sm:$0xff] }
 0x193   : > { %v1402_v60 = vpop.f32.mrf.mxu1  ;;  %2875 = vmatmul.msk.f32.gmra.mxu2 %vm298_vm0, %v3099_v0  ;;  %v4586_v0 = vld [vmem:[#allocation23_spill] sm:$0xff] }
 0x194   : > { %2891 = vmatmul.msk.f32.gmra.mxu3 %vm298_vm0, %v4582_v30 }
 0x195   : > { %2941 = vmatmul.msk.f32.gmra.mxu0 %vm298_vm0, %v3533_v10  ;;  %v3100_v10 = vld [vmem:[%s3202_s7 + $0xa1] sm:$0xff] }
 0x196   : > { %2957 = vmatmul.msk.f32.gmra.mxu1 %vm298_vm0, %v4040_v1  ;;  %v1060_v23 = vpop.f32.mrf.mxu2 }
 0x197   : > { %v1173_v31 = vpop.f32.mrf.mxu3  ;;  %v1205_v17 = vadd.f32 %v1060_v23, %v3798_v59 }
 0x198   : > { %v1221_v28 = vadd.f32 %v1173_v31, %v3800_v52 }
 0x199   : > { %v4052_v54 = vadd.f32 %v1289_v51, %v1205_v17  ;;  %v4585_v51 = vld [vmem:[#allocation24_spill] sm:$0xff] }
 0x19a   : > { %v4054_v34 = vadd.f32 %v1402_v60, %v1221_v28  ;;  %v1292_v13 = vpop.f32.mrf.mxu0 }
 0x19b   : > { %v1405_v26 = vpop.f32.mrf.mxu1  ;;  %2876 = vmatmul.msk.f32.gmra.mxu2 %vm298_vm0, %v3100_v10  ;;  %v4588_v10 = vld [vmem:[#allocation31_spill] sm:$0xff] }
 0x19c   : > { %2892 = vmatmul.msk.f32.gmra.mxu3 %vm298_vm0, %v4583_v35 }
 0x19d   : > { %2942 = vmatmul.msk.f32.gmra.mxu0 %vm298_vm0, %v3555_v50  ;;  %v3101_v50 = vld [vmem:[%s3202_s7 + $0xb1] sm:$0xff] }
 0x19e   : > { %2958 = vmatmul.msk.f32.gmra.mxu1 %vm298_vm0, %v4057_v27  ;;  %v1063_v59 = vpop.f32.mrf.mxu2 }
 0x19f   : > { %v1176_v52 = vpop.f32.mrf.mxu3  ;;  %v1206_v45 = vadd.f32 %v1063_v59, %v3812_v57  ;;  %v4589_v59 = vld [vmem:[#allocation2_spill] sm:$0xff] }
 0x1a0   : > { %v1222_v55 = vadd.f32 %v1176_v52, %v3814_v61 }
 0x1a1   : > { %v4069_v38 = vadd.f32 %v1292_v13, %v1206_v45  ;;  %v4108_v13 = vld [vmem:[%s3197_s30 + $0xe0] sm:$0xff]  ;;  %v4590_v45 = vld [vmem:[#allocation3_spill] sm:$0xff] }
 0x1a2   : > { %v4071_v3 = vadd.f32 %v1405_v26, %v1222_v55  ;;  %v1295_v53 = vpop.f32.mrf.mxu0  ;;  %v4587_v26 = vld [vmem:[#allocation28_spill] sm:$0xff] }
 0x1a3   : > { %v1408_v21 = vpop.f32.mrf.mxu1  ;;  %2877 = vmatmul.msk.f32.gmra.mxu2 %vm298_vm0, %v3101_v50 }
 0x1a4   : > { %2893 = vmatmul.msk.f32.gmra.mxu3 %vm298_vm0, %v4584_v39 }
 0x1a5   : > { %2943 = vmatmul.msk.f32.gmra.mxu0 %vm298_vm0, %v4545_v47  ;;  %v3102_v47 = vld [vmem:[%s3202_s7 + $0xc1] sm:$0xff] }
 0x1a6   : > { %2959 = vmatmul.msk.f32.gmra.mxu1 %vm298_vm0, %v4074_v63  ;;  %v1066_v57 = vpop.f32.mrf.mxu2 }
 0x1a7   : > { %v1179_v61 = vpop.f32.mrf.mxu3  ;;  %v1207_v48 = vadd.f32 %v1066_v57, %v3826_v33  ;;  %v4125_v57 = vld [vmem:[%s3197_s30 + $0xf0] sm:$0xff] }
 0x1a8   : > { %v1223_v58 = vadd.f32 %v1179_v61, %v3828_v4  ;;  %v3104_v61 = vld [vmem:[%s3202_s7 + $0xe1] sm:$0xff] }
 0x1a9   : > { %v4086_v11 = vadd.f32 %v1295_v53, %v1207_v48  ;;  %v4591_v48 = vld [vmem:[#allocation32_spill] sm:$0xff] }
 0x1aa   : > { %v4088_v32 = vadd.f32 %v1408_v21, %v1223_v58  ;;  %v1298_v49 = vpop.f32.mrf.mxu0  ;;  %v4592_v58 = vld [vmem:[#allocation35_spill] sm:$0xff] }
 0x1ab   : > { %v1411_v25 = vpop.f32.mrf.mxu1  ;;  %2878 = vmatmul.msk.f32.gmra.mxu2 %vm298_vm0, %v3102_v47  ;;  %v4593_v47 = vld [vmem:[#allocation21_spill] sm:$0xff] }
 0x1ac   : > { %2894 = vmatmul.msk.f32.gmra.mxu3 %vm298_vm0, %v4585_v51 }
 0x1ad   : > { %2944 = vmatmul.msk.f32.gmra.mxu0 %vm298_vm0, %v4551_v14  ;;  %v3103_v14 = vld [vmem:[%s3202_s7 + $0xd1] sm:$0xff] }
 0x1ae   : > { %2960 = vmatmul.msk.f32.gmra.mxu1 %vm298_vm0, %v4091_v16  ;;  %v1069_v33 = vpop.f32.mrf.mxu2 }
 0x1af   : > { %v1182_v4 = vpop.f32.mrf.mxu3  ;;  %v1208_v60 = vadd.f32 %v1069_v33, %v3840_v62  ;;  %v4594_v33 = vld [vmem:[#allocation22_spill] sm:$0xff] }
 0x1b0   : > { %v1224_v30 = vadd.f32 %v1182_v4, %v4586_v0 }
 0x1b1   : > { %v4103_v23 = vadd.f32 %v1298_v49, %v1208_v60 }
 0x1b2   : > { %v4105_v31 = vadd.f32 %v1411_v25, %v1224_v30  ;;  %v1301_v17 = vpop.f32.mrf.mxu0 }
 0x1b3   : > { %v1414_v28 = vpop.f32.mrf.mxu1  ;;  %2879 = vmatmul.msk.f32.gmra.mxu2 %vm298_vm0, %v3103_v14  ;;  %v4595_v14 = vld [vmem:[#allocation36_spill] sm:$0xff] }
 0x1b4   : > { %2895 = vmatmul.msk.f32.gmra.mxu3 %vm298_vm0, %v4587_v26 }
 0x1b5   : > { %2945 = vmatmul.msk.f32.gmra.mxu0 %vm298_vm0, %v4588_v10 }
 0x1b6   : > { %2961 = vmatmul.msk.f32.gmra.mxu1 %vm298_vm0, %v4108_v13  ;;  %v1072_v62 = vpop.f32.mrf.mxu2 }
 0x1b7   : > { %v1185_v35 = vpop.f32.mrf.mxu3  ;;  %v1209_v52 = vadd.f32 %v1072_v62, %v4589_v59  ;;  %v4596_v62 = vld [vmem:[#allocation27_spill] sm:$0xff]  ;;  %v4597_v59 = vld [vmem:[#allocation4_spill] sm:$0xff] }
 0x1b8   : > { %v1225_v55 = vadd.f32 %v1185_v35, %v4590_v45  ;;  %v4152_v45 = vld [vmem:[%s3197_s30 + $0x101] sm:$0xff] }
 0x1b9   : > { %v4120_v53 = vadd.f32 %v1301_v17, %v1209_v52 }
 0x1ba   : > { %v4122_v21 = vadd.f32 %v1414_v28, %v1225_v55  ;;  %v1304_v50 = vpop.f32.mrf.mxu0  ;;  %v3105_v28 = vld [vmem:[%s3202_s7 + $0xf1] sm:$0xff] }
 0x1bb   : > { %v1417_v39 = vpop.f32.mrf.mxu1  ;;  %2880 = vmatmul.msk.f32.gmra.mxu2 %vm298_vm0, %v3104_v61 }
 0x1bc   : > { %2896 = vmatmul.msk.f32.gmra.mxu3 %vm298_vm0, %v4591_v48  ;;  %v4160_v48 = vld [vmem:[%s3197_s30 + $0x110] sm:$0xff] }
 0x1bd   : > { %2946 = vmatmul.msk.f32.gmra.mxu0 %vm298_vm0, %v4592_v58 }
 0x1be   : > { %2962 = vmatmul.msk.f32.gmra.mxu1 %vm298_vm0, %v4125_v57  ;;  %v1075_v49 = vpop.f32.mrf.mxu2 }
 0x1bf   : > { %v1188_v25 = vpop.f32.mrf.mxu3  ;;  %v1210_v51 = vadd.f32 %v1075_v49, %v4593_v47 }
 0x1c0   : > { %v1226_v4 = vadd.f32 %v1188_v25, %v4594_v33 }
 0x1c1   : > { %v4137_v60 = vadd.f32 %v1304_v50, %v1210_v51  ;;  %v2965_v51 = vld [vmem:[%s3202_s7 + $0x21] sm:$0xff] }
 0x1c2   : > { %v4139_v0 = vadd.f32 %v1417_v39, %v1226_v4  ;;  %v1307_v30 = vpop.f32.mrf.mxu0 }
 0x1c3   : > { %v1420_v17 = vpop.f32.mrf.mxu1  ;;  %2881 = vmatmul.msk.f32.gmra.mxu2 %vm298_vm0, %v3105_v28  ;;  %v3015_v28 = vld [vmem:[%s3197_s30 + $0x21] sm:$0xff] }
 0x1c4   : > { %2897 = vmatmul.msk.f32.gmra.mxu3 %vm298_vm0, %v4595_v14  ;;  %v3106_v14 = vld [vmem:[%s3197_s30 + $0x20] sm:$0xff] }
 0x1c5   : > { %2947 = vmatmul.msk.f32.gmra.mxu0 %vm298_vm0, %v3889_v2  ;;  %v2914_v2 = vld [vmem:[%s3202_s7 + $0x110] sm:$0xff] }
 0x1c6   : > { %2963 = vmatmul.msk.f32.gmra.mxu1 %vm298_vm0, %v3892_v18  ;;  %v1078_v26 = vpop.f32.mrf.mxu2 }
 0x1c7   : > { %v1191_v10 = vpop.f32.mrf.mxu3  ;;  %v1211_v35 = vadd.f32 %v1078_v26, %v4596_v62  ;;  %v2966_v62 = vld [vmem:[%s3202_s7 + $0x31] sm:$0xff] }
 0x1c8   : > { %v1227_v52 = vadd.f32 %v1191_v10, %v4597_v59 }
 0x1c9   : > { %v4154_v55 = vadd.f32 %v1307_v30, %v1211_v35 }
 0x1ca   : > { %v4156_v50 = vadd.f32 %v1420_v17, %v1227_v52  ;;  %v1310_v39 = vpop.f32.mrf.mxu0 }
 0x1cb   : > { %v1423_v61 = vpop.f32.mrf.mxu1  ;;  %2882 = vmatmul.msk.f32.gmra.mxu2 %vm298_vm0, %v3899_v7 }
 0x1cc   : > { %2898 = vmatmul.msk.f32.gmra.mxu3 %vm298_vm0, %v4152_v45 }
 0x1cd   : > { %2948 = vmatmul.msk.f32.gmra.mxu0 %vm298_vm0, %v2914_v2  ;;  %v3107_v2 = vld [vmem:[%s3197_s30 + $0x30] sm:$0xff] }
 0x1ce   : > { %2964 = vmatmul.msk.f32.gmra.mxu1 %vm298_vm0, %v4160_v48  ;;  %v1081_v58 = vpop.f32.mrf.mxu2 }
 0x1cf   : > { %v1194_v49 = vpop.f32.mrf.mxu3  ;;  %v1212_v25 = vadd.f32 %v1081_v58, %v3911_v9 }
 0x1d0   : > { %v1228_v47 = vadd.f32 %v1194_v49, %v3913_v5 }
 0x1d1   : > { %v4172_v33 = vadd.f32 %v1310_v39, %v1212_v25  ;;  %v2967_v25 = vld [vmem:[%s3202_s7 + $0x41] sm:$0xff] }
 0x1d2   : > { %v4174_v4 = vadd.f32 %v1423_v61, %v1228_v47  ;;  %v1791_v30 = vpop.f32.mrf.mxu0  ;;  %v3016_v61 = vld [vmem:[%s3197_s30 + $0x31] sm:$0xff] }
 0x1d3   : > { %v1904_v17 = vpop.f32.mrf.mxu1  ;;  %2983 = vmatmul.msk.f32.vlgmr.msra.gmra.mxu2 %vm298_vm0, %v3106_v14  ;;  %v3108_v14 = vld [vmem:[%s3197_s30 + $0x40] sm:$0xff] }
 0x1d4   : > { %2999 = vmatmul.msk.f32.vlgmr.msra.gmra.mxu3 %vm298_vm0, %v2965_v51 }
 0x1d5   : > { %3033 = vmatmul.msk.f32.vlgmr.msra.gmra.mxu0 %vm298_vm0, %v2965_v51 }
 0x1d6   : > { %3049 = vmatmul.msk.f32.vlgmr.msra.gmra.mxu1 %vm298_vm0, %v3015_v28  ;;  %v1494_v9 = vpop.f32.mrf.mxu2  ;;  %v3017_v28 = vld [vmem:[%s3197_s30 + $0x41] sm:$0xff] }
 0x1d7   : > { %v1607_v5 = vpop.f32.mrf.mxu3  ;;  %v1655_v26 = vadd.f32 %v1494_v9, %v3925_v15 }
 0x1d8   : > { %v1671_v10 = vadd.f32 %v1607_v5, %v3927_v37 }
 0x1d9   : > { %v4185_v35 = vadd.f32 %v1791_v30, %v1655_v26  ;;  %v2968_v26 = vld [vmem:[%s3202_s7 + $0x51] sm:$0xff] }
 0x1da   : > { %v4187_v59 = vadd.f32 %v1904_v17, %v1671_v10  ;;  %v1794_v52 = vpop.f32.mrf.mxu0 }
 0x1db   : > { %v1907_v39 = vpop.f32.mrf.mxu1  ;;  %2984 = vmatmul.msk.f32.gmra.mxu2 %vm298_vm0, %v3107_v2  ;;  %v3109_v2 = vld [vmem:[%s3197_s30 + $0x50] sm:$0xff] }
 0x1dc   : > { %3000 = vmatmul.msk.f32.gmra.mxu3 %vm298_vm0, %v2966_v62 }
 0x1dd   : > { %3034 = vmatmul.msk.f32.gmra.mxu0 %vm298_vm0, %v2966_v62 }
 0x1de   : > { %3050 = vmatmul.msk.f32.gmra.mxu1 %vm298_vm0, %v3016_v61  ;;  %v1497_v15 = vpop.f32.mrf.mxu2  ;;  %v3018_v61 = vld [vmem:[%s3197_s30 + $0x51] sm:$0xff] }
 0x1df   : > { %v1610_v37 = vpop.f32.mrf.mxu3  ;;  %v1656_v58 = vadd.f32 %v1497_v15, %v3939_v19 }
 0x1e0   : > { %v1672_v49 = vadd.f32 %v1610_v37, %v3941_v22 }
 0x1e1   : > { %v4198_v47 = vadd.f32 %v1794_v52, %v1656_v58  ;;  %v2969_v58 = vld [vmem:[%s3202_s7 + $0x61] sm:$0xff] }
 0x1e2   : > { %v4200_v51 = vadd.f32 %v1907_v39, %v1672_v49  ;;  %v1797_v30 = vpop.f32.mrf.mxu0 }
 0x1e3   : > { %v1910_v17 = vpop.f32.mrf.mxu1  ;;  %2985 = vmatmul.msk.f32.gmra.mxu2 %vm298_vm0, %v3108_v14  ;;  %v3110_v14 = vld [vmem:[%s3197_s30 + $0x60] sm:$0xff] }
 0x1e4   : > { %3001 = vmatmul.msk.f32.gmra.mxu3 %vm298_vm0, %v2967_v25 }
 0x1e5   : > { %3035 = vmatmul.msk.f32.gmra.mxu0 %vm298_vm0, %v2967_v25 }
 0x1e6   : > { %3051 = vmatmul.msk.f32.gmra.mxu1 %vm298_vm0, %v3017_v28  ;;  %v1500_v19 = vpop.f32.mrf.mxu2  ;;  %v3019_v28 = vld [vmem:[%s3197_s30 + $0x61] sm:$0xff] }
 0x1e7   : > { %v1613_v22 = vpop.f32.mrf.mxu3  ;;  %v1657_v9 = vadd.f32 %v1500_v19, %v3953_v6 }
 0x1e8   : > { %v1673_v5 = vadd.f32 %v1613_v22, %v3955_v41 }
 0x1e9   : > { %v4211_v10 = vadd.f32 %v1797_v30, %v1657_v9  ;;  %v2970_v9 = vld [vmem:[%s3202_s7 + $0x71] sm:$0xff] }
 0x1ea   : > { %v4213_v62 = vadd.f32 %v1910_v17, %v1673_v5  ;;  %v1800_v52 = vpop.f32.mrf.mxu0 }
 0x1eb   : > { %v1913_v39 = vpop.f32.mrf.mxu1  ;;  %2986 = vmatmul.msk.f32.gmra.mxu2 %vm298_vm0, %v3109_v2  ;;  %v3111_v2 = vld [vmem:[%s3197_s30 + $0x70] sm:$0xff] }
 0x1ec   : > { %3002 = vmatmul.msk.f32.gmra.mxu3 %vm298_vm0, %v2968_v26 }
 0x1ed   : > { %3036 = vmatmul.msk.f32.gmra.mxu0 %vm298_vm0, %v2968_v26 }
 0x1ee   : > { %3052 = vmatmul.msk.f32.gmra.mxu1 %vm298_vm0, %v3018_v61  ;;  %v1503_v6 = vpop.f32.mrf.mxu2  ;;  %v3020_v61 = vld [vmem:[%s3197_s30 + $0x71] sm:$0xff] }
 0x1ef   : > { %v1616_v41 = vpop.f32.mrf.mxu3  ;;  %v1658_v15 = vadd.f32 %v1503_v6, %v3967_v8 }
 0x1f0   : > { %v1674_v37 = vadd.f32 %v1616_v41, %v3969_v40 }
 0x1f1   : > { %v4224_v49 = vadd.f32 %v1800_v52, %v1658_v15  ;;  %v2971_v15 = vld [vmem:[%s3202_s7 + $0x81] sm:$0xff] }
 0x1f2   : > { %v4226_v25 = vadd.f32 %v1913_v39, %v1674_v37  ;;  %v1803_v30 = vpop.f32.mrf.mxu0 }
 0x1f3   : > { %v1916_v17 = vpop.f32.mrf.mxu1  ;;  %2987 = vmatmul.msk.f32.gmra.mxu2 %vm298_vm0, %v3110_v14 }
 0x1f4   : > { %3003 = vmatmul.msk.f32.gmra.mxu3 %vm298_vm0, %v2969_v58 }
 0x1f5   : > { %3037 = vmatmul.msk.f32.gmra.mxu0 %vm298_vm0, %v2969_v58 }
 0x1f6   : > { %3053 = vmatmul.msk.f32.gmra.mxu1 %vm298_vm0, %v3019_v28  ;;  %v1506_v8 = vpop.f32.mrf.mxu2  ;;  %v3021_v28 = vld [vmem:[%s3197_s30 + $0x81] sm:$0xff] }
 0x1f7   : > { %v1619_v40 = vpop.f32.mrf.mxu3  ;;  %v1659_v19 = vadd.f32 %v1506_v8, %v3984_v43 }
 0x1f8   : > { %v1675_v22 = vadd.f32 %v1619_v40, %v3986_v44  ;;  %v2972_v40 = vld [vmem:[%s3202_s7 + $0x91] sm:$0xff] }
 0x1f9   : > { %v4237_v5 = vadd.f32 %v1803_v30, %v1659_v19 }
 0x1fa   : > { %v4239_v26 = vadd.f32 %v1916_v17, %v1675_v22  ;;  %v1806_v52 = vpop.f32.mrf.mxu0 }
 0x1fb   : > { %v1919_v39 = vpop.f32.mrf.mxu1  ;;  %2988 = vmatmul.msk.f32.gmra.mxu2 %vm298_vm0, %v3111_v2  ;;  %v2973_v2 = vld [vmem:[%s3202_s7 + $0xa1] sm:$0xff] }
 0x1fc   : > { %3004 = vmatmul.msk.f32.gmra.mxu3 %vm298_vm0, %v2970_v9 }
 0x1fd   : > { %3038 = vmatmul.msk.f32.gmra.mxu0 %vm298_vm0, %v2970_v9 }
 0x1fe   : > { %3054 = vmatmul.msk.f32.gmra.mxu1 %vm298_vm0, %v3020_v61  ;;  %v1509_v43 = vpop.f32.mrf.mxu2 }
 0x1ff   : > { %v1622_v44 = vpop.f32.mrf.mxu3  ;;  %v1660_v6 = vadd.f32 %v1509_v43, %v4001_v20 }
 0x200   : > { %v1676_v41 = vadd.f32 %v1622_v44, %v4003_v46 }
 0x201   : > { %v4250_v37 = vadd.f32 %v1806_v52, %v1660_v6  ;;  %v3022_v52 = vld [vmem:[%s3197_s30 + $0x91] sm:$0xff] }
 0x202   : > { %v4252_v58 = vadd.f32 %v1919_v39, %v1676_v41  ;;  %v1809_v30 = vpop.f32.mrf.mxu0  ;;  %v3023_v41 = vld [vmem:[%s3197_s30 + $0xa1] sm:$0xff] }
 0x203   : > { %v1922_v17 = vpop.f32.mrf.mxu1  ;;  %2989 = vmatmul.msk.f32.gmra.mxu2 %vm298_vm0, %v4006_v56 }
 0x204   : > { %3005 = vmatmul.msk.f32.gmra.mxu3 %vm298_vm0, %v2971_v15 }
 0x205   : > { %3039 = vmatmul.msk.f32.gmra.mxu0 %vm298_vm0, %v2971_v15 }
 0x206   : > { %3055 = vmatmul.msk.f32.gmra.mxu1 %vm298_vm0, %v3021_v28  ;;  %v1512_v20 = vpop.f32.mrf.mxu2 }
 0x207   : > { %v1625_v46 = vpop.f32.mrf.mxu3  ;;  %v1661_v14 = vadd.f32 %v1512_v20, %v4018_v12 }
 0x208   : > { %v1677_v8 = vadd.f32 %v1625_v46, %v4020_v24 }
 0x209   : > { %v4263_v19 = vadd.f32 %v1809_v30, %v1661_v14  ;;  %v3024_v14 = vld [vmem:[%s3197_s30 + $0xb1] sm:$0xff] }
 0x20a   : > { %v4265_v22 = vadd.f32 %v1922_v17, %v1677_v8  ;;  %v1812_v9 = vpop.f32.mrf.mxu0  ;;  %v2974_v17 = vld [vmem:[%s3202_s7 + $0xb1] sm:$0xff] }
 0x20b   : > { %v1925_v56 = vpop.f32.mrf.mxu1  ;;  %2990 = vmatmul.msk.f32.gmra.mxu2 %vm298_vm0, %v4023_v42 }
 0x20c   : > { %3006 = vmatmul.msk.f32.gmra.mxu3 %vm298_vm0, %v2972_v40 }
 0x20d   : > { %3040 = vmatmul.msk.f32.gmra.mxu0 %vm298_vm0, %v2972_v40 }
 0x20e   : > { %3056 = vmatmul.msk.f32.gmra.mxu1 %vm298_vm0, %v3022_v52  ;;  %v1515_v12 = vpop.f32.mrf.mxu2 }
 0x20f   : > { %v1628_v24 = vpop.f32.mrf.mxu3  ;;  %v1662_v39 = vadd.f32 %v1515_v12, %v4035_v36 }
 0x210   : > { %v1678_v61 = vadd.f32 %v1628_v24, %v4037_v29  ;;  %v3025_v24 = vld [vmem:[%s3197_s30 + $0xc1] sm:$0xff] }
 0x211   : > { %v4276_v43 = vadd.f32 %v1812_v9, %v1662_v39  ;;  %v2975_v9 = vld [vmem:[%s3202_s7 + $0xc1] sm:$0xff] }
 0x212   : > { %v4278_v44 = vadd.f32 %v1925_v56, %v1678_v61  ;;  %v1815_v6 = vpop.f32.mrf.mxu0 }
 0x213   : > { %v1928_v42 = vpop.f32.mrf.mxu1  ;;  %2991 = vmatmul.msk.f32.gmra.mxu2 %vm298_vm0, %v4040_v1 }
 0x214   : > { %3007 = vmatmul.msk.f32.gmra.mxu3 %vm298_vm0, %v2973_v2 }
 0x215   : > { %3041 = vmatmul.msk.f32.gmra.mxu0 %vm298_vm0, %v2973_v2  ;;  %v2976_v2 = vld [vmem:[%s3202_s7 + $0xd1] sm:$0xff] }
 0x216   : > { %3057 = vmatmul.msk.f32.gmra.mxu1 %vm298_vm0, %v3023_v41  ;;  %v1518_v36 = vpop.f32.mrf.mxu2 }
 0x217   : > { %v1631_v29 = vpop.f32.mrf.mxu3  ;;  %v1663_v15 = vadd.f32 %v1518_v36, %v4052_v54  ;;  %v3026_v36 = vld [vmem:[%s3197_s30 + $0xd1] sm:$0xff] }
 0x218   : > { %v1679_v30 = vadd.f32 %v1631_v29, %v4054_v34 }
 0x219   : > { %v4289_v28 = vadd.f32 %v1815_v6, %v1663_v15 }
 0x21a   : > { %v4291_v20 = vadd.f32 %v1928_v42, %v1679_v30  ;;  %v1818_v46 = vpop.f32.mrf.mxu0  ;;  %v2977_v30 = vld [vmem:[%s3202_s7 + $0xe1] sm:$0xff] }
 0x21b   : > { %v1931_v1 = vpop.f32.mrf.mxu1  ;;  %2992 = vmatmul.msk.f32.gmra.mxu2 %vm298_vm0, %v4057_v27 }
 0x21c   : > { %3008 = vmatmul.msk.f32.gmra.mxu3 %vm298_vm0, %v2974_v17 }
 0x21d   : > { %3042 = vmatmul.msk.f32.gmra.mxu0 %vm298_vm0, %v2974_v17 }
 0x21e   : > { %3058 = vmatmul.msk.f32.gmra.mxu1 %vm298_vm0, %v3024_v14  ;;  %v1521_v54 = vpop.f32.mrf.mxu2  ;;  %v3027_v14 = vld [vmem:[%s3197_s30 + $0xe1] sm:$0xff] }
 0x21f   : > { %v1634_v34 = vpop.f32.mrf.mxu3  ;;  %v1664_v8 = vadd.f32 %v1521_v54, %v4069_v38 }
 0x220   : > { %v1680_v40 = vadd.f32 %v1634_v34, %v4071_v3 }
 0x221   : > { %v4302_v56 = vadd.f32 %v1818_v46, %v1664_v8  ;;  %v2978_v8 = vld [vmem:[%s3202_s7 + $0xf1] sm:$0xff] }
 0x222   : > { %v4304_v52 = vadd.f32 %v1931_v1, %v1680_v40  ;;  %v1821_v12 = vpop.f32.mrf.mxu0 }
 0x223   : > { %v1934_v27 = vpop.f32.mrf.mxu1  ;;  %2993 = vmatmul.msk.f32.gmra.mxu2 %vm298_vm0, %v4074_v63 }
 0x224   : > { %3009 = vmatmul.msk.f32.gmra.mxu3 %vm298_vm0, %v2975_v9 }
 0x225   : > { %3043 = vmatmul.msk.f32.gmra.mxu0 %vm298_vm0, %v2975_v9 }
 0x226   : > { %3059 = vmatmul.msk.f32.gmra.mxu1 %vm298_vm0, %v3025_v24  ;;  %v1524_v38 = vpop.f32.mrf.mxu2 }
 0x227   : > { %v1637_v3 = vpop.f32.mrf.mxu3  ;;  %v1665_v39 = vadd.f32 %v1524_v38, %v4086_v11 }
 0x228   : > { %v1681_v61 = vadd.f32 %v1637_v3, %v4088_v32 }
 0x229   : > { %v4315_v6 = vadd.f32 %v1821_v12, %v1665_v39 }
 0x22a   : > { %v4317_v42 = vadd.f32 %v1934_v27, %v1681_v61  ;;  %v1824_v41 = vpop.f32.mrf.mxu0 }
 0x22b   : > { %v1937_v63 = vpop.f32.mrf.mxu1  ;;  %2994 = vmatmul.msk.f32.gmra.mxu2 %vm298_vm0, %v4091_v16 }
 0x22c   : > { %3010 = vmatmul.msk.f32.gmra.mxu3 %vm298_vm0, %v2976_v2 }
 0x22d   : > { %3044 = vmatmul.msk.f32.gmra.mxu0 %vm298_vm0, %v2976_v2 }
 0x22e   : > { %3060 = vmatmul.msk.f32.gmra.mxu1 %vm298_vm0, %v3026_v36  ;;  %v1527_v11 = vpop.f32.mrf.mxu2 }
 0x22f   : > { %v1640_v32 = vpop.f32.mrf.mxu3  ;;  %v1666_v29 = vadd.f32 %v1527_v11, %v4103_v23 }
 0x230   : > { %v1682_v15 = vadd.f32 %v1640_v32, %v4105_v31 }
 0x231   : > { %v4328_v17 = vadd.f32 %v1824_v41, %v1666_v29  ;;  %v3030_v29 = vld [vmem:[%s3197_s30 + $0x111] sm:$0xff] }
 0x232   : > { %v4330_v46 = vadd.f32 %v1937_v63, %v1682_v15  ;;  %v1827_v1 = vpop.f32.mrf.mxu0  ;;  %v2980_v63 = vld [vmem:[%s3202_s7 + $0x111] sm:$0xff] }
 0x233   : > { %v1940_v16 = vpop.f32.mrf.mxu1  ;;  %2995 = vmatmul.msk.f32.gmra.mxu2 %vm298_vm0, %v4108_v13  ;;  %v3028_v13 = vld [vmem:[%s3197_s30 + $0xf1] sm:$0xff] }
 0x234   : > { %3011 = vmatmul.msk.f32.gmra.mxu3 %vm298_vm0, %v2977_v30 }
 0x235   : > { %3045 = vmatmul.msk.f32.gmra.mxu0 %vm298_vm0, %v2977_v30 }
 0x236   : > { %3061 = vmatmul.msk.f32.gmra.mxu1 %vm298_vm0, %v3027_v14  ;;  %v1530_v23 = vpop.f32.mrf.mxu2 }
 0x237   : > { %v1643_v31 = vpop.f32.mrf.mxu3  ;;  %v1667_v54 = vadd.f32 %v1530_v23, %v4120_v53 }
 0x238   : > { %v1683_v34 = vadd.f32 %v1643_v31, %v4122_v21 }
 0x239   : > { %v4341_v40 = vadd.f32 %v1827_v1, %v1667_v54 }
 0x23a   : > { %v4343_v9 = vadd.f32 %v1940_v16, %v1683_v34  ;;  %v1830_v12 = vpop.f32.mrf.mxu0 }
 0x23b   : > { %v1943_v27 = vpop.f32.mrf.mxu1  ;;  %2996 = vmatmul.msk.f32.gmra.mxu2 %vm298_vm0, %v4125_v57 }
 0x23c   : > { %3012 = vmatmul.msk.f32.gmra.mxu3 %vm298_vm0, %v2978_v8 }
 0x23d   : > { %3046 = vmatmul.msk.f32.gmra.mxu0 %vm298_vm0, %v2978_v8 }
 0x23e   : > { %3062 = vmatmul.msk.f32.gmra.mxu1 %vm298_vm0, %v3028_v13  ;;  %v1533_v53 = vpop.f32.mrf.mxu2  ;;  %v4389_v13 = vld [vmem:[%s4471_s3] ss:$0 sm:$0xff] }
 0x23f   : > { %v1646_v21 = vpop.f32.mrf.mxu3  ;;  %v1668_v24 = vadd.f32 %v1533_v53, %v4137_v60 }
 0x240   : > { %v1684_v38 = vadd.f32 %v1646_v21, %v4139_v0 }
 0x241   : > { %v4353_v3 = vadd.f32 %v1830_v12, %v1668_v24 }
 0x242   : > { %v4355_v39 = vadd.f32 %v1943_v27, %v1684_v38  ;;  %v1833_v61 = vpop.f32.mrf.mxu0 }
 0x243   : > { %v1946_v57 = vpop.f32.mrf.mxu1  ;;  %2997 = vmatmul.msk.f32.gmra.mxu2 %vm298_vm0, %v3892_v18 }
 0x244   : > { %3013 = vmatmul.msk.f32.gmra.mxu3 %vm298_vm0, %v3899_v7 }
 0x245   : > { %3047 = vmatmul.msk.f32.gmra.mxu0 %vm298_vm0, %v3899_v7 }
 0x246   : > { %3063 = vmatmul.msk.f32.gmra.mxu1 %vm298_vm0, %v4152_v45  ;;  %v1536_v60 = vpop.f32.mrf.mxu2 }
 0x247   : > { %v1649_v0 = vpop.f32.mrf.mxu3  ;;  %v1669_v2 = vadd.f32 %v1536_v60, %v4154_v55 }
 0x248   : > { %v1685_v41 = vadd.f32 %v1649_v0, %v4156_v50 }
 0x249   : > { %v4368_v36 = vadd.f32 %v1833_v61, %v1669_v2 }
 0x24a   : > { %v4370_v11 = vadd.f32 %v1946_v57, %v1685_v41  ;;  %v1836_v18 = vpop.f32.mrf.mxu0 }
 0x24b   : > { %v1949_v32 = vpop.f32.mrf.mxu1  ;;  %2998 = vmatmul.msk.f32.gmra.mxu2 %vm298_vm0, %v4160_v48 }
 0x24c   : > { %3014 = vmatmul.msk.f32.gmra.mxu3 %vm298_vm0, %v2980_v63 }
 0x24d   : > { %3048 = vmatmul.msk.f32.gmra.mxu0 %vm298_vm0, %v2980_v63 }
 0x24e   : > { %3064 = vmatmul.msk.f32.gmra.mxu1 %vm298_vm0, %v3030_v29  ;;  %v1539_v7 = vpop.f32.mrf.mxu2 }
 0x24f   : > { %v1652_v45 = vpop.f32.mrf.mxu3  ;;  %v1670_v55 = vadd.f32 %v1539_v7, %v4172_v33 }
 0x250   : > { %v1686_v50 = vadd.f32 %v1652_v45, %v4174_v4 }
 0x251   : > { %v4380_v15 = vadd.f32 %v1836_v18, %v1670_v55 }
 0x252   : > { %v4382_v30 = vadd.f32 %v1949_v32, %v1686_v50  ;;  %v2249_v1 = vpop.f32.mrf.mxu0 }
 0x253   : > { %v2362_v16 = vpop.f32.mrf.mxu1 }
 0x256   : > { %v2020_v14 = vpop.f32.mrf.mxu2 }
 0x257   : > { %v2133_v48 = vpop.f32.mrf.mxu3  ;;  %v2181_v23 = vadd.f32 %v2020_v14, %v4185_v35 }
 0x258   : > { %v2197_v31 = vadd.f32 %v2133_v48, %v4187_v59 }
 0x259   : > { %v2410_v54 = vadd.f32 %v2249_v1, %v2181_v23 }
 0x25a   : > { %v2426_v34 = vadd.f32 %v2362_v16, %v2197_v31  ;;  %v2252_v8 = vpop.f32.mrf.mxu0 }
 0x25b   : > { %v2365_v12 = vpop.f32.mrf.mxu1 }
 0x25c   : > { %v2442_v33 = vmax.f32 %v2410_v54, %v2426_v34 }
 0x25e   : > { %v2023_v27 = vpop.f32.mrf.mxu2  ;;  %v2462_v61 = vadd.f32 %v4389_v13, %v2442_v33 }
 0x25f   : > { %v2136_v4 = vpop.f32.mrf.mxu3  ;;  %v2182_v53 = vadd.f32 %v2023_v27, %v4198_v47 }
 0x260   : > { %v2198_v21 = vadd.f32 %v2136_v4, %v4200_v51  ;;  %v2478_v41 = vmax.f32 %v2462_v61, 0.0 }
 0x261   : > { %v2411_v35 = vadd.f32 %v2252_v8, %v2182_v53 }
 0x262   : > { %v2427_v24 = vadd.f32 %v2365_v12, %v2198_v21  ;;  %v2255_v59 = vpop.f32.mrf.mxu0 }
 0x263   : > { %v2368_v38 = vpop.f32.mrf.mxu1 }
 0x264   : > { %v2443_v57 = vmax.f32 %v2411_v35, %v2427_v24 }
 0x266   : > { %v2463_v60 = vadd.f32 %v4389_v13, %v2443_v57  ;;  %v2026_v0 = vpop.f32.mrf.mxu2 }
 0x267   : > { %v2139_v2 = vpop.f32.mrf.mxu3  ;;  %v2183_v18 = vadd.f32 %v2026_v0, %v4211_v10 }
 0x268   : > { %v2479_v63 = vmax.f32 %v2463_v60, 0.0  ;;  %v2199_v47 = vadd.f32 %v2139_v2, %v4213_v62 }
 0x269   : > { %v2412_v32 = vadd.f32 %v2255_v59, %v2183_v18 }
 0x26a   : > { %v2494_v51 = vmax.f32 %v2478_v41, %v2479_v63  ;;  %v2428_v29 = vadd.f32 %v2368_v38, %v2199_v47  ;;  %v2258_v7 = vpop.f32.mrf.mxu0 }
 0x26b   : > { %v2371_v45 = vpop.f32.mrf.mxu1 }
 0x26c   : > { %2503 = vst.msk [vmem:[%s4401_s23] sm:$0xff] %vm2502_vm1, %v2494_v51  ;;  %v2444_v55 = vmax.f32 %v2412_v32, %v2428_v29 }
 0x26e   : > { %v2029_v50 = vpop.f32.mrf.mxu2  ;;  %v2464_v31 = vadd.f32 %v4389_v13, %v2444_v55 }
 0x26f   : > { %v2142_v1 = vpop.f32.mrf.mxu3  ;;  %v2184_v10 = vadd.f32 %v2029_v50, %v4224_v49 }
 0x270   : > { %v2200_v62 = vadd.f32 %v2142_v1, %v4226_v25  ;;  %v2480_v33 = vmax.f32 %v2464_v31, 0.0 }
 0x271   : > { %v2413_v16 = vadd.f32 %v2258_v7, %v2184_v10 }
 0x272   : > { %v2429_v14 = vadd.f32 %v2371_v45, %v2200_v62  ;;  %v2261_v48 = vpop.f32.mrf.mxu0 }
 0x273   : > { %v2374_v23 = vpop.f32.mrf.mxu1 }
 0x274   : > { %v2445_v54 = vmax.f32 %v2413_v16, %v2429_v14 }
 0x276   : > { %v2465_v34 = vadd.f32 %v4389_v13, %v2445_v54  ;;  %v2032_v8 = vpop.f32.mrf.mxu2 }
 0x277   : > { %v2145_v12 = vpop.f32.mrf.mxu3  ;;  %v2185_v4 = vadd.f32 %v2032_v8, %v4237_v5 }
 0x278   : > { %v2481_v27 = vmax.f32 %v2465_v34, 0.0  ;;  %v2201_v49 = vadd.f32 %v2145_v12, %v4239_v26 }
 0x279   : > { %v2414_v25 = vadd.f32 %v2261_v48, %v2185_v4 }
 0x27a   : > { %v2495_v53 = vmax.f32 %v2480_v33, %v2481_v27  ;;  %v2430_v21 = vadd.f32 %v2374_v23, %v2201_v49  ;;  %v2264_v35 = vpop.f32.mrf.mxu0 }
 0x27b   : > { %v2377_v24 = vpop.f32.mrf.mxu1 }
 0x27c   : > { %2504 = vst.msk [vmem:[%s4401_s23 + $0x8] sm:$0xff] %vm2502_vm1, %v2495_v53  ;;  %v2446_v59 = vmax.f32 %v2414_v25, %v2430_v21 }
 0x27e   : > { %v2035_v38 = vpop.f32.mrf.mxu2  ;;  %v2466_v26 = vadd.f32 %v4389_v13, %v2446_v59 }
 0x27f   : > { %v2148_v61 = vpop.f32.mrf.mxu3  ;;  %v2186_v57 = vadd.f32 %v2035_v38, %v4250_v37 }
 0x280   : > { %v2202_v60 = vadd.f32 %v2148_v61, %v4252_v58  ;;  %v2482_v32 = vmax.f32 %v2466_v26, 0.0 }
 0x281   : > { %v2415_v0 = vadd.f32 %v2264_v35, %v2186_v57 }
 0x282   : > { %v2431_v2 = vadd.f32 %v2377_v24, %v2202_v60  ;;  %v2267_v41 = vpop.f32.mrf.mxu0 }
 0x283   : > { %v2380_v5 = vpop.f32.mrf.mxu1 }
 0x284   : > { %v2447_v63 = vmax.f32 %v2415_v0, %v2431_v2 }
 0x286   : > { %v2467_v18 = vadd.f32 %v4389_v13, %v2447_v63  ;;  %v2038_v47 = vpop.f32.mrf.mxu2 }
 0x287   : > { %v2151_v51 = vpop.f32.mrf.mxu3  ;;  %v2187_v7 = vadd.f32 %v2038_v47, %v4263_v19 }
 0x288   : > { %v2483_v29 = vmax.f32 %v2467_v18, 0.0  ;;  %v2203_v37 = vadd.f32 %v2151_v51, %v4265_v22 }
 0x289   : > { %v2416_v58 = vadd.f32 %v2267_v41, %v2187_v7 }
 0x28a   : > { %v2496_v45 = vmax.f32 %v2482_v32, %v2483_v29  ;;  %v2432_v55 = vadd.f32 %v2380_v5, %v2203_v37  ;;  %v2270_v50 = vpop.f32.mrf.mxu0 }
 0x28b   : > { %v2383_v1 = vpop.f32.mrf.mxu1 }
 0x28c   : > { %2505 = vst.msk [vmem:[%s4401_s23 + $0x10] sm:$0xff] %vm2502_vm1, %v2496_v45  ;;  %v2448_v10 = vmax.f32 %v2416_v58, %v2432_v55 }
 0x28e   : > { %v2041_v62 = vpop.f32.mrf.mxu2  ;;  %v2468_v22 = vadd.f32 %v4389_v13, %v2448_v10 }
 0x28f   : > { %v2154_v16 = vpop.f32.mrf.mxu3  ;;  %v2188_v14 = vadd.f32 %v2041_v62, %v4276_v43 }
 0x290   : > { %v2204_v48 = vadd.f32 %v2154_v16, %v4278_v44  ;;  %v2484_v27 = vmax.f32 %v2468_v22, 0.0 }
 0x291   : > { %v2417_v23 = vadd.f32 %v2270_v50, %v2188_v14 }
 0x292   : > { %v2433_v31 = vadd.f32 %v2383_v1, %v2204_v48  ;;  %v2273_v54 = vpop.f32.mrf.mxu0 }
 0x293   : > { %v2386_v19 = vpop.f32.mrf.mxu1 }
 0x294   : > { %v2449_v34 = vmax.f32 %v2417_v23, %v2433_v31 }
 0x296   : > { %v2469_v8 = vadd.f32 %v4389_v13, %v2449_v34  ;;  %v2044_v12 = vpop.f32.mrf.mxu2 }
 0x297   : > { %v2157_v33 = vpop.f32.mrf.mxu3  ;;  %v2189_v49 = vadd.f32 %v2044_v12, %v4289_v28 }
 0x298   : > { %v2485_v4 = vmax.f32 %v2469_v8, 0.0  ;;  %v2205_v43 = vadd.f32 %v2157_v33, %v4291_v20 }
 0x299   : > { %v2418_v44 = vadd.f32 %v2273_v54, %v2189_v49 }
 0x29a   : > { %v2497_v53 = vmax.f32 %v2484_v27, %v2485_v4  ;;  %v2434_v25 = vadd.f32 %v2386_v19, %v2205_v43  ;;  %v2276_v21 = vpop.f32.mrf.mxu0 }
 0x29b   : > { %v2389_v35 = vpop.f32.mrf.mxu1 }
 0x29c   : > { %2506 = vst.msk [vmem:[%s4401_s23 + $0x18] sm:$0xff] %vm2502_vm1, %v2497_v53  ;;  %v2450_v24 = vmax.f32 %v2418_v44, %v2434_v25 }
 0x29e   : > { %v2047_v59 = vpop.f32.mrf.mxu2  ;;  %v2470_v20 = vadd.f32 %v4389_v13, %v2450_v24 }
 0x29f   : > { %v2160_v38 = vpop.f32.mrf.mxu3  ;;  %v2190_v61 = vadd.f32 %v2047_v59, %v4302_v56 }
 0x2a0   : > { %v2206_v57 = vadd.f32 %v2160_v38, %v4304_v52  ;;  %v2486_v18 = vmax.f32 %v2470_v20, 0.0 }
 0x2a1   : > { %v2419_v60 = vadd.f32 %v2276_v21, %v2190_v61 }
 0x2a2   : > { %v2435_v0 = vadd.f32 %v2389_v35, %v2206_v57  ;;  %v2279_v2 = vpop.f32.mrf.mxu0 }
 0x2a3   : > { %v2392_v28 = vpop.f32.mrf.mxu1 }
 0x2a4   : > { %v2451_v41 = vmax.f32 %v2419_v60, %v2435_v0 }
 0x2a6   : > { %v2471_v5 = vadd.f32 %v4389_v13, %v2451_v41  ;;  %v2050_v26 = vpop.f32.mrf.mxu2 }
 0x2a7   : > { %v2163_v63 = vpop.f32.mrf.mxu3  ;;  %v2191_v51 = vadd.f32 %v2050_v26, %v4315_v6 }
 0x2a8   : > { %v2487_v47 = vmax.f32 %v2471_v5, 0.0  ;;  %v2207_v56 = vadd.f32 %v2163_v63, %v4317_v42 }
 0x2a9   : > { %v2420_v52 = vadd.f32 %v2279_v2, %v2191_v51 }
 0x2aa   : > { %v2498_v32 = vmax.f32 %v2486_v18, %v2487_v47  ;;  %v2436_v29 = vadd.f32 %v2392_v28, %v2207_v56  ;;  %v2282_v7 = vpop.f32.mrf.mxu0 }
 0x2ab   : > { %v2395_v37 = vpop.f32.mrf.mxu1 }
 0x2ac   : > { %2507 = vst.msk [vmem:[%s4401_s23 + $0x20] sm:$0xff] %vm2502_vm1, %v2498_v32  ;;  %v2452_v45 = vmax.f32 %v2420_v52, %v2436_v29 }
 0x2ae   : > { %v2053_v58 = vpop.f32.mrf.mxu2  ;;  %v2472_v42 = vadd.f32 %v4389_v13, %v2452_v45 }
 0x2af   : > { %v2166_v55 = vpop.f32.mrf.mxu3  ;;  %v2192_v50 = vadd.f32 %v2053_v58, %v4328_v17 }
 0x2b0   : > { %v2208_v1 = vadd.f32 %v2166_v55, %v4330_v46  ;;  %v2488_v54 = vmax.f32 %v2472_v42, 0.0 }
 0x2b1   : > { %v2421_v10 = vadd.f32 %v2282_v7, %v2192_v50 }
 0x2b2   : > { %v2437_v62 = vadd.f32 %v2395_v37, %v2208_v1  ;;  %v2285_v16 = vpop.f32.mrf.mxu0 }
 0x2b3   : > { %v2398_v6 = vpop.f32.mrf.mxu1 }
 0x2b4   : > { %v2453_v14 = vmax.f32 %v2421_v10, %v2437_v62 }
 0x2b6   : > { %v2473_v48 = vadd.f32 %v4389_v13, %v2453_v14  ;;  %v2056_v23 = vpop.f32.mrf.mxu2 }
 0x2b7   : > { %v2169_v31 = vpop.f32.mrf.mxu3  ;;  %v2193_v22 = vadd.f32 %v2056_v23, %v4341_v40 }
 0x2b8   : > { %v2489_v19 = vmax.f32 %v2473_v48, 0.0  ;;  %v2209_v17 = vadd.f32 %v2169_v31, %v4343_v9 }
 0x2b9   : > { %v2422_v46 = vadd.f32 %v2285_v16, %v2193_v22 }
 0x2ba   : > { %v2499_v34 = vmax.f32 %v2488_v54, %v2489_v19  ;;  %v2438_v8 = vadd.f32 %v2398_v6, %v2209_v17  ;;  %v2288_v12 = vpop.f32.mrf.mxu0 }
 0x2bb   : > { %v2401_v33 = vpop.f32.mrf.mxu1 }
 0x2bc   : > { %2508 = vst.msk [vmem:[%s4401_s23 + $0x28] sm:$0xff] %vm2502_vm1, %v2499_v34  ;;  %v2454_v27 = vmax.f32 %v2422_v46, %v2438_v8 }
 0x2be   : > { %v2059_v4 = vpop.f32.mrf.mxu2  ;;  %v2474_v40 = vadd.f32 %v4389_v13, %v2454_v27 }
 0x2bf   : > { %v2172_v49 = vpop.f32.mrf.mxu3  ;;  %v2194_v43 = vadd.f32 %v2059_v4, %v4353_v3 }
 0x2c0   : > { %v2210_v53 = vadd.f32 %v2172_v49, %v4355_v39  ;;  %v2490_v61 = vmax.f32 %v2474_v40, 0.0 }
 0x2c1   : > { %v2423_v44 = vadd.f32 %v2288_v12, %v2194_v43 }
 0x2c2   : > { %v2439_v25 = vadd.f32 %v2401_v33, %v2210_v53  ;;  %v2291_v21 = vpop.f32.mrf.mxu0 }
 0x2c3   : > { %v2404_v35 = vpop.f32.mrf.mxu1 }
 0x2c4   : > { %v2455_v9 = vmax.f32 %v2423_v44, %v2439_v25 }
 0x2c6   : > { %v2475_v24 = vadd.f32 %v4389_v13, %v2455_v9  ;;  %v2062_v59 = vpop.f32.mrf.mxu2 }
 0x2c7   : > { %v2175_v38 = vpop.f32.mrf.mxu3  ;;  %v2195_v60 = vadd.f32 %v2062_v59, %v4368_v36 }
 0x2c8   : > { %v2491_v57 = vmax.f32 %v2475_v24, 0.0  ;;  %v2211_v3 = vadd.f32 %v2175_v38, %v4370_v11 }
 0x2c9   : > { %v2424_v39 = vadd.f32 %v2291_v21, %v2195_v60 }
 0x2ca   : > { %v2500_v0 = vmax.f32 %v2490_v61, %v2491_v57  ;;  %v2440_v2 = vadd.f32 %v2404_v35, %v2211_v3  ;;  %v2294_v20 = vpop.f32.mrf.mxu0 }
 0x2cb   : > { %v2407_v41 = vpop.f32.mrf.mxu1 }
 0x2cc   : > { %2509 = vst.msk [vmem:[%s4401_s23 + $0x30] sm:$0xff] %vm2502_vm1, %v2500_v0  ;;  %v2456_v28 = vmax.f32 %v2424_v39, %v2440_v2 }
 0x2ce   : > { %v2065_v5 = vpop.f32.mrf.mxu2  ;;  %v2476_v36 = vadd.f32 %v4389_v13, %v2456_v28 }
 0x2cf   : > { %v2178_v26 = vpop.f32.mrf.mxu3  ;;  %v2196_v63 = vadd.f32 %v2065_v5, %v4380_v15 }
 0x2d0   : > { %v2212_v18 = vadd.f32 %v2178_v26, %v4382_v30  ;;  %v2492_v32 = vmax.f32 %v2476_v36, 0.0 }
 0x2d1   : > { %v2425_v47 = vadd.f32 %v2294_v20, %v2196_v63 }
 0x2d2   : > { %v2441_v51 = vadd.f32 %v2407_v41, %v2212_v18 }
 0x2d4   : > { %v2457_v11 = vmax.f32 %v2425_v47, %v2441_v51 }
 0x2d6   : > { %v2477_v56 = vadd.f32 %v4389_v13, %v2457_v11 }
 0x2d8   : > { %v2493_v52 = vmax.f32 %v2477_v56, 0.0 }
 0x2da   : > { %v2501_v29 = vmax.f32 %v2492_v32, %v2493_v52 }
 0x2dc   : > { %2510 = vst.msk [vmem:[%s4401_s23 + $0x38] sm:$0xff] %vm2502_vm1, %v2501_v29 }
 0x2dd PF: > { %s14_s17 = sadd.s32 1, %s3134_s17   ;;  %s4598_s15 = smov %s3130_s16 }
 0x2de   : > { %p11_p5 = scmp.ge.s32.totalorder %s14_s17, 4   ;;  %s4599_s16 = smov %s4601_s18 }
 0x2e0   :  { %13 = sbr.rel (!%p11_p5) target bundleno = 2 (0x2), region = 83 }

// kernel: mushroom_cnn_forward.3
= control target key start
LH: loop header
LB: loop body
LE: loop exit
PB: predicated region body
PF: predicated region fallthrough
CT: control target
= control target key end

     0   :  { %s5595_s15 = smov 0   ;;  %s5597_s16 = smov 0   ;;  %s8236_s0 = inlined_call_operand.vmem [shape: f32[2,34,17,3], index: 0, kind: input, shape index: {}]   ;;  %s8237_s1 = inlined_call_operand.vmem [shape: f32[2,34,17,3], index: 1, kind: input, shape index: {}]   ;;  %s8238_s2 = inlined_call_operand.vmem [shape: f32[3,3,3,16], index: 2, kind: input, shape index: {}]   ;;  %s8239_s3 = inlined_call_operand.vmem [shape: f32[1,16], index: 3, kind: input, shape index: {}]   ;;  %s8240_s4 = inlined_call_operand.vmem [shape: f32[2,16,16,16], index: 4, kind: output, shape index: {}]  }
   0x1   :  { %s5599_s17 = smov 0   ;;  %s5601_s18 = smov 0  }
   0x2   :  { %s5603_s19 = smov 0  }
   0x3 LB: > { %s23_s20 = sadd.s32 1, %s5560_s17  ;;  %s26_s21 = sadd.s32 1, %s5564_s18  ;;  %s5568_s19 = sphi %s5603_s19, %s14_s19   ;;  %s5564_s18 = sphi %s5601_s18, %s8728_s18   ;;  %s5560_s17 = sphi %s5599_s17, %s8727_s17   ;;  %s5556_s16 = sphi %s5597_s16, %s8726_s16   ;;  %s5552_s15 = sphi %s5595_s15, %s8725_s15  }
   0x4   : > { %p24_p0 = scmp.ge.s32.totalorder %s23_s20, 2  ;;  %p4578_p1 = scmp.ge.s32.totalorder %s5568_s19, 1 }
   0x5   : > { %p186_p2 = scmp.lt.s32.totalorder %s5568_s19, 5 }
   0x6   : > { %s8730_s20 = smov (%p24_p0, %s23_s20), 0  ;;  %s8732_s21 = smov (!%p24_p0, %s26_s21), %s5564_s18 }
   0x7   : > { %p187_p3 = pnand %p4578_p1, %p186_p2  ;;  %p28_p4 = scmp.ge.s32.totalorder %s8732_s21, 2 }
   0x9   : > { %s8734_s21 = smov (%p28_p4, %s8732_s21), 0  ;;  %190 = sbr.rel (%p187_p3) target bundleno = 1312 (0x520), region = 36 }
   0xe   : > { %v4587_v0 = vld [vmem:[%s8238_s2 + $0x4] sm:$0x7]  ;;  %vm443_vm0 = vcmask 1042432   ;;  %p222_p5 = scmp.lt.s32.totalorder %s5556_s16, 1  ;;  %v311_v1 = vld [vmem:[%s8238_s2] sm:$0x7] }
   0xf   : > { %5455 = vmatpush.msk.msra.mxu2 %vm443_vm0, %v4587_v0  ;;  %5456 = vmatpush.msk.msra.mxu3 %vm443_vm0, %v4587_v0  ;;  %v4720_v2 = vld [vmem:[%s8238_s2 + $0x8] sm:$0x7]  ;;  %s4586_s28 = smul.u32 384, %s5552_s15  ;;  %vm346_vm1 = vcmask 23552   ;;  %v4855_v55 = vld [vmem:[%s8238_s2 + $0xc] sm:$0x7] }
  0x10   : > { %s8736_s16 = smov (!%p222_p5, %s5556_s16), 1  ;;  %4588 = vmatpush.msk.msra.mxu0 %vm443_vm0, %v4587_v0  ;;  %4621 = vmatpush.msk.msra.mxu1 %vm443_vm0, %v4587_v0  ;;  %v4954_v60 = vld [vmem:[%s8238_s2 + $0x10] sm:$0x7]  ;;  %s4581_s5 = sshll.u32 %s5552_s15, 3  ;;  %vm4435_vm2 = vcmask 130048  }
  0x11   : > { %4654 = vmatpush.msk.msrb.mxu2 %vm443_vm0, %v311_v1  ;;  %4687 = vmatpush.msk.msrb.mxu3 %vm443_vm0, %v311_v1  ;;  %s5457_s29 = smul.u32 816, %s8736_s16  ;;  %p235_p6 = scmp.lt.s32.totalorder %s4581_s5, 15 }
  0x12   : > { %4721 = vmatpush.msk.msrb.mxu0 %vm443_vm0, %v4720_v2  ;;  %4754 = vmatpush.msk.msrb.mxu1 %vm443_vm0, %v4720_v2  ;;  %s4583_s8 = sshll.u32 %s8736_s16, 5 }
  0x13   : > { %s231_s6 = scalar_lea.vmem %s8237_s1, %s5457_s29  ;;  %s226_s9 = scalar_lea.vmem %s8236_s0, %s5457_s29 }
  0x14   : > { %s5654_s10 = scalar_lea.vmem %s231_s6, %s4586_s28  ;;  %s5656_s11 = scalar_lea.vmem %s226_s9, %s4586_s28 }
  0x15   : > { %v5659_v3 = vld [vmem:[%s5654_s10 + $0xc0] sm:$0xff]  ;;  %v5679_v7 = vld [vmem:[%s5654_s10 + $0xc8] sm:$0xff]  ;;  %v5699_v11 = vld [vmem:[%s5654_s10 + $0xd8] sm:$0xff]  ;;  %s8738_s5 = smov (!%p235_p6, %s4581_s5), 15 }
  0x16   : > { %v5662_v4 = vld [vmem:[%s5656_s11 + $0xc1] sm:$0xff]  ;;  %4605 = vmatmul.msk.f32.vlgmr.msra.gmra.mxu2 %vm346_vm1, %v5659_v3  ;;  %v5682_v8 = vld [vmem:[%s5656_s11 + $0xc9] sm:$0xff]  ;;  %v5702_v12 = vld [vmem:[%s5656_s11 + $0xd9] sm:$0xff]  ;;  %s4582_s7 = sshll.u32 %s8738_s5, 1 }
  0x17   : > { %v5665_v5 = vld [vmem:[%s5654_s10] sm:$0xff]  ;;  %4638 = vmatmul.msk.f32.vlgmr.msra.gmra.mxu3 %vm346_vm1, %v5662_v4  ;;  %v5685_v9 = vld [vmem:[%s5654_s10 + $0x8] sm:$0xff]  ;;  %v5705_v13 = vld [vmem:[%s5654_s10 + $0x18] sm:$0xff]  ;;  %4856 = vmatpush.msk.msra.mxu2 %vm443_vm0, %v4855_v55  ;;  %s239_s9 = sadd.s32 %s4583_s8, %s4582_s7 }
  0x18   : > { %v5672_v6 = vld [vmem:[%s5656_s11 + $0x1] sm:$0xff]  ;;  %4589 = vmatmul.msk.f32.vlgmr.msra.gmra.mxu0 %vm346_vm1, %v5665_v5  ;;  %v5688_v10 = vld [vmem:[%s5656_s11 + $0x9] sm:$0xff]  ;;  %8309 = vst [vmem:[#allocation2_spill] sm:$0xff] %v5705_v13  ;;  %v5708_v14 = vld [vmem:[%s5656_s11 + $0x19] sm:$0xff]  ;;  %4889 = vmatpush.msk.msra.mxu3 %vm443_vm0, %v4855_v55  ;;  %s4584_s16 = sshll.u32 %s239_s9, 3 }
  0x19   : > { %4622 = vmatmul.msk.f32.vlgmr.msra.gmra.mxu1 %vm346_vm1, %v5672_v6  ;;  %v5719_v15 = vld [vmem:[%s5654_s10 + $0xe0] sm:$0xff]  ;;  %v5739_v19 = vld [vmem:[%s5654_s10 + $0xf0] sm:$0xff]  ;;  %v5759_v23 = vld [vmem:[%s5654_s10 + $0xf8] sm:$0xff]  ;;  %4955 = vmatpush.msk.msra.mxu0 %vm443_vm0, %v4954_v60  ;;  %s8017_s14 = scalar_lea.vmem %s8240_s4, %s4584_s16 }
  0x1a   : > { %v5722_v16 = vld [vmem:[%s5656_s11 + $0xe1] sm:$0xff]  ;;  %v5742_v20 = vld [vmem:[%s5656_s11 + $0xf1] sm:$0xff]  ;;  %v5762_v24 = vld [vmem:[%s5656_s11 + $0xf9] sm:$0xff]  ;;  %4988 = vmatpush.msk.msra.mxu1 %vm443_vm0, %v4954_v60 }
  0x1b   : > { %v5725_v17 = vld [vmem:[%s5654_s10 + $0x20] sm:$0xff]  ;;  %v5745_v21 = vld [vmem:[%s5654_s10 + $0x30] sm:$0xff]  ;;  %v5765_v25 = vld [vmem:[%s5654_s10 + $0x38] sm:$0xff] }
  0x1c   : > { %v5728_v18 = vld [vmem:[%s5656_s11 + $0x21] sm:$0xff]  ;;  %v5748_v22 = vld [vmem:[%s5656_s11 + $0x31] sm:$0xff]  ;;  %v5768_v26 = vld [vmem:[%s5656_s11 + $0x39] sm:$0xff] }
  0x1d   : > { %v5779_v27 = vld [vmem:[%s5654_s10 + $0x108] sm:$0xff]  ;;  %v5799_v31 = vld [vmem:[%s5654_s10 + $0x110] sm:$0xff]  ;;  %v5819_v35 = vld [vmem:[%s5654_s10 + $0x120] sm:$0xff] }
  0x1e   : > { %4606 = vmatmul.msk.f32.gmra.mxu2 %vm346_vm1, %v5679_v7  ;;  %v5782_v28 = vld [vmem:[%s5656_s11 + $0x109] sm:$0xff]  ;;  %v5802_v32 = vld [vmem:[%s5656_s11 + $0x111] sm:$0xff]  ;;  %v5822_v36 = vld [vmem:[%s5656_s11 + $0x121] sm:$0xff] }
  0x1f   : > { %4639 = vmatmul.msk.f32.gmra.mxu3 %vm346_vm1, %v5682_v8  ;;  %v5785_v29 = vld [vmem:[%s5654_s10 + $0x48] sm:$0xff]  ;;  %v5805_v33 = vld [vmem:[%s5654_s10 + $0x50] sm:$0xff]  ;;  %v5825_v37 = vld [vmem:[%s5654_s10 + $0x60] sm:$0xff] }
  0x20   : > { %4590 = vmatmul.msk.f32.gmra.mxu0 %vm346_vm1, %v5685_v9  ;;  %v5788_v30 = vld [vmem:[%s5656_s11 + $0x49] sm:$0xff]  ;;  %v5808_v34 = vld [vmem:[%s5656_s11 + $0x51] sm:$0xff]  ;;  %v5828_v38 = vld [vmem:[%s5656_s11 + $0x61] sm:$0xff] }
  0x21   : > { %4623 = vmatmul.msk.f32.gmra.mxu1 %vm346_vm1, %v5688_v10  ;;  %v5839_v39 = vld [vmem:[%s5654_s10 + $0x128] sm:$0xff]  ;;  %v5859_v43 = vld [vmem:[%s5654_s10 + $0x138] sm:$0xff]  ;;  %v5879_v47 = vld [vmem:[%s5654_s10 + $0x140] sm:$0xff] }
  0x22   : > { %v5842_v40 = vld [vmem:[%s5656_s11 + $0x129] sm:$0xff]  ;;  %v5862_v44 = vld [vmem:[%s5656_s11 + $0x139] sm:$0xff]  ;;  %v5882_v48 = vld [vmem:[%s5656_s11 + $0x141] sm:$0xff] }
  0x23   : > { %v5845_v41 = vld [vmem:[%s5654_s10 + $0x68] sm:$0xff]  ;;  %v5865_v45 = vld [vmem:[%s5654_s10 + $0x78] sm:$0xff]  ;;  %8310 = vst [vmem:[#allocation3_spill] sm:$0xff] %v5882_v48  ;;  %v5885_v49 = vld [vmem:[%s5654_s10 + $0x80] sm:$0xff] }
  0x24   : > { %v5848_v42 = vld [vmem:[%s5656_s11 + $0x69] sm:$0xff]  ;;  %v5868_v46 = vld [vmem:[%s5656_s11 + $0x79] sm:$0xff]  ;;  %v5888_v50 = vld [vmem:[%s5656_s11 + $0x81] sm:$0xff] }
  0x25   : > { %v5899_v51 = vld [vmem:[%s5654_s10 + $0x150] sm:$0xff]  ;;  %v5924_v56 = vld [vmem:[%s5654_s10 + $0x158] sm:$0xff]  ;;  %v5949_v61 = vld [vmem:[%s5654_s10 + $0x168] sm:$0xff] }
  0x26   : > { %4607 = vmatmul.msk.f32.gmra.mxu2 %vm346_vm1, %v5699_v11  ;;  %8311 = vst [vmem:[#allocation4_spill] sm:$0xff] %v5899_v51  ;;  %v5902_v52 = vld [vmem:[%s5656_s11 + $0x151] sm:$0xff]  ;;  %v5927_v57 = vld [vmem:[%s5656_s11 + $0x159] sm:$0xff]  ;;  %v5952_v62 = vld [vmem:[%s5656_s11 + $0x169] sm:$0xff] }
  0x27   : > { %4640 = vmatmul.msk.f32.gmra.mxu3 %vm346_vm1, %v5702_v12  ;;  %8312 = vst [vmem:[#allocation5_spill] sm:$0xff] %v5902_v52  ;;  %v5905_v53 = vld [vmem:[%s5654_s10 + $0x90] sm:$0xff]  ;;  %v5930_v58 = vld [vmem:[%s5654_s10 + $0x98] sm:$0xff]  ;;  %v5955_v63 = vld [vmem:[%s5654_s10 + $0xa8] sm:$0xff] }
  0x28   : > { %4591 = vmatmul.msk.f32.gmra.mxu0 %vm346_vm1, %v5705_v13  ;;  %v5908_v54 = vld [vmem:[%s5656_s11 + $0x91] sm:$0xff]  ;;  %8313 = vst [vmem:[#allocation6_spill] sm:$0xff] %v5924_v56  ;;  %v5933_v59 = vld [vmem:[%s5656_s11 + $0x99] sm:$0xff]  ;;  %v5958_v0 = vld [vmem:[%s5656_s11 + $0xa9] sm:$0xff] }
  0x29   : > { %4624 = vmatmul.msk.f32.gmra.mxu1 %vm346_vm1, %v5708_v14  ;;  %8314 = vst [vmem:[#allocation7_spill] sm:$0xff] %v5927_v57  ;;  %v5969_v1 = vld [vmem:[%s5654_s10 + $0x170] sm:$0xff] }
  0x2a   : > { %8315 = vst [vmem:[#allocation8_spill] sm:$0xff] %v5949_v61  ;;  %v5972_v2 = vld [vmem:[%s5656_s11 + $0x171] sm:$0xff] }
  0x2b   : > { %8316 = vst [vmem:[#allocation9_spill] sm:$0xff] %v5952_v62  ;;  %v5975_v55 = vld [vmem:[%s5654_s10 + $0xb0] sm:$0xff] }
  0x2c   : > { %8317 = vst [vmem:[#allocation10_spill] sm:$0xff] %v5969_v1  ;;  %v5978_v60 = vld [vmem:[%s5656_s11 + $0xb1] sm:$0xff] }
  0x2d   : > { %8318 = vst [vmem:[#allocation11_spill] sm:$0xff] %v5972_v2 }
  0x2e   : > { %4608 = vmatmul.msk.f32.gmra.mxu2 %vm346_vm1, %v5719_v15 }
  0x2f   : > { %4641 = vmatmul.msk.f32.gmra.mxu3 %vm346_vm1, %v5722_v16 }
  0x30   : > { %4592 = vmatmul.msk.f32.gmra.mxu0 %vm346_vm1, %v5725_v17 }
  0x31   : > { %4625 = vmatmul.msk.f32.gmra.mxu1 %vm346_vm1, %v5728_v18 }
  0x36   : > { %4609 = vmatmul.msk.f32.gmra.mxu2 %vm346_vm1, %v5739_v19 }
  0x37   : > { %4642 = vmatmul.msk.f32.gmra.mxu3 %vm346_vm1, %v5742_v20 }
  0x38   : > { %4593 = vmatmul.msk.f32.gmra.mxu0 %vm346_vm1, %v5745_v21 }
  0x39   : > { %4626 = vmatmul.msk.f32.gmra.mxu1 %vm346_vm1, %v5748_v22 }
  0x3e   : > { %4610 = vmatmul.msk.f32.gmra.mxu2 %vm346_vm1, %v5759_v23 }
  0x3f   : > { %4643 = vmatmul.msk.f32.gmra.mxu3 %vm346_vm1, %v5762_v24 }
  0x40   : > { %4594 = vmatmul.msk.f32.gmra.mxu0 %vm346_vm1, %v5765_v25 }
  0x41   : > { %4627 = vmatmul.msk.f32.gmra.mxu1 %vm346_vm1, %v5768_v26 }
  0x46   : > { %4611 = vmatmul.msk.f32.gmra.mxu2 %vm346_vm1, %v5779_v27 }
  0x47   : > { %4644 = vmatmul.msk.f32.gmra.mxu3 %vm346_vm1, %v5782_v28 }
  0x48   : > { %4595 = vmatmul.msk.f32.gmra.mxu0 %vm346_vm1, %v5785_v29 }
  0x49   : > { %4628 = vmatmul.msk.f32.gmra.mxu1 %vm346_vm1, %v5788_v30 }
  0x4e   : > { %4612 = vmatmul.msk.f32.gmra.mxu2 %vm346_vm1, %v5799_v31 }
  0x4f   : > { %4645 = vmatmul.msk.f32.gmra.mxu3 %vm346_vm1, %v5802_v32 }
  0x50   : > { %4596 = vmatmul.msk.f32.gmra.mxu0 %vm346_vm1, %v5805_v33 }
  0x51   : > { %4629 = vmatmul.msk.f32.gmra.mxu1 %vm346_vm1, %v5808_v34 }
  0x56   : > { %4613 = vmatmul.msk.f32.gmra.mxu2 %vm346_vm1, %v5819_v35 }
  0x57   : > { %4646 = vmatmul.msk.f32.gmra.mxu3 %vm346_vm1, %v5822_v36 }
  0x58   : > { %4597 = vmatmul.msk.f32.gmra.mxu0 %vm346_vm1, %v5825_v37 }
  0x59   : > { %4630 = vmatmul.msk.f32.gmra.mxu1 %vm346_vm1, %v5828_v38 }
  0x5e   : > { %4614 = vmatmul.msk.f32.gmra.mxu2 %vm346_vm1, %v5839_v39 }
  0x5f   : > { %4647 = vmatmul.msk.f32.gmra.mxu3 %vm346_vm1, %v5842_v40 }
  0x60   : > { %4598 = vmatmul.msk.f32.gmra.mxu0 %vm346_vm1, %v5845_v41 }
  0x61   : > { %4631 = vmatmul.msk.f32.gmra.mxu1 %vm346_vm1, %v5848_v42 }
  0x66   : > { %4615 = vmatmul.msk.f32.gmra.mxu2 %vm346_vm1, %v5859_v43 }
  0x67   : > { %4648 = vmatmul.msk.f32.gmra.mxu3 %vm346_vm1, %v5862_v44 }
  0x68   : > { %4599 = vmatmul.msk.f32.gmra.mxu0 %vm346_vm1, %v5865_v45 }
  0x69   : > { %4632 = vmatmul.msk.f32.gmra.mxu1 %vm346_vm1, %v5868_v46 }
  0x6e   : > { %4616 = vmatmul.msk.f32.gmra.mxu2 %vm346_vm1, %v5879_v47 }
  0x6f   : > { %4649 = vmatmul.msk.f32.gmra.mxu3 %vm346_vm1, %v5882_v48 }
  0x70   : > { %4600 = vmatmul.msk.f32.gmra.mxu0 %vm346_vm1, %v5885_v49 }
  0x71   : > { %4633 = vmatmul.msk.f32.gmra.mxu1 %vm346_vm1, %v5888_v50 }
  0x76   : > { %4617 = vmatmul.msk.f32.gmra.mxu2 %vm346_vm1, %v5899_v51 }
  0x77   : > { %4650 = vmatmul.msk.f32.gmra.mxu3 %vm346_vm1, %v5902_v52  ;;  %v247_v52 = vld [vmem:[%s5656_s11 + $0x8] sm:$0xff] }
  0x78   : > { %4601 = vmatmul.msk.f32.gmra.mxu0 %vm346_vm1, %v5905_v53 }
  0x79   : > { %4634 = vmatmul.msk.f32.gmra.mxu1 %vm346_vm1, %v5908_v54 }
  0x7e   : > { %4618 = vmatmul.msk.f32.gmra.mxu2 %vm346_vm1, %v5924_v56  ;;  %v1094_v56 = vld [vmem:[%s5654_s10 + $0x1] sm:$0xff] }
  0x7f   : > { %4651 = vmatmul.msk.f32.gmra.mxu3 %vm346_vm1, %v5927_v57 }
  0x80   : > { %4602 = vmatmul.msk.f32.gmra.mxu0 %vm346_vm1, %v5930_v58 }
  0x81   : > { %4635 = vmatmul.msk.f32.gmra.mxu1 %vm346_vm1, %v5933_v59 }
  0x86   : > { %4619 = vmatmul.msk.f32.gmra.mxu2 %vm346_vm1, %v5949_v61 }
  0x87   : > { %4652 = vmatmul.msk.f32.gmra.mxu3 %vm346_vm1, %v5952_v62  ;;  %v246_v62 = vld [vmem:[%s5656_s11] sm:$0xff] }
  0x88   : > { %4603 = vmatmul.msk.f32.gmra.mxu0 %vm346_vm1, %v5955_v63 }
  0x89   : > { %4636 = vmatmul.msk.f32.gmra.mxu1 %vm346_vm1, %v5958_v0 }
  0x8e   : > { %4620 = vmatmul.msk.f32.gmra.mxu2 %vm346_vm1, %v5969_v1 }
  0x8f   : > { %4653 = vmatmul.msk.f32.gmra.mxu3 %vm346_vm1, %v5972_v2 }
  0x90   : > { %4604 = vmatmul.msk.f32.gmra.mxu0 %vm346_vm1, %v5975_v55 }
  0x91   : > { %4637 = vmatmul.msk.f32.gmra.mxu1 %vm346_vm1, %v5978_v60 }
  0x95   : > { %v5989_v61 = vpop.f32.mrf.mxu0 }
  0x96   : > { %v5991_v57 = vpop.f32.mrf.mxu1  ;;  %4655 = vmatmul.msk.f32.vlgmr.msrb.gmra.mxu2 %vm346_vm1, %v246_v62  ;;  %v1095_v62 = vld [vmem:[%s5654_s10 + $0x9] sm:$0xff] }
  0x97   : > { %4688 = vmatmul.msk.f32.vlgmr.msrb.gmra.mxu3 %vm346_vm1, %v5665_v5 }
  0x98   : > { %4722 = vmatmul.msk.f32.vlgmr.msrb.gmra.mxu0 %vm346_vm1, %v5672_v6 }
  0x99   : > { %4755 = vmatmul.msk.f32.vlgmr.msrb.gmra.mxu1 %vm346_vm1, %v1094_v56  ;;  %v6000_v2 = vpop.f32.mrf.mxu2  ;;  %v6021_v56 = vld [vmem:[%s5656_s11 + $0x18] sm:$0xff] }
  0x9a   : > { %8319 = vst [vmem:[#allocation12_spill] sm:$0xff] %v6000_v2  ;;  %v6002_v1 = vpop.f32.mrf.mxu3 }
  0x9b   : > { %8320 = vst [vmem:[#allocation13_spill] sm:$0xff] %v6002_v1 }
  0x9c   : > { %8323 = vst [vmem:[#allocation16_spill] sm:$0xff] %v6021_v56 }
  0x9d   : > { %v6005_v51 = vpop.f32.mrf.mxu0 }
  0x9e   : > { %v6007_v48 = vpop.f32.mrf.mxu1  ;;  %4656 = vmatmul.msk.f32.gmra.mxu2 %vm346_vm1, %v247_v52  ;;  %v1096_v52 = vld [vmem:[%s5654_s10 + $0x19] sm:$0xff] }
  0x9f   : > { %4689 = vmatmul.msk.f32.gmra.mxu3 %vm346_vm1, %v5685_v9 }
  0xa0   : > { %4723 = vmatmul.msk.f32.gmra.mxu0 %vm346_vm1, %v5688_v10 }
  0xa1   : > { %4756 = vmatmul.msk.f32.gmra.mxu1 %vm346_vm1, %v1095_v62  ;;  %v6016_v5 = vpop.f32.mrf.mxu2  ;;  %v6040_v62 = vld [vmem:[%s5656_s11 + $0x20] sm:$0xff] }
  0xa2   : > { %8321 = vst [vmem:[#allocation14_spill] sm:$0xff] %v6016_v5  ;;  %v6018_v6 = vpop.f32.mrf.mxu3 }
  0xa3   : > { %8322 = vst [vmem:[#allocation15_spill] sm:$0xff] %v6018_v6 }
  0xa4   : > { %8326 = vst [vmem:[#allocation19_spill] sm:$0xff] %v6040_v62 }
  0xa5   : > { %v6023_v1 = vpop.f32.mrf.mxu0 }
  0xa6   : > { %v6025_v2 = vpop.f32.mrf.mxu1  ;;  %4657 = vmatmul.msk.f32.gmra.mxu2 %vm346_vm1, %v6021_v56  ;;  %v1097_v56 = vld [vmem:[%s5654_s10 + $0x21] sm:$0xff] }
  0xa7   : > { %4690 = vmatmul.msk.f32.gmra.mxu3 %vm346_vm1, %v5705_v13 }
  0xa8   : > { %4724 = vmatmul.msk.f32.gmra.mxu0 %vm346_vm1, %v5708_v14 }
  0xa9   : > { %4757 = vmatmul.msk.f32.gmra.mxu1 %vm346_vm1, %v1096_v52  ;;  %v6035_v9 = vpop.f32.mrf.mxu2 }
  0xaa   : > { %8324 = vst [vmem:[#allocation17_spill] sm:$0xff] %v6035_v9  ;;  %v6037_v10 = vpop.f32.mrf.mxu3 }
  0xab   : > { %8325 = vst [vmem:[#allocation18_spill] sm:$0xff] %v6037_v10  ;;  %v6059_v10 = vld [vmem:[%s5656_s11 + $0x30] sm:$0xff] }
  0xac   : > { %8329 = vst [vmem:[#allocation22_spill] sm:$0xff] %v6059_v10 }
  0xad   : > { %v6042_v6 = vpop.f32.mrf.mxu0 }
  0xae   : > { %v6044_v5 = vpop.f32.mrf.mxu1  ;;  %4658 = vmatmul.msk.f32.gmra.mxu2 %vm346_vm1, %v6040_v62  ;;  %v1098_v62 = vld [vmem:[%s5654_s10 + $0x31] sm:$0xff] }
  0xaf   : > { %4691 = vmatmul.msk.f32.gmra.mxu3 %vm346_vm1, %v5725_v17 }
  0xb0   : > { %4725 = vmatmul.msk.f32.gmra.mxu0 %vm346_vm1, %v5728_v18 }
  0xb1   : > { %4758 = vmatmul.msk.f32.gmra.mxu1 %vm346_vm1, %v1097_v56  ;;  %v6054_v14 = vpop.f32.mrf.mxu2  ;;  %v6078_v56 = vld [vmem:[%s5656_s11 + $0x38] sm:$0xff] }
  0xb2   : > { %8327 = vst [vmem:[#allocation20_spill] sm:$0xff] %v6054_v14  ;;  %v6056_v52 = vpop.f32.mrf.mxu3 }
  0xb3   : > { %8328 = vst [vmem:[#allocation21_spill] sm:$0xff] %v6056_v52 }
  0xb4   : > { %8332 = vst [vmem:[#allocation25_spill] sm:$0xff] %v6078_v56 }
  0xb5   : > { %v6061_v9 = vpop.f32.mrf.mxu0 }
  0xb6   : > { %v6063_v13 = vpop.f32.mrf.mxu1  ;;  %4659 = vmatmul.msk.f32.gmra.mxu2 %vm346_vm1, %v6059_v10  ;;  %v1099_v10 = vld [vmem:[%s5654_s10 + $0x39] sm:$0xff] }
  0xb7   : > { %4692 = vmatmul.msk.f32.gmra.mxu3 %vm346_vm1, %v5745_v21 }
  0xb8   : > { %4726 = vmatmul.msk.f32.gmra.mxu0 %vm346_vm1, %v5748_v22 }
  0xb9   : > { %4759 = vmatmul.msk.f32.gmra.mxu1 %vm346_vm1, %v1098_v62  ;;  %v6073_v17 = vpop.f32.mrf.mxu2  ;;  %v6097_v62 = vld [vmem:[%s5656_s11 + $0x48] sm:$0xff] }
  0xba   : > { %8330 = vst [vmem:[#allocation23_spill] sm:$0xff] %v6073_v17  ;;  %v6075_v18 = vpop.f32.mrf.mxu3 }
  0xbb   : > { %8331 = vst [vmem:[#allocation24_spill] sm:$0xff] %v6075_v18 }
  0xbc   : > { %8335 = vst [vmem:[#allocation28_spill] sm:$0xff] %v6097_v62 }
  0xbd   : > { %v6080_v52 = vpop.f32.mrf.mxu0 }
  0xbe   : > { %v6082_v14 = vpop.f32.mrf.mxu1  ;;  %4660 = vmatmul.msk.f32.gmra.mxu2 %vm346_vm1, %v6078_v56  ;;  %v1100_v56 = vld [vmem:[%s5654_s10 + $0x49] sm:$0xff] }
  0xbf   : > { %4693 = vmatmul.msk.f32.gmra.mxu3 %vm346_vm1, %v5765_v25 }
  0xc0   : > { %4727 = vmatmul.msk.f32.gmra.mxu0 %vm346_vm1, %v5768_v26 }
  0xc1   : > { %4760 = vmatmul.msk.f32.gmra.mxu1 %vm346_vm1, %v1099_v10  ;;  %v6092_v21 = vpop.f32.mrf.mxu2  ;;  %v6116_v10 = vld [vmem:[%s5656_s11 + $0x50] sm:$0xff] }
  0xc2   : > { %8333 = vst [vmem:[#allocation26_spill] sm:$0xff] %v6092_v21  ;;  %v6094_v22 = vpop.f32.mrf.mxu3 }
  0xc3   : > { %8334 = vst [vmem:[#allocation27_spill] sm:$0xff] %v6094_v22 }
  0xc4   : > { %8338 = vst [vmem:[#allocation31_spill] sm:$0xff] %v6116_v10 }
  0xc5   : > { %v6099_v18 = vpop.f32.mrf.mxu0 }
  0xc6   : > { %v6101_v17 = vpop.f32.mrf.mxu1  ;;  %4661 = vmatmul.msk.f32.gmra.mxu2 %vm346_vm1, %v6097_v62  ;;  %v1101_v62 = vld [vmem:[%s5654_s10 + $0x51] sm:$0xff] }
  0xc7   : > { %4694 = vmatmul.msk.f32.gmra.mxu3 %vm346_vm1, %v5785_v29 }
  0xc8   : > { %4728 = vmatmul.msk.f32.gmra.mxu0 %vm346_vm1, %v5788_v30 }
  0xc9   : > { %4761 = vmatmul.msk.f32.gmra.mxu1 %vm346_vm1, %v1100_v56  ;;  %v6111_v25 = vpop.f32.mrf.mxu2  ;;  %v6135_v56 = vld [vmem:[%s5656_s11 + $0x60] sm:$0xff] }
  0xca   : > { %8336 = vst [vmem:[#allocation29_spill] sm:$0xff] %v6111_v25  ;;  %v6113_v26 = vpop.f32.mrf.mxu3 }
  0xcb   : > { %8337 = vst [vmem:[#allocation30_spill] sm:$0xff] %v6113_v26 }
  0xcc   : > { %8341 = vst [vmem:[#allocation34_spill] sm:$0xff] %v6135_v56 }
  0xcd   : > { %v6118_v22 = vpop.f32.mrf.mxu0 }
  0xce   : > { %v6120_v21 = vpop.f32.mrf.mxu1  ;;  %4662 = vmatmul.msk.f32.gmra.mxu2 %vm346_vm1, %v6116_v10  ;;  %v1102_v10 = vld [vmem:[%s5654_s10 + $0x61] sm:$0xff] }
  0xcf   : > { %4695 = vmatmul.msk.f32.gmra.mxu3 %vm346_vm1, %v5805_v33 }
  0xd0   : > { %4729 = vmatmul.msk.f32.gmra.mxu0 %vm346_vm1, %v5808_v34 }
  0xd1   : > { %4762 = vmatmul.msk.f32.gmra.mxu1 %vm346_vm1, %v1101_v62  ;;  %v6130_v29 = vpop.f32.mrf.mxu2  ;;  %v6154_v62 = vld [vmem:[%s5656_s11 + $0x68] sm:$0xff] }
  0xd2   : > { %8339 = vst [vmem:[#allocation32_spill] sm:$0xff] %v6130_v29  ;;  %v6132_v30 = vpop.f32.mrf.mxu3 }
  0xd3   : > { %8340 = vst [vmem:[#allocation33_spill] sm:$0xff] %v6132_v30 }
  0xd4   : > { %8344 = vst [vmem:[#allocation37_spill] sm:$0xff] %v6154_v62 }
  0xd5   : > { %v6137_v26 = vpop.f32.mrf.mxu0 }
  0xd6   : > { %v6139_v25 = vpop.f32.mrf.mxu1  ;;  %4663 = vmatmul.msk.f32.gmra.mxu2 %vm346_vm1, %v6135_v56  ;;  %v1103_v56 = vld [vmem:[%s5654_s10 + $0x69] sm:$0xff] }
  0xd7   : > { %4696 = vmatmul.msk.f32.gmra.mxu3 %vm346_vm1, %v5825_v37 }
  0xd8   : > { %4730 = vmatmul.msk.f32.gmra.mxu0 %vm346_vm1, %v5828_v38 }
  0xd9   : > { %4763 = vmatmul.msk.f32.gmra.mxu1 %vm346_vm1, %v1102_v10  ;;  %v6149_v33 = vpop.f32.mrf.mxu2  ;;  %v6173_v10 = vld [vmem:[%s5656_s11 + $0x78] sm:$0xff] }
  0xda   : > { %8342 = vst [vmem:[#allocation35_spill] sm:$0xff] %v6149_v33  ;;  %v6151_v34 = vpop.f32.mrf.mxu3 }
  0xdb   : > { %8343 = vst [vmem:[#allocation36_spill] sm:$0xff] %v6151_v34 }
  0xdc   : > { %8347 = vst [vmem:[#allocation40_spill] sm:$0xff] %v6173_v10 }
  0xdd   : > { %v6156_v30 = vpop.f32.mrf.mxu0 }
  0xde   : > { %v6158_v29 = vpop.f32.mrf.mxu1  ;;  %4664 = vmatmul.msk.f32.gmra.mxu2 %vm346_vm1, %v6154_v62  ;;  %v1104_v62 = vld [vmem:[%s5654_s10 + $0x79] sm:$0xff] }
  0xdf   : > { %4697 = vmatmul.msk.f32.gmra.mxu3 %vm346_vm1, %v5845_v41 }
  0xe0   : > { %4731 = vmatmul.msk.f32.gmra.mxu0 %vm346_vm1, %v5848_v42 }
  0xe1   : > { %4764 = vmatmul.msk.f32.gmra.mxu1 %vm346_vm1, %v1103_v56  ;;  %v6168_v37 = vpop.f32.mrf.mxu2  ;;  %v6192_v56 = vld [vmem:[%s5656_s11 + $0x80] sm:$0xff] }
  0xe2   : > { %8345 = vst [vmem:[#allocation38_spill] sm:$0xff] %v6168_v37  ;;  %v6170_v38 = vpop.f32.mrf.mxu3 }
  0xe3   : > { %8346 = vst [vmem:[#allocation39_spill] sm:$0xff] %v6170_v38 }
  0xe4   : > { %8350 = vst [vmem:[#allocation43_spill] sm:$0xff] %v6192_v56 }
  0xe5   : > { %v6175_v34 = vpop.f32.mrf.mxu0 }
  0xe6   : > { %v6177_v33 = vpop.f32.mrf.mxu1  ;;  %4665 = vmatmul.msk.f32.gmra.mxu2 %vm346_vm1, %v6173_v10  ;;  %v1105_v10 = vld [vmem:[%s5654_s10 + $0x81] sm:$0xff] }
  0xe7   : > { %4698 = vmatmul.msk.f32.gmra.mxu3 %vm346_vm1, %v5865_v45 }
  0xe8   : > { %4732 = vmatmul.msk.f32.gmra.mxu0 %vm346_vm1, %v5868_v46 }
  0xe9   : > { %4765 = vmatmul.msk.f32.gmra.mxu1 %vm346_vm1, %v1104_v62  ;;  %v6187_v41 = vpop.f32.mrf.mxu2  ;;  %v6211_v62 = vld [vmem:[%s5656_s11 + $0x90] sm:$0xff] }
  0xea   : > { %8348 = vst [vmem:[#allocation41_spill] sm:$0xff] %v6187_v41  ;;  %v6189_v42 = vpop.f32.mrf.mxu3 }
  0xeb   : > { %8349 = vst [vmem:[#allocation42_spill] sm:$0xff] %v6189_v42 }
  0xec   : > { %8353 = vst [vmem:[#allocation46_spill] sm:$0xff] %v6211_v62 }
  0xed   : > { %v6194_v38 = vpop.f32.mrf.mxu0 }
  0xee   : > { %v6196_v37 = vpop.f32.mrf.mxu1  ;;  %4666 = vmatmul.msk.f32.gmra.mxu2 %vm346_vm1, %v6192_v56  ;;  %v1106_v56 = vld [vmem:[%s5654_s10 + $0x91] sm:$0xff] }
  0xef   : > { %4699 = vmatmul.msk.f32.gmra.mxu3 %vm346_vm1, %v5885_v49 }
  0xf0   : > { %4733 = vmatmul.msk.f32.gmra.mxu0 %vm346_vm1, %v5888_v50 }
  0xf1   : > { %4766 = vmatmul.msk.f32.gmra.mxu1 %vm346_vm1, %v1105_v10  ;;  %v6206_v45 = vpop.f32.mrf.mxu2  ;;  %v6230_v10 = vld [vmem:[%s5656_s11 + $0x98] sm:$0xff] }
  0xf2   : > { %8351 = vst [vmem:[#allocation44_spill] sm:$0xff] %v6206_v45  ;;  %v6208_v46 = vpop.f32.mrf.mxu3 }
  0xf3   : > { %8352 = vst [vmem:[#allocation45_spill] sm:$0xff] %v6208_v46 }
  0xf4   : > { %8356 = vst [vmem:[#allocation49_spill] sm:$0xff] %v6230_v10 }
  0xf5   : > { %v6213_v42 = vpop.f32.mrf.mxu0 }
  0xf6   : > { %v6215_v41 = vpop.f32.mrf.mxu1  ;;  %4667 = vmatmul.msk.f32.gmra.mxu2 %vm346_vm1, %v6211_v62  ;;  %v1107_v62 = vld [vmem:[%s5654_s10 + $0x99] sm:$0xff] }
  0xf7   : > { %4700 = vmatmul.msk.f32.gmra.mxu3 %vm346_vm1, %v5905_v53 }
  0xf8   : > { %4734 = vmatmul.msk.f32.gmra.mxu0 %vm346_vm1, %v5908_v54 }
  0xf9   : > { %4767 = vmatmul.msk.f32.gmra.mxu1 %vm346_vm1, %v1106_v56  ;;  %v6225_v49 = vpop.f32.mrf.mxu2  ;;  %v6249_v56 = vld [vmem:[%s5656_s11 + $0xa8] sm:$0xff] }
  0xfa   : > { %8354 = vst [vmem:[#allocation47_spill] sm:$0xff] %v6225_v49  ;;  %v6227_v50 = vpop.f32.mrf.mxu3 }
  0xfb   : > { %8355 = vst [vmem:[#allocation48_spill] sm:$0xff] %v6227_v50 }
  0xfc   : > { %8359 = vst [vmem:[#allocation52_spill] sm:$0xff] %v6249_v56 }
  0xfd   : > { %v6232_v46 = vpop.f32.mrf.mxu0 }
  0xfe   : > { %v6234_v45 = vpop.f32.mrf.mxu1  ;;  %4668 = vmatmul.msk.f32.gmra.mxu2 %vm346_vm1, %v6230_v10  ;;  %v1108_v10 = vld [vmem:[%s5654_s10 + $0xa9] sm:$0xff] }
  0xff   : > { %4701 = vmatmul.msk.f32.gmra.mxu3 %vm346_vm1, %v5930_v58 }
 0x100   : > { %4735 = vmatmul.msk.f32.gmra.mxu0 %vm346_vm1, %v5933_v59 }
 0x101   : > { %4768 = vmatmul.msk.f32.gmra.mxu1 %vm346_vm1, %v1107_v62  ;;  %v6244_v53 = vpop.f32.mrf.mxu2  ;;  %v6268_v62 = vld [vmem:[%s5656_s11 + $0xb0] sm:$0xff] }
 0x102   : > { %8357 = vst [vmem:[#allocation50_spill] sm:$0xff] %v6244_v53  ;;  %v6246_v54 = vpop.f32.mrf.mxu3 }
 0x103   : > { %8358 = vst [vmem:[#allocation51_spill] sm:$0xff] %v6246_v54 }
 0x104   : > { %8363 = vst [vmem:[#allocation56_spill] sm:$0xff] %v6268_v62 }
 0x105   : > { %v6251_v50 = vpop.f32.mrf.mxu0 }
 0x106   : > { %v6253_v49 = vpop.f32.mrf.mxu1  ;;  %4669 = vmatmul.msk.f32.gmra.mxu2 %vm346_vm1, %v6249_v56  ;;  %v1109_v56 = vld [vmem:[%s5654_s10 + $0xb1] sm:$0xff] }
 0x107   : > { %8360 = vst [vmem:[#allocation53_spill] sm:$0xff] %v6253_v49  ;;  %4702 = vmatmul.msk.f32.gmra.mxu3 %vm346_vm1, %v5955_v63  ;;  %v1111_v49 = vld [vmem:[%s5654_s10 + $0xc9] sm:$0xff] }
 0x108   : > { %4736 = vmatmul.msk.f32.gmra.mxu0 %vm346_vm1, %v5958_v0 }
 0x109   : > { %4769 = vmatmul.msk.f32.gmra.mxu1 %vm346_vm1, %v1108_v10  ;;  %v6263_v58 = vpop.f32.mrf.mxu2  ;;  %v6287_v10 = vld [vmem:[%s5656_s11 + $0xc0] sm:$0xff] }
 0x10a   : > { %8361 = vst [vmem:[#allocation54_spill] sm:$0xff] %v6263_v58  ;;  %v6265_v59 = vpop.f32.mrf.mxu3 }
 0x10b   : > { %8362 = vst [vmem:[#allocation55_spill] sm:$0xff] %v6265_v59 }
 0x10c   : > { %8368 = vst [vmem:[#allocation61_spill] sm:$0xff] %v6287_v10 }
 0x10d   : > { %v6270_v54 = vpop.f32.mrf.mxu0 }
 0x10e   : > { %8364 = vst [vmem:[#allocation57_spill] sm:$0xff] %v6270_v54  ;;  %v6272_v53 = vpop.f32.mrf.mxu1  ;;  %4670 = vmatmul.msk.f32.gmra.mxu2 %vm346_vm1, %v6268_v62 }
 0x10f   : > { %8365 = vst [vmem:[#allocation58_spill] sm:$0xff] %v6272_v53  ;;  %4703 = vmatmul.msk.f32.gmra.mxu3 %vm346_vm1, %v5975_v55  ;;  %v1110_v53 = vld [vmem:[%s5654_s10 + $0xc1] sm:$0xff] }
 0x110   : > { %4737 = vmatmul.msk.f32.gmra.mxu0 %vm346_vm1, %v5978_v60 }
 0x111   : > { %4770 = vmatmul.msk.f32.gmra.mxu1 %vm346_vm1, %v1109_v56  ;;  %v6282_v63 = vpop.f32.mrf.mxu2 }
 0x112   : > { %8366 = vst [vmem:[#allocation59_spill] sm:$0xff] %v6282_v63  ;;  %v6284_v0 = vpop.f32.mrf.mxu3  ;;  %v6300_v63 = vld [vmem:[%s5656_s11 + $0xc8] sm:$0xff] }
 0x113   : > { %8367 = vst [vmem:[#allocation60_spill] sm:$0xff] %v6284_v0 }
 0x115   : > { %v1148_v59 = vpop.f32.mrf.mxu0 }
 0x116   : > { %v1357_v58 = vpop.f32.mrf.mxu1  ;;  %4671 = vmatmul.msk.f32.gmra.mxu2 %vm346_vm1, %v6287_v10 }
 0x117   : > { %4704 = vmatmul.msk.f32.gmra.mxu3 %vm346_vm1, %v5659_v3 }
 0x118   : > { %4738 = vmatmul.msk.f32.gmra.mxu0 %vm346_vm1, %v5662_v4 }
 0x119   : > { %4771 = vmatmul.msk.f32.gmra.mxu1 %vm346_vm1, %v1110_v53  ;;  %v885_v55 = vpop.f32.mrf.mxu2 }
 0x11a   : > { %v998_v60 = vpop.f32.mrf.mxu3  ;;  %v886_v56 = vadd.f32 %v885_v55, %v5989_v61 }
 0x11b   : > { %v999_v0 = vadd.f32 %v998_v60, %v5991_v57  ;;  %v1112_v60 = vld [vmem:[%s5654_s10 + $0xd9] sm:$0xff] }
 0x11c   : > { %v6302_v62 = vadd.f32 %v1148_v59, %v886_v56 }
 0x11d   : > { %v6304_v10 = vadd.f32 %v1357_v58, %v999_v0  ;;  %v1151_v54 = vpop.f32.mrf.mxu0  ;;  %v6317_v58 = vld [vmem:[%s5656_s11 + $0xd8] sm:$0xff] }
 0x11e   : > { %v1360_v3 = vpop.f32.mrf.mxu1  ;;  %4672 = vmatmul.msk.f32.gmra.mxu2 %vm346_vm1, %v6300_v63 }
 0x11f   : > { %4705 = vmatmul.msk.f32.gmra.mxu3 %vm346_vm1, %v5679_v7 }
 0x120   : > { %4739 = vmatmul.msk.f32.gmra.mxu0 %vm346_vm1, %v5682_v8 }
 0x121   : > { %4772 = vmatmul.msk.f32.gmra.mxu1 %vm346_vm1, %v1111_v49  ;;  %v888_v4 = vpop.f32.mrf.mxu2 }
 0x122   : > { %v1001_v57 = vpop.f32.mrf.mxu3  ;;  %v889_v61 = vadd.f32 %v888_v4, %v6005_v51 }
 0x123   : > { %v1002_v53 = vadd.f32 %v1001_v57, %v6007_v48  ;;  %v1113_v57 = vld [vmem:[%s5654_s10 + $0xe1] sm:$0xff] }
 0x124   : > { %v6319_v59 = vadd.f32 %v1151_v54, %v889_v61  ;;  %v6334_v54 = vld [vmem:[%s5656_s11 + $0xe0] sm:$0xff] }
 0x125   : > { %v6321_v0 = vadd.f32 %v1360_v3, %v1002_v53  ;;  %v1154_v55 = vpop.f32.mrf.mxu0  ;;  %v6351_v53 = vld [vmem:[%s5656_s11 + $0xf0] sm:$0xff] }
 0x126   : > { %v1363_v7 = vpop.f32.mrf.mxu1  ;;  %4673 = vmatmul.msk.f32.gmra.mxu2 %vm346_vm1, %v6317_v58 }
 0x127   : > { %4706 = vmatmul.msk.f32.gmra.mxu3 %vm346_vm1, %v5699_v11 }
 0x128   : > { %4740 = vmatmul.msk.f32.gmra.mxu0 %vm346_vm1, %v5702_v12 }
 0x129   : > { %4773 = vmatmul.msk.f32.gmra.mxu1 %vm346_vm1, %v1112_v60  ;;  %v891_v8 = vpop.f32.mrf.mxu2 }
 0x12a   : > { %v1004_v48 = vpop.f32.mrf.mxu3  ;;  %v892_v51 = vadd.f32 %v891_v8, %v6023_v1  ;;  %v1114_v8 = vld [vmem:[%s5654_s10 + $0xf1] sm:$0xff] }
 0x12b   : > { %v1005_v49 = vadd.f32 %v1004_v48, %v6025_v2 }
 0x12c   : > { %v6336_v56 = vadd.f32 %v1154_v55, %v892_v51  ;;  %v6368_v51 = vld [vmem:[%s5656_s11 + $0xf8] sm:$0xff] }
 0x12d   : > { %v6338_v3 = vadd.f32 %v1363_v7, %v1005_v49  ;;  %v1157_v4 = vpop.f32.mrf.mxu0 }
 0x12e   : > { %v1366_v11 = vpop.f32.mrf.mxu1  ;;  %4674 = vmatmul.msk.f32.gmra.mxu2 %vm346_vm1, %v6334_v54 }
 0x12f   : > { %4707 = vmatmul.msk.f32.gmra.mxu3 %vm346_vm1, %v5719_v15 }
 0x130   : > { %4741 = vmatmul.msk.f32.gmra.mxu0 %vm346_vm1, %v5722_v16 }
 0x131   : > { %4774 = vmatmul.msk.f32.gmra.mxu1 %vm346_vm1, %v1113_v57  ;;  %v894_v12 = vpop.f32.mrf.mxu2  ;;  %v1115_v57 = vld [vmem:[%s5654_s10 + $0xf9] sm:$0xff] }
 0x132   : > { %v1007_v1 = vpop.f32.mrf.mxu3  ;;  %v895_v2 = vadd.f32 %v894_v12, %v6042_v6 }
 0x133   : > { %v1008_v61 = vadd.f32 %v1007_v1, %v6044_v5  ;;  %v6385_v1 = vld [vmem:[%s5656_s11 + $0x108] sm:$0xff] }
 0x134   : > { %v6353_v55 = vadd.f32 %v1157_v4, %v895_v2 }
 0x135   : > { %v6355_v7 = vadd.f32 %v1366_v11, %v1008_v61  ;;  %v1160_v60 = vpop.f32.mrf.mxu0 }
 0x136   : > { %v1369_v15 = vpop.f32.mrf.mxu1  ;;  %4675 = vmatmul.msk.f32.gmra.mxu2 %vm346_vm1, %v6351_v53 }
 0x137   : > { %4708 = vmatmul.msk.f32.gmra.mxu3 %vm346_vm1, %v5739_v19 }
 0x138   : > { %4742 = vmatmul.msk.f32.gmra.mxu0 %vm346_vm1, %v5742_v20 }
 0x139   : > { %4775 = vmatmul.msk.f32.gmra.mxu1 %vm346_vm1, %v1114_v8  ;;  %v897_v16 = vpop.f32.mrf.mxu2 }
 0x13a   : > { %v1010_v5 = vpop.f32.mrf.mxu3  ;;  %v898_v6 = vadd.f32 %v897_v16, %v6061_v9  ;;  %v6402_v16 = vld [vmem:[%s5656_s11 + $0x110] sm:$0xff] }
 0x13b   : > { %v1011_v48 = vadd.f32 %v1010_v5, %v6063_v13 }
 0x13c   : > { %v6370_v49 = vadd.f32 %v1160_v60, %v898_v6 }
 0x13d   : > { %v6372_v4 = vadd.f32 %v1369_v15, %v1011_v48  ;;  %v1163_v11 = vpop.f32.mrf.mxu0  ;;  %v1116_v15 = vld [vmem:[%s5654_s10 + $0x109] sm:$0xff] }
 0x13e   : > { %v1372_v19 = vpop.f32.mrf.mxu1  ;;  %4676 = vmatmul.msk.f32.gmra.mxu2 %vm346_vm1, %v6368_v51 }
 0x13f   : > { %4709 = vmatmul.msk.f32.gmra.mxu3 %vm346_vm1, %v5759_v23 }
 0x140   : > { %4743 = vmatmul.msk.f32.gmra.mxu0 %vm346_vm1, %v5762_v24 }
 0x141   : > { %4776 = vmatmul.msk.f32.gmra.mxu1 %vm346_vm1, %v1115_v57  ;;  %v900_v13 = vpop.f32.mrf.mxu2  ;;  %v6419_v57 = vld [vmem:[%s5656_s11 + $0x120] sm:$0xff] }
 0x142   : > { %v1013_v20 = vpop.f32.mrf.mxu3  ;;  %v901_v9 = vadd.f32 %v900_v13, %v6080_v52 }
 0x143   : > { %v1014_v12 = vadd.f32 %v1013_v20, %v6082_v14 }
 0x144   : > { %v6387_v2 = vadd.f32 %v1163_v11, %v901_v9  ;;  %v1117_v11 = vld [vmem:[%s5654_s10 + $0x111] sm:$0xff] }
 0x145   : > { %v6389_v61 = vadd.f32 %v1372_v19, %v1014_v12  ;;  %v1166_v60 = vpop.f32.mrf.mxu0  ;;  %v1118_v12 = vld [vmem:[%s5654_s10 + $0x121] sm:$0xff] }
 0x146   : > { %v1375_v23 = vpop.f32.mrf.mxu1  ;;  %4677 = vmatmul.msk.f32.gmra.mxu2 %vm346_vm1, %v6385_v1 }
 0x147   : > { %4710 = vmatmul.msk.f32.gmra.mxu3 %vm346_vm1, %v5779_v27 }
 0x148   : > { %4744 = vmatmul.msk.f32.gmra.mxu0 %vm346_vm1, %v5782_v28 }
 0x149   : > { %4777 = vmatmul.msk.f32.gmra.mxu1 %vm346_vm1, %v1116_v15  ;;  %v903_v24 = vpop.f32.mrf.mxu2 }
 0x14a   : > { %v1016_v14 = vpop.f32.mrf.mxu3  ;;  %v904_v52 = vadd.f32 %v903_v24, %v6099_v18 }
 0x14b   : > { %v1017_v8 = vadd.f32 %v1016_v14, %v6101_v17 }
 0x14c   : > { %v6404_v5 = vadd.f32 %v1166_v60, %v904_v52  ;;  %v1119_v52 = vld [vmem:[%s5654_s10 + $0x129] sm:$0xff] }
 0x14d   : > { %v6406_v6 = vadd.f32 %v1375_v23, %v1017_v8  ;;  %v1169_v48 = vpop.f32.mrf.mxu0  ;;  %v6436_v23 = vld [vmem:[%s5656_s11 + $0x128] sm:$0xff] }
 0x14e   : > { %v1378_v27 = vpop.f32.mrf.mxu1  ;;  %4678 = vmatmul.msk.f32.gmra.mxu2 %vm346_vm1, %v6402_v16 }
 0x14f   : > { %4711 = vmatmul.msk.f32.gmra.mxu3 %vm346_vm1, %v5799_v31 }
 0x150   : > { %4745 = vmatmul.msk.f32.gmra.mxu0 %vm346_vm1, %v5802_v32 }
 0x151   : > { %4778 = vmatmul.msk.f32.gmra.mxu1 %vm346_vm1, %v1117_v11  ;;  %v906_v28 = vpop.f32.mrf.mxu2 }
 0x152   : > { %v1019_v17 = vpop.f32.mrf.mxu3  ;;  %v907_v18 = vadd.f32 %v906_v28, %v6118_v22 }
 0x153   : > { %v1020_v19 = vadd.f32 %v1019_v17, %v6120_v21  ;;  %v1120_v17 = vld [vmem:[%s5654_s10 + $0x139] sm:$0xff] }
 0x154   : > { %v6421_v13 = vadd.f32 %v1169_v48, %v907_v18  ;;  %v6453_v48 = vld [vmem:[%s5656_s11 + $0x138] sm:$0xff] }
 0x155   : > { %v6423_v20 = vadd.f32 %v1378_v27, %v1020_v19  ;;  %v1172_v9 = vpop.f32.mrf.mxu0  ;;  %v6470_v19 = vld [vmem:[%s5656_s11 + $0x140] sm:$0xff] }
 0x156   : > { %v1381_v31 = vpop.f32.mrf.mxu1  ;;  %4679 = vmatmul.msk.f32.gmra.mxu2 %vm346_vm1, %v6419_v57 }
 0x157   : > { %4712 = vmatmul.msk.f32.gmra.mxu3 %vm346_vm1, %v5819_v35 }
 0x158   : > { %4746 = vmatmul.msk.f32.gmra.mxu0 %vm346_vm1, %v5822_v36 }
 0x159   : > { %4779 = vmatmul.msk.f32.gmra.mxu1 %vm346_vm1, %v1118_v12  ;;  %v909_v32 = vpop.f32.mrf.mxu2 }
 0x15a   : > { %v1022_v21 = vpop.f32.mrf.mxu3  ;;  %v910_v22 = vadd.f32 %v909_v32, %v6137_v26  ;;  %v1121_v32 = vld [vmem:[%s5654_s10 + $0x141] sm:$0xff] }
 0x15b   : > { %v1023_v60 = vadd.f32 %v1022_v21, %v6139_v25 }
 0x15c   : > { %v6438_v15 = vadd.f32 %v1172_v9, %v910_v22 }
 0x15d   : > { %v6440_v24 = vadd.f32 %v1381_v31, %v1023_v60  ;;  %v1175_v14 = vpop.f32.mrf.mxu0  ;;  %v6487_v60 = vld [vmem:[%s5656_s11 + $0x150] sm:$0xff] }
 0x15e   : > { %v1384_v35 = vpop.f32.mrf.mxu1  ;;  %4680 = vmatmul.msk.f32.gmra.mxu2 %vm346_vm1, %v6436_v23 }
 0x15f   : > { %4713 = vmatmul.msk.f32.gmra.mxu3 %vm346_vm1, %v5839_v39 }
 0x160   : > { %4747 = vmatmul.msk.f32.gmra.mxu0 %vm346_vm1, %v5842_v40 }
 0x161   : > { %4780 = vmatmul.msk.f32.gmra.mxu1 %vm346_vm1, %v1119_v52  ;;  %v912_v36 = vpop.f32.mrf.mxu2 }
 0x162   : > { %v1025_v25 = vpop.f32.mrf.mxu3  ;;  %v913_v26 = vadd.f32 %v912_v36, %v6156_v30  ;;  %v1122_v36 = vld [vmem:[%s5654_s10 + $0x151] sm:$0xff] }
 0x163   : > { %v1026_v8 = vadd.f32 %v1025_v25, %v6158_v29  ;;  %v8370_v25 = vld [vmem:[#allocation4_spill] sm:$0xff] }
 0x164   : > { %v6455_v27 = vadd.f32 %v1175_v14, %v913_v26 }
 0x165   : > { %v6457_v11 = vadd.f32 %v1384_v35, %v1026_v8  ;;  %v1178_v28 = vpop.f32.mrf.mxu0 }
 0x166   : > { %v1387_v39 = vpop.f32.mrf.mxu1  ;;  %4681 = vmatmul.msk.f32.gmra.mxu2 %vm346_vm1, %v6453_v48 }
 0x167   : > { %4714 = vmatmul.msk.f32.gmra.mxu3 %vm346_vm1, %v5859_v43 }
 0x168   : > { %4748 = vmatmul.msk.f32.gmra.mxu0 %vm346_vm1, %v5862_v44  ;;  %v8369_v44 = vld [vmem:[#allocation3_spill] sm:$0xff] }
 0x169   : > { %4781 = vmatmul.msk.f32.gmra.mxu1 %vm346_vm1, %v1120_v17  ;;  %v915_v40 = vpop.f32.mrf.mxu2  ;;  %v6509_v17 = vld [vmem:[%s5656_s11 + $0x158] sm:$0xff] }
 0x16a   : > { %v1028_v29 = vpop.f32.mrf.mxu3  ;;  %v916_v30 = vadd.f32 %v915_v40, %v6175_v34 }
 0x16b   : > { %v1029_v18 = vadd.f32 %v1028_v29, %v6177_v33 }
 0x16c   : > { %v6472_v9 = vadd.f32 %v1178_v28, %v916_v30 }
 0x16d   : > { %v6474_v31 = vadd.f32 %v1387_v39, %v1029_v18  ;;  %v1181_v12 = vpop.f32.mrf.mxu0 }
 0x16e   : > { %v1390_v43 = vpop.f32.mrf.mxu1  ;;  %4682 = vmatmul.msk.f32.gmra.mxu2 %vm346_vm1, %v6470_v19 }
 0x16f   : > { %4715 = vmatmul.msk.f32.gmra.mxu3 %vm346_vm1, %v5879_v47 }
 0x170   : > { %4749 = vmatmul.msk.f32.gmra.mxu0 %vm346_vm1, %v8369_v44 }
 0x171   : > { %4782 = vmatmul.msk.f32.gmra.mxu1 %vm346_vm1, %v1121_v32  ;;  %v918_v33 = vpop.f32.mrf.mxu2 }
 0x172   : > { %v1031_v34 = vpop.f32.mrf.mxu3  ;;  %v919_v21 = vadd.f32 %v918_v33, %v6194_v38  ;;  %v8371_v38 = vld [vmem:[#allocation5_spill] sm:$0xff] }
 0x173   : > { %v1032_v22 = vadd.f32 %v1031_v34, %v6196_v37  ;;  %v5053_v37 = vld [vmem:[%s8238_s2 + $0x14] sm:$0x7] }
 0x174   : > { %v6489_v14 = vadd.f32 %v1181_v12, %v919_v21  ;;  %5054 = vmatpush.msk.msrb.mxu2 %vm443_vm0, %v5053_v37  ;;  %5087 = vmatpush.msk.msrb.mxu3 %vm443_vm0, %v5053_v37  ;;  %v1123_v12 = vld [vmem:[%s5654_s10 + $0x159] sm:$0xff]  ;;  %v6531_v21 = vld [vmem:[%s5656_s11 + $0x168] sm:$0xff]  ;;  %v8374_v37 = vld [vmem:[#allocation8_spill] sm:$0xff] }
 0x175   : > { %v6491_v35 = vadd.f32 %v1390_v43, %v1032_v22  ;;  %v1184_v52 = vpop.f32.mrf.mxu0  ;;  %v8372_v43 = vld [vmem:[#allocation6_spill] sm:$0xff] }
 0x176   : > { %v1393_v47 = vpop.f32.mrf.mxu1  ;;  %4683 = vmatmul.msk.f32.gmra.mxu2 %vm346_vm1, %v6487_v60 }
 0x177   : > { %4716 = vmatmul.msk.f32.gmra.mxu3 %vm346_vm1, %v8370_v25  ;;  %v1124_v25 = vld [vmem:[%s5654_s10 + $0x169] sm:$0xff] }
 0x178   : > { %4750 = vmatmul.msk.f32.gmra.mxu0 %vm346_vm1, %v8371_v38 }
 0x179   : > { %4783 = vmatmul.msk.f32.gmra.mxu1 %vm346_vm1, %v1122_v36  ;;  %v921_v26 = vpop.f32.mrf.mxu2 }
 0x17a   : > { %v1034_v8 = vpop.f32.mrf.mxu3  ;;  %v922_v28 = vadd.f32 %v921_v26, %v6213_v42  ;;  %v8373_v42 = vld [vmem:[#allocation7_spill] sm:$0xff] }
 0x17b   : > { %v1035_v39 = vadd.f32 %v1034_v8, %v6215_v41  ;;  %v5188_v41 = vld [vmem:[%s8238_s2 + $0x18] sm:$0x7] }
 0x17c   : > { %v6511_v40 = vadd.f32 %v1184_v52, %v922_v28  ;;  %5189 = vmatpush.msk.msrb.mxu0 %vm443_vm0, %v5188_v41  ;;  %5222 = vmatpush.msk.msrb.mxu1 %vm443_vm0, %v5188_v41  ;;  %v8376_v8 = vld [vmem:[#allocation53_spill] sm:$0xff] }
 0x17d   : > { %v6513_v29 = vadd.f32 %v1393_v47, %v1035_v39  ;;  %v1187_v30 = vpop.f32.mrf.mxu0  ;;  %v6548_v39 = vld [vmem:[%s5656_s11 + $0x170] sm:$0xff] }
 0x17e   : > { %v1396_v18 = vpop.f32.mrf.mxu1  ;;  %4684 = vmatmul.msk.f32.gmra.mxu2 %vm346_vm1, %v6509_v17  ;;  %v1125_v41 = vld [vmem:[%s5654_s10 + $0x171] sm:$0xff] }
 0x17f   : > { %4717 = vmatmul.msk.f32.gmra.mxu3 %vm346_vm1, %v8372_v43 }
 0x180   : > { %4751 = vmatmul.msk.f32.gmra.mxu0 %vm346_vm1, %v8373_v42  ;;  %v8377_v42 = vld [vmem:[#allocation10_spill] sm:$0xff] }
 0x181   : > { %4784 = vmatmul.msk.f32.gmra.mxu1 %vm346_vm1, %v1123_v12  ;;  %v924_v32 = vpop.f32.mrf.mxu2 }
 0x182   : > { %v1037_v44 = vpop.f32.mrf.mxu3  ;;  %v925_v33 = vadd.f32 %v924_v32, %v6232_v46  ;;  %v8375_v46 = vld [vmem:[#allocation9_spill] sm:$0xff]  ;;  %v8378_v32 = vld [vmem:[#allocation11_spill] sm:$0xff] }
 0x183   : > { %v1038_v34 = vadd.f32 %v1037_v44, %v6234_v45 }
 0x184   : > { %v6533_v22 = vadd.f32 %v1187_v30, %v925_v33  ;;  %v8379_v33 = vld [vmem:[#allocation57_spill] sm:$0xff] }
 0x185   : > { %v6535_v52 = vadd.f32 %v1396_v18, %v1038_v34  ;;  %v1190_v47 = vpop.f32.mrf.mxu0 }
 0x186   : > { %v1399_v36 = vpop.f32.mrf.mxu1  ;;  %4685 = vmatmul.msk.f32.gmra.mxu2 %vm346_vm1, %v6531_v21 }
 0x187   : > { %4718 = vmatmul.msk.f32.gmra.mxu3 %vm346_vm1, %v8374_v37 }
 0x188   : > { %4752 = vmatmul.msk.f32.gmra.mxu0 %vm346_vm1, %v8375_v46 }
 0x189   : > { %4785 = vmatmul.msk.f32.gmra.mxu1 %vm346_vm1, %v1124_v25  ;;  %v927_v45 = vpop.f32.mrf.mxu2 }
 0x18a   : > { %v1040_v38 = vpop.f32.mrf.mxu3  ;;  %v928_v26 = vadd.f32 %v927_v45, %v6251_v50 }
 0x18b   : > { %v1041_v28 = vadd.f32 %v1040_v38, %v8376_v8  ;;  %v6569_v38 = vld [vmem:[%s5656_s11 + $0x19] sm:$0xff] }
 0x18c   : > { %v6550_v30 = vadd.f32 %v1190_v47, %v928_v26  ;;  %v8380_v47 = vld [vmem:[#allocation58_spill] sm:$0xff]  ;;  %v8381_v26 = vld [vmem:[#allocation16_spill] sm:$0xff] }
 0x18d   : > { %v6552_v18 = vadd.f32 %v1399_v36, %v1041_v28  ;;  %v1193_v12 = vpop.f32.mrf.mxu0  ;;  %v8382_v8 = vld [vmem:[#allocation2_spill] sm:$0xff] }
 0x18e   : > { %v1402_v43 = vpop.f32.mrf.mxu1  ;;  %4686 = vmatmul.msk.f32.gmra.mxu2 %vm346_vm1, %v6548_v39 }
 0x18f   : > { %4719 = vmatmul.msk.f32.gmra.mxu3 %vm346_vm1, %v8377_v42  ;;  %v8384_v42 = vld [vmem:[#allocation13_spill] sm:$0xff] }
 0x190   : > { %4753 = vmatmul.msk.f32.gmra.mxu0 %vm346_vm1, %v8378_v32 }
 0x191   : > { %4786 = vmatmul.msk.f32.gmra.mxu1 %vm346_vm1, %v1125_v41  ;;  %v930_v50 = vpop.f32.mrf.mxu2 }
 0x192   : > { %v1043_v44 = vpop.f32.mrf.mxu3  ;;  %v931_v34 = vadd.f32 %v930_v50, %v8379_v33 }
 0x193   : > { %v1044_v36 = vadd.f32 %v1043_v44, %v8380_v47  ;;  %v6586_v47 = vld [vmem:[%s5656_s11 + $0x21] sm:$0xff] }
 0x194   : > { %v6564_v25 = vadd.f32 %v1193_v12, %v931_v34  ;;  %8387 = vst [vmem:[#allocation5_spill] sm:$0xff] %v6586_v47 }
 0x195   : > { %v6566_v37 = vadd.f32 %v1402_v43, %v1044_v36  ;;  %v1196_v46 = vpop.f32.mrf.mxu0  ;;  %v8383_v43 = vld [vmem:[#allocation12_spill] sm:$0xff]  ;;  %v8388_v36 = vld [vmem:[#allocation19_spill] sm:$0xff] }
 0x196   : > { %v1405_v45 = vpop.f32.mrf.mxu1  ;;  %4857 = vmatmul.msk.f32.vlgmr.msra.gmra.mxu2 %vm346_vm1, %v8381_v26  ;;  %v5499_v26 = vld [vmem:[%s5654_s10 + $0x20] sm:$0xff] }
 0x197   : > { %4890 = vmatmul.msk.f32.vlgmr.msra.gmra.mxu3 %vm346_vm1, %v8382_v8 }
 0x198   : > { %4956 = vmatmul.msk.f32.vlgmr.msra.gmra.mxu0 %vm346_vm1, %v8382_v8 }
 0x199   : > { %4989 = vmatmul.msk.f32.vlgmr.msra.gmra.mxu1 %vm346_vm1, %v6569_v38  ;;  %v933_v28 = vpop.f32.mrf.mxu2 }
 0x19a   : > { %v1046_v12 = vpop.f32.mrf.mxu3  ;;  %v934_v41 = vadd.f32 %v933_v28, %v8383_v43 }
 0x19b   : > { %v1047_v32 = vadd.f32 %v1046_v12, %v8384_v42  ;;  %v8390_v12 = vld [vmem:[#allocation15_spill] sm:$0xff] }
 0x19c   : > { %v6581_v50 = vadd.f32 %v1196_v46, %v934_v41  ;;  %v6598_v41 = vld [vmem:[%s5654_s10 + $0x30] sm:$0xff] }
 0x19d   : > { %v6583_v44 = vadd.f32 %v1405_v45, %v1047_v32  ;;  %v1199_v33 = vpop.f32.mrf.mxu0  ;;  %v8389_v45 = vld [vmem:[#allocation14_spill] sm:$0xff]  ;;  %8391 = vst [vmem:[#allocation6_spill] sm:$0xff] %v6598_v41 }
 0x19e   : > { %8385 = vst [vmem:[#allocation3_spill] sm:$0xff] %v6581_v50  ;;  %v1408_v34 = vpop.f32.mrf.mxu1  ;;  %4858 = vmatmul.msk.f32.gmra.mxu2 %vm346_vm1, %v8388_v36  ;;  %v8395_v50 = vld [vmem:[#allocation22_spill] sm:$0xff] }
 0x19f   : > { %8386 = vst [vmem:[#allocation4_spill] sm:$0xff] %v6583_v44  ;;  %4891 = vmatmul.msk.f32.gmra.mxu3 %vm346_vm1, %v5499_v26 }
 0x1a0   : > { %4957 = vmatmul.msk.f32.gmra.mxu0 %vm346_vm1, %v5499_v26  ;;  %v6605_v26 = vld [vmem:[%s5656_s11 + $0x31] sm:$0xff] }
 0x1a1   : > { %4990 = vmatmul.msk.f32.gmra.mxu1 %vm346_vm1, %v6586_v47  ;;  %v936_v46 = vpop.f32.mrf.mxu2  ;;  %8394 = vst [vmem:[#allocation9_spill] sm:$0xff] %v6605_v26  ;;  %v6625_v47 = vld [vmem:[%s5656_s11 + $0x39] sm:$0xff] }
 0x1a2   : > { %v1049_v8 = vpop.f32.mrf.mxu3  ;;  %v937_v28 = vadd.f32 %v936_v46, %v8389_v45  ;;  %v8396_v46 = vld [vmem:[#allocation17_spill] sm:$0xff]  ;;  %v8397_v45 = vld [vmem:[#allocation18_spill] sm:$0xff]  ;;  %8401 = vst [vmem:[#allocation57_spill] sm:$0xff] %v6625_v47 }
 0x1a3   : > { %v1050_v43 = vadd.f32 %v1049_v8, %v8390_v12  ;;  %v6618_v12 = vld [vmem:[%s5654_s10 + $0x38] sm:$0xff] }
 0x1a4   : > { %v6600_v42 = vadd.f32 %v1199_v33, %v937_v28  ;;  %8398 = vst [vmem:[#allocation53_spill] sm:$0xff] %v6618_v12 }
 0x1a5   : > { %v6602_v32 = vadd.f32 %v1408_v34, %v1050_v43  ;;  %v1202_v36 = vpop.f32.mrf.mxu0 }
 0x1a6   : > { %8392 = vst [vmem:[#allocation7_spill] sm:$0xff] %v6600_v42  ;;  %v1411_v44 = vpop.f32.mrf.mxu1  ;;  %4859 = vmatmul.msk.f32.gmra.mxu2 %vm346_vm1, %v8395_v50 }
 0x1a7   : > { %8393 = vst [vmem:[#allocation8_spill] sm:$0xff] %v6602_v32  ;;  %4892 = vmatmul.msk.f32.gmra.mxu3 %vm346_vm1, %v6598_v41 }
 0x1a8   : > { %4958 = vmatmul.msk.f32.gmra.mxu0 %vm346_vm1, %v6598_v41  ;;  %v8402_v41 = vld [vmem:[#allocation25_spill] sm:$0xff] }
 0x1a9   : > { %4991 = vmatmul.msk.f32.gmra.mxu1 %vm346_vm1, %v6605_v26  ;;  %v939_v33 = vpop.f32.mrf.mxu2  ;;  %v6645_v26 = vld [vmem:[%s5656_s11 + $0x49] sm:$0xff] }
 0x1aa   : > { %v1052_v34 = vpop.f32.mrf.mxu3  ;;  %v940_v8 = vadd.f32 %v939_v33, %v8396_v46  ;;  %v8403_v33 = vld [vmem:[#allocation20_spill] sm:$0xff]  ;;  %v8404_v46 = vld [vmem:[#allocation21_spill] sm:$0xff]  ;;  %8408 = vst [vmem:[#allocation12_spill] sm:$0xff] %v6645_v26 }
 0x1ab   : > { %v1053_v28 = vadd.f32 %v1052_v34, %v8397_v45  ;;  %v6638_v45 = vld [vmem:[%s5654_s10 + $0x48] sm:$0xff] }
 0x1ac   : > { %v6620_v43 = vadd.f32 %v1202_v36, %v940_v8  ;;  %8405 = vst [vmem:[#allocation58_spill] sm:$0xff] %v6638_v45 }
 0x1ad   : > { %v6622_v50 = vadd.f32 %v1411_v44, %v1053_v28  ;;  %v1205_v32 = vpop.f32.mrf.mxu0 }
 0x1ae   : > { %8399 = vst [vmem:[#allocation10_spill] sm:$0xff] %v6620_v43  ;;  %v1414_v42 = vpop.f32.mrf.mxu1  ;;  %4860 = vmatmul.msk.f32.gmra.mxu2 %vm346_vm1, %v8402_v41 }
 0x1af   : > { %8400 = vst [vmem:[#allocation11_spill] sm:$0xff] %v6622_v50  ;;  %4893 = vmatmul.msk.f32.gmra.mxu3 %vm346_vm1, %v6618_v12 }
 0x1b0   : > { %4959 = vmatmul.msk.f32.gmra.mxu0 %vm346_vm1, %v6618_v12  ;;  %v8409_v12 = vld [vmem:[#allocation28_spill] sm:$0xff] }
 0x1b1   : > { %4992 = vmatmul.msk.f32.gmra.mxu1 %vm346_vm1, %v6625_v47  ;;  %v942_v36 = vpop.f32.mrf.mxu2  ;;  %v6665_v47 = vld [vmem:[%s5656_s11 + $0x51] sm:$0xff] }
 0x1b2   : > { %v1055_v44 = vpop.f32.mrf.mxu3  ;;  %v943_v34 = vadd.f32 %v942_v36, %v8403_v33  ;;  %v8410_v36 = vld [vmem:[#allocation23_spill] sm:$0xff]  ;;  %v8411_v33 = vld [vmem:[#allocation24_spill] sm:$0xff]  ;;  %8415 = vst [vmem:[#allocation15_spill] sm:$0xff] %v6665_v47 }
 0x1b3   : > { %v1056_v8 = vadd.f32 %v1055_v44, %v8404_v46  ;;  %v6658_v46 = vld [vmem:[%s5654_s10 + $0x50] sm:$0xff] }
 0x1b4   : > { %v6640_v28 = vadd.f32 %v1205_v32, %v943_v34  ;;  %8412 = vst [vmem:[#allocation13_spill] sm:$0xff] %v6658_v46 }
 0x1b5   : > { %v6642_v41 = vadd.f32 %v1414_v42, %v1056_v8  ;;  %v1208_v50 = vpop.f32.mrf.mxu0 }
 0x1b6   : > { %8406 = vst [vmem:[#allocation16_spill] sm:$0xff] %v6640_v28  ;;  %v1417_v43 = vpop.f32.mrf.mxu1  ;;  %4861 = vmatmul.msk.f32.gmra.mxu2 %vm346_vm1, %v8409_v12 }
 0x1b7   : > { %8407 = vst [vmem:[#allocation2_spill] sm:$0xff] %v6642_v41  ;;  %4894 = vmatmul.msk.f32.gmra.mxu3 %vm346_vm1, %v6638_v45 }
 0x1b8   : > { %4960 = vmatmul.msk.f32.gmra.mxu0 %vm346_vm1, %v6638_v45  ;;  %v8416_v45 = vld [vmem:[#allocation31_spill] sm:$0xff] }
 0x1b9   : > { %4993 = vmatmul.msk.f32.gmra.mxu1 %vm346_vm1, %v6645_v26  ;;  %v945_v32 = vpop.f32.mrf.mxu2  ;;  %v6685_v26 = vld [vmem:[%s5656_s11 + $0x61] sm:$0xff] }
 0x1ba   : > { %v1058_v42 = vpop.f32.mrf.mxu3  ;;  %v946_v44 = vadd.f32 %v945_v32, %v8410_v36  ;;  %v8417_v32 = vld [vmem:[#allocation26_spill] sm:$0xff]  ;;  %v8418_v36 = vld [vmem:[#allocation27_spill] sm:$0xff]  ;;  %8422 = vst [vmem:[#allocation25_spill] sm:$0xff] %v6685_v26 }
 0x1bb   : > { %v1059_v34 = vadd.f32 %v1058_v42, %v8411_v33  ;;  %v6678_v33 = vld [vmem:[%s5654_s10 + $0x60] sm:$0xff] }
 0x1bc   : > { %v6660_v8 = vadd.f32 %v1208_v50, %v946_v44  ;;  %8419 = vst [vmem:[#allocation22_spill] sm:$0xff] %v6678_v33 }
 0x1bd   : > { %v6662_v12 = vadd.f32 %v1417_v43, %v1059_v34  ;;  %v1211_v41 = vpop.f32.mrf.mxu0 }
 0x1be   : > { %8413 = vst [vmem:[#allocation19_spill] sm:$0xff] %v6660_v8  ;;  %v1420_v28 = vpop.f32.mrf.mxu1  ;;  %4862 = vmatmul.msk.f32.gmra.mxu2 %vm346_vm1, %v8416_v45 }
 0x1bf   : > { %8414 = vst [vmem:[#allocation14_spill] sm:$0xff] %v6662_v12  ;;  %4895 = vmatmul.msk.f32.gmra.mxu3 %vm346_vm1, %v6658_v46 }
 0x1c0   : > { %4961 = vmatmul.msk.f32.gmra.mxu0 %vm346_vm1, %v6658_v46  ;;  %v8423_v46 = vld [vmem:[#allocation34_spill] sm:$0xff] }
 0x1c1   : > { %4994 = vmatmul.msk.f32.gmra.mxu1 %vm346_vm1, %v6665_v47  ;;  %v948_v50 = vpop.f32.mrf.mxu2  ;;  %v6705_v47 = vld [vmem:[%s5656_s11 + $0x69] sm:$0xff] }
 0x1c2   : > { %v1061_v43 = vpop.f32.mrf.mxu3  ;;  %v949_v42 = vadd.f32 %v948_v50, %v8417_v32  ;;  %v8424_v50 = vld [vmem:[#allocation29_spill] sm:$0xff]  ;;  %v8425_v32 = vld [vmem:[#allocation30_spill] sm:$0xff]  ;;  %8429 = vst [vmem:[#allocation23_spill] sm:$0xff] %v6705_v47 }
 0x1c3   : > { %v1062_v44 = vadd.f32 %v1061_v43, %v8418_v36  ;;  %v6698_v36 = vld [vmem:[%s5654_s10 + $0x68] sm:$0xff] }
 0x1c4   : > { %v6680_v34 = vadd.f32 %v1211_v41, %v949_v42  ;;  %8426 = vst [vmem:[#allocation20_spill] sm:$0xff] %v6698_v36 }
 0x1c5   : > { %v6682_v45 = vadd.f32 %v1420_v28, %v1062_v44  ;;  %v1214_v12 = vpop.f32.mrf.mxu0 }
 0x1c6   : > { %8420 = vst [vmem:[#allocation17_spill] sm:$0xff] %v6680_v34  ;;  %v1423_v8 = vpop.f32.mrf.mxu1  ;;  %4863 = vmatmul.msk.f32.gmra.mxu2 %vm346_vm1, %v8423_v46 }
 0x1c7   : > { %8421 = vst [vmem:[#allocation18_spill] sm:$0xff] %v6682_v45  ;;  %4896 = vmatmul.msk.f32.gmra.mxu3 %vm346_vm1, %v6678_v33 }
 0x1c8   : > { %4962 = vmatmul.msk.f32.gmra.mxu0 %vm346_vm1, %v6678_v33  ;;  %v8430_v33 = vld [vmem:[#allocation37_spill] sm:$0xff] }
 0x1c9   : > { %4995 = vmatmul.msk.f32.gmra.mxu1 %vm346_vm1, %v6685_v26  ;;  %v951_v41 = vpop.f32.mrf.mxu2  ;;  %v6725_v26 = vld [vmem:[%s5656_s11 + $0x79] sm:$0xff] }
 0x1ca   : > { %v1064_v28 = vpop.f32.mrf.mxu3  ;;  %v952_v43 = vadd.f32 %v951_v41, %v8424_v50  ;;  %v8431_v41 = vld [vmem:[#allocation32_spill] sm:$0xff]  ;;  %v8432_v50 = vld [vmem:[#allocation33_spill] sm:$0xff]  ;;  %8436 = vst [vmem:[#allocation27_spill] sm:$0xff] %v6725_v26 }
 0x1cb   : > { %v1065_v42 = vadd.f32 %v1064_v28, %v8425_v32  ;;  %v6718_v32 = vld [vmem:[%s5654_s10 + $0x78] sm:$0xff] }
 0x1cc   : > { %v6700_v44 = vadd.f32 %v1214_v12, %v952_v43  ;;  %8433 = vst [vmem:[#allocation24_spill] sm:$0xff] %v6718_v32 }
 0x1cd   : > { %v6702_v46 = vadd.f32 %v1423_v8, %v1065_v42  ;;  %v1217_v45 = vpop.f32.mrf.mxu0 }
 0x1ce   : > { %8427 = vst [vmem:[#allocation21_spill] sm:$0xff] %v6700_v44  ;;  %v1426_v34 = vpop.f32.mrf.mxu1  ;;  %4864 = vmatmul.msk.f32.gmra.mxu2 %vm346_vm1, %v8430_v33 }
 0x1cf   : > { %8428 = vst [vmem:[#allocation28_spill] sm:$0xff] %v6702_v46  ;;  %4897 = vmatmul.msk.f32.gmra.mxu3 %vm346_vm1, %v6698_v36 }
 0x1d0   : > { %4963 = vmatmul.msk.f32.gmra.mxu0 %vm346_vm1, %v6698_v36  ;;  %v8437_v36 = vld [vmem:[#allocation40_spill] sm:$0xff] }
 0x1d1   : > { %4996 = vmatmul.msk.f32.gmra.mxu1 %vm346_vm1, %v6705_v47  ;;  %v954_v12 = vpop.f32.mrf.mxu2  ;;  %v6745_v47 = vld [vmem:[%s5656_s11 + $0x81] sm:$0xff] }
 0x1d2   : > { %v1067_v8 = vpop.f32.mrf.mxu3  ;;  %v955_v28 = vadd.f32 %v954_v12, %v8431_v41  ;;  %v8438_v12 = vld [vmem:[#allocation35_spill] sm:$0xff]  ;;  %v8439_v41 = vld [vmem:[#allocation36_spill] sm:$0xff]  ;;  %8443 = vst [vmem:[#allocation37_spill] sm:$0xff] %v6745_v47 }
 0x1d3   : > { %v1068_v43 = vadd.f32 %v1067_v8, %v8432_v50  ;;  %v6738_v50 = vld [vmem:[%s5654_s10 + $0x80] sm:$0xff] }
 0x1d4   : > { %v6720_v42 = vadd.f32 %v1217_v45, %v955_v28  ;;  %8440 = vst [vmem:[#allocation34_spill] sm:$0xff] %v6738_v50 }
 0x1d5   : > { %v6722_v33 = vadd.f32 %v1426_v34, %v1068_v43  ;;  %v1220_v46 = vpop.f32.mrf.mxu0 }
 0x1d6   : > { %8434 = vst [vmem:[#allocation31_spill] sm:$0xff] %v6720_v42  ;;  %v1429_v44 = vpop.f32.mrf.mxu1  ;;  %4865 = vmatmul.msk.f32.gmra.mxu2 %vm346_vm1, %v8437_v36 }
 0x1d7   : > { %8435 = vst [vmem:[#allocation26_spill] sm:$0xff] %v6722_v33  ;;  %4898 = vmatmul.msk.f32.gmra.mxu3 %vm346_vm1, %v6718_v32 }
 0x1d8   : > { %4964 = vmatmul.msk.f32.gmra.mxu0 %vm346_vm1, %v6718_v32  ;;  %v8444_v32 = vld [vmem:[#allocation43_spill] sm:$0xff] }
 0x1d9   : > { %4997 = vmatmul.msk.f32.gmra.mxu1 %vm346_vm1, %v6725_v26  ;;  %v957_v45 = vpop.f32.mrf.mxu2  ;;  %v6765_v26 = vld [vmem:[%s5656_s11 + $0x91] sm:$0xff] }
 0x1da   : > { %v1070_v34 = vpop.f32.mrf.mxu3  ;;  %v958_v8 = vadd.f32 %v957_v45, %v8438_v12  ;;  %v8445_v45 = vld [vmem:[#allocation38_spill] sm:$0xff]  ;;  %v8446_v12 = vld [vmem:[#allocation39_spill] sm:$0xff]  ;;  %8450 = vst [vmem:[#allocation35_spill] sm:$0xff] %v6765_v26 }
 0x1db   : > { %v1071_v28 = vadd.f32 %v1070_v34, %v8439_v41  ;;  %v6758_v41 = vld [vmem:[%s5654_s10 + $0x90] sm:$0xff] }
 0x1dc   : > { %v6740_v43 = vadd.f32 %v1220_v46, %v958_v8  ;;  %8447 = vst [vmem:[#allocation32_spill] sm:$0xff] %v6758_v41 }
 0x1dd   : > { %v6742_v36 = vadd.f32 %v1429_v44, %v1071_v28  ;;  %v1223_v33 = vpop.f32.mrf.mxu0 }
 0x1de   : > { %8441 = vst [vmem:[#allocation29_spill] sm:$0xff] %v6740_v43  ;;  %v1432_v42 = vpop.f32.mrf.mxu1  ;;  %4866 = vmatmul.msk.f32.gmra.mxu2 %vm346_vm1, %v8444_v32 }
 0x1df   : > { %8442 = vst [vmem:[#allocation30_spill] sm:$0xff] %v6742_v36  ;;  %4899 = vmatmul.msk.f32.gmra.mxu3 %vm346_vm1, %v6738_v50 }
 0x1e0   : > { %4965 = vmatmul.msk.f32.gmra.mxu0 %vm346_vm1, %v6738_v50  ;;  %v8451_v50 = vld [vmem:[#allocation46_spill] sm:$0xff] }
 0x1e1   : > { %4998 = vmatmul.msk.f32.gmra.mxu1 %vm346_vm1, %v6745_v47  ;;  %v960_v46 = vpop.f32.mrf.mxu2  ;;  %v6785_v47 = vld [vmem:[%s5656_s11 + $0x99] sm:$0xff] }
 0x1e2   : > { %v1073_v44 = vpop.f32.mrf.mxu3  ;;  %v961_v34 = vadd.f32 %v960_v46, %v8445_v45  ;;  %v8452_v46 = vld [vmem:[#allocation41_spill] sm:$0xff]  ;;  %v8453_v45 = vld [vmem:[#allocation42_spill] sm:$0xff]  ;;  %8457 = vst [vmem:[#allocation39_spill] sm:$0xff] %v6785_v47 }
 0x1e3   : > { %v1074_v8 = vadd.f32 %v1073_v44, %v8446_v12  ;;  %v6778_v12 = vld [vmem:[%s5654_s10 + $0x98] sm:$0xff] }
 0x1e4   : > { %v6760_v28 = vadd.f32 %v1223_v33, %v961_v34  ;;  %8454 = vst [vmem:[#allocation36_spill] sm:$0xff] %v6778_v12 }
 0x1e5   : > { %v6762_v32 = vadd.f32 %v1432_v42, %v1074_v8  ;;  %v1226_v36 = vpop.f32.mrf.mxu0 }
 0x1e6   : > { %8448 = vst [vmem:[#allocation33_spill] sm:$0xff] %v6760_v28  ;;  %v1435_v43 = vpop.f32.mrf.mxu1  ;;  %4867 = vmatmul.msk.f32.gmra.mxu2 %vm346_vm1, %v8451_v50 }
 0x1e7   : > { %8449 = vst [vmem:[#allocation40_spill] sm:$0xff] %v6762_v32  ;;  %4900 = vmatmul.msk.f32.gmra.mxu3 %vm346_vm1, %v6758_v41 }
 0x1e8   : > { %4966 = vmatmul.msk.f32.gmra.mxu0 %vm346_vm1, %v6758_v41  ;;  %v8458_v41 = vld [vmem:[#allocation49_spill] sm:$0xff] }
 0x1e9   : > { %4999 = vmatmul.msk.f32.gmra.mxu1 %vm346_vm1, %v6765_v26  ;;  %v963_v33 = vpop.f32.mrf.mxu2  ;;  %v6805_v26 = vld [vmem:[%s5656_s11 + $0xa9] sm:$0xff] }
 0x1ea   : > { %v1076_v42 = vpop.f32.mrf.mxu3  ;;  %v964_v44 = vadd.f32 %v963_v33, %v8452_v46  ;;  %v8459_v33 = vld [vmem:[#allocation44_spill] sm:$0xff]  ;;  %v8460_v46 = vld [vmem:[#allocation45_spill] sm:$0xff]  ;;  %8464 = vst [vmem:[#allocation49_spill] sm:$0xff] %v6805_v26 }
 0x1eb   : > { %v1077_v34 = vadd.f32 %v1076_v42, %v8453_v45  ;;  %v6798_v45 = vld [vmem:[%s5654_s10 + $0xa8] sm:$0xff] }
 0x1ec   : > { %v6780_v8 = vadd.f32 %v1226_v36, %v964_v44  ;;  %8461 = vst [vmem:[#allocation46_spill] sm:$0xff] %v6798_v45 }
 0x1ed   : > { %v6782_v50 = vadd.f32 %v1435_v43, %v1077_v34  ;;  %v1229_v32 = vpop.f32.mrf.mxu0 }
 0x1ee   : > { %8455 = vst [vmem:[#allocation43_spill] sm:$0xff] %v6780_v8  ;;  %v1438_v28 = vpop.f32.mrf.mxu1  ;;  %4868 = vmatmul.msk.f32.gmra.mxu2 %vm346_vm1, %v8458_v41 }
 0x1ef   : > { %8456 = vst [vmem:[#allocation38_spill] sm:$0xff] %v6782_v50  ;;  %4901 = vmatmul.msk.f32.gmra.mxu3 %vm346_vm1, %v6778_v12 }
 0x1f0   : > { %4967 = vmatmul.msk.f32.gmra.mxu0 %vm346_vm1, %v6778_v12  ;;  %v8465_v12 = vld [vmem:[#allocation52_spill] sm:$0xff] }
 0x1f1   : > { %5000 = vmatmul.msk.f32.gmra.mxu1 %vm346_vm1, %v6785_v47  ;;  %v966_v36 = vpop.f32.mrf.mxu2  ;;  %v6825_v47 = vld [vmem:[%s5656_s11 + $0xb1] sm:$0xff] }
 0x1f2   : > { %v1079_v43 = vpop.f32.mrf.mxu3  ;;  %v967_v42 = vadd.f32 %v966_v36, %v8459_v33  ;;  %v8466_v36 = vld [vmem:[#allocation47_spill] sm:$0xff]  ;;  %v8467_v33 = vld [vmem:[#allocation48_spill] sm:$0xff] }
 0x1f3   : > { %v1080_v44 = vadd.f32 %v1079_v43, %v8460_v46  ;;  %v6818_v46 = vld [vmem:[%s5654_s10 + $0xb0] sm:$0xff]  ;;  %8471 = vst [vmem:[#allocation47_spill] sm:$0xff] %v6825_v47 }
 0x1f4   : > { %v6800_v34 = vadd.f32 %v1229_v32, %v967_v42  ;;  %8468 = vst [vmem:[#allocation44_spill] sm:$0xff] %v6818_v46 }
 0x1f5   : > { %v6802_v41 = vadd.f32 %v1438_v28, %v1080_v44  ;;  %v1232_v50 = vpop.f32.mrf.mxu0 }
 0x1f6   : > { %8462 = vst [vmem:[#allocation41_spill] sm:$0xff] %v6800_v34  ;;  %v1441_v8 = vpop.f32.mrf.mxu1  ;;  %4869 = vmatmul.msk.f32.gmra.mxu2 %vm346_vm1, %v8465_v12 }
 0x1f7   : > { %8463 = vst [vmem:[#allocation42_spill] sm:$0xff] %v6802_v41  ;;  %4902 = vmatmul.msk.f32.gmra.mxu3 %vm346_vm1, %v6798_v45 }
 0x1f8   : > { %4968 = vmatmul.msk.f32.gmra.mxu0 %vm346_vm1, %v6798_v45  ;;  %v8472_v45 = vld [vmem:[#allocation56_spill] sm:$0xff] }
 0x1f9   : > { %5001 = vmatmul.msk.f32.gmra.mxu1 %vm346_vm1, %v6805_v26  ;;  %v969_v32 = vpop.f32.mrf.mxu2  ;;  %v6845_v26 = vld [vmem:[%s5656_s11 + $0xc1] sm:$0xff] }
 0x1fa   : > { %v1082_v28 = vpop.f32.mrf.mxu3  ;;  %v970_v43 = vadd.f32 %v969_v32, %v8466_v36  ;;  %v8473_v32 = vld [vmem:[#allocation50_spill] sm:$0xff]  ;;  %v8474_v36 = vld [vmem:[#allocation51_spill] sm:$0xff] }
 0x1fb   : > { %v1083_v42 = vadd.f32 %v1082_v28, %v8467_v33  ;;  %v6838_v33 = vld [vmem:[%s5654_s10 + $0xc0] sm:$0xff]  ;;  %8477 = vst [vmem:[#allocation50_spill] sm:$0xff] %v6845_v26 }
 0x1fc   : > { %v6820_v44 = vadd.f32 %v1232_v50, %v970_v43 }
 0x1fd   : > { %v6822_v12 = vadd.f32 %v1441_v8, %v1083_v42  ;;  %v1235_v41 = vpop.f32.mrf.mxu0 }
 0x1fe   : > { %8469 = vst [vmem:[#allocation45_spill] sm:$0xff] %v6820_v44  ;;  %v1444_v34 = vpop.f32.mrf.mxu1  ;;  %4870 = vmatmul.msk.f32.gmra.mxu2 %vm346_vm1, %v8472_v45 }
 0x1ff   : > { %8470 = vst [vmem:[#allocation52_spill] sm:$0xff] %v6822_v12  ;;  %4903 = vmatmul.msk.f32.gmra.mxu3 %vm346_vm1, %v6818_v46 }
 0x200   : > { %4969 = vmatmul.msk.f32.gmra.mxu0 %vm346_vm1, %v6818_v46  ;;  %v8478_v46 = vld [vmem:[#allocation61_spill] sm:$0xff] }
 0x201   : > { %5002 = vmatmul.msk.f32.gmra.mxu1 %vm346_vm1, %v6825_v47  ;;  %v972_v50 = vpop.f32.mrf.mxu2  ;;  %v6865_v47 = vld [vmem:[%s5656_s11 + $0xc9] sm:$0xff] }
 0x202   : > { %v1085_v8 = vpop.f32.mrf.mxu3  ;;  %v973_v28 = vadd.f32 %v972_v50, %v8473_v32  ;;  %v8479_v50 = vld [vmem:[#allocation54_spill] sm:$0xff]  ;;  %v8480_v32 = vld [vmem:[#allocation55_spill] sm:$0xff] }
 0x203   : > { %v1086_v43 = vadd.f32 %v1085_v8, %v8474_v36  ;;  %v6858_v36 = vld [vmem:[%s5654_s10 + $0xc8] sm:$0xff] }
 0x204   : > { %v6840_v42 = vadd.f32 %v1235_v41, %v973_v28 }
 0x205   : > { %v6842_v45 = vadd.f32 %v1444_v34, %v1086_v43  ;;  %v1238_v12 = vpop.f32.mrf.mxu0 }
 0x206   : > { %8475 = vst [vmem:[#allocation48_spill] sm:$0xff] %v6840_v42  ;;  %v1447_v44 = vpop.f32.mrf.mxu1  ;;  %4871 = vmatmul.msk.f32.gmra.mxu2 %vm346_vm1, %v8478_v46 }
 0x207   : > { %8476 = vst [vmem:[#allocation56_spill] sm:$0xff] %v6842_v45  ;;  %4904 = vmatmul.msk.f32.gmra.mxu3 %vm346_vm1, %v6838_v33 }
 0x208   : > { %4970 = vmatmul.msk.f32.gmra.mxu0 %vm346_vm1, %v6838_v33 }
 0x209   : > { %5003 = vmatmul.msk.f32.gmra.mxu1 %vm346_vm1, %v6845_v26  ;;  %v975_v41 = vpop.f32.mrf.mxu2  ;;  %v6885_v26 = vld [vmem:[%s5656_s11 + $0xd9] sm:$0xff] }
 0x20a   : > { %v1088_v34 = vpop.f32.mrf.mxu3  ;;  %v976_v8 = vadd.f32 %v975_v41, %v8479_v50  ;;  %v8483_v41 = vld [vmem:[#allocation59_spill] sm:$0xff]  ;;  %v8484_v50 = vld [vmem:[#allocation60_spill] sm:$0xff] }
 0x20b   : > { %v1089_v28 = vadd.f32 %v1088_v34, %v8480_v32  ;;  %v6878_v32 = vld [vmem:[%s5654_s10 + $0xd8] sm:$0xff] }
 0x20c   : > { %v6860_v43 = vadd.f32 %v1238_v12, %v976_v8 }
 0x20d   : > { %v6862_v46 = vadd.f32 %v1447_v44, %v1089_v28  ;;  %v1241_v45 = vpop.f32.mrf.mxu0 }
 0x20e   : > { %8481 = vst [vmem:[#allocation51_spill] sm:$0xff] %v6860_v43  ;;  %v1450_v42 = vpop.f32.mrf.mxu1  ;;  %4872 = vmatmul.msk.f32.gmra.mxu2 %vm346_vm1, %v6300_v63 }
 0x20f   : > { %8482 = vst [vmem:[#allocation61_spill] sm:$0xff] %v6862_v46  ;;  %4905 = vmatmul.msk.f32.gmra.mxu3 %vm346_vm1, %v6858_v36 }
 0x210   : > { %4971 = vmatmul.msk.f32.gmra.mxu0 %vm346_vm1, %v6858_v36 }
 0x211   : > { %5004 = vmatmul.msk.f32.gmra.mxu1 %vm346_vm1, %v6865_v47  ;;  %v978_v12 = vpop.f32.mrf.mxu2 }
 0x212   : > { %v1091_v44 = vpop.f32.mrf.mxu3  ;;  %v979_v34 = vadd.f32 %v978_v12, %v8483_v41  ;;  %v6898_v41 = vld [vmem:[%s5654_s10 + $0xe0] sm:$0xff] }
 0x213   : > { %v1092_v8 = vadd.f32 %v1091_v44, %v8484_v50 }
 0x214   : > { %v6880_v28 = vadd.f32 %v1241_v45, %v979_v34 }
 0x215   : > { %v6882_v63 = vadd.f32 %v1450_v42, %v1092_v8  ;;  %v2126_v46 = vpop.f32.mrf.mxu0 }
 0x216   : > { %v2335_v43 = vpop.f32.mrf.mxu1  ;;  %4873 = vmatmul.msk.f32.gmra.mxu2 %vm346_vm1, %v6317_v58 }
 0x217   : > { %8485 = vst [vmem:[#allocation54_spill] sm:$0xff] %v6882_v63  ;;  %4906 = vmatmul.msk.f32.gmra.mxu3 %vm346_vm1, %v6878_v32  ;;  %v6905_v63 = vld [vmem:[%s5656_s11 + $0xe1] sm:$0xff] }
 0x218   : > { %4972 = vmatmul.msk.f32.gmra.mxu0 %vm346_vm1, %v6878_v32 }
 0x219   : > { %5005 = vmatmul.msk.f32.gmra.mxu1 %vm346_vm1, %v6885_v26  ;;  %v1703_v45 = vpop.f32.mrf.mxu2 }
 0x21a   : > { %v1912_v42 = vpop.f32.mrf.mxu3  ;;  %v2008_v12 = vadd.f32 %v1703_v45, %v6302_v62  ;;  %v6918_v45 = vld [vmem:[%s5654_s10 + $0xf0] sm:$0xff] }
 0x21b   : > { %v2040_v44 = vadd.f32 %v1912_v42, %v6304_v10 }
 0x21c   : > { %v6900_v34 = vadd.f32 %v2126_v46, %v2008_v12 }
 0x21d   : > { %v6902_v58 = vadd.f32 %v2335_v43, %v2040_v44  ;;  %v2129_v50 = vpop.f32.mrf.mxu0 }
 0x21e   : > { %v2338_v8 = vpop.f32.mrf.mxu1  ;;  %4874 = vmatmul.msk.f32.gmra.mxu2 %vm346_vm1, %v6334_v54 }
 0x21f   : > { %8486 = vst [vmem:[#allocation55_spill] sm:$0xff] %v6902_v58  ;;  %4907 = vmatmul.msk.f32.gmra.mxu3 %vm346_vm1, %v6898_v41  ;;  %v6925_v58 = vld [vmem:[%s5656_s11 + $0xf1] sm:$0xff] }
 0x220   : > { %4973 = vmatmul.msk.f32.gmra.mxu0 %vm346_vm1, %v6898_v41 }
 0x221   : > { %5006 = vmatmul.msk.f32.gmra.mxu1 %vm346_vm1, %v6905_v63  ;;  %v1706_v62 = vpop.f32.mrf.mxu2 }
 0x222   : > { %v1915_v10 = vpop.f32.mrf.mxu3  ;;  %v2009_v43 = vadd.f32 %v1706_v62, %v6319_v59  ;;  %v6938_v62 = vld [vmem:[%s5654_s10 + $0xf8] sm:$0xff] }
 0x223   : > { %v2041_v46 = vadd.f32 %v1915_v10, %v6321_v0 }
 0x224   : > { %v6920_v42 = vadd.f32 %v2129_v50, %v2009_v43 }
 0x225   : > { %v6922_v54 = vadd.f32 %v2338_v8, %v2041_v46  ;;  %v2132_v12 = vpop.f32.mrf.mxu0 }
 0x226   : > { %v2341_v44 = vpop.f32.mrf.mxu1  ;;  %4875 = vmatmul.msk.f32.gmra.mxu2 %vm346_vm1, %v6351_v53 }
 0x227   : > { %8487 = vst [vmem:[#allocation59_spill] sm:$0xff] %v6922_v54  ;;  %4908 = vmatmul.msk.f32.gmra.mxu3 %vm346_vm1, %v6918_v45  ;;  %v6945_v54 = vld [vmem:[%s5656_s11 + $0xf9] sm:$0xff] }
 0x228   : > { %4974 = vmatmul.msk.f32.gmra.mxu0 %vm346_vm1, %v6918_v45 }
 0x229   : > { %5007 = vmatmul.msk.f32.gmra.mxu1 %vm346_vm1, %v6925_v58  ;;  %v1709_v59 = vpop.f32.mrf.mxu2 }
 0x22a   : > { %v1918_v0 = vpop.f32.mrf.mxu3  ;;  %v2010_v50 = vadd.f32 %v1709_v59, %v6336_v56  ;;  %v6958_v59 = vld [vmem:[%s5654_s10 + $0x108] sm:$0xff] }
 0x22b   : > { %v2042_v8 = vadd.f32 %v1918_v0, %v6338_v3 }
 0x22c   : > { %v6940_v10 = vadd.f32 %v2132_v12, %v2010_v50 }
 0x22d   : > { %v6942_v53 = vadd.f32 %v2341_v44, %v2042_v8  ;;  %v2135_v43 = vpop.f32.mrf.mxu0 }
 0x22e   : > { %v2344_v46 = vpop.f32.mrf.mxu1  ;;  %4876 = vmatmul.msk.f32.gmra.mxu2 %vm346_vm1, %v6368_v51 }
 0x22f   : > { %8488 = vst [vmem:[#allocation60_spill] sm:$0xff] %v6942_v53  ;;  %4909 = vmatmul.msk.f32.gmra.mxu3 %vm346_vm1, %v6938_v62  ;;  %v6965_v53 = vld [vmem:[%s5656_s11 + $0x109] sm:$0xff] }
 0x230   : > { %4975 = vmatmul.msk.f32.gmra.mxu0 %vm346_vm1, %v6938_v62 }
 0x231   : > { %5008 = vmatmul.msk.f32.gmra.mxu1 %vm346_vm1, %v6945_v54  ;;  %v1712_v56 = vpop.f32.mrf.mxu2 }
 0x232   : > { %v1921_v3 = vpop.f32.mrf.mxu3  ;;  %v2011_v12 = vadd.f32 %v1712_v56, %v6353_v55  ;;  %v6978_v56 = vld [vmem:[%s5654_s10 + $0x110] sm:$0xff] }
 0x233   : > { %v2043_v44 = vadd.f32 %v1921_v3, %v6355_v7 }
 0x234   : > { %v6960_v0 = vadd.f32 %v2135_v43, %v2011_v12 }
 0x235   : > { %v6962_v51 = vadd.f32 %v2344_v46, %v2043_v44  ;;  %v2138_v50 = vpop.f32.mrf.mxu0 }
 0x236   : > { %v2347_v8 = vpop.f32.mrf.mxu1  ;;  %4877 = vmatmul.msk.f32.gmra.mxu2 %vm346_vm1, %v6385_v1 }
 0x237   : > { %8489 = vst [vmem:[#allocation62_spill] sm:$0xff] %v6962_v51  ;;  %4910 = vmatmul.msk.f32.gmra.mxu3 %vm346_vm1, %v6958_v59  ;;  %v6985_v51 = vld [vmem:[%s5656_s11 + $0x111] sm:$0xff] }
 0x238   : > { %4976 = vmatmul.msk.f32.gmra.mxu0 %vm346_vm1, %v6958_v59 }
 0x239   : > { %5009 = vmatmul.msk.f32.gmra.mxu1 %vm346_vm1, %v6965_v53  ;;  %v1715_v55 = vpop.f32.mrf.mxu2 }
 0x23a   : > { %v1924_v7 = vpop.f32.mrf.mxu3  ;;  %v2012_v43 = vadd.f32 %v1715_v55, %v6370_v49  ;;  %v6998_v55 = vld [vmem:[%s5654_s10 + $0x120] sm:$0xff] }
 0x23b   : > { %v2044_v46 = vadd.f32 %v1924_v7, %v6372_v4 }
 0x23c   : > { %v6980_v3 = vadd.f32 %v2138_v50, %v2012_v43 }
 0x23d   : > { %v6982_v1 = vadd.f32 %v2347_v8, %v2044_v46  ;;  %v2141_v12 = vpop.f32.mrf.mxu0 }
 0x23e   : > { %v2350_v44 = vpop.f32.mrf.mxu1  ;;  %4878 = vmatmul.msk.f32.gmra.mxu2 %vm346_vm1, %v6402_v16 }
 0x23f   : > { %8490 = vst [vmem:[#allocation63_spill] sm:$0xff] %v6982_v1  ;;  %4911 = vmatmul.msk.f32.gmra.mxu3 %vm346_vm1, %v6978_v56  ;;  %v7005_v1 = vld [vmem:[%s5656_s11 + $0x121] sm:$0xff] }
 0x240   : > { %4977 = vmatmul.msk.f32.gmra.mxu0 %vm346_vm1, %v6978_v56 }
 0x241   : > { %5010 = vmatmul.msk.f32.gmra.mxu1 %vm346_vm1, %v6985_v51  ;;  %v1718_v49 = vpop.f32.mrf.mxu2 }
 0x242   : > { %v1927_v4 = vpop.f32.mrf.mxu3  ;;  %v2013_v50 = vadd.f32 %v1718_v49, %v6387_v2  ;;  %v7018_v49 = vld [vmem:[%s5654_s10 + $0x128] sm:$0xff] }
 0x243   : > { %v2045_v8 = vadd.f32 %v1927_v4, %v6389_v61 }
 0x244   : > { %v7000_v7 = vadd.f32 %v2141_v12, %v2013_v50 }
 0x245   : > { %v7002_v16 = vadd.f32 %v2350_v44, %v2045_v8  ;;  %v2144_v43 = vpop.f32.mrf.mxu0 }
 0x246   : > { %v2353_v46 = vpop.f32.mrf.mxu1  ;;  %4879 = vmatmul.msk.f32.gmra.mxu2 %vm346_vm1, %v6419_v57 }
 0x247   : > { %8491 = vst [vmem:[#allocation64_spill] sm:$0xff] %v7002_v16  ;;  %4912 = vmatmul.msk.f32.gmra.mxu3 %vm346_vm1, %v6998_v55  ;;  %v7025_v16 = vld [vmem:[%s5656_s11 + $0x129] sm:$0xff] }
 0x248   : > { %4978 = vmatmul.msk.f32.gmra.mxu0 %vm346_vm1, %v6998_v55 }
 0x249   : > { %5011 = vmatmul.msk.f32.gmra.mxu1 %vm346_vm1, %v7005_v1  ;;  %v1721_v2 = vpop.f32.mrf.mxu2 }
 0x24a   : > { %v1930_v61 = vpop.f32.mrf.mxu3  ;;  %v2014_v12 = vadd.f32 %v1721_v2, %v6404_v5  ;;  %v7038_v2 = vld [vmem:[%s5654_s10 + $0x138] sm:$0xff] }
 0x24b   : > { %v2046_v44 = vadd.f32 %v1930_v61, %v6406_v6 }
 0x24c   : > { %v7020_v4 = vadd.f32 %v2144_v43, %v2014_v12 }
 0x24d   : > { %v7022_v57 = vadd.f32 %v2353_v46, %v2046_v44  ;;  %v2147_v50 = vpop.f32.mrf.mxu0 }
 0x24e   : > { %v2356_v8 = vpop.f32.mrf.mxu1  ;;  %4880 = vmatmul.msk.f32.gmra.mxu2 %vm346_vm1, %v6436_v23 }
 0x24f   : > { %8492 = vst [vmem:[#allocation65_spill] sm:$0xff] %v7022_v57  ;;  %4913 = vmatmul.msk.f32.gmra.mxu3 %vm346_vm1, %v7018_v49  ;;  %v7045_v57 = vld [vmem:[%s5656_s11 + $0x139] sm:$0xff] }
 0x250   : > { %4979 = vmatmul.msk.f32.gmra.mxu0 %vm346_vm1, %v7018_v49 }
 0x251   : > { %5012 = vmatmul.msk.f32.gmra.mxu1 %vm346_vm1, %v7025_v16  ;;  %v1724_v5 = vpop.f32.mrf.mxu2 }
 0x252   : > { %v1933_v6 = vpop.f32.mrf.mxu3  ;;  %v2015_v43 = vadd.f32 %v1724_v5, %v6421_v13  ;;  %v7058_v5 = vld [vmem:[%s5654_s10 + $0x140] sm:$0xff] }
 0x253   : > { %v2047_v46 = vadd.f32 %v1933_v6, %v6423_v20 }
 0x254   : > { %v7040_v61 = vadd.f32 %v2147_v50, %v2015_v43 }
 0x255   : > { %v7042_v23 = vadd.f32 %v2356_v8, %v2047_v46  ;;  %v2150_v12 = vpop.f32.mrf.mxu0 }
 0x256   : > { %v2359_v44 = vpop.f32.mrf.mxu1  ;;  %4881 = vmatmul.msk.f32.gmra.mxu2 %vm346_vm1, %v6453_v48 }
 0x257   : > { %8493 = vst [vmem:[#allocation66_spill] sm:$0xff] %v7042_v23  ;;  %4914 = vmatmul.msk.f32.gmra.mxu3 %vm346_vm1, %v7038_v2  ;;  %v7065_v23 = vld [vmem:[%s5656_s11 + $0x141] sm:$0xff] }
 0x258   : > { %4980 = vmatmul.msk.f32.gmra.mxu0 %vm346_vm1, %v7038_v2 }
 0x259   : > { %5013 = vmatmul.msk.f32.gmra.mxu1 %vm346_vm1, %v7045_v57  ;;  %v1727_v13 = vpop.f32.mrf.mxu2 }
 0x25a   : > { %v1936_v20 = vpop.f32.mrf.mxu3  ;;  %v2016_v50 = vadd.f32 %v1727_v13, %v6438_v15  ;;  %v7078_v13 = vld [vmem:[%s5654_s10 + $0x150] sm:$0xff] }
 0x25b   : > { %v2048_v8 = vadd.f32 %v1936_v20, %v6440_v24 }
 0x25c   : > { %v7060_v6 = vadd.f32 %v2150_v12, %v2016_v50 }
 0x25d   : > { %v7062_v48 = vadd.f32 %v2359_v44, %v2048_v8  ;;  %v2153_v43 = vpop.f32.mrf.mxu0 }
 0x25e   : > { %v2362_v46 = vpop.f32.mrf.mxu1  ;;  %4882 = vmatmul.msk.f32.gmra.mxu2 %vm346_vm1, %v6470_v19 }
 0x25f   : > { %8494 = vst [vmem:[#allocation67_spill] sm:$0xff] %v7062_v48  ;;  %4915 = vmatmul.msk.f32.gmra.mxu3 %vm346_vm1, %v7058_v5  ;;  %v7085_v48 = vld [vmem:[%s5656_s11 + $0x151] sm:$0xff] }
 0x260   : > { %4981 = vmatmul.msk.f32.gmra.mxu0 %vm346_vm1, %v7058_v5 }
 0x261   : > { %5014 = vmatmul.msk.f32.gmra.mxu1 %vm346_vm1, %v7065_v23  ;;  %v1730_v15 = vpop.f32.mrf.mxu2 }
 0x262   : > { %v1939_v24 = vpop.f32.mrf.mxu3  ;;  %v2017_v12 = vadd.f32 %v1730_v15, %v6455_v27  ;;  %v7098_v15 = vld [vmem:[%s5654_s10 + $0x158] sm:$0xff] }
 0x263   : > { %v2049_v44 = vadd.f32 %v1939_v24, %v6457_v11 }
 0x264   : > { %v7080_v20 = vadd.f32 %v2153_v43, %v2017_v12 }
 0x265   : > { %v7082_v19 = vadd.f32 %v2362_v46, %v2049_v44  ;;  %v2156_v50 = vpop.f32.mrf.mxu0 }
 0x266   : > { %v2365_v8 = vpop.f32.mrf.mxu1  ;;  %4883 = vmatmul.msk.f32.gmra.mxu2 %vm346_vm1, %v6487_v60 }
 0x267   : > { %8495 = vst [vmem:[#allocation68_spill] sm:$0xff] %v7082_v19  ;;  %4916 = vmatmul.msk.f32.gmra.mxu3 %vm346_vm1, %v7078_v13  ;;  %v7105_v19 = vld [vmem:[%s5656_s11 + $0x159] sm:$0xff] }
 0x268   : > { %4982 = vmatmul.msk.f32.gmra.mxu0 %vm346_vm1, %v7078_v13 }
 0x269   : > { %5015 = vmatmul.msk.f32.gmra.mxu1 %vm346_vm1, %v7085_v48  ;;  %v1733_v27 = vpop.f32.mrf.mxu2 }
 0x26a   : > { %v1942_v11 = vpop.f32.mrf.mxu3  ;;  %v2018_v43 = vadd.f32 %v1733_v27, %v6472_v9  ;;  %v7118_v27 = vld [vmem:[%s5654_s10 + $0x168] sm:$0xff] }
 0x26b   : > { %v2050_v46 = vadd.f32 %v1942_v11, %v6474_v31 }
 0x26c   : > { %v7100_v24 = vadd.f32 %v2156_v50, %v2018_v43 }
 0x26d   : > { %v7102_v60 = vadd.f32 %v2365_v8, %v2050_v46  ;;  %v2159_v12 = vpop.f32.mrf.mxu0 }
 0x26e   : > { %v2368_v44 = vpop.f32.mrf.mxu1  ;;  %4884 = vmatmul.msk.f32.gmra.mxu2 %vm346_vm1, %v6509_v17 }
 0x26f   : > { %8496 = vst [vmem:[#allocation69_spill] sm:$0xff] %v7102_v60  ;;  %4917 = vmatmul.msk.f32.gmra.mxu3 %vm346_vm1, %v7098_v15  ;;  %v7125_v60 = vld [vmem:[%s5656_s11 + $0x169] sm:$0xff] }
 0x270   : > { %4983 = vmatmul.msk.f32.gmra.mxu0 %vm346_vm1, %v7098_v15  ;;  %8498 = vst [vmem:[#allocation71_spill] sm:$0xff] %v7125_v60 }
 0x271   : > { %5016 = vmatmul.msk.f32.gmra.mxu1 %vm346_vm1, %v7105_v19  ;;  %v1736_v9 = vpop.f32.mrf.mxu2 }
 0x272   : > { %v1945_v31 = vpop.f32.mrf.mxu3  ;;  %v2019_v50 = vadd.f32 %v1736_v9, %v6489_v14  ;;  %v5287_v14 = vld [vmem:[%s8238_s2 + $0x1c] sm:$0x7]  ;;  %v7143_v9 = vld [vmem:[%s5654_s10 + $0x170] sm:$0xff] }
 0x273   : > { %v2051_v8 = vadd.f32 %v1945_v31, %v6491_v35  ;;  %5288 = vmatpush.msk.msra.mxu2 %vm443_vm0, %v5287_v14  ;;  %5321 = vmatpush.msk.msra.mxu3 %vm443_vm0, %v5287_v14  ;;  %v7168_v14 = vld [vmem:[%s5656_s11 + $0x180] sm:$0xff] }
 0x274   : > { %v7120_v11 = vadd.f32 %v2159_v12, %v2019_v50 }
 0x275   : > { %v7122_v17 = vadd.f32 %v2368_v44, %v2051_v8  ;;  %v2162_v43 = vpop.f32.mrf.mxu0 }
 0x276   : > { %v2371_v46 = vpop.f32.mrf.mxu1  ;;  %4885 = vmatmul.msk.f32.gmra.mxu2 %vm346_vm1, %v6531_v21 }
 0x277   : > { %8497 = vst [vmem:[#allocation70_spill] sm:$0xff] %v7122_v17  ;;  %4918 = vmatmul.msk.f32.gmra.mxu3 %vm346_vm1, %v7118_v27  ;;  %v7150_v17 = vld [vmem:[%s5656_s11 + $0x171] sm:$0xff] }
 0x278   : > { %4984 = vmatmul.msk.f32.gmra.mxu0 %vm346_vm1, %v7118_v27  ;;  %8500 = vst [vmem:[#allocation73_spill] sm:$0xff] %v7150_v17 }
 0x279   : > { %5017 = vmatmul.msk.f32.gmra.mxu1 %vm346_vm1, %v7125_v60  ;;  %v1739_v35 = vpop.f32.mrf.mxu2 }
 0x27a   : > { %v1948_v21 = vpop.f32.mrf.mxu3  ;;  %v2020_v12 = vadd.f32 %v1739_v35, %v6511_v40  ;;  %v5386_v40 = vld [vmem:[%s8238_s2 + $0x20] sm:$0x7] }
 0x27b   : > { %v2052_v44 = vadd.f32 %v1948_v21, %v6513_v29  ;;  %5387 = vmatpush.msk.msra.mxu0 %vm443_vm0, %v5386_v40  ;;  %5420 = vmatpush.msk.msra.mxu1 %vm443_vm0, %v5386_v40  ;;  %v7171_v35 = vld [vmem:[%s5654_s10 + $0x180] sm:$0xff] }
 0x27c   : > { %v7145_v31 = vadd.f32 %v2162_v43, %v2020_v12  ;;  %v7178_v40 = vld [vmem:[%s5656_s11 + $0x181] sm:$0xff] }
 0x27d   : > { %v7147_v50 = vadd.f32 %v2371_v46, %v2052_v44  ;;  %v2165_v8 = vpop.f32.mrf.mxu0 }
 0x27e   : > { %v2374_v60 = vpop.f32.mrf.mxu1  ;;  %4886 = vmatmul.msk.f32.gmra.mxu2 %vm346_vm1, %v6548_v39 }
 0x27f   : > { %8499 = vst [vmem:[#allocation72_spill] sm:$0xff] %v7147_v50  ;;  %4919 = vmatmul.msk.f32.gmra.mxu3 %vm346_vm1, %v7143_v9  ;;  %v7201_v50 = vld [vmem:[%s5656_s11 + $0x189] sm:$0xff] }
 0x280   : > { %4985 = vmatmul.msk.f32.gmra.mxu0 %vm346_vm1, %v7143_v9  ;;  %8505 = vst [vmem:[#allocation78_spill] sm:$0xff] %v7201_v50 }
 0x281   : > { %5018 = vmatmul.msk.f32.gmra.mxu1 %vm346_vm1, %v7150_v17  ;;  %v1742_v29 = vpop.f32.mrf.mxu2 }
 0x282   : > { %v1951_v39 = vpop.f32.mrf.mxu3  ;;  %v2021_v43 = vadd.f32 %v1742_v29, %v6533_v22  ;;  %v7191_v29 = vld [vmem:[%s5656_s11 + $0x188] sm:$0xff] }
 0x283   : > { %v2053_v46 = vadd.f32 %v1951_v39, %v6535_v52  ;;  %v7194_v39 = vld [vmem:[%s5654_s10 + $0x188] sm:$0xff] }
 0x284   : > { %v7173_v21 = vadd.f32 %v2165_v8, %v2021_v43 }
 0x285   : > { %v7175_v12 = vadd.f32 %v2374_v60, %v2053_v46  ;;  %v2168_v44 = vpop.f32.mrf.mxu0 }
 0x286   : > { %8501 = vst [vmem:[#allocation74_spill] sm:$0xff] %v7173_v21  ;;  %v2377_v17 = vpop.f32.mrf.mxu1  ;;  %4887 = vmatmul.msk.f32.gmra.mxu2 %vm346_vm1, %v7168_v14 }
 0x287   : > { %8502 = vst [vmem:[#allocation75_spill] sm:$0xff] %v7175_v12  ;;  %4920 = vmatmul.msk.f32.gmra.mxu3 %vm346_vm1, %v7171_v35 }
 0x288   : > { %4986 = vmatmul.msk.f32.gmra.mxu0 %vm346_vm1, %v7171_v35 }
 0x289   : > { %5019 = vmatmul.msk.f32.gmra.mxu1 %vm346_vm1, %v7178_v40  ;;  %v1745_v22 = vpop.f32.mrf.mxu2 }
 0x28a   : > { %v1954_v52 = vpop.f32.mrf.mxu3  ;;  %v2022_v60 = vadd.f32 %v1745_v22, %v6550_v30  ;;  %v5021_v22 = vld [vmem:[%s5654_s10 + $0x19] sm:$0xff] }
 0x28b   : > { %v2054_v8 = vadd.f32 %v1954_v52, %v6552_v18 }
 0x28c   : > { %v7196_v43 = vadd.f32 %v2168_v44, %v2022_v60 }
 0x28d   : > { %v7198_v46 = vadd.f32 %v2377_v17, %v2054_v8  ;;  %v2171_v12 = vpop.f32.mrf.mxu0 }
 0x28e   : > { %8503 = vst [vmem:[#allocation76_spill] sm:$0xff] %v7196_v43  ;;  %v2380_v21 = vpop.f32.mrf.mxu1  ;;  %4888 = vmatmul.msk.f32.gmra.mxu2 %vm346_vm1, %v7191_v29  ;;  %v5122_v43 = vld [vmem:[%s5656_s11 + $0x30] sm:$0xff] }
 0x28f   : > { %8504 = vst [vmem:[#allocation77_spill] sm:$0xff] %v7198_v46  ;;  %4921 = vmatmul.msk.f32.gmra.mxu3 %vm346_vm1, %v7194_v39 }
 0x290   : > { %4987 = vmatmul.msk.f32.gmra.mxu0 %vm346_vm1, %v7194_v39 }
 0x291   : > { %5020 = vmatmul.msk.f32.gmra.mxu1 %vm346_vm1, %v7201_v50  ;;  %v1748_v30 = vpop.f32.mrf.mxu2  ;;  %v5123_v50 = vld [vmem:[%s5656_s11 + $0x38] sm:$0xff] }
 0x292   : > { %v1957_v18 = vpop.f32.mrf.mxu3  ;;  %v2023_v17 = vadd.f32 %v1748_v30, %v6564_v25  ;;  %v8508_v25 = vld [vmem:[#allocation6_spill] sm:$0xff] }
 0x293   : > { %v2055_v44 = vadd.f32 %v1957_v18, %v6566_v37 }
 0x294   : > { %v7214_v52 = vadd.f32 %v2171_v12, %v2023_v17  ;;  %v8509_v12 = vld [vmem:[#allocation3_spill] sm:$0xff] }
 0x295   : > { %v7216_v60 = vadd.f32 %v2380_v21, %v2055_v44  ;;  %v2174_v8 = vpop.f32.mrf.mxu0  ;;  %v8510_v21 = vld [vmem:[#allocation4_spill] sm:$0xff]  ;;  %v5022_v44 = vld [vmem:[%s5654_s10 + $0x21] sm:$0xff] }
 0x296   : > { %8506 = vst [vmem:[#allocation79_spill] sm:$0xff] %v7214_v52  ;;  %v2383_v46 = vpop.f32.mrf.mxu1  ;;  %5055 = vmatmul.msk.f32.vlgmr.msrb.gmra.mxu2 %vm346_vm1, %v6569_v38 }
 0x297   : > { %8507 = vst [vmem:[#allocation80_spill] sm:$0xff] %v7216_v60  ;;  %5088 = vmatmul.msk.f32.vlgmr.msrb.gmra.mxu3 %vm346_vm1, %v5021_v22 }
 0x298   : > { %5190 = vmatmul.msk.f32.vlgmr.msrb.gmra.mxu0 %vm346_vm1, %v5122_v43  ;;  %v8513_v43 = vld [vmem:[#allocation5_spill] sm:$0xff] }
 0x299   : > { %5223 = vmatmul.msk.f32.vlgmr.msrb.gmra.mxu1 %vm346_vm1, %v8508_v25  ;;  %v1751_v37 = vpop.f32.mrf.mxu2  ;;  %v8514_v25 = vld [vmem:[#allocation53_spill] sm:$0xff] }
 0x29a   : > { %v1960_v30 = vpop.f32.mrf.mxu3  ;;  %v2024_v18 = vadd.f32 %v1751_v37, %v8509_v12 }
 0x29b   : > { %v2056_v17 = vadd.f32 %v1960_v30, %v8510_v21  ;;  %v7242_v21 = vld [vmem:[%s5654_s10 + $0x31] sm:$0xff] }
 0x29c   : > { %v7228_v60 = vadd.f32 %v2174_v8, %v2024_v18  ;;  %v8515_v8 = vld [vmem:[#allocation7_spill] sm:$0xff]  ;;  %8517 = vst [vmem:[#allocation4_spill] sm:$0xff] %v7242_v21 }
 0x29d   : > { %v7230_v52 = vadd.f32 %v2383_v46, %v2056_v17  ;;  %v2177_v38 = vpop.f32.mrf.mxu0  ;;  %v8516_v46 = vld [vmem:[#allocation8_spill] sm:$0xff] }
 0x29e   : > { %8511 = vst [vmem:[#allocation6_spill] sm:$0xff] %v7228_v60  ;;  %v2386_v22 = vpop.f32.mrf.mxu1  ;;  %5056 = vmatmul.msk.f32.gmra.mxu2 %vm346_vm1, %v8513_v43  ;;  %v8520_v60 = vld [vmem:[#allocation9_spill] sm:$0xff] }
 0x29f   : > { %8512 = vst [vmem:[#allocation3_spill] sm:$0xff] %v7230_v52  ;;  %5089 = vmatmul.msk.f32.gmra.mxu3 %vm346_vm1, %v5022_v44 }
 0x2a0   : > { %5191 = vmatmul.msk.f32.gmra.mxu0 %vm346_vm1, %v5123_v50  ;;  %v5124_v50 = vld [vmem:[%s5656_s11 + $0x48] sm:$0xff] }
 0x2a1   : > { %5224 = vmatmul.msk.f32.gmra.mxu1 %vm346_vm1, %v8514_v25  ;;  %v1754_v37 = vpop.f32.mrf.mxu2  ;;  %v8521_v25 = vld [vmem:[#allocation58_spill] sm:$0xff] }
 0x2a2   : > { %v1963_v30 = vpop.f32.mrf.mxu3  ;;  %v2025_v12 = vadd.f32 %v1754_v37, %v8515_v8  ;;  %v8523_v8 = vld [vmem:[#allocation11_spill] sm:$0xff] }
 0x2a3   : > { %v2057_v18 = vadd.f32 %v1963_v30, %v8516_v46  ;;  %v8522_v30 = vld [vmem:[#allocation10_spill] sm:$0xff] }
 0x2a4   : > { %v7244_v17 = vadd.f32 %v2177_v38, %v2025_v12  ;;  %v7259_v46 = vld [vmem:[%s5654_s10 + $0x39] sm:$0xff] }
 0x2a5   : > { %v7246_v52 = vadd.f32 %v2386_v22, %v2057_v18  ;;  %v2180_v43 = vpop.f32.mrf.mxu0  ;;  %8524 = vst [vmem:[#allocation7_spill] sm:$0xff] %v7259_v46 }
 0x2a6   : > { %8518 = vst [vmem:[#allocation5_spill] sm:$0xff] %v7244_v17  ;;  %v2389_v44 = vpop.f32.mrf.mxu1  ;;  %5057 = vmatmul.msk.f32.gmra.mxu2 %vm346_vm1, %v8520_v60 }
 0x2a7   : > { %8519 = vst [vmem:[#allocation53_spill] sm:$0xff] %v7246_v52  ;;  %5090 = vmatmul.msk.f32.gmra.mxu3 %vm346_vm1, %v7242_v21  ;;  %v8527_v21 = vld [vmem:[#allocation57_spill] sm:$0xff] }
 0x2a8   : > { %5192 = vmatmul.msk.f32.gmra.mxu0 %vm346_vm1, %v5124_v50  ;;  %v5125_v50 = vld [vmem:[%s5656_s11 + $0x50] sm:$0xff] }
 0x2a9   : > { %5225 = vmatmul.msk.f32.gmra.mxu1 %vm346_vm1, %v8521_v25  ;;  %v1757_v37 = vpop.f32.mrf.mxu2  ;;  %v8528_v25 = vld [vmem:[#allocation13_spill] sm:$0xff] }
 0x2aa   : > { %v1966_v38 = vpop.f32.mrf.mxu3  ;;  %v2026_v22 = vadd.f32 %v1757_v37, %v8522_v30  ;;  %v8530_v30 = vld [vmem:[#allocation2_spill] sm:$0xff] }
 0x2ab   : > { %v2058_v12 = vadd.f32 %v1966_v38, %v8523_v8  ;;  %v8529_v38 = vld [vmem:[#allocation16_spill] sm:$0xff] }
 0x2ac   : > { %v7261_v18 = vadd.f32 %v2180_v43, %v2026_v22  ;;  %v7276_v8 = vld [vmem:[%s5654_s10 + $0x49] sm:$0xff] }
 0x2ad   : > { %v7263_v60 = vadd.f32 %v2389_v44, %v2058_v12  ;;  %v2183_v52 = vpop.f32.mrf.mxu0  ;;  %8531 = vst [vmem:[#allocation58_spill] sm:$0xff] %v7276_v8 }
 0x2ae   : > { %8525 = vst [vmem:[#allocation8_spill] sm:$0xff] %v7261_v18  ;;  %v2392_v17 = vpop.f32.mrf.mxu1  ;;  %5058 = vmatmul.msk.f32.gmra.mxu2 %vm346_vm1, %v8527_v21 }
 0x2af   : > { %8526 = vst [vmem:[#allocation9_spill] sm:$0xff] %v7263_v60  ;;  %5091 = vmatmul.msk.f32.gmra.mxu3 %vm346_vm1, %v7259_v46  ;;  %v8534_v46 = vld [vmem:[#allocation12_spill] sm:$0xff] }
 0x2b0   : > { %5193 = vmatmul.msk.f32.gmra.mxu0 %vm346_vm1, %v5125_v50  ;;  %v5126_v50 = vld [vmem:[%s5656_s11 + $0x60] sm:$0xff] }
 0x2b1   : > { %5226 = vmatmul.msk.f32.gmra.mxu1 %vm346_vm1, %v8528_v25  ;;  %v1760_v37 = vpop.f32.mrf.mxu2  ;;  %v8535_v25 = vld [vmem:[#allocation22_spill] sm:$0xff] }
 0x2b2   : > { %v1969_v43 = vpop.f32.mrf.mxu3  ;;  %v2027_v44 = vadd.f32 %v1760_v37, %v8529_v38  ;;  %v8537_v38 = vld [vmem:[#allocation14_spill] sm:$0xff] }
 0x2b3   : > { %v2059_v22 = vadd.f32 %v1969_v43, %v8530_v30  ;;  %v8536_v43 = vld [vmem:[#allocation19_spill] sm:$0xff]  ;;  %v7293_v30 = vld [vmem:[%s5654_s10 + $0x51] sm:$0xff] }
 0x2b4   : > { %v7278_v12 = vadd.f32 %v2183_v52, %v2027_v44  ;;  %8538 = vst [vmem:[#allocation57_spill] sm:$0xff] %v7293_v30 }
 0x2b5   : > { %v7280_v21 = vadd.f32 %v2392_v17, %v2059_v22  ;;  %v2186_v60 = vpop.f32.mrf.mxu0 }
 0x2b6   : > { %8532 = vst [vmem:[#allocation10_spill] sm:$0xff] %v7278_v12  ;;  %v2395_v18 = vpop.f32.mrf.mxu1  ;;  %5059 = vmatmul.msk.f32.gmra.mxu2 %vm346_vm1, %v8534_v46 }
 0x2b7   : > { %8533 = vst [vmem:[#allocation11_spill] sm:$0xff] %v7280_v21  ;;  %5092 = vmatmul.msk.f32.gmra.mxu3 %vm346_vm1, %v7276_v8  ;;  %v8541_v8 = vld [vmem:[#allocation15_spill] sm:$0xff] }
 0x2b8   : > { %5194 = vmatmul.msk.f32.gmra.mxu0 %vm346_vm1, %v5126_v50  ;;  %v5127_v50 = vld [vmem:[%s5656_s11 + $0x68] sm:$0xff] }
 0x2b9   : > { %5227 = vmatmul.msk.f32.gmra.mxu1 %vm346_vm1, %v8535_v25  ;;  %v1763_v37 = vpop.f32.mrf.mxu2  ;;  %v8542_v25 = vld [vmem:[#allocation20_spill] sm:$0xff] }
 0x2ba   : > { %v1972_v52 = vpop.f32.mrf.mxu3  ;;  %v2028_v17 = vadd.f32 %v1763_v37, %v8536_v43  ;;  %v8544_v43 = vld [vmem:[#allocation18_spill] sm:$0xff] }
 0x2bb   : > { %v2060_v44 = vadd.f32 %v1972_v52, %v8537_v38  ;;  %v8543_v52 = vld [vmem:[#allocation17_spill] sm:$0xff]  ;;  %v7310_v38 = vld [vmem:[%s5654_s10 + $0x61] sm:$0xff] }
 0x2bc   : > { %v7295_v22 = vadd.f32 %v2186_v60, %v2028_v17  ;;  %8545 = vst [vmem:[#allocation2_spill] sm:$0xff] %v7310_v38 }
 0x2bd   : > { %v7297_v46 = vadd.f32 %v2395_v18, %v2060_v44  ;;  %v2189_v21 = vpop.f32.mrf.mxu0 }
 0x2be   : > { %8539 = vst [vmem:[#allocation13_spill] sm:$0xff] %v7295_v22  ;;  %v2398_v12 = vpop.f32.mrf.mxu1  ;;  %5060 = vmatmul.msk.f32.gmra.mxu2 %vm346_vm1, %v8541_v8 }
 0x2bf   : > { %8540 = vst [vmem:[#allocation16_spill] sm:$0xff] %v7297_v46  ;;  %5093 = vmatmul.msk.f32.gmra.mxu3 %vm346_vm1, %v7293_v30  ;;  %v8548_v30 = vld [vmem:[#allocation25_spill] sm:$0xff] }
 0x2c0   : > { %5195 = vmatmul.msk.f32.gmra.mxu0 %vm346_vm1, %v5127_v50  ;;  %v5128_v50 = vld [vmem:[%s5656_s11 + $0x78] sm:$0xff] }
 0x2c1   : > { %5228 = vmatmul.msk.f32.gmra.mxu1 %vm346_vm1, %v8542_v25  ;;  %v1766_v37 = vpop.f32.mrf.mxu2  ;;  %v8549_v25 = vld [vmem:[#allocation24_spill] sm:$0xff] }
 0x2c2   : > { %v1975_v60 = vpop.f32.mrf.mxu3  ;;  %v2029_v18 = vadd.f32 %v1766_v37, %v8543_v52  ;;  %v8551_v52 = vld [vmem:[#allocation28_spill] sm:$0xff] }
 0x2c3   : > { %v2061_v17 = vadd.f32 %v1975_v60, %v8544_v43  ;;  %v8550_v60 = vld [vmem:[#allocation21_spill] sm:$0xff]  ;;  %v7327_v43 = vld [vmem:[%s5654_s10 + $0x69] sm:$0xff] }
 0x2c4   : > { %v7312_v44 = vadd.f32 %v2189_v21, %v2029_v18  ;;  %8552 = vst [vmem:[#allocation19_spill] sm:$0xff] %v7327_v43 }
 0x2c5   : > { %v7314_v8 = vadd.f32 %v2398_v12, %v2061_v17  ;;  %v2192_v46 = vpop.f32.mrf.mxu0 }
 0x2c6   : > { %8546 = vst [vmem:[#allocation12_spill] sm:$0xff] %v7312_v44  ;;  %v2401_v22 = vpop.f32.mrf.mxu1  ;;  %5061 = vmatmul.msk.f32.gmra.mxu2 %vm346_vm1, %v8548_v30 }
 0x2c7   : > { %8547 = vst [vmem:[#allocation22_spill] sm:$0xff] %v7314_v8  ;;  %5094 = vmatmul.msk.f32.gmra.mxu3 %vm346_vm1, %v7310_v38  ;;  %v8555_v38 = vld [vmem:[#allocation23_spill] sm:$0xff] }
 0x2c8   : > { %5196 = vmatmul.msk.f32.gmra.mxu0 %vm346_vm1, %v5128_v50  ;;  %v5129_v50 = vld [vmem:[%s5656_s11 + $0x80] sm:$0xff] }
 0x2c9   : > { %5229 = vmatmul.msk.f32.gmra.mxu1 %vm346_vm1, %v8549_v25  ;;  %v1769_v37 = vpop.f32.mrf.mxu2  ;;  %v8556_v25 = vld [vmem:[#allocation34_spill] sm:$0xff] }
 0x2ca   : > { %v1978_v21 = vpop.f32.mrf.mxu3  ;;  %v2030_v12 = vadd.f32 %v1769_v37, %v8550_v60  ;;  %v8558_v60 = vld [vmem:[#allocation26_spill] sm:$0xff] }
 0x2cb   : > { %v2062_v18 = vadd.f32 %v1978_v21, %v8551_v52  ;;  %v8557_v21 = vld [vmem:[#allocation31_spill] sm:$0xff]  ;;  %v7344_v52 = vld [vmem:[%s5654_s10 + $0x79] sm:$0xff] }
 0x2cc   : > { %v7329_v17 = vadd.f32 %v2192_v46, %v2030_v12  ;;  %8559 = vst [vmem:[#allocation20_spill] sm:$0xff] %v7344_v52 }
 0x2cd   : > { %v7331_v30 = vadd.f32 %v2401_v22, %v2062_v18  ;;  %v2195_v8 = vpop.f32.mrf.mxu0 }
 0x2ce   : > { %8553 = vst [vmem:[#allocation14_spill] sm:$0xff] %v7329_v17  ;;  %v2404_v44 = vpop.f32.mrf.mxu1  ;;  %5062 = vmatmul.msk.f32.gmra.mxu2 %vm346_vm1, %v8555_v38 }
 0x2cf   : > { %8554 = vst [vmem:[#allocation15_spill] sm:$0xff] %v7331_v30  ;;  %5095 = vmatmul.msk.f32.gmra.mxu3 %vm346_vm1, %v7327_v43  ;;  %v8562_v43 = vld [vmem:[#allocation27_spill] sm:$0xff] }
 0x2d0   : > { %5197 = vmatmul.msk.f32.gmra.mxu0 %vm346_vm1, %v5129_v50  ;;  %v5130_v50 = vld [vmem:[%s5656_s11 + $0x90] sm:$0xff] }
 0x2d1   : > { %5230 = vmatmul.msk.f32.gmra.mxu1 %vm346_vm1, %v8556_v25  ;;  %v1772_v37 = vpop.f32.mrf.mxu2  ;;  %v8563_v25 = vld [vmem:[#allocation32_spill] sm:$0xff] }
 0x2d2   : > { %v1981_v46 = vpop.f32.mrf.mxu3  ;;  %v2031_v22 = vadd.f32 %v1772_v37, %v8557_v21  ;;  %v8565_v21 = vld [vmem:[#allocation30_spill] sm:$0xff] }
 0x2d3   : > { %v2063_v12 = vadd.f32 %v1981_v46, %v8558_v60  ;;  %v8564_v46 = vld [vmem:[#allocation29_spill] sm:$0xff]  ;;  %v7361_v60 = vld [vmem:[%s5654_s10 + $0x81] sm:$0xff] }
 0x2d4   : > { %v7346_v18 = vadd.f32 %v2195_v8, %v2031_v22  ;;  %8566 = vst [vmem:[#allocation25_spill] sm:$0xff] %v7361_v60 }
 0x2d5   : > { %v7348_v38 = vadd.f32 %v2404_v44, %v2063_v12  ;;  %v2198_v30 = vpop.f32.mrf.mxu0 }
 0x2d6   : > { %8560 = vst [vmem:[#allocation17_spill] sm:$0xff] %v7346_v18  ;;  %v2407_v17 = vpop.f32.mrf.mxu1  ;;  %5063 = vmatmul.msk.f32.gmra.mxu2 %vm346_vm1, %v8562_v43 }
 0x2d7   : > { %8561 = vst [vmem:[#allocation18_spill] sm:$0xff] %v7348_v38  ;;  %5096 = vmatmul.msk.f32.gmra.mxu3 %vm346_vm1, %v7344_v52  ;;  %v8569_v52 = vld [vmem:[#allocation37_spill] sm:$0xff] }
 0x2d8   : > { %5198 = vmatmul.msk.f32.gmra.mxu0 %vm346_vm1, %v5130_v50  ;;  %v5131_v50 = vld [vmem:[%s5656_s11 + $0x98] sm:$0xff] }
 0x2d9   : > { %5231 = vmatmul.msk.f32.gmra.mxu1 %vm346_vm1, %v8563_v25  ;;  %v1775_v37 = vpop.f32.mrf.mxu2  ;;  %v8570_v25 = vld [vmem:[#allocation36_spill] sm:$0xff] }
 0x2da   : > { %v1984_v8 = vpop.f32.mrf.mxu3  ;;  %v2032_v44 = vadd.f32 %v1775_v37, %v8564_v46  ;;  %v8572_v46 = vld [vmem:[#allocation40_spill] sm:$0xff] }
 0x2db   : > { %v2064_v22 = vadd.f32 %v1984_v8, %v8565_v21  ;;  %v8571_v8 = vld [vmem:[#allocation33_spill] sm:$0xff] }
 0x2dc   : > { %v7363_v12 = vadd.f32 %v2198_v30, %v2032_v44  ;;  %v7378_v21 = vld [vmem:[%s5654_s10 + $0x91] sm:$0xff] }
 0x2dd   : > { %v7365_v43 = vadd.f32 %v2407_v17, %v2064_v22  ;;  %v2201_v38 = vpop.f32.mrf.mxu0  ;;  %8573 = vst [vmem:[#allocation28_spill] sm:$0xff] %v7378_v21 }
 0x2de   : > { %8567 = vst [vmem:[#allocation24_spill] sm:$0xff] %v7363_v12  ;;  %v2410_v18 = vpop.f32.mrf.mxu1  ;;  %5064 = vmatmul.msk.f32.gmra.mxu2 %vm346_vm1, %v8569_v52 }
 0x2df   : > { %8568 = vst [vmem:[#allocation21_spill] sm:$0xff] %v7365_v43  ;;  %5097 = vmatmul.msk.f32.gmra.mxu3 %vm346_vm1, %v7361_v60  ;;  %v8576_v60 = vld [vmem:[#allocation35_spill] sm:$0xff] }
 0x2e0   : > { %5199 = vmatmul.msk.f32.gmra.mxu0 %vm346_vm1, %v5131_v50  ;;  %v5132_v50 = vld [vmem:[%s5656_s11 + $0xa8] sm:$0xff] }
 0x2e1   : > { %5232 = vmatmul.msk.f32.gmra.mxu1 %vm346_vm1, %v8570_v25  ;;  %v1778_v37 = vpop.f32.mrf.mxu2  ;;  %v8577_v25 = vld [vmem:[#allocation46_spill] sm:$0xff] }
 0x2e2   : > { %v1987_v30 = vpop.f32.mrf.mxu3  ;;  %v2033_v17 = vadd.f32 %v1778_v37, %v8571_v8  ;;  %v8579_v8 = vld [vmem:[#allocation38_spill] sm:$0xff] }
 0x2e3   : > { %v2065_v44 = vadd.f32 %v1987_v30, %v8572_v46  ;;  %v8578_v30 = vld [vmem:[#allocation43_spill] sm:$0xff]  ;;  %v7395_v46 = vld [vmem:[%s5654_s10 + $0x99] sm:$0xff] }
 0x2e4   : > { %v7380_v22 = vadd.f32 %v2201_v38, %v2033_v17  ;;  %8580 = vst [vmem:[#allocation31_spill] sm:$0xff] %v7395_v46 }
 0x2e5   : > { %v7382_v52 = vadd.f32 %v2410_v18, %v2065_v44  ;;  %v2204_v43 = vpop.f32.mrf.mxu0 }
 0x2e6   : > { %8574 = vst [vmem:[#allocation23_spill] sm:$0xff] %v7380_v22  ;;  %v2413_v12 = vpop.f32.mrf.mxu1  ;;  %5065 = vmatmul.msk.f32.gmra.mxu2 %vm346_vm1, %v8576_v60 }
 0x2e7   : > { %8575 = vst [vmem:[#allocation34_spill] sm:$0xff] %v7382_v52  ;;  %5098 = vmatmul.msk.f32.gmra.mxu3 %vm346_vm1, %v7378_v21  ;;  %v8583_v21 = vld [vmem:[#allocation39_spill] sm:$0xff] }
 0x2e8   : > { %5200 = vmatmul.msk.f32.gmra.mxu0 %vm346_vm1, %v5132_v50  ;;  %v5133_v50 = vld [vmem:[%s5656_s11 + $0xb0] sm:$0xff] }
 0x2e9   : > { %5233 = vmatmul.msk.f32.gmra.mxu1 %vm346_vm1, %v8577_v25  ;;  %v1781_v37 = vpop.f32.mrf.mxu2  ;;  %v8584_v25 = vld [vmem:[#allocation44_spill] sm:$0xff] }
 0x2ea   : > { %v1990_v38 = vpop.f32.mrf.mxu3  ;;  %v2034_v18 = vadd.f32 %v1781_v37, %v8578_v30  ;;  %v8586_v30 = vld [vmem:[#allocation42_spill] sm:$0xff] }
 0x2eb   : > { %v2066_v17 = vadd.f32 %v1990_v38, %v8579_v8  ;;  %v8585_v38 = vld [vmem:[#allocation41_spill] sm:$0xff]  ;;  %v7412_v8 = vld [vmem:[%s5654_s10 + $0xa9] sm:$0xff] }
 0x2ec   : > { %v7397_v44 = vadd.f32 %v2204_v43, %v2034_v18 }
 0x2ed   : > { %v7399_v60 = vadd.f32 %v2413_v12, %v2066_v17  ;;  %v2207_v52 = vpop.f32.mrf.mxu0 }
 0x2ee   : > { %8581 = vst [vmem:[#allocation26_spill] sm:$0xff] %v7397_v44  ;;  %v2416_v22 = vpop.f32.mrf.mxu1  ;;  %5066 = vmatmul.msk.f32.gmra.mxu2 %vm346_vm1, %v8583_v21 }
 0x2ef   : > { %8582 = vst [vmem:[#allocation27_spill] sm:$0xff] %v7399_v60  ;;  %5099 = vmatmul.msk.f32.gmra.mxu3 %vm346_vm1, %v7395_v46  ;;  %v8589_v46 = vld [vmem:[#allocation49_spill] sm:$0xff] }
 0x2f0   : > { %5201 = vmatmul.msk.f32.gmra.mxu0 %vm346_vm1, %v5133_v50  ;;  %v5134_v50 = vld [vmem:[%s5656_s11 + $0xc0] sm:$0xff] }
 0x2f1   : > { %5234 = vmatmul.msk.f32.gmra.mxu1 %vm346_vm1, %v8584_v25  ;;  %v1784_v37 = vpop.f32.mrf.mxu2 }
 0x2f2   : > { %v1993_v43 = vpop.f32.mrf.mxu3  ;;  %v2035_v12 = vadd.f32 %v1784_v37, %v8585_v38  ;;  %v8590_v37 = vld [vmem:[#allocation45_spill] sm:$0xff] }
 0x2f3   : > { %v2067_v18 = vadd.f32 %v1993_v43, %v8586_v30  ;;  %v8591_v43 = vld [vmem:[#allocation52_spill] sm:$0xff] }
 0x2f4   : > { %v7414_v17 = vadd.f32 %v2207_v52, %v2035_v12  ;;  %v7429_v12 = vld [vmem:[%s5654_s10 + $0xb1] sm:$0xff] }
 0x2f5   : > { %v7416_v21 = vadd.f32 %v2416_v22, %v2067_v18  ;;  %v2210_v60 = vpop.f32.mrf.mxu0 }
 0x2f6   : > { %8587 = vst [vmem:[#allocation32_spill] sm:$0xff] %v7414_v17  ;;  %v2419_v44 = vpop.f32.mrf.mxu1  ;;  %5067 = vmatmul.msk.f32.gmra.mxu2 %vm346_vm1, %v8589_v46  ;;  %v8594_v17 = vld [vmem:[#allocation47_spill] sm:$0xff] }
 0x2f7   : > { %8588 = vst [vmem:[#allocation29_spill] sm:$0xff] %v7416_v21  ;;  %5100 = vmatmul.msk.f32.gmra.mxu3 %vm346_vm1, %v7412_v8 }
 0x2f8   : > { %5202 = vmatmul.msk.f32.gmra.mxu0 %vm346_vm1, %v5134_v50  ;;  %v5135_v50 = vld [vmem:[%s5656_s11 + $0xc8] sm:$0xff] }
 0x2f9   : > { %5235 = vmatmul.msk.f32.gmra.mxu1 %vm346_vm1, %v6838_v33  ;;  %v1787_v25 = vpop.f32.mrf.mxu2 }
 0x2fa   : > { %v1996_v52 = vpop.f32.mrf.mxu3  ;;  %v2036_v22 = vadd.f32 %v1787_v25, %v8590_v37  ;;  %v8595_v25 = vld [vmem:[#allocation48_spill] sm:$0xff] }
 0x2fb   : > { %v2068_v38 = vadd.f32 %v1996_v52, %v8591_v43  ;;  %v8596_v52 = vld [vmem:[#allocation56_spill] sm:$0xff] }
 0x2fc   : > { %v7431_v30 = vadd.f32 %v2210_v60, %v2036_v22  ;;  %v7446_v22 = vld [vmem:[%s5654_s10 + $0xc1] sm:$0xff] }
 0x2fd   : > { %v7433_v46 = vadd.f32 %v2419_v44, %v2068_v38  ;;  %v2213_v18 = vpop.f32.mrf.mxu0 }
 0x2fe   : > { %8592 = vst [vmem:[#allocation30_spill] sm:$0xff] %v7431_v30  ;;  %v2422_v21 = vpop.f32.mrf.mxu1  ;;  %5068 = vmatmul.msk.f32.gmra.mxu2 %vm346_vm1, %v8594_v17  ;;  %v8598_v30 = vld [vmem:[#allocation50_spill] sm:$0xff] }
 0x2ff   : > { %8593 = vst [vmem:[#allocation37_spill] sm:$0xff] %v7433_v46  ;;  %5101 = vmatmul.msk.f32.gmra.mxu3 %vm346_vm1, %v7429_v12 }
 0x300   : > { %5203 = vmatmul.msk.f32.gmra.mxu0 %vm346_vm1, %v5135_v50  ;;  %v5136_v50 = vld [vmem:[%s5656_s11 + $0xd8] sm:$0xff] }
 0x301   : > { %5236 = vmatmul.msk.f32.gmra.mxu1 %vm346_vm1, %v6858_v36  ;;  %v1790_v33 = vpop.f32.mrf.mxu2 }
 0x302   : > { %v1999_v60 = vpop.f32.mrf.mxu3  ;;  %v2037_v44 = vadd.f32 %v1790_v33, %v8595_v25  ;;  %v8599_v33 = vld [vmem:[#allocation51_spill] sm:$0xff] }
 0x303   : > { %v2069_v37 = vadd.f32 %v1999_v60, %v8596_v52  ;;  %v8600_v60 = vld [vmem:[#allocation61_spill] sm:$0xff] }
 0x304   : > { %v7448_v43 = vadd.f32 %v2213_v18, %v2037_v44  ;;  %v7463_v44 = vld [vmem:[%s5654_s10 + $0xc9] sm:$0xff] }
 0x305   : > { %v7450_v17 = vadd.f32 %v2422_v21, %v2069_v37  ;;  %v2216_v38 = vpop.f32.mrf.mxu0 }
 0x306   : > { %v2425_v46 = vpop.f32.mrf.mxu1  ;;  %5069 = vmatmul.msk.f32.gmra.mxu2 %vm346_vm1, %v8598_v30 }
 0x307   : > { %8597 = vst [vmem:[#allocation36_spill] sm:$0xff] %v7450_v17  ;;  %5102 = vmatmul.msk.f32.gmra.mxu3 %vm346_vm1, %v7446_v22 }
 0x308   : > { %5204 = vmatmul.msk.f32.gmra.mxu0 %vm346_vm1, %v5136_v50  ;;  %v5137_v50 = vld [vmem:[%s5656_s11 + $0xe0] sm:$0xff] }
 0x309   : > { %5237 = vmatmul.msk.f32.gmra.mxu1 %vm346_vm1, %v6878_v32  ;;  %v1793_v36 = vpop.f32.mrf.mxu2 }
 0x30a   : > { %v2002_v18 = vpop.f32.mrf.mxu3  ;;  %v2038_v21 = vadd.f32 %v1793_v36, %v8599_v33  ;;  %v8601_v36 = vld [vmem:[#allocation54_spill] sm:$0xff] }
 0x30b   : > { %v2070_v25 = vadd.f32 %v2002_v18, %v8600_v60  ;;  %v7480_v33 = vld [vmem:[%s5654_s10 + $0xd9] sm:$0xff] }
 0x30c   : > { %v7465_v52 = vadd.f32 %v2216_v38, %v2038_v21 }
 0x30d   : > { %v7467_v30 = vadd.f32 %v2425_v46, %v2070_v25  ;;  %v2219_v37 = vpop.f32.mrf.mxu0 }
 0x30e   : > { %v2428_v17 = vpop.f32.mrf.mxu1  ;;  %5070 = vmatmul.msk.f32.gmra.mxu2 %vm346_vm1, %v6865_v47 }
 0x30f   : > { %5103 = vmatmul.msk.f32.gmra.mxu3 %vm346_vm1, %v7463_v44 }
 0x310   : > { %5205 = vmatmul.msk.f32.gmra.mxu0 %vm346_vm1, %v5137_v50  ;;  %v5138_v50 = vld [vmem:[%s5656_s11 + $0xf0] sm:$0xff] }
 0x311   : > { %5238 = vmatmul.msk.f32.gmra.mxu1 %vm346_vm1, %v6898_v41  ;;  %v1796_v32 = vpop.f32.mrf.mxu2 }
 0x312   : > { %v2005_v38 = vpop.f32.mrf.mxu3  ;;  %v2039_v46 = vadd.f32 %v1796_v32, %v6880_v28 }
 0x313   : > { %v2071_v18 = vadd.f32 %v2005_v38, %v8601_v36  ;;  %v7497_v38 = vld [vmem:[%s5654_s10 + $0xe1] sm:$0xff] }
 0x314   : > { %v7482_v21 = vadd.f32 %v2219_v37, %v2039_v46  ;;  %v8602_v37 = vld [vmem:[#allocation55_spill] sm:$0xff] }
 0x315   : > { %v7484_v47 = vadd.f32 %v2428_v17, %v2071_v18  ;;  %v3104_v60 = vpop.f32.mrf.mxu0 }
 0x316   : > { %v3313_v25 = vpop.f32.mrf.mxu1  ;;  %5071 = vmatmul.msk.f32.gmra.mxu2 %vm346_vm1, %v6885_v26 }
 0x317   : > { %5104 = vmatmul.msk.f32.gmra.mxu3 %vm346_vm1, %v7480_v33 }
 0x318   : > { %5206 = vmatmul.msk.f32.gmra.mxu0 %vm346_vm1, %v5138_v50  ;;  %v5139_v50 = vld [vmem:[%s5656_s11 + $0xf8] sm:$0xff] }
 0x319   : > { %5239 = vmatmul.msk.f32.gmra.mxu1 %vm346_vm1, %v6918_v45  ;;  %v2549_v28 = vpop.f32.mrf.mxu2 }
 0x31a   : > { %v2758_v41 = vpop.f32.mrf.mxu3  ;;  %v2854_v17 = vadd.f32 %v2549_v28, %v6900_v34 }
 0x31b   : > { %v2886_v32 = vadd.f32 %v2758_v41, %v8602_v37  ;;  %v7514_v41 = vld [vmem:[%s5654_s10 + $0xf1] sm:$0xff] }
 0x31c   : > { %v7499_v46 = vadd.f32 %v3104_v60, %v2854_v17 }
 0x31d   : > { %v7501_v26 = vadd.f32 %v3313_v25, %v2886_v32  ;;  %v3107_v36 = vpop.f32.mrf.mxu0  ;;  %v8603_v25 = vld [vmem:[#allocation59_spill] sm:$0xff] }
 0x31e   : > { %v3316_v18 = vpop.f32.mrf.mxu1  ;;  %5072 = vmatmul.msk.f32.gmra.mxu2 %vm346_vm1, %v6905_v63 }
 0x31f   : > { %5105 = vmatmul.msk.f32.gmra.mxu3 %vm346_vm1, %v7497_v38 }
 0x320   : > { %5207 = vmatmul.msk.f32.gmra.mxu0 %vm346_vm1, %v5139_v50  ;;  %v5140_v50 = vld [vmem:[%s5656_s11 + $0x108] sm:$0xff] }
 0x321   : > { %5240 = vmatmul.msk.f32.gmra.mxu1 %vm346_vm1, %v6938_v62  ;;  %v2552_v34 = vpop.f32.mrf.mxu2 }
 0x322   : > { %v2761_v45 = vpop.f32.mrf.mxu3  ;;  %v2855_v60 = vadd.f32 %v2552_v34, %v6920_v42 }
 0x323   : > { %v2887_v28 = vadd.f32 %v2761_v45, %v8603_v25  ;;  %v7531_v45 = vld [vmem:[%s5654_s10 + $0xf9] sm:$0xff] }
 0x324   : > { %v7516_v17 = vadd.f32 %v3107_v36, %v2855_v60 }
 0x325   : > { %v7518_v63 = vadd.f32 %v3316_v18, %v2887_v28  ;;  %v3110_v37 = vpop.f32.mrf.mxu0  ;;  %v8604_v18 = vld [vmem:[#allocation60_spill] sm:$0xff] }
 0x326   : > { %v3319_v32 = vpop.f32.mrf.mxu1  ;;  %5073 = vmatmul.msk.f32.gmra.mxu2 %vm346_vm1, %v6925_v58 }
 0x327   : > { %5106 = vmatmul.msk.f32.gmra.mxu3 %vm346_vm1, %v7514_v41 }
 0x328   : > { %5208 = vmatmul.msk.f32.gmra.mxu0 %vm346_vm1, %v5140_v50  ;;  %v5141_v50 = vld [vmem:[%s5656_s11 + $0x110] sm:$0xff] }
 0x329   : > { %5241 = vmatmul.msk.f32.gmra.mxu1 %vm346_vm1, %v6958_v59  ;;  %v2555_v42 = vpop.f32.mrf.mxu2 }
 0x32a   : > { %v2764_v62 = vpop.f32.mrf.mxu3  ;;  %v2856_v36 = vadd.f32 %v2555_v42, %v6940_v10 }
 0x32b   : > { %v2888_v34 = vadd.f32 %v2764_v62, %v8604_v18  ;;  %v7548_v62 = vld [vmem:[%s5654_s10 + $0x109] sm:$0xff] }
 0x32c   : > { %v7533_v60 = vadd.f32 %v3110_v37, %v2856_v36 }
 0x32d   : > { %v7535_v58 = vadd.f32 %v3319_v32, %v2888_v34  ;;  %v3113_v25 = vpop.f32.mrf.mxu0  ;;  %v8605_v32 = vld [vmem:[#allocation62_spill] sm:$0xff] }
 0x32e   : > { %v3322_v28 = vpop.f32.mrf.mxu1  ;;  %5074 = vmatmul.msk.f32.gmra.mxu2 %vm346_vm1, %v6945_v54 }
 0x32f   : > { %5107 = vmatmul.msk.f32.gmra.mxu3 %vm346_vm1, %v7531_v45 }
 0x330   : > { %5209 = vmatmul.msk.f32.gmra.mxu0 %vm346_vm1, %v5141_v50  ;;  %v5142_v50 = vld [vmem:[%s5656_s11 + $0x120] sm:$0xff] }
 0x331   : > { %5242 = vmatmul.msk.f32.gmra.mxu1 %vm346_vm1, %v6978_v56  ;;  %v2558_v10 = vpop.f32.mrf.mxu2 }
 0x332   : > { %v2767_v59 = vpop.f32.mrf.mxu3  ;;  %v2857_v37 = vadd.f32 %v2558_v10, %v6960_v0 }
 0x333   : > { %v2889_v42 = vadd.f32 %v2767_v59, %v8605_v32  ;;  %v7565_v59 = vld [vmem:[%s5654_s10 + $0x111] sm:$0xff] }
 0x334   : > { %v7550_v36 = vadd.f32 %v3113_v25, %v2857_v37 }
 0x335   : > { %v7552_v54 = vadd.f32 %v3322_v28, %v2889_v42  ;;  %v3116_v18 = vpop.f32.mrf.mxu0  ;;  %v8606_v28 = vld [vmem:[#allocation63_spill] sm:$0xff] }
 0x336   : > { %v3325_v34 = vpop.f32.mrf.mxu1  ;;  %5075 = vmatmul.msk.f32.gmra.mxu2 %vm346_vm1, %v6965_v53 }
 0x337   : > { %5108 = vmatmul.msk.f32.gmra.mxu3 %vm346_vm1, %v7548_v62 }
 0x338   : > { %5210 = vmatmul.msk.f32.gmra.mxu0 %vm346_vm1, %v5142_v50  ;;  %v5143_v50 = vld [vmem:[%s5656_s11 + $0x128] sm:$0xff] }
 0x339   : > { %5243 = vmatmul.msk.f32.gmra.mxu1 %vm346_vm1, %v6998_v55  ;;  %v2561_v0 = vpop.f32.mrf.mxu2 }
 0x33a   : > { %v2770_v56 = vpop.f32.mrf.mxu3  ;;  %v2858_v25 = vadd.f32 %v2561_v0, %v6980_v3 }
 0x33b   : > { %v2890_v10 = vadd.f32 %v2770_v56, %v8606_v28  ;;  %v7582_v56 = vld [vmem:[%s5654_s10 + $0x121] sm:$0xff] }
 0x33c   : > { %v7567_v37 = vadd.f32 %v3116_v18, %v2858_v25 }
 0x33d   : > { %v7569_v53 = vadd.f32 %v3325_v34, %v2890_v10  ;;  %v3119_v32 = vpop.f32.mrf.mxu0  ;;  %v8607_v34 = vld [vmem:[#allocation64_spill] sm:$0xff] }
 0x33e   : > { %v3328_v42 = vpop.f32.mrf.mxu1  ;;  %5076 = vmatmul.msk.f32.gmra.mxu2 %vm346_vm1, %v6985_v51 }
 0x33f   : > { %5109 = vmatmul.msk.f32.gmra.mxu3 %vm346_vm1, %v7565_v59 }
 0x340   : > { %5211 = vmatmul.msk.f32.gmra.mxu0 %vm346_vm1, %v5143_v50  ;;  %v5144_v50 = vld [vmem:[%s5656_s11 + $0x138] sm:$0xff] }
 0x341   : > { %5244 = vmatmul.msk.f32.gmra.mxu1 %vm346_vm1, %v7018_v49  ;;  %v2564_v3 = vpop.f32.mrf.mxu2 }
 0x342   : > { %v2773_v55 = vpop.f32.mrf.mxu3  ;;  %v2859_v18 = vadd.f32 %v2564_v3, %v7000_v7 }
 0x343   : > { %v2891_v0 = vadd.f32 %v2773_v55, %v8607_v34  ;;  %v7599_v55 = vld [vmem:[%s5654_s10 + $0x129] sm:$0xff] }
 0x344   : > { %v7584_v25 = vadd.f32 %v3119_v32, %v2859_v18 }
 0x345   : > { %v7586_v51 = vadd.f32 %v3328_v42, %v2891_v0  ;;  %v3122_v28 = vpop.f32.mrf.mxu0  ;;  %v8608_v42 = vld [vmem:[#allocation65_spill] sm:$0xff] }
 0x346   : > { %v3331_v10 = vpop.f32.mrf.mxu1  ;;  %5077 = vmatmul.msk.f32.gmra.mxu2 %vm346_vm1, %v7005_v1 }
 0x347   : > { %5110 = vmatmul.msk.f32.gmra.mxu3 %vm346_vm1, %v7582_v56 }
 0x348   : > { %5212 = vmatmul.msk.f32.gmra.mxu0 %vm346_vm1, %v5144_v50  ;;  %v5145_v50 = vld [vmem:[%s5656_s11 + $0x140] sm:$0xff] }
 0x349   : > { %5245 = vmatmul.msk.f32.gmra.mxu1 %vm346_vm1, %v7038_v2  ;;  %v2567_v7 = vpop.f32.mrf.mxu2 }
 0x34a   : > { %v2776_v49 = vpop.f32.mrf.mxu3  ;;  %v2860_v32 = vadd.f32 %v2567_v7, %v7020_v4 }
 0x34b   : > { %v2892_v3 = vadd.f32 %v2776_v49, %v8608_v42  ;;  %v7616_v49 = vld [vmem:[%s5654_s10 + $0x139] sm:$0xff] }
 0x34c   : > { %v7601_v18 = vadd.f32 %v3122_v28, %v2860_v32 }
 0x34d   : > { %v7603_v1 = vadd.f32 %v3331_v10, %v2892_v3  ;;  %v3125_v34 = vpop.f32.mrf.mxu0  ;;  %v8609_v10 = vld [vmem:[#allocation66_spill] sm:$0xff] }
 0x34e   : > { %v3334_v0 = vpop.f32.mrf.mxu1  ;;  %5078 = vmatmul.msk.f32.gmra.mxu2 %vm346_vm1, %v7025_v16 }
 0x34f   : > { %5111 = vmatmul.msk.f32.gmra.mxu3 %vm346_vm1, %v7599_v55 }
 0x350   : > { %5213 = vmatmul.msk.f32.gmra.mxu0 %vm346_vm1, %v5145_v50  ;;  %v5146_v50 = vld [vmem:[%s5656_s11 + $0x150] sm:$0xff] }
 0x351   : > { %5246 = vmatmul.msk.f32.gmra.mxu1 %vm346_vm1, %v7058_v5  ;;  %v2570_v4 = vpop.f32.mrf.mxu2 }
 0x352   : > { %v2779_v2 = vpop.f32.mrf.mxu3  ;;  %v2861_v28 = vadd.f32 %v2570_v4, %v7040_v61 }
 0x353   : > { %v2893_v7 = vadd.f32 %v2779_v2, %v8609_v10  ;;  %v7633_v2 = vld [vmem:[%s5654_s10 + $0x141] sm:$0xff] }
 0x354   : > { %v7618_v32 = vadd.f32 %v3125_v34, %v2861_v28 }
 0x355   : > { %v7620_v16 = vadd.f32 %v3334_v0, %v2893_v7  ;;  %v3128_v42 = vpop.f32.mrf.mxu0  ;;  %v8610_v0 = vld [vmem:[#allocation67_spill] sm:$0xff] }
 0x356   : > { %v3337_v3 = vpop.f32.mrf.mxu1  ;;  %5079 = vmatmul.msk.f32.gmra.mxu2 %vm346_vm1, %v7045_v57 }
 0x357   : > { %5112 = vmatmul.msk.f32.gmra.mxu3 %vm346_vm1, %v7616_v49 }
 0x358   : > { %5214 = vmatmul.msk.f32.gmra.mxu0 %vm346_vm1, %v5146_v50  ;;  %v5147_v50 = vld [vmem:[%s5656_s11 + $0x158] sm:$0xff] }
 0x359   : > { %5247 = vmatmul.msk.f32.gmra.mxu1 %vm346_vm1, %v7078_v13  ;;  %v2573_v61 = vpop.f32.mrf.mxu2 }
 0x35a   : > { %v2782_v5 = vpop.f32.mrf.mxu3  ;;  %v2862_v34 = vadd.f32 %v2573_v61, %v7060_v6 }
 0x35b   : > { %v2894_v4 = vadd.f32 %v2782_v5, %v8610_v0  ;;  %v7650_v5 = vld [vmem:[%s5654_s10 + $0x151] sm:$0xff] }
 0x35c   : > { %v7635_v28 = vadd.f32 %v3128_v42, %v2862_v34 }
 0x35d   : > { %v7637_v57 = vadd.f32 %v3337_v3, %v2894_v4  ;;  %v3131_v10 = vpop.f32.mrf.mxu0  ;;  %v8611_v3 = vld [vmem:[#allocation68_spill] sm:$0xff] }
 0x35e   : > { %v3340_v7 = vpop.f32.mrf.mxu1  ;;  %5080 = vmatmul.msk.f32.gmra.mxu2 %vm346_vm1, %v7065_v23 }
 0x35f   : > { %5113 = vmatmul.msk.f32.gmra.mxu3 %vm346_vm1, %v7633_v2 }
 0x360   : > { %5215 = vmatmul.msk.f32.gmra.mxu0 %vm346_vm1, %v5147_v50  ;;  %v5148_v50 = vld [vmem:[%s5656_s11 + $0x168] sm:$0xff] }
 0x361   : > { %5248 = vmatmul.msk.f32.gmra.mxu1 %vm346_vm1, %v7098_v15  ;;  %v2576_v6 = vpop.f32.mrf.mxu2 }
 0x362   : > { %v2785_v13 = vpop.f32.mrf.mxu3  ;;  %v2863_v42 = vadd.f32 %v2576_v6, %v7080_v20 }
 0x363   : > { %v2895_v61 = vadd.f32 %v2785_v13, %v8611_v3  ;;  %v7667_v13 = vld [vmem:[%s5654_s10 + $0x159] sm:$0xff] }
 0x364   : > { %v7652_v34 = vadd.f32 %v3131_v10, %v2863_v42 }
 0x365   : > { %v7654_v23 = vadd.f32 %v3340_v7, %v2895_v61  ;;  %v3134_v0 = vpop.f32.mrf.mxu0  ;;  %v8613_v7 = vld [vmem:[#allocation69_spill] sm:$0xff] }
 0x366   : > { %v3343_v4 = vpop.f32.mrf.mxu1  ;;  %5081 = vmatmul.msk.f32.gmra.mxu2 %vm346_vm1, %v7085_v48 }
 0x367   : > { %8612 = vst [vmem:[#allocation33_spill] sm:$0xff] %v7654_v23  ;;  %5114 = vmatmul.msk.f32.gmra.mxu3 %vm346_vm1, %v7650_v5  ;;  %v5149_v23 = vld [vmem:[%s5656_s11 + $0x170] sm:$0xff] }
 0x368   : > { %5216 = vmatmul.msk.f32.gmra.mxu0 %vm346_vm1, %v5148_v50 }
 0x369   : > { %5249 = vmatmul.msk.f32.gmra.mxu1 %vm346_vm1, %v7118_v27  ;;  %v2579_v20 = vpop.f32.mrf.mxu2 }
 0x36a   : > { %v2788_v15 = vpop.f32.mrf.mxu3  ;;  %v2864_v10 = vadd.f32 %v2579_v20, %v7100_v24  ;;  %v7684_v20 = vld [vmem:[%s5654_s10 + $0x169] sm:$0xff] }
 0x36b   : > { %v2896_v6 = vadd.f32 %v2788_v15, %v8613_v7 }
 0x36c   : > { %v7669_v42 = vadd.f32 %v3134_v0, %v2864_v10 }
 0x36d   : > { %v7671_v48 = vadd.f32 %v3343_v4, %v2896_v6  ;;  %v3137_v3 = vpop.f32.mrf.mxu0  ;;  %v8614_v4 = vld [vmem:[#allocation70_spill] sm:$0xff]  ;;  %v8615_v6 = vld [vmem:[#allocation71_spill] sm:$0xff] }
 0x36e   : > { %v3346_v61 = vpop.f32.mrf.mxu1  ;;  %5082 = vmatmul.msk.f32.gmra.mxu2 %vm346_vm1, %v7105_v19 }
 0x36f   : > { %5115 = vmatmul.msk.f32.gmra.mxu3 %vm346_vm1, %v7667_v13 }
 0x370   : > { %5217 = vmatmul.msk.f32.gmra.mxu0 %vm346_vm1, %v5149_v23 }
 0x371   : > { %5250 = vmatmul.msk.f32.gmra.mxu1 %vm346_vm1, %v7143_v9  ;;  %v2582_v24 = vpop.f32.mrf.mxu2 }
 0x372   : > { %v2791_v27 = vpop.f32.mrf.mxu3  ;;  %v2865_v0 = vadd.f32 %v2582_v24, %v7120_v11  ;;  %v7701_v24 = vld [vmem:[%s5654_s10 + $0x171] sm:$0xff] }
 0x373   : > { %v2897_v50 = vadd.f32 %v2791_v27, %v8614_v4 }
 0x374   : > { %v7686_v15 = vadd.f32 %v3137_v3, %v2865_v0  ;;  %v8616_v3 = vld [vmem:[#allocation72_spill] sm:$0xff] }
 0x375   : > { %v7688_v19 = vadd.f32 %v3346_v61, %v2897_v50  ;;  %v3140_v10 = vpop.f32.mrf.mxu0  ;;  %v8618_v50 = vld [vmem:[#allocation73_spill] sm:$0xff] }
 0x376   : > { %v3349_v7 = vpop.f32.mrf.mxu1  ;;  %5083 = vmatmul.msk.f32.gmra.mxu2 %vm346_vm1, %v8615_v6  ;;  %v8620_v6 = vld [vmem:[#allocation75_spill] sm:$0xff] }
 0x377   : > { %5116 = vmatmul.msk.f32.gmra.mxu3 %vm346_vm1, %v7684_v20 }
 0x378   : > { %5218 = vmatmul.msk.f32.gmra.mxu0 %vm346_vm1, %v7168_v14 }
 0x379   : > { %5251 = vmatmul.msk.f32.gmra.mxu1 %vm346_vm1, %v7171_v35  ;;  %v2585_v11 = vpop.f32.mrf.mxu2 }
 0x37a   : > { %v2794_v9 = vpop.f32.mrf.mxu3  ;;  %v2866_v23 = vadd.f32 %v2585_v11, %v7145_v31 }
 0x37b   : > { %v2898_v61 = vadd.f32 %v2794_v9, %v8616_v3  ;;  %v7718_v9 = vld [vmem:[%s5654_s10 + $0x181] sm:$0xff] }
 0x37c   : > { %v7703_v27 = vadd.f32 %v3140_v10, %v2866_v23  ;;  %v8619_v10 = vld [vmem:[#allocation74_spill] sm:$0xff] }
 0x37d   : > { %v7705_v0 = vadd.f32 %v3349_v7, %v2898_v61  ;;  %v3143_v4 = vpop.f32.mrf.mxu0 }
 0x37e   : > { %v3352_v14 = vpop.f32.mrf.mxu1  ;;  %5084 = vmatmul.msk.f32.gmra.mxu2 %vm346_vm1, %v8618_v50 }
 0x37f   : > { %8617 = vst [vmem:[#allocation40_spill] sm:$0xff] %v7705_v0  ;;  %5117 = vmatmul.msk.f32.gmra.mxu3 %vm346_vm1, %v7701_v24  ;;  %v7726_v0 = vld [vmem:[%s5654_s10 + $0x198] sm:$0xff] }
 0x380   : > { %5219 = vmatmul.msk.f32.gmra.mxu0 %vm346_vm1, %v7191_v29  ;;  %v5152_v29 = vld [vmem:[%s5656_s11 + $0x198] sm:$0xff]  ;;  %8623 = vst [vmem:[#allocation43_spill] sm:$0xff] %v7726_v0 }
 0x381   : > { %5252 = vmatmul.msk.f32.gmra.mxu1 %vm346_vm1, %v7194_v39  ;;  %v2588_v31 = vpop.f32.mrf.mxu2 }
 0x382   : > { %v2797_v35 = vpop.f32.mrf.mxu3  ;;  %v2867_v7 = vadd.f32 %v2588_v31, %v8619_v10 }
 0x383   : > { %v2899_v11 = vadd.f32 %v2797_v35, %v8620_v6  ;;  %v8625_v35 = vld [vmem:[#allocation77_spill] sm:$0xff] }
 0x384   : > { %v7720_v23 = vadd.f32 %v3143_v4, %v2867_v7  ;;  %v7738_v7 = vld [vmem:[%s5654_s10 + $0x189] sm:$0xff] }
 0x385   : > { %v7722_v3 = vadd.f32 %v3352_v14, %v2899_v11  ;;  %v3146_v61 = vpop.f32.mrf.mxu0  ;;  %v8624_v14 = vld [vmem:[#allocation76_spill] sm:$0xff]  ;;  %8626 = vst [vmem:[#allocation38_spill] sm:$0xff] %v7738_v7 }
 0x386   : > { %8621 = vst [vmem:[#allocation35_spill] sm:$0xff] %v7720_v23  ;;  %v3355_v50 = vpop.f32.mrf.mxu1  ;;  %5085 = vmatmul.msk.f32.gmra.mxu2 %vm346_vm1, %v7178_v40  ;;  %v7746_v23 = vld [vmem:[%s5654_s10 + $0x1a0] sm:$0xff] }
 0x387   : > { %8622 = vst [vmem:[#allocation46_spill] sm:$0xff] %v7722_v3  ;;  %5118 = vmatmul.msk.f32.gmra.mxu3 %vm346_vm1, %v7718_v9 }
 0x388   : > { %5220 = vmatmul.msk.f32.gmra.mxu0 %vm346_vm1, %v5152_v29  ;;  %v5153_v29 = vld [vmem:[%s5656_s11 + $0x1a0] sm:$0xff]  ;;  %8629 = vst [vmem:[#allocation41_spill] sm:$0xff] %v7746_v23 }
 0x389   : > { %5253 = vmatmul.msk.f32.gmra.mxu1 %vm346_vm1, %v7726_v0  ;;  %v2591_v39 = vpop.f32.mrf.mxu2  ;;  %v8630_v0 = vld [vmem:[#allocation78_spill] sm:$0xff] }
 0x38a   : > { %v2800_v4 = vpop.f32.mrf.mxu3  ;;  %v2868_v31 = vadd.f32 %v2591_v39, %v8624_v14  ;;  %v8631_v39 = vld [vmem:[#allocation79_spill] sm:$0xff]  ;;  %v8632_v14 = vld [vmem:[#allocation80_spill] sm:$0xff] }
 0x38b   : > { %v2900_v10 = vadd.f32 %v2800_v4, %v8625_v35  ;;  %v5255_v35 = vld [vmem:[%s5656_s11 + $0x31] sm:$0xff] }
 0x38c   : > { %v7740_v6 = vadd.f32 %v3146_v61, %v2868_v31 }
 0x38d   : > { %v7742_v40 = vadd.f32 %v3355_v50, %v2900_v10  ;;  %v3149_v11 = vpop.f32.mrf.mxu0 }
 0x38e   : > { %8627 = vst [vmem:[#allocation39_spill] sm:$0xff] %v7740_v6  ;;  %v3358_v3 = vpop.f32.mrf.mxu1  ;;  %5086 = vmatmul.msk.f32.gmra.mxu2 %vm346_vm1, %v8630_v0 }
 0x38f   : > { %8628 = vst [vmem:[#allocation44_spill] sm:$0xff] %v7742_v40  ;;  %5119 = vmatmul.msk.f32.gmra.mxu3 %vm346_vm1, %v7738_v7  ;;  %v5500_v7 = vld [vmem:[%s5654_s10 + $0x30] sm:$0xff] }
 0x390   : > { %5221 = vmatmul.msk.f32.gmra.mxu0 %vm346_vm1, %v5153_v29  ;;  %v8635_v29 = vld [vmem:[#allocation4_spill] sm:$0xff] }
 0x391   : > { %5254 = vmatmul.msk.f32.gmra.mxu1 %vm346_vm1, %v7746_v23  ;;  %v2594_v61 = vpop.f32.mrf.mxu2  ;;  %v5501_v23 = vld [vmem:[%s5654_s10 + $0x38] sm:$0xff] }
 0x392   : > { %v2803_v50 = vpop.f32.mrf.mxu3  ;;  %v2869_v4 = vadd.f32 %v2594_v61, %v8631_v39  ;;  %v8636_v39 = vld [vmem:[#allocation6_spill] sm:$0xff] }
 0x393   : > { %v2901_v31 = vadd.f32 %v2803_v50, %v8632_v14  ;;  %v5256_v14 = vld [vmem:[%s5656_s11 + $0x39] sm:$0xff] }
 0x394   : > { %v7758_v10 = vadd.f32 %v3149_v11, %v2869_v4  ;;  %v8637_v4 = vld [vmem:[#allocation3_spill] sm:$0xff] }
 0x395   : > { %v7760_v40 = vadd.f32 %v3358_v3, %v2901_v31  ;;  %v3152_v0 = vpop.f32.mrf.mxu0 }
 0x396   : > { %8633 = vst [vmem:[#allocation42_spill] sm:$0xff] %v7758_v10  ;;  %v3361_v6 = vpop.f32.mrf.mxu1  ;;  %5289 = vmatmul.msk.f32.vlgmr.msra.gmra.mxu2 %vm346_vm1, %v5500_v7 }
 0x397   : > { %8634 = vst [vmem:[#allocation49_spill] sm:$0xff] %v7760_v40  ;;  %5322 = vmatmul.msk.f32.vlgmr.msra.gmra.mxu3 %vm346_vm1, %v5255_v35 }
 0x398   : > { %5388 = vmatmul.msk.f32.vlgmr.msra.gmra.mxu0 %vm346_vm1, %v5255_v35  ;;  %v8640_v35 = vld [vmem:[#allocation7_spill] sm:$0xff] }
 0x399   : > { %5421 = vmatmul.msk.f32.vlgmr.msra.gmra.mxu1 %vm346_vm1, %v8635_v29  ;;  %v2597_v61 = vpop.f32.mrf.mxu2 }
 0x39a   : > { %v2806_v50 = vpop.f32.mrf.mxu3  ;;  %v2870_v11 = vadd.f32 %v2597_v61, %v8636_v39  ;;  %v8642_v39 = vld [vmem:[#allocation53_spill] sm:$0xff] }
 0x39b   : > { %v2902_v3 = vadd.f32 %v2806_v50, %v8637_v4  ;;  %v8641_v50 = vld [vmem:[#allocation5_spill] sm:$0xff] }
 0x39c   : > { %v7771_v31 = vadd.f32 %v3152_v0, %v2870_v11  ;;  %v5257_v11 = vld [vmem:[%s5656_s11 + $0x49] sm:$0xff] }
 0x39d   : > { %v7773_v40 = vadd.f32 %v3361_v6, %v2902_v3  ;;  %v3155_v7 = vpop.f32.mrf.mxu0 }
 0x39e   : > { %8638 = vst [vmem:[#allocation45_spill] sm:$0xff] %v7771_v31  ;;  %v3364_v10 = vpop.f32.mrf.mxu1  ;;  %5290 = vmatmul.msk.f32.gmra.mxu2 %vm346_vm1, %v5501_v23  ;;  %v5502_v31 = vld [vmem:[%s5654_s10 + $0x48] sm:$0xff] }
 0x39f   : > { %8639 = vst [vmem:[#allocation52_spill] sm:$0xff] %v7773_v40  ;;  %5323 = vmatmul.msk.f32.gmra.mxu3 %vm346_vm1, %v5256_v14 }
 0x3a0   : > { %5389 = vmatmul.msk.f32.gmra.mxu0 %vm346_vm1, %v5256_v14  ;;  %v8645_v14 = vld [vmem:[#allocation58_spill] sm:$0xff] }
 0x3a1   : > { %5422 = vmatmul.msk.f32.gmra.mxu1 %vm346_vm1, %v8640_v35  ;;  %v2600_v29 = vpop.f32.mrf.mxu2 }
 0x3a2   : > { %v2809_v61 = vpop.f32.mrf.mxu3  ;;  %v2871_v0 = vadd.f32 %v2600_v29, %v8641_v50  ;;  %v8647_v50 = vld [vmem:[#allocation9_spill] sm:$0xff] }
 0x3a3   : > { %v2903_v6 = vadd.f32 %v2809_v61, %v8642_v39  ;;  %v8646_v61 = vld [vmem:[#allocation8_spill] sm:$0xff] }
 0x3a4   : > { %v7784_v4 = vadd.f32 %v3155_v7, %v2871_v0  ;;  %v5258_v0 = vld [vmem:[%s5656_s11 + $0x51] sm:$0xff] }
 0x3a5   : > { %v7786_v3 = vadd.f32 %v3364_v10, %v2903_v6  ;;  %v3158_v23 = vpop.f32.mrf.mxu0 }
 0x3a6   : > { %8643 = vst [vmem:[#allocation47_spill] sm:$0xff] %v7784_v4  ;;  %v3367_v40 = vpop.f32.mrf.mxu1  ;;  %5291 = vmatmul.msk.f32.gmra.mxu2 %vm346_vm1, %v5502_v31  ;;  %v5503_v4 = vld [vmem:[%s5654_s10 + $0x50] sm:$0xff] }
 0x3a7   : > { %8644 = vst [vmem:[#allocation48_spill] sm:$0xff] %v7786_v3  ;;  %5324 = vmatmul.msk.f32.gmra.mxu3 %vm346_vm1, %v5257_v11 }
 0x3a8   : > { %5390 = vmatmul.msk.f32.gmra.mxu0 %vm346_vm1, %v5257_v11  ;;  %v8650_v11 = vld [vmem:[#allocation57_spill] sm:$0xff] }
 0x3a9   : > { %5423 = vmatmul.msk.f32.gmra.mxu1 %vm346_vm1, %v8645_v14  ;;  %v2603_v35 = vpop.f32.mrf.mxu2 }
 0x3aa   : > { %v2812_v29 = vpop.f32.mrf.mxu3  ;;  %v2872_v7 = vadd.f32 %v2603_v35, %v8646_v61  ;;  %v8652_v61 = vld [vmem:[#allocation11_spill] sm:$0xff] }
 0x3ab   : > { %v2904_v10 = vadd.f32 %v2812_v29, %v8647_v50  ;;  %v8651_v29 = vld [vmem:[#allocation10_spill] sm:$0xff] }
 0x3ac   : > { %v7797_v39 = vadd.f32 %v3158_v23, %v2872_v7  ;;  %v5259_v7 = vld [vmem:[%s5656_s11 + $0x61] sm:$0xff] }
 0x3ad   : > { %v7799_v6 = vadd.f32 %v3367_v40, %v2904_v10  ;;  %v3161_v31 = vpop.f32.mrf.mxu0 }
 0x3ae   : > { %8648 = vst [vmem:[#allocation56_spill] sm:$0xff] %v7797_v39  ;;  %v3370_v3 = vpop.f32.mrf.mxu1  ;;  %5292 = vmatmul.msk.f32.gmra.mxu2 %vm346_vm1, %v5503_v4  ;;  %v5504_v39 = vld [vmem:[%s5654_s10 + $0x60] sm:$0xff] }
 0x3af   : > { %8649 = vst [vmem:[#allocation50_spill] sm:$0xff] %v7799_v6  ;;  %5325 = vmatmul.msk.f32.gmra.mxu3 %vm346_vm1, %v5258_v0 }
 0x3b0   : > { %5391 = vmatmul.msk.f32.gmra.mxu0 %vm346_vm1, %v5258_v0  ;;  %v8655_v0 = vld [vmem:[#allocation2_spill] sm:$0xff] }
 0x3b1   : > { %5424 = vmatmul.msk.f32.gmra.mxu1 %vm346_vm1, %v8650_v11  ;;  %v2606_v14 = vpop.f32.mrf.mxu2 }
 0x3b2   : > { %v2815_v35 = vpop.f32.mrf.mxu3  ;;  %v2873_v23 = vadd.f32 %v2606_v14, %v8651_v29  ;;  %v8657_v29 = vld [vmem:[#allocation16_spill] sm:$0xff] }
 0x3b3   : > { %v2905_v40 = vadd.f32 %v2815_v35, %v8652_v61  ;;  %v8656_v35 = vld [vmem:[#allocation13_spill] sm:$0xff] }
 0x3b4   : > { %v7810_v50 = vadd.f32 %v3161_v31, %v2873_v23  ;;  %v5260_v23 = vld [vmem:[%s5656_s11 + $0x69] sm:$0xff] }
 0x3b5   : > { %v7812_v10 = vadd.f32 %v3370_v3, %v2905_v40  ;;  %v3164_v4 = vpop.f32.mrf.mxu0 }
 0x3b6   : > { %8653 = vst [vmem:[#allocation51_spill] sm:$0xff] %v7810_v50  ;;  %v3373_v6 = vpop.f32.mrf.mxu1  ;;  %5293 = vmatmul.msk.f32.gmra.mxu2 %vm346_vm1, %v5504_v39  ;;  %v5505_v50 = vld [vmem:[%s5654_s10 + $0x68] sm:$0xff] }
 0x3b7   : > { %8654 = vst [vmem:[#allocation61_spill] sm:$0xff] %v7812_v10  ;;  %5326 = vmatmul.msk.f32.gmra.mxu3 %vm346_vm1, %v5259_v7 }
 0x3b8   : > { %5392 = vmatmul.msk.f32.gmra.mxu0 %vm346_vm1, %v5259_v7  ;;  %v8660_v7 = vld [vmem:[#allocation19_spill] sm:$0xff] }
 0x3b9   : > { %5425 = vmatmul.msk.f32.gmra.mxu1 %vm346_vm1, %v8655_v0  ;;  %v2609_v11 = vpop.f32.mrf.mxu2 }
 0x3ba   : > { %v2818_v14 = vpop.f32.mrf.mxu3  ;;  %v2874_v31 = vadd.f32 %v2609_v11, %v8656_v35  ;;  %v8662_v35 = vld [vmem:[#allocation22_spill] sm:$0xff] }
 0x3bb   : > { %v2906_v3 = vadd.f32 %v2818_v14, %v8657_v29  ;;  %v8661_v14 = vld [vmem:[#allocation12_spill] sm:$0xff] }
 0x3bc   : > { %v7823_v61 = vadd.f32 %v3164_v4, %v2874_v31  ;;  %v5261_v31 = vld [vmem:[%s5656_s11 + $0x79] sm:$0xff] }
 0x3bd   : > { %v7825_v40 = vadd.f32 %v3373_v6, %v2906_v3  ;;  %v3167_v39 = vpop.f32.mrf.mxu0 }
 0x3be   : > { %8658 = vst [vmem:[#allocation54_spill] sm:$0xff] %v7823_v61  ;;  %v3376_v10 = vpop.f32.mrf.mxu1  ;;  %5294 = vmatmul.msk.f32.gmra.mxu2 %vm346_vm1, %v5505_v50  ;;  %v5506_v61 = vld [vmem:[%s5654_s10 + $0x78] sm:$0xff] }
 0x3bf   : > { %8659 = vst [vmem:[#allocation55_spill] sm:$0xff] %v7825_v40  ;;  %5327 = vmatmul.msk.f32.gmra.mxu3 %vm346_vm1, %v5260_v23 }
 0x3c0   : > { %5393 = vmatmul.msk.f32.gmra.mxu0 %vm346_vm1, %v5260_v23  ;;  %v8665_v23 = vld [vmem:[#allocation20_spill] sm:$0xff] }
 0x3c1   : > { %5426 = vmatmul.msk.f32.gmra.mxu1 %vm346_vm1, %v8660_v7  ;;  %v2612_v0 = vpop.f32.mrf.mxu2 }
 0x3c2   : > { %v2821_v11 = vpop.f32.mrf.mxu3  ;;  %v2875_v4 = vadd.f32 %v2612_v0, %v8661_v14  ;;  %v8667_v14 = vld [vmem:[#allocation15_spill] sm:$0xff] }
 0x3c3   : > { %v2907_v6 = vadd.f32 %v2821_v11, %v8662_v35  ;;  %v8666_v11 = vld [vmem:[#allocation14_spill] sm:$0xff] }
 0x3c4   : > { %v7836_v29 = vadd.f32 %v3167_v39, %v2875_v4  ;;  %v5262_v4 = vld [vmem:[%s5656_s11 + $0x81] sm:$0xff] }
 0x3c5   : > { %v7838_v3 = vadd.f32 %v3376_v10, %v2907_v6  ;;  %v3170_v50 = vpop.f32.mrf.mxu0 }
 0x3c6   : > { %8663 = vst [vmem:[#allocation59_spill] sm:$0xff] %v7836_v29  ;;  %v3379_v40 = vpop.f32.mrf.mxu1  ;;  %5295 = vmatmul.msk.f32.gmra.mxu2 %vm346_vm1, %v5506_v61  ;;  %v5507_v29 = vld [vmem:[%s5654_s10 + $0x80] sm:$0xff] }
 0x3c7   : > { %8664 = vst [vmem:[#allocation60_spill] sm:$0xff] %v7838_v3  ;;  %5328 = vmatmul.msk.f32.gmra.mxu3 %vm346_vm1, %v5261_v31 }
 0x3c8   : > { %5394 = vmatmul.msk.f32.gmra.mxu0 %vm346_vm1, %v5261_v31  ;;  %v8670_v31 = vld [vmem:[#allocation25_spill] sm:$0xff] }
 0x3c9   : > { %5427 = vmatmul.msk.f32.gmra.mxu1 %vm346_vm1, %v8665_v23  ;;  %v2615_v7 = vpop.f32.mrf.mxu2 }
 0x3ca   : > { %v2824_v0 = vpop.f32.mrf.mxu3  ;;  %v2876_v39 = vadd.f32 %v2615_v7, %v8666_v11  ;;  %v8672_v11 = vld [vmem:[#allocation18_spill] sm:$0xff] }
 0x3cb   : > { %v2908_v10 = vadd.f32 %v2824_v0, %v8667_v14  ;;  %v8671_v0 = vld [vmem:[#allocation17_spill] sm:$0xff] }
 0x3cc   : > { %v7849_v35 = vadd.f32 %v3170_v50, %v2876_v39  ;;  %v5263_v39 = vld [vmem:[%s5656_s11 + $0x91] sm:$0xff] }
 0x3cd   : > { %v7851_v6 = vadd.f32 %v3379_v40, %v2908_v10  ;;  %v3173_v61 = vpop.f32.mrf.mxu0 }
 0x3ce   : > { %8668 = vst [vmem:[#allocation62_spill] sm:$0xff] %v7849_v35  ;;  %v3382_v3 = vpop.f32.mrf.mxu1  ;;  %5296 = vmatmul.msk.f32.gmra.mxu2 %vm346_vm1, %v5507_v29  ;;  %v5508_v35 = vld [vmem:[%s5654_s10 + $0x90] sm:$0xff] }
 0x3cf   : > { %8669 = vst [vmem:[#allocation63_spill] sm:$0xff] %v7851_v6  ;;  %5329 = vmatmul.msk.f32.gmra.mxu3 %vm346_vm1, %v5262_v4 }
 0x3d0   : > { %5395 = vmatmul.msk.f32.gmra.mxu0 %vm346_vm1, %v5262_v4  ;;  %v8675_v4 = vld [vmem:[#allocation28_spill] sm:$0xff] }
 0x3d1   : > { %5428 = vmatmul.msk.f32.gmra.mxu1 %vm346_vm1, %v8670_v31  ;;  %v2618_v23 = vpop.f32.mrf.mxu2 }
 0x3d2   : > { %v2827_v7 = vpop.f32.mrf.mxu3  ;;  %v2877_v50 = vadd.f32 %v2618_v23, %v8671_v0  ;;  %v8677_v0 = vld [vmem:[#allocation21_spill] sm:$0xff] }
 0x3d3   : > { %v2909_v40 = vadd.f32 %v2827_v7, %v8672_v11  ;;  %v8676_v7 = vld [vmem:[#allocation24_spill] sm:$0xff] }
 0x3d4   : > { %v7862_v14 = vadd.f32 %v3173_v61, %v2877_v50  ;;  %v5264_v50 = vld [vmem:[%s5656_s11 + $0x99] sm:$0xff] }
 0x3d5   : > { %v7864_v10 = vadd.f32 %v3382_v3, %v2909_v40  ;;  %v3176_v29 = vpop.f32.mrf.mxu0 }
 0x3d6   : > { %8673 = vst [vmem:[#allocation64_spill] sm:$0xff] %v7862_v14  ;;  %v3385_v6 = vpop.f32.mrf.mxu1  ;;  %5297 = vmatmul.msk.f32.gmra.mxu2 %vm346_vm1, %v5508_v35  ;;  %v5509_v14 = vld [vmem:[%s5654_s10 + $0x98] sm:$0xff] }
 0x3d7   : > { %8674 = vst [vmem:[#allocation65_spill] sm:$0xff] %v7864_v10  ;;  %5330 = vmatmul.msk.f32.gmra.mxu3 %vm346_vm1, %v5263_v39 }
 0x3d8   : > { %5396 = vmatmul.msk.f32.gmra.mxu0 %vm346_vm1, %v5263_v39  ;;  %v8680_v39 = vld [vmem:[#allocation31_spill] sm:$0xff] }
 0x3d9   : > { %5429 = vmatmul.msk.f32.gmra.mxu1 %vm346_vm1, %v8675_v4  ;;  %v2621_v31 = vpop.f32.mrf.mxu2 }
 0x3da   : > { %v2830_v23 = vpop.f32.mrf.mxu3  ;;  %v2878_v61 = vadd.f32 %v2621_v31, %v8676_v7  ;;  %v8682_v7 = vld [vmem:[#allocation34_spill] sm:$0xff] }
 0x3db   : > { %v2910_v3 = vadd.f32 %v2830_v23, %v8677_v0  ;;  %v8681_v23 = vld [vmem:[#allocation23_spill] sm:$0xff] }
 0x3dc   : > { %v7875_v11 = vadd.f32 %v3176_v29, %v2878_v61  ;;  %v5265_v61 = vld [vmem:[%s5656_s11 + $0xa9] sm:$0xff] }
 0x3dd   : > { %v7877_v40 = vadd.f32 %v3385_v6, %v2910_v3  ;;  %v3179_v35 = vpop.f32.mrf.mxu0 }
 0x3de   : > { %8678 = vst [vmem:[#allocation66_spill] sm:$0xff] %v7875_v11  ;;  %v3388_v10 = vpop.f32.mrf.mxu1  ;;  %5298 = vmatmul.msk.f32.gmra.mxu2 %vm346_vm1, %v5509_v14  ;;  %v5510_v11 = vld [vmem:[%s5654_s10 + $0xa8] sm:$0xff] }
 0x3df   : > { %8679 = vst [vmem:[#allocation67_spill] sm:$0xff] %v7877_v40  ;;  %5331 = vmatmul.msk.f32.gmra.mxu3 %vm346_vm1, %v5264_v50 }
 0x3e0   : > { %5397 = vmatmul.msk.f32.gmra.mxu0 %vm346_vm1, %v5264_v50 }
 0x3e1   : > { %5430 = vmatmul.msk.f32.gmra.mxu1 %vm346_vm1, %v8680_v39  ;;  %v2624_v4 = vpop.f32.mrf.mxu2 }
 0x3e2   : > { %v2833_v31 = vpop.f32.mrf.mxu3  ;;  %v2879_v29 = vadd.f32 %v2624_v4, %v8681_v23  ;;  %v8684_v4 = vld [vmem:[#allocation26_spill] sm:$0xff]  ;;  %v5266_v23 = vld [vmem:[%s5656_s11 + $0xb1] sm:$0xff] }
 0x3e3   : > { %v2911_v6 = vadd.f32 %v2833_v31, %v8682_v7  ;;  %v8685_v31 = vld [vmem:[#allocation27_spill] sm:$0xff] }
 0x3e4   : > { %v7888_v0 = vadd.f32 %v3179_v35, %v2879_v29 }
 0x3e5   : > { %v7890_v3 = vadd.f32 %v3388_v10, %v2911_v6  ;;  %v3182_v14 = vpop.f32.mrf.mxu0 }
 0x3e6   : > { %v3391_v40 = vpop.f32.mrf.mxu1  ;;  %5299 = vmatmul.msk.f32.gmra.mxu2 %vm346_vm1, %v5510_v11 }
 0x3e7   : > { %8683 = vst [vmem:[#allocation68_spill] sm:$0xff] %v7890_v3  ;;  %5332 = vmatmul.msk.f32.gmra.mxu3 %vm346_vm1, %v5265_v61  ;;  %v5511_v3 = vld [vmem:[%s5654_s10 + $0xb0] sm:$0xff] }
 0x3e8   : > { %5398 = vmatmul.msk.f32.gmra.mxu0 %vm346_vm1, %v5265_v61 }
 0x3e9   : > { %5431 = vmatmul.msk.f32.gmra.mxu1 %vm346_vm1, %v7412_v8  ;;  %v2627_v50 = vpop.f32.mrf.mxu2 }
 0x3ea   : > { %v2836_v39 = vpop.f32.mrf.mxu3  ;;  %v2880_v35 = vadd.f32 %v2627_v50, %v8684_v4  ;;  %v8687_v50 = vld [vmem:[#allocation32_spill] sm:$0xff]  ;;  %v5267_v4 = vld [vmem:[%s5656_s11 + $0xc1] sm:$0xff] }
 0x3eb   : > { %v2912_v10 = vadd.f32 %v2836_v39, %v8685_v31  ;;  %v8688_v39 = vld [vmem:[#allocation29_spill] sm:$0xff] }
 0x3ec   : > { %v7901_v29 = vadd.f32 %v3182_v14, %v2880_v35 }
 0x3ed   : > { %v7903_v7 = vadd.f32 %v3391_v40, %v2912_v10  ;;  %v3185_v11 = vpop.f32.mrf.mxu0 }
 0x3ee   : > { %v3394_v6 = vpop.f32.mrf.mxu1  ;;  %5300 = vmatmul.msk.f32.gmra.mxu2 %vm346_vm1, %v5511_v3 }
 0x3ef   : > { %8686 = vst [vmem:[#allocation69_spill] sm:$0xff] %v7903_v7  ;;  %5333 = vmatmul.msk.f32.gmra.mxu3 %vm346_vm1, %v5266_v23  ;;  %v5512_v7 = vld [vmem:[%s5654_s10 + $0xc0] sm:$0xff] }
 0x3f0   : > { %5399 = vmatmul.msk.f32.gmra.mxu0 %vm346_vm1, %v5266_v23 }
 0x3f1   : > { %5432 = vmatmul.msk.f32.gmra.mxu1 %vm346_vm1, %v7429_v12  ;;  %v2630_v8 = vpop.f32.mrf.mxu2 }
 0x3f2   : > { %v2839_v61 = vpop.f32.mrf.mxu3  ;;  %v2881_v14 = vadd.f32 %v2630_v8, %v8687_v50  ;;  %v8690_v8 = vld [vmem:[#allocation30_spill] sm:$0xff]  ;;  %v5268_v50 = vld [vmem:[%s5656_s11 + $0xc9] sm:$0xff] }
 0x3f3   : > { %v2913_v40 = vadd.f32 %v2839_v61, %v8688_v39  ;;  %v8691_v61 = vld [vmem:[#allocation37_spill] sm:$0xff] }
 0x3f4   : > { %v7914_v35 = vadd.f32 %v3185_v11, %v2881_v14 }
 0x3f5   : > { %v7916_v31 = vadd.f32 %v3394_v6, %v2913_v40  ;;  %v3188_v3 = vpop.f32.mrf.mxu0 }
 0x3f6   : > { %v3397_v10 = vpop.f32.mrf.mxu1  ;;  %5301 = vmatmul.msk.f32.gmra.mxu2 %vm346_vm1, %v5512_v7 }
 0x3f7   : > { %8689 = vst [vmem:[#allocation70_spill] sm:$0xff] %v7916_v31  ;;  %5334 = vmatmul.msk.f32.gmra.mxu3 %vm346_vm1, %v5267_v4  ;;  %v5513_v31 = vld [vmem:[%s5654_s10 + $0xc8] sm:$0xff] }
 0x3f8   : > { %5400 = vmatmul.msk.f32.gmra.mxu0 %vm346_vm1, %v5267_v4 }
 0x3f9   : > { %5433 = vmatmul.msk.f32.gmra.mxu1 %vm346_vm1, %v7446_v22  ;;  %v2633_v12 = vpop.f32.mrf.mxu2 }
 0x3fa   : > { %v2842_v23 = vpop.f32.mrf.mxu3  ;;  %v2882_v11 = vadd.f32 %v2633_v12, %v8690_v8  ;;  %v8692_v12 = vld [vmem:[#allocation36_spill] sm:$0xff] }
 0x3fb   : > { %v2914_v6 = vadd.f32 %v2842_v23, %v8691_v61  ;;  %v5269_v23 = vld [vmem:[%s5656_s11 + $0xd9] sm:$0xff] }
 0x3fc   : > { %v7927_v14 = vadd.f32 %v3188_v3, %v2882_v11 }
 0x3fd   : > { %v7929_v39 = vadd.f32 %v3397_v10, %v2914_v6  ;;  %v3191_v7 = vpop.f32.mrf.mxu0  ;;  %v5514_v6 = vld [vmem:[%s5654_s10 + $0xd8] sm:$0xff] }
 0x3fe   : > { %v3400_v40 = vpop.f32.mrf.mxu1  ;;  %5302 = vmatmul.msk.f32.gmra.mxu2 %vm346_vm1, %v5513_v31 }
 0x3ff   : > { %5335 = vmatmul.msk.f32.gmra.mxu3 %vm346_vm1, %v5268_v50 }
 0x400   : > { %5401 = vmatmul.msk.f32.gmra.mxu0 %vm346_vm1, %v5268_v50 }
 0x401   : > { %5434 = vmatmul.msk.f32.gmra.mxu1 %vm346_vm1, %v7463_v44  ;;  %v2636_v22 = vpop.f32.mrf.mxu2 }
 0x402   : > { %v2845_v4 = vpop.f32.mrf.mxu3  ;;  %v2883_v3 = vadd.f32 %v2636_v22, %v7448_v43 }
 0x403   : > { %v2915_v10 = vadd.f32 %v2845_v4, %v8692_v12 }
 0x404   : > { %v7940_v8 = vadd.f32 %v3191_v7, %v2883_v3 }
 0x405   : > { %v7942_v11 = vadd.f32 %v3400_v40, %v2915_v10  ;;  %v3194_v31 = vpop.f32.mrf.mxu0  ;;  %v5270_v40 = vld [vmem:[%s5656_s11 + $0xe1] sm:$0xff] }
 0x406   : > { %v3403_v61 = vpop.f32.mrf.mxu1  ;;  %5303 = vmatmul.msk.f32.gmra.mxu2 %vm346_vm1, %v5514_v6  ;;  %v5515_v10 = vld [vmem:[%s5654_s10 + $0xe0] sm:$0xff] }
 0x407   : > { %5336 = vmatmul.msk.f32.gmra.mxu3 %vm346_vm1, %v5269_v23 }
 0x408   : > { %5402 = vmatmul.msk.f32.gmra.mxu0 %vm346_vm1, %v5269_v23 }
 0x409   : > { %5435 = vmatmul.msk.f32.gmra.mxu1 %vm346_vm1, %v7480_v33  ;;  %v2639_v43 = vpop.f32.mrf.mxu2 }
 0x40a   : > { %v2848_v44 = vpop.f32.mrf.mxu3  ;;  %v2884_v50 = vadd.f32 %v2639_v43, %v7465_v52 }
 0x40b   : > { %v2916_v7 = vadd.f32 %v2848_v44, %v7467_v30 }
 0x40c   : > { %v7953_v22 = vadd.f32 %v3194_v31, %v2884_v50  ;;  %v5271_v31 = vld [vmem:[%s5656_s11 + $0xf1] sm:$0xff] }
 0x40d   : > { %v7955_v4 = vadd.f32 %v3403_v61, %v2916_v7  ;;  %v3197_v3 = vpop.f32.mrf.mxu0  ;;  %v5516_v50 = vld [vmem:[%s5654_s10 + $0xf0] sm:$0xff] }
 0x40e   : > { %v3406_v12 = vpop.f32.mrf.mxu1  ;;  %5304 = vmatmul.msk.f32.gmra.mxu2 %vm346_vm1, %v5515_v10 }
 0x40f   : > { %5337 = vmatmul.msk.f32.gmra.mxu3 %vm346_vm1, %v5270_v40 }
 0x410   : > { %5403 = vmatmul.msk.f32.gmra.mxu0 %vm346_vm1, %v5270_v40  ;;  %v5272_v40 = vld [vmem:[%s5656_s11 + $0xf9] sm:$0xff] }
 0x411   : > { %5436 = vmatmul.msk.f32.gmra.mxu1 %vm346_vm1, %v7497_v38  ;;  %v2642_v52 = vpop.f32.mrf.mxu2 }
 0x412   : > { %v2851_v30 = vpop.f32.mrf.mxu3  ;;  %v2885_v33 = vadd.f32 %v2642_v52, %v7482_v21 }
 0x413   : > { %v2917_v23 = vadd.f32 %v2851_v30, %v7484_v47 }
 0x414   : > { %v7966_v61 = vadd.f32 %v3197_v3, %v2885_v33  ;;  %v5517_v33 = vld [vmem:[%s5654_s10 + $0xf8] sm:$0xff] }
 0x415   : > { %v7968_v6 = vadd.f32 %v3406_v12, %v2917_v23  ;;  %v3950_v43 = vpop.f32.mrf.mxu0 }
 0x416   : > { %v4159_v44 = vpop.f32.mrf.mxu1  ;;  %5305 = vmatmul.msk.f32.gmra.mxu2 %vm346_vm1, %v5516_v50 }
 0x417   : > { %5338 = vmatmul.msk.f32.gmra.mxu3 %vm346_vm1, %v5271_v31 }
 0x418   : > { %5404 = vmatmul.msk.f32.gmra.mxu0 %vm346_vm1, %v5271_v31  ;;  %v5273_v31 = vld [vmem:[%s5656_s11 + $0x109] sm:$0xff] }
 0x419   : > { %5437 = vmatmul.msk.f32.gmra.mxu1 %vm346_vm1, %v7514_v41  ;;  %v3527_v21 = vpop.f32.mrf.mxu2 }
 0x41a   : > { %v3736_v47 = vpop.f32.mrf.mxu3  ;;  %v3832_v38 = vadd.f32 %v3527_v21, %v7499_v46 }
 0x41b   : > { %v3864_v7 = vadd.f32 %v3736_v47, %v7501_v26 }
 0x41c   : > { %v4255_v3 = vadd.f32 %v3950_v43, %v3832_v38  ;;  %v5518_v38 = vld [vmem:[%s5654_s10 + $0x108] sm:$0xff] }
 0x41d   : > { %v4287_v12 = vadd.f32 %v4159_v44, %v3864_v7  ;;  %v3953_v10 = vpop.f32.mrf.mxu0 }
 0x41e   : > { %v4162_v52 = vpop.f32.mrf.mxu1  ;;  %5306 = vmatmul.msk.f32.gmra.mxu2 %vm346_vm1, %v5517_v33 }
 0x41f   : > { %v4319_v30 = vmax.f32 %v4255_v3, %v4287_v12  ;;  %5339 = vmatmul.msk.f32.gmra.mxu3 %vm346_vm1, %v5272_v40  ;;  %v5274_v3 = vld [vmem:[%s5656_s11 + $0x111] sm:$0xff] }
 0x420   : > { %5405 = vmatmul.msk.f32.gmra.mxu0 %vm346_vm1, %v5272_v40 }
 0x421   : > { %5438 = vmatmul.msk.f32.gmra.mxu1 %vm346_vm1, %v7531_v45  ;;  %v3530_v46 = vpop.f32.mrf.mxu2  ;;  %v7998_v45 = vld [vmem:[%s8239_s3] ss:$0 sm:$0xff] }
 0x422   : > { %v3739_v26 = vpop.f32.mrf.mxu3  ;;  %v3833_v41 = vadd.f32 %v3530_v46, %v7516_v17 }
 0x423   : > { %v3865_v23 = vadd.f32 %v3739_v26, %v7518_v63  ;;  %v5519_v26 = vld [vmem:[%s5654_s10 + $0x110] sm:$0xff] }
 0x424   : > { %v4256_v43 = vadd.f32 %v3953_v10, %v3833_v41 }
 0x425   : > { %v4288_v44 = vadd.f32 %v4162_v52, %v3865_v23  ;;  %v3956_v50 = vpop.f32.mrf.mxu0 }
 0x426   : > { %v4165_v21 = vpop.f32.mrf.mxu1  ;;  %5307 = vmatmul.msk.f32.gmra.mxu2 %vm346_vm1, %v5518_v38 }
 0x427   : > { %v4320_v47 = vmax.f32 %v4256_v43, %v4288_v44  ;;  %5340 = vmatmul.msk.f32.gmra.mxu3 %vm346_vm1, %v5273_v31 }
 0x428   : > { %5406 = vmatmul.msk.f32.gmra.mxu0 %vm346_vm1, %v5273_v31 }
 0x429   : > { %5439 = vmatmul.msk.f32.gmra.mxu1 %vm346_vm1, %v7548_v62  ;;  %v3533_v17 = vpop.f32.mrf.mxu2  ;;  %v4355_v62 = vadd.f32 %v7998_v45, %v4319_v30 }
 0x42a   : > { %v3742_v63 = vpop.f32.mrf.mxu3  ;;  %v3834_v7 = vadd.f32 %v3533_v17, %v7533_v60 }
 0x42b   : > { %v3866_v40 = vadd.f32 %v3742_v63, %v7535_v58  ;;  %v4387_v23 = vmax.f32 %v4355_v62, 0.0  ;;  %v4356_v63 = vadd.f32 %v7998_v45, %v4320_v47 }
 0x42c   : > { %v4257_v12 = vadd.f32 %v3956_v50, %v3834_v7 }
 0x42d   : > { %v4289_v10 = vadd.f32 %v4165_v21, %v3866_v40  ;;  %v3959_v52 = vpop.f32.mrf.mxu0  ;;  %v4388_v47 = vmax.f32 %v4356_v63, 0.0  ;;  %v5278_v63 = vld [vmem:[%s5656_s11 + $0x141] sm:$0xff] }
 0x42e   : > { %v4168_v33 = vpop.f32.mrf.mxu1  ;;  %5308 = vmatmul.msk.f32.gmra.mxu2 %vm346_vm1, %v5519_v26 }
 0x42f   : > { %v4321_v46 = vmax.f32 %v4257_v12, %v4289_v10  ;;  %5341 = vmatmul.msk.f32.gmra.mxu3 %vm346_vm1, %v5274_v3 }
 0x430   : > { %5407 = vmatmul.msk.f32.gmra.mxu0 %vm346_vm1, %v5274_v3 }
 0x431   : > { %5440 = vmatmul.msk.f32.gmra.mxu1 %vm346_vm1, %v7565_v59  ;;  %v4357_v60 = vadd.f32 %v7998_v45, %v4321_v46  ;;  %v3536_v58 = vpop.f32.mrf.mxu2  ;;  %v5275_v59 = vld [vmem:[%s5656_s11 + $0x121] sm:$0xff] }
 0x432   : > { %v3745_v41 = vpop.f32.mrf.mxu3  ;;  %v3835_v31 = vadd.f32 %v3536_v58, %v7550_v36 }
 0x433   : > { %v4389_v30 = vmax.f32 %v4357_v60, 0.0  ;;  %v3867_v43 = vadd.f32 %v3745_v41, %v7552_v54  ;;  %v5520_v54 = vld [vmem:[%s5654_s10 + $0x120] sm:$0xff]  ;;  %v5521_v41 = vld [vmem:[%s5654_s10 + $0x128] sm:$0xff] }
 0x434   : > { %v4258_v50 = vadd.f32 %v3959_v52, %v3835_v31  ;;  %v5277_v31 = vld [vmem:[%s5656_s11 + $0x139] sm:$0xff] }
 0x435   : > { %v4419_v44 = vmax.f32 %v4387_v23, %v4389_v30  ;;  %v4290_v21 = vadd.f32 %v4168_v33, %v3867_v43  ;;  %v3962_v38 = vpop.f32.mrf.mxu0  ;;  %v5276_v33 = vld [vmem:[%s5656_s11 + $0x129] sm:$0xff] }
 0x436   : > { %v4171_v17 = vpop.f32.mrf.mxu1  ;;  %5309 = vmatmul.msk.f32.gmra.mxu2 %vm346_vm1, %v5520_v54 }
 0x437   : > { %4436 = vst.msk [vmem:[%s8017_s14] sm:$0xff] %vm4435_vm2, %v4419_v44  ;;  %v4322_v36 = vmax.f32 %v4258_v50, %v4290_v21  ;;  %5342 = vmatmul.msk.f32.gmra.mxu3 %vm346_vm1, %v5275_v59 }
 0x438   : > { %5408 = vmatmul.msk.f32.gmra.mxu0 %vm346_vm1, %v5275_v59 }
 0x439   : > { %5441 = vmatmul.msk.f32.gmra.mxu1 %vm346_vm1, %v7582_v56  ;;  %v4358_v7 = vadd.f32 %v7998_v45, %v4322_v36  ;;  %v3539_v40 = vpop.f32.mrf.mxu2 }
 0x43a   : > { %v3748_v3 = vpop.f32.mrf.mxu3  ;;  %v3836_v10 = vadd.f32 %v3539_v40, %v7567_v37 }
 0x43b   : > { %v4390_v12 = vmax.f32 %v4358_v7, 0.0  ;;  %v3868_v52 = vadd.f32 %v3748_v3, %v7569_v53 }
 0x43c   : > { %v4259_v46 = vadd.f32 %v3962_v38, %v3836_v10  ;;  %v5522_v38 = vld [vmem:[%s5654_s10 + $0x138] sm:$0xff] }
 0x43d   : > { %v4420_v62 = vmax.f32 %v4388_v47, %v4390_v12  ;;  %v4291_v26 = vadd.f32 %v4171_v17, %v3868_v52  ;;  %v3965_v60 = vpop.f32.mrf.mxu0  ;;  %v5523_v12 = vld [vmem:[%s5654_s10 + $0x140] sm:$0xff] }
 0x43e   : > { %v4174_v58 = vpop.f32.mrf.mxu1  ;;  %5310 = vmatmul.msk.f32.gmra.mxu2 %vm346_vm1, %v5521_v41 }
 0x43f   : > { %4437 = vst.msk [vmem:[%s8017_s14 + $0x8] sm:$0xff] %vm4435_vm2, %v4420_v62  ;;  %v4323_v56 = vmax.f32 %v4259_v46, %v4291_v26  ;;  %5343 = vmatmul.msk.f32.gmra.mxu3 %vm346_vm1, %v5276_v33  ;;  %v5279_v46 = vld [vmem:[%s5656_s11 + $0x151] sm:$0xff] }
 0x440   : > { %5409 = vmatmul.msk.f32.gmra.mxu0 %vm346_vm1, %v5276_v33 }
 0x441   : > { %5442 = vmatmul.msk.f32.gmra.mxu1 %vm346_vm1, %v7599_v55  ;;  %v3542_v37 = vpop.f32.mrf.mxu2  ;;  %v4359_v3 = vadd.f32 %v7998_v45, %v4323_v56 }
 0x442   : > { %v3751_v53 = vpop.f32.mrf.mxu3  ;;  %v3837_v23 = vadd.f32 %v3542_v37, %v7584_v25 }
 0x443   : > { %v3869_v30 = vadd.f32 %v3751_v53, %v7586_v51  ;;  %v4391_v10 = vmax.f32 %v4359_v3, 0.0  ;;  %v5524_v53 = vld [vmem:[%s5654_s10 + $0x150] sm:$0xff] }
 0x444   : > { %v4260_v43 = vadd.f32 %v3965_v60, %v3837_v23 }
 0x445   : > { %v4292_v59 = vadd.f32 %v4174_v58, %v3869_v30  ;;  %v3968_v44 = vpop.f32.mrf.mxu0 }
 0x446   : > { %v4177_v50 = vpop.f32.mrf.mxu1  ;;  %5311 = vmatmul.msk.f32.gmra.mxu2 %vm346_vm1, %v5522_v38 }
 0x447   : > { %v4324_v21 = vmax.f32 %v4260_v43, %v4292_v59  ;;  %5344 = vmatmul.msk.f32.gmra.mxu3 %vm346_vm1, %v5277_v31 }
 0x448   : > { %5410 = vmatmul.msk.f32.gmra.mxu0 %vm346_vm1, %v5277_v31 }
 0x449   : > { %5443 = vmatmul.msk.f32.gmra.mxu1 %vm346_vm1, %v7616_v49  ;;  %v3545_v25 = vpop.f32.mrf.mxu2 }
 0x44a   : > { %v3754_v51 = vpop.f32.mrf.mxu3  ;;  %v3838_v55 = vadd.f32 %v3545_v25, %v7601_v18 }
 0x44b   : > { %v3870_v17 = vadd.f32 %v3754_v51, %v7603_v1 }
 0x44c   : > { %v4261_v36 = vadd.f32 %v3968_v44, %v3838_v55  ;;  %v5280_v44 = vld [vmem:[%s5656_s11 + $0x159] sm:$0xff] }
 0x44d   : > { %v4293_v54 = vadd.f32 %v4177_v50, %v3870_v17  ;;  %v3971_v7 = vpop.f32.mrf.mxu0  ;;  %v5525_v55 = vld [vmem:[%s5654_s10 + $0x158] sm:$0xff] }
 0x44e   : > { %v4180_v40 = vpop.f32.mrf.mxu1  ;;  %5312 = vmatmul.msk.f32.gmra.mxu2 %vm346_vm1, %v5523_v12 }
 0x44f   : > { %v4325_v47 = vmax.f32 %v4261_v36, %v4293_v54  ;;  %5345 = vmatmul.msk.f32.gmra.mxu3 %vm346_vm1, %v5278_v63  ;;  %v5281_v54 = vld [vmem:[%s5656_s11 + $0x169] sm:$0xff] }
 0x450   : > { %5411 = vmatmul.msk.f32.gmra.mxu0 %vm346_vm1, %v5278_v63  ;;  %v8693_v63 = vld [vmem:[#allocation33_spill] sm:$0xff] }
 0x451   : > { %5444 = vmatmul.msk.f32.gmra.mxu1 %vm346_vm1, %v7633_v2  ;;  %v4361_v18 = vadd.f32 %v7998_v45, %v4325_v47  ;;  %v3548_v1 = vpop.f32.mrf.mxu2  ;;  %v4360_v2 = vadd.f32 %v7998_v45, %v4324_v21 }
 0x452   : > { %v3757_v49 = vpop.f32.mrf.mxu3  ;;  %v3839_v33 = vadd.f32 %v3548_v1, %v7618_v32 }
 0x453   : > { %v4393_v52 = vmax.f32 %v4361_v18, 0.0  ;;  %v3871_v62 = vadd.f32 %v3757_v49, %v7620_v16  ;;  %v4392_v30 = vmax.f32 %v4360_v2, 0.0  ;;  %v5526_v18 = vld [vmem:[%s5654_s10 + $0x168] sm:$0xff] }
 0x454   : > { %v4262_v60 = vadd.f32 %v3971_v7, %v3839_v33 }
 0x455   : > { %v4421_v26 = vmax.f32 %v4391_v10, %v4393_v52  ;;  %v4294_v58 = vadd.f32 %v4180_v40, %v3871_v62  ;;  %v3974_v56 = vpop.f32.mrf.mxu0  ;;  %v5282_v10 = vld [vmem:[%s5656_s11 + $0x171] sm:$0xff] }
 0x456   : > { %v4183_v41 = vpop.f32.mrf.mxu1  ;;  %5313 = vmatmul.msk.f32.gmra.mxu2 %vm346_vm1, %v5524_v53  ;;  %v5283_v53 = vld [vmem:[%s5656_s11 + $0x181] sm:$0xff] }
 0x457   : > { %4438 = vst.msk [vmem:[%s8017_s14 + $0x10] sm:$0xff] %vm4435_vm2, %v4421_v26  ;;  %v4326_v37 = vmax.f32 %v4262_v60, %v4294_v58  ;;  %5346 = vmatmul.msk.f32.gmra.mxu3 %vm346_vm1, %v5279_v46  ;;  %v5527_v58 = vld [vmem:[%s5654_s10 + $0x170] sm:$0xff] }
 0x458   : > { %5412 = vmatmul.msk.f32.gmra.mxu0 %vm346_vm1, %v5279_v46 }
 0x459   : > { %5445 = vmatmul.msk.f32.gmra.mxu1 %vm346_vm1, %v7650_v5  ;;  %v4362_v32 = vadd.f32 %v7998_v45, %v4326_v37  ;;  %v3551_v16 = vpop.f32.mrf.mxu2 }
 0x45a   : > { %v3760_v23 = vpop.f32.mrf.mxu3  ;;  %v3840_v43 = vadd.f32 %v3551_v16, %v7635_v28 }
 0x45b   : > { %v4394_v31 = vmax.f32 %v4362_v32, 0.0  ;;  %v3872_v59 = vadd.f32 %v3760_v23, %v7637_v57 }
 0x45c   : > { %v4263_v21 = vadd.f32 %v3974_v56, %v3840_v43 }
 0x45d   : > { %v4422_v50 = vmax.f32 %v4392_v30, %v4394_v31  ;;  %v4295_v38 = vadd.f32 %v4183_v41, %v3872_v59  ;;  %v3977_v25 = vpop.f32.mrf.mxu0  ;;  %v5528_v59 = vld [vmem:[%s5654_s10 + $0x180] sm:$0xff] }
 0x45e   : > { %v4186_v51 = vpop.f32.mrf.mxu1  ;;  %5314 = vmatmul.msk.f32.gmra.mxu2 %vm346_vm1, %v5525_v55 }
 0x45f   : > { %4439 = vst.msk [vmem:[%s8017_s14 + $0x18] sm:$0xff] %vm4435_vm2, %v4422_v50  ;;  %v4327_v5 = vmax.f32 %v4263_v21, %v4295_v38  ;;  %5347 = vmatmul.msk.f32.gmra.mxu3 %vm346_vm1, %v5280_v44 }
 0x460   : > { %5413 = vmatmul.msk.f32.gmra.mxu0 %vm346_vm1, %v5280_v44 }
 0x461   : > { %5446 = vmatmul.msk.f32.gmra.mxu1 %vm346_vm1, %v7667_v13  ;;  %v3554_v28 = vpop.f32.mrf.mxu2  ;;  %v4363_v26 = vadd.f32 %v7998_v45, %v4327_v5  ;;  %v5284_v5 = vld [vmem:[%s5656_s11 + $0x189] sm:$0xff] }
 0x462   : > { %v3763_v57 = vpop.f32.mrf.mxu3  ;;  %v3841_v17 = vadd.f32 %v3554_v28, %v7652_v34 }
 0x463   : > { %v3873_v36 = vadd.f32 %v3763_v57, %v8693_v63  ;;  %v4395_v56 = vmax.f32 %v4363_v26, 0.0  ;;  %v8699_v26 = vld [vmem:[#allocation39_spill] sm:$0xff] }
 0x464   : > { %v4264_v7 = vadd.f32 %v3977_v25, %v3841_v17  ;;  %v8694_v25 = vld [vmem:[#allocation40_spill] sm:$0xff] }
 0x465   : > { %v4296_v40 = vadd.f32 %v4186_v51, %v3873_v36  ;;  %v3980_v3 = vpop.f32.mrf.mxu0  ;;  %v5529_v36 = vld [vmem:[%s5654_s10 + $0x188] sm:$0xff] }
 0x466   : > { %v4189_v47 = vpop.f32.mrf.mxu1  ;;  %5315 = vmatmul.msk.f32.gmra.mxu2 %vm346_vm1, %v5526_v18  ;;  %v5285_v18 = vld [vmem:[%s5656_s11 + $0x199] sm:$0xff] }
 0x467   : > { %v4328_v12 = vmax.f32 %v4264_v7, %v4296_v40  ;;  %5348 = vmatmul.msk.f32.gmra.mxu3 %vm346_vm1, %v5281_v54  ;;  %v8696_v40 = vld [vmem:[#allocation35_spill] sm:$0xff] }
 0x468   : > { %5414 = vmatmul.msk.f32.gmra.mxu0 %vm346_vm1, %v5281_v54 }
 0x469   : > { %5447 = vmatmul.msk.f32.gmra.mxu1 %vm346_vm1, %v7684_v20  ;;  %v3557_v34 = vpop.f32.mrf.mxu2 }
 0x46a   : > { %v3766_v13 = vpop.f32.mrf.mxu3  ;;  %v3842_v1 = vadd.f32 %v3557_v34, %v7669_v42 }
 0x46b   : > { %v3874_v49 = vadd.f32 %v3766_v13, %v7671_v48 }
 0x46c   : > { %v4265_v52 = vadd.f32 %v3980_v3, %v3842_v1 }
 0x46d   : > { %v4297_v33 = vadd.f32 %v4189_v47, %v3874_v49  ;;  %v3983_v62 = vpop.f32.mrf.mxu0  ;;  %v8697_v47 = vld [vmem:[#allocation46_spill] sm:$0xff] }
 0x46e   : > { %v4192_v46 = vpop.f32.mrf.mxu1  ;;  %5316 = vmatmul.msk.f32.gmra.mxu2 %vm346_vm1, %v5527_v58  ;;  %v8700_v58 = vld [vmem:[#allocation44_spill] sm:$0xff] }
 0x46f   : > { %v4329_v60 = vmax.f32 %v4265_v52, %v4297_v33  ;;  %5349 = vmatmul.msk.f32.gmra.mxu3 %vm346_vm1, %v5282_v10  ;;  %v8698_v33 = vld [vmem:[#allocation43_spill] sm:$0xff] }
 0x470   : > { %5415 = vmatmul.msk.f32.gmra.mxu0 %vm346_vm1, %v5282_v10  ;;  %v5384_v10 = vld [vmem:[%s5654_s10 + $0x199] sm:$0xff] }
 0x471   : > { %5448 = vmatmul.msk.f32.gmra.mxu1 %vm346_vm1, %v7701_v24  ;;  %v4365_v42 = vadd.f32 %v7998_v45, %v4329_v60  ;;  %v3560_v48 = vpop.f32.mrf.mxu2  ;;  %v4364_v24 = vadd.f32 %v7998_v45, %v4328_v12 }
 0x472   : > { %v3769_v20 = vpop.f32.mrf.mxu3  ;;  %v3843_v2 = vadd.f32 %v3560_v48, %v7686_v15  ;;  %v5286_v48 = vld [vmem:[%s5656_s11 + $0x1a1] sm:$0xff] }
 0x473   : > { %v4397_v41 = vmax.f32 %v4365_v42, 0.0  ;;  %v3875_v37 = vadd.f32 %v3769_v20, %v7688_v19  ;;  %v4396_v50 = vmax.f32 %v4364_v24, 0.0 }
 0x474   : > { %v4266_v16 = vadd.f32 %v3983_v62, %v3843_v2 }
 0x475   : > { %v4423_v32 = vmax.f32 %v4395_v56, %v4397_v41  ;;  %v4298_v23 = vadd.f32 %v4192_v46, %v3875_v37  ;;  %v3986_v30 = vpop.f32.mrf.mxu0  ;;  %v5385_v37 = vld [vmem:[%s5654_s10 + $0x1a1] sm:$0xff] }
 0x476   : > { %v4195_v31 = vpop.f32.mrf.mxu1  ;;  %5317 = vmatmul.msk.f32.gmra.mxu2 %vm346_vm1, %v5528_v59  ;;  %v8702_v59 = vld [vmem:[#allocation42_spill] sm:$0xff] }
 0x477   : > { %4440 = vst.msk [vmem:[%s8017_s14 + $0x20] sm:$0xff] %vm4435_vm2, %v4423_v32  ;;  %v4330_v43 = vmax.f32 %v4266_v16, %v4298_v23  ;;  %5350 = vmatmul.msk.f32.gmra.mxu3 %vm346_vm1, %v5283_v53  ;;  %v8701_v16 = vld [vmem:[#allocation41_spill] sm:$0xff] }
 0x478   : > { %5416 = vmatmul.msk.f32.gmra.mxu0 %vm346_vm1, %v5283_v53 }
 0x479   : > { %5449 = vmatmul.msk.f32.gmra.mxu1 %vm346_vm1, %v7718_v9  ;;  %v4366_v15 = vadd.f32 %v7998_v45, %v4330_v43  ;;  %v3563_v19 = vpop.f32.mrf.mxu2 }
 0x47a   : > { %v3772_v44 = vpop.f32.mrf.mxu3  ;;  %v3844_v38 = vadd.f32 %v3563_v19, %v7703_v27  ;;  %v8695_v27 = vld [vmem:[#allocation38_spill] sm:$0xff]  ;;  %v8703_v19 = vld [vmem:[#allocation49_spill] sm:$0xff] }
 0x47b   : > { %v4398_v21 = vmax.f32 %v4366_v15, 0.0  ;;  %v3876_v51 = vadd.f32 %v3772_v44, %v8694_v25 }
 0x47c   : > { %v4267_v28 = vadd.f32 %v3986_v30, %v3844_v38 }
 0x47d   : > { %v4424_v55 = vmax.f32 %v4396_v50, %v4398_v21  ;;  %v4299_v57 = vadd.f32 %v4195_v31, %v3876_v51  ;;  %v3989_v17 = vpop.f32.mrf.mxu0 }
 0x47e   : > { %v4198_v63 = vpop.f32.mrf.mxu1  ;;  %5318 = vmatmul.msk.f32.gmra.mxu2 %vm346_vm1, %v5529_v36  ;;  %v8704_v36 = vld [vmem:[#allocation45_spill] sm:$0xff] }
 0x47f   : > { %4441 = vst.msk [vmem:[%s8017_s14 + $0x28] sm:$0xff] %vm4435_vm2, %v4424_v55  ;;  %v4331_v9 = vmax.f32 %v4267_v28, %v4299_v57  ;;  %5351 = vmatmul.msk.f32.gmra.mxu3 %vm346_vm1, %v5284_v5 }
 0x480   : > { %5417 = vmatmul.msk.f32.gmra.mxu0 %vm346_vm1, %v5284_v5 }
 0x481   : > { %5450 = vmatmul.msk.f32.gmra.mxu1 %vm346_vm1, %v8695_v27  ;;  %v3566_v54 = vpop.f32.mrf.mxu2  ;;  %v4367_v53 = vadd.f32 %v7998_v45, %v4331_v9 }
 0x482   : > { %v3775_v7 = vpop.f32.mrf.mxu3  ;;  %v3845_v3 = vadd.f32 %v3566_v54, %v8696_v40  ;;  %v8705_v54 = vld [vmem:[#allocation52_spill] sm:$0xff] }
 0x483   : > { %v3877_v12 = vadd.f32 %v3775_v7, %v8697_v47  ;;  %v4399_v24 = vmax.f32 %v4367_v53, 0.0 }
 0x484   : > { %v4268_v34 = vadd.f32 %v3989_v17, %v3845_v3 }
 0x485   : > { %v4300_v13 = vadd.f32 %v4198_v63, %v3877_v12  ;;  %v3992_v1 = vpop.f32.mrf.mxu0 }
 0x486   : > { %v4201_v49 = vpop.f32.mrf.mxu1  ;;  %5319 = vmatmul.msk.f32.gmra.mxu2 %vm346_vm1, %v8698_v33 }
 0x487   : > { %v4332_v52 = vmax.f32 %v4268_v34, %v4300_v13  ;;  %5352 = vmatmul.msk.f32.gmra.mxu3 %vm346_vm1, %v5285_v18 }
 0x488   : > { %5418 = vmatmul.msk.f32.gmra.mxu0 %vm346_vm1, %v5285_v18 }
 0x489   : > { %5451 = vmatmul.msk.f32.gmra.mxu1 %vm346_vm1, %v5384_v10  ;;  %v3569_v62 = vpop.f32.mrf.mxu2  ;;  %v4368_v5 = vadd.f32 %v7998_v45, %v4332_v52  ;;  %v8707_v52 = vld [vmem:[#allocation48_spill] sm:$0xff] }
 0x48a   : > { %v3778_v46 = vpop.f32.mrf.mxu3  ;;  %v3846_v60 = vadd.f32 %v3569_v62, %v8699_v26 }
 0x48b   : > { %v3878_v42 = vadd.f32 %v3778_v46, %v8700_v58  ;;  %v4400_v63 = vmax.f32 %v4368_v5, 0.0 }
 0x48c   : > { %v4269_v20 = vadd.f32 %v3992_v1, %v3846_v60 }
 0x48d   : > { %v4301_v56 = vadd.f32 %v4201_v49, %v3878_v42  ;;  %v3995_v41 = vpop.f32.mrf.mxu0  ;;  %v8706_v49 = vld [vmem:[#allocation47_spill] sm:$0xff] }
 0x48e   : > { %v4204_v2 = vpop.f32.mrf.mxu1  ;;  %5320 = vmatmul.msk.f32.gmra.mxu2 %vm346_vm1, %v8701_v16 }
 0x48f   : > { %v4333_v32 = vmax.f32 %v4269_v20, %v4301_v56  ;;  %5353 = vmatmul.msk.f32.gmra.mxu3 %vm346_vm1, %v5286_v48  ;;  %v8708_v20 = vld [vmem:[#allocation56_spill] sm:$0xff] }
 0x490   : > { %5419 = vmatmul.msk.f32.gmra.mxu0 %vm346_vm1, %v5286_v48 }
 0x491   : > { %5452 = vmatmul.msk.f32.gmra.mxu1 %vm346_vm1, %v5385_v37  ;;  %v4369_v23 = vadd.f32 %v7998_v45, %v4333_v32  ;;  %v3572_v30 = vpop.f32.mrf.mxu2 }
 0x492   : > { %v3781_v31 = vpop.f32.mrf.mxu3  ;;  %v3847_v15 = vadd.f32 %v3572_v30, %v8702_v59 }
 0x493   : > { %v4401_v43 = vmax.f32 %v4369_v23, 0.0  ;;  %v3879_v44 = vadd.f32 %v3781_v31, %v8703_v19  ;;  %v8710_v19 = vld [vmem:[#allocation51_spill] sm:$0xff] }
 0x494   : > { %v4270_v21 = vadd.f32 %v3995_v41, %v3847_v15  ;;  %v8709_v41 = vld [vmem:[#allocation50_spill] sm:$0xff] }
 0x495   : > { %v4425_v50 = vmax.f32 %v4399_v24, %v4401_v43  ;;  %v4302_v38 = vadd.f32 %v4204_v2, %v3879_v44  ;;  %v3998_v25 = vpop.f32.mrf.mxu0 }
 0x496   : > { %v4207_v51 = vpop.f32.mrf.mxu1 }
 0x497   : > { %4442 = vst.msk [vmem:[%s8017_s14 + $0x30] sm:$0xff] %vm4435_vm2, %v4425_v50  ;;  %v4334_v55 = vmax.f32 %v4270_v21, %v4302_v38  ;;  %v8711_v50 = vld [vmem:[#allocation61_spill] sm:$0xff] }
 0x499   : > { %v4370_v28 = vadd.f32 %v7998_v45, %v4334_v55  ;;  %v3575_v57 = vpop.f32.mrf.mxu2 }
 0x49a   : > { %v3784_v17 = vpop.f32.mrf.mxu3  ;;  %v3848_v27 = vadd.f32 %v3575_v57, %v8704_v36 }
 0x49b   : > { %v4402_v9 = vmax.f32 %v4370_v28, 0.0  ;;  %v3880_v7 = vadd.f32 %v3784_v17, %v8705_v54  ;;  %v8712_v54 = vld [vmem:[#allocation54_spill] sm:$0xff] }
 0x49c   : > { %v4271_v3 = vadd.f32 %v3998_v25, %v3848_v27 }
 0x49d   : > { %v4426_v40 = vmax.f32 %v4400_v63, %v4402_v9  ;;  %v4303_v47 = vadd.f32 %v4207_v51, %v3880_v7  ;;  %v4001_v12 = vpop.f32.mrf.mxu0 }
 0x49e   : > { %v4210_v18 = vpop.f32.mrf.mxu1 }
 0x49f   : > { %4443 = vst.msk [vmem:[%s8017_s14 + $0x38] sm:$0xff] %vm4435_vm2, %v4426_v40  ;;  %v4335_v34 = vmax.f32 %v4271_v3, %v4303_v47  ;;  %v8713_v40 = vld [vmem:[#allocation55_spill] sm:$0xff] }
 0x4a1   : > { %v3578_v13 = vpop.f32.mrf.mxu2  ;;  %v4371_v23 = vadd.f32 %v7998_v45, %v4335_v34 }
 0x4a2   : > { %v3787_v1 = vpop.f32.mrf.mxu3  ;;  %v3849_v10 = vadd.f32 %v3578_v13, %v8706_v49 }
 0x4a3   : > { %v3881_v33 = vadd.f32 %v3787_v1, %v8707_v52  ;;  %v4403_v59 = vmax.f32 %v4371_v23, 0.0  ;;  %v8714_v52 = vld [vmem:[#allocation59_spill] sm:$0xff] }
 0x4a4   : > { %v4272_v62 = vadd.f32 %v4001_v12, %v3849_v10 }
 0x4a5   : > { %v4304_v46 = vadd.f32 %v4210_v18, %v3881_v33  ;;  %v4004_v26 = vpop.f32.mrf.mxu0 }
 0x4a6   : > { %v4213_v60 = vpop.f32.mrf.mxu1 }
 0x4a7   : > { %v4336_v58 = vmax.f32 %v4272_v62, %v4304_v46  ;;  %v8715_v62 = vld [vmem:[#allocation60_spill] sm:$0xff] }
 0x4a9   : > { %v3581_v42 = vpop.f32.mrf.mxu2  ;;  %v4372_v28 = vadd.f32 %v7998_v45, %v4336_v58 }
 0x4aa   : > { %v3790_v48 = vpop.f32.mrf.mxu3  ;;  %v3850_v56 = vadd.f32 %v3581_v42, %v8708_v20 }
 0x4ab   : > { %v3882_v2 = vadd.f32 %v3790_v48, %v8709_v41  ;;  %v4404_v36 = vmax.f32 %v4372_v28, 0.0  ;;  %v8716_v41 = vld [vmem:[#allocation62_spill] sm:$0xff] }
 0x4ac   : > { %v4273_v37 = vadd.f32 %v4004_v26, %v3850_v56 }
 0x4ad   : > { %v4305_v53 = vadd.f32 %v4213_v60, %v3882_v2  ;;  %v4007_v32 = vpop.f32.mrf.mxu0 }
 0x4ae   : > { %v4216_v16 = vpop.f32.mrf.mxu1 }
 0x4af   : > { %v4337_v30 = vmax.f32 %v4273_v37, %v4305_v53  ;;  %v8717_v37 = vld [vmem:[#allocation63_spill] sm:$0xff] }
 0x4b1   : > { %v4373_v31 = vadd.f32 %v7998_v45, %v4337_v30  ;;  %v3584_v24 = vpop.f32.mrf.mxu2 }
 0x4b2   : > { %v3793_v43 = vpop.f32.mrf.mxu3  ;;  %v3851_v44 = vadd.f32 %v3584_v24, %v8710_v19 }
 0x4b3   : > { %v4405_v15 = vmax.f32 %v4373_v31, 0.0  ;;  %v3883_v21 = vadd.f32 %v3793_v43, %v8711_v50  ;;  %v8718_v50 = vld [vmem:[#allocation64_spill] sm:$0xff] }
 0x4b4   : > { %v4274_v25 = vadd.f32 %v4007_v32, %v3851_v44 }
 0x4b5   : > { %v4427_v38 = vmax.f32 %v4403_v59, %v4405_v15  ;;  %v4306_v51 = vadd.f32 %v4216_v16, %v3883_v21  ;;  %v4010_v5 = vpop.f32.mrf.mxu0 }
 0x4b6   : > { %v4219_v55 = vpop.f32.mrf.mxu1 }
 0x4b7   : > { %4444 = vst.msk [vmem:[%s8017_s14 + $0x40] sm:$0xff] %vm4435_vm2, %v4427_v38  ;;  %v4338_v57 = vmax.f32 %v4274_v25, %v4306_v51  ;;  %v8719_v38 = vld [vmem:[#allocation65_spill] sm:$0xff] }
 0x4b9   : > { %v4374_v17 = vadd.f32 %v7998_v45, %v4338_v57  ;;  %v3587_v63 = vpop.f32.mrf.mxu2 }
 0x4ba   : > { %v3796_v9 = vpop.f32.mrf.mxu3  ;;  %v3852_v7 = vadd.f32 %v3587_v63, %v8712_v54 }
 0x4bb   : > { %v4406_v27 = vmax.f32 %v4374_v17, 0.0  ;;  %v3884_v3 = vadd.f32 %v3796_v9, %v8713_v40  ;;  %v8720_v40 = vld [vmem:[#allocation66_spill] sm:$0xff] }
 0x4bc   : > { %v4275_v12 = vadd.f32 %v4010_v5, %v3852_v7 }
 0x4bd   : > { %v4428_v47 = vmax.f32 %v4404_v36, %v4406_v27  ;;  %v4307_v18 = vadd.f32 %v4219_v55, %v3884_v3  ;;  %v4013_v34 = vpop.f32.mrf.mxu0 }
 0x4be   : > { %v4222_v13 = vpop.f32.mrf.mxu1 }
 0x4bf   : > { %4445 = vst.msk [vmem:[%s8017_s14 + $0x48] sm:$0xff] %vm4435_vm2, %v4428_v47  ;;  %v4339_v1 = vmax.f32 %v4275_v12, %v4307_v18  ;;  %v8721_v47 = vld [vmem:[#allocation67_spill] sm:$0xff] }
 0x4c1   : > { %v3590_v49 = vpop.f32.mrf.mxu2  ;;  %v4375_v31 = vadd.f32 %v7998_v45, %v4339_v1 }
 0x4c2   : > { %v3799_v10 = vpop.f32.mrf.mxu3  ;;  %v3853_v33 = vadd.f32 %v3590_v49, %v8714_v52 }
 0x4c3   : > { %v3885_v46 = vadd.f32 %v3799_v10, %v8715_v62  ;;  %v4407_v19 = vmax.f32 %v4375_v31, 0.0 }
 0x4c4   : > { %v4276_v26 = vadd.f32 %v4013_v34, %v3853_v33 }
 0x4c5   : > { %v4308_v60 = vadd.f32 %v4222_v13, %v3885_v46  ;;  %v4016_v58 = vpop.f32.mrf.mxu0  ;;  %v8722_v46 = vld [vmem:[#allocation68_spill] sm:$0xff] }
 0x4c6   : > { %v4225_v42 = vpop.f32.mrf.mxu1 }
 0x4c7   : > { %v4340_v48 = vmax.f32 %v4276_v26, %v4308_v60 }
 0x4c9   : > { %v3593_v20 = vpop.f32.mrf.mxu2  ;;  %v4376_v17 = vadd.f32 %v7998_v45, %v4340_v48 }
 0x4ca   : > { %v3802_v56 = vpop.f32.mrf.mxu3  ;;  %v3854_v2 = vadd.f32 %v3593_v20, %v8716_v41 }
 0x4cb   : > { %v3886_v53 = vadd.f32 %v3802_v56, %v8717_v37  ;;  %v4408_v54 = vmax.f32 %v4376_v17, 0.0  ;;  %v8723_v37 = vld [vmem:[#allocation69_spill] sm:$0xff] }
 0x4cc   : > { %v4277_v32 = vadd.f32 %v4016_v58, %v3854_v2 }
 0x4cd   : > { %v4309_v16 = vadd.f32 %v4225_v42, %v3886_v53  ;;  %v4019_v23 = vpop.f32.mrf.mxu0 }
 0x4ce   : > { %v4228_v30 = vpop.f32.mrf.mxu1 }
 0x4cf   : > { %v4341_v24 = vmax.f32 %v4277_v32, %v4309_v16 }
 0x4d1   : > { %v4377_v43 = vadd.f32 %v7998_v45, %v4341_v24  ;;  %v3596_v59 = vpop.f32.mrf.mxu2 }
 0x4d2   : > { %v3805_v15 = vpop.f32.mrf.mxu3  ;;  %v3855_v21 = vadd.f32 %v3596_v59, %v8718_v50  ;;  %v8724_v50 = vld [vmem:[#allocation70_spill] sm:$0xff] }
 0x4d3   : > { %v4409_v44 = vmax.f32 %v4377_v43, 0.0  ;;  %v3887_v25 = vadd.f32 %v3805_v15, %v8719_v38 }
 0x4d4   : > { %v4278_v5 = vadd.f32 %v4019_v23, %v3855_v21 }
 0x4d5   : > { %v4429_v51 = vmax.f32 %v4407_v19, %v4409_v44  ;;  %v4310_v55 = vadd.f32 %v4228_v30, %v3887_v25  ;;  %v4022_v28 = vpop.f32.mrf.mxu0 }
 0x4d6   : > { %v4231_v57 = vpop.f32.mrf.mxu1 }
 0x4d7   : > { %4446 = vst.msk [vmem:[%s8017_s14 + $0x50] sm:$0xff] %vm4435_vm2, %v4429_v51  ;;  %v4342_v63 = vmax.f32 %v4278_v5, %v4310_v55 }
 0x4d9   : > { %v4378_v9 = vadd.f32 %v7998_v45, %v4342_v63  ;;  %v3599_v36 = vpop.f32.mrf.mxu2 }
 0x4da   : > { %v3808_v27 = vpop.f32.mrf.mxu3  ;;  %v3856_v3 = vadd.f32 %v3599_v36, %v8720_v40 }
 0x4db   : > { %v4410_v7 = vmax.f32 %v4378_v9, 0.0  ;;  %v3888_v12 = vadd.f32 %v3808_v27, %v8721_v47 }
 0x4dc   : > { %v4279_v34 = vadd.f32 %v4022_v28, %v3856_v3 }
 0x4dd   : > { %v4430_v18 = vmax.f32 %v4408_v54, %v4410_v7  ;;  %v4311_v13 = vadd.f32 %v4231_v57, %v3888_v12  ;;  %v4025_v1 = vpop.f32.mrf.mxu0 }
 0x4de   : > { %v4234_v49 = vpop.f32.mrf.mxu1 }
 0x4df   : > { %4447 = vst.msk [vmem:[%s8017_s14 + $0x58] sm:$0xff] %vm4435_vm2, %v4430_v18  ;;  %v4343_v10 = vmax.f32 %v4279_v34, %v4311_v13 }
 0x4e1   : > { %v3602_v52 = vpop.f32.mrf.mxu2 }
 0x4e2   : > { %v3811_v33 = vpop.f32.mrf.mxu3  ;;  %v3857_v62 = vadd.f32 %v3602_v52, %v7888_v0  ;;  %v4379_v0 = vadd.f32 %v7998_v45, %v4343_v10 }
 0x4e3   : > { %v3889_v26 = vadd.f32 %v3811_v33, %v8722_v46 }
 0x4e4   : > { %v4280_v60 = vadd.f32 %v4025_v1, %v3857_v62  ;;  %v4411_v15 = vmax.f32 %v4379_v0, 0.0 }
 0x4e5   : > { %v4312_v58 = vadd.f32 %v4234_v49, %v3889_v26  ;;  %v4028_v42 = vpop.f32.mrf.mxu0 }
 0x4e6   : > { %v4237_v48 = vpop.f32.mrf.mxu1 }
 0x4e7   : > { %v4344_v20 = vmax.f32 %v4280_v60, %v4312_v58 }
 0x4e9   : > { %v3605_v56 = vpop.f32.mrf.mxu2  ;;  %v4380_v55 = vadd.f32 %v7998_v45, %v4344_v20 }
 0x4ea   : > { %v3814_v41 = vpop.f32.mrf.mxu3  ;;  %v3858_v2 = vadd.f32 %v3605_v56, %v7901_v29 }
 0x4eb   : > { %v3890_v53 = vadd.f32 %v3814_v41, %v8723_v37  ;;  %v4412_v9 = vmax.f32 %v4380_v55, 0.0 }
 0x4ec   : > { %v4281_v32 = vadd.f32 %v4028_v42, %v3858_v2 }
 0x4ed   : > { %v4313_v16 = vadd.f32 %v4237_v48, %v3890_v53  ;;  %v4031_v23 = vpop.f32.mrf.mxu0 }
 0x4ee   : > { %v4240_v30 = vpop.f32.mrf.mxu1 }
 0x4ef   : > { %v4345_v31 = vmax.f32 %v4281_v32, %v4313_v16 }
 0x4f1   : > { %v4381_v24 = vadd.f32 %v7998_v45, %v4345_v31  ;;  %v3608_v43 = vpop.f32.mrf.mxu2 }
 0x4f2   : > { %v3817_v59 = vpop.f32.mrf.mxu3  ;;  %v3859_v44 = vadd.f32 %v3608_v43, %v7914_v35 }
 0x4f3   : > { %v4413_v19 = vmax.f32 %v4381_v24, 0.0  ;;  %v3891_v29 = vadd.f32 %v3817_v59, %v8724_v50 }
 0x4f4   : > { %v4282_v38 = vadd.f32 %v4031_v23, %v3859_v44 }
 0x4f5   : > { %v4431_v21 = vmax.f32 %v4411_v15, %v4413_v19  ;;  %v4314_v25 = vadd.f32 %v4240_v30, %v3891_v29  ;;  %v4034_v51 = vpop.f32.mrf.mxu0 }
 0x4f6   : > { %v4243_v5 = vpop.f32.mrf.mxu1 }
 0x4f7   : > { %4448 = vst.msk [vmem:[%s8017_s14 + $0x60] sm:$0xff] %vm4435_vm2, %v4431_v21  ;;  %v4346_v28 = vmax.f32 %v4282_v38, %v4314_v25 }
 0x4f9   : > { %v4382_v57 = vadd.f32 %v7998_v45, %v4346_v28  ;;  %v3611_v17 = vpop.f32.mrf.mxu2 }
 0x4fa   : > { %v3820_v63 = vpop.f32.mrf.mxu3  ;;  %v3860_v35 = vadd.f32 %v3611_v17, %v7927_v14 }
 0x4fb   : > { %v4414_v36 = vmax.f32 %v4382_v57, 0.0  ;;  %v3892_v27 = vadd.f32 %v3820_v63, %v7929_v39 }
 0x4fc   : > { %v4283_v7 = vadd.f32 %v4034_v51, %v3860_v35 }
 0x4fd   : > { %v4432_v54 = vmax.f32 %v4412_v9, %v4414_v36  ;;  %v4315_v40 = vadd.f32 %v4243_v5, %v3892_v27  ;;  %v4037_v3 = vpop.f32.mrf.mxu0 }
 0x4fe   : > { %v4246_v47 = vpop.f32.mrf.mxu1 }
 0x4ff   : > { %4449 = vst.msk [vmem:[%s8017_s14 + $0x68] sm:$0xff] %vm4435_vm2, %v4432_v54  ;;  %v4347_v12 = vmax.f32 %v4283_v7, %v4315_v40 }
 0x501   : > { %v3614_v18 = vpop.f32.mrf.mxu2  ;;  %v4383_v42 = vadd.f32 %v7998_v45, %v4347_v12 }
 0x502   : > { %v3823_v34 = vpop.f32.mrf.mxu3  ;;  %v3861_v13 = vadd.f32 %v3614_v18, %v7940_v8 }
 0x503   : > { %v3893_v1 = vadd.f32 %v3823_v34, %v7942_v11  ;;  %v4415_v2 = vmax.f32 %v4383_v42, 0.0 }
 0x504   : > { %v4284_v49 = vadd.f32 %v4037_v3, %v3861_v13 }
 0x505   : > { %v4316_v10 = vadd.f32 %v4246_v47, %v3893_v1  ;;  %v4040_v14 = vpop.f32.mrf.mxu0 }
 0x506   : > { %v4249_v33 = vpop.f32.mrf.mxu1 }
 0x507   : > { %v4348_v52 = vmax.f32 %v4284_v49, %v4316_v10 }
 0x509   : > { %v3617_v39 = vpop.f32.mrf.mxu2  ;;  %v4384_v23 = vadd.f32 %v7998_v45, %v4348_v52 }
 0x50a   : > { %v3826_v62 = vpop.f32.mrf.mxu3  ;;  %v3862_v46 = vadd.f32 %v3617_v39, %v7953_v22 }
 0x50b   : > { %v3894_v26 = vadd.f32 %v3826_v62, %v7955_v4  ;;  %v4416_v31 = vmax.f32 %v4384_v23, 0.0 }
 0x50c   : > { %v4285_v60 = vadd.f32 %v4040_v14, %v3862_v46 }
 0x50d   : > { %v4317_v58 = vadd.f32 %v4249_v33, %v3894_v26  ;;  %v4043_v11 = vpop.f32.mrf.mxu0 }
 0x50e   : > { %v4252_v20 = vpop.f32.mrf.mxu1 }
 0x50f   : > { %v4349_v48 = vmax.f32 %v4285_v60, %v4317_v58 }
 0x511   : > { %v4385_v8 = vadd.f32 %v7998_v45, %v4349_v48  ;;  %v3620_v56 = vpop.f32.mrf.mxu2 }
 0x512   : > { %v3829_v41 = vpop.f32.mrf.mxu3  ;;  %v3863_v53 = vadd.f32 %v3620_v56, %v7966_v61 }
 0x513   : > { %v4417_v37 = vmax.f32 %v4385_v8, 0.0  ;;  %v3895_v22 = vadd.f32 %v3829_v41, %v7968_v6 }
 0x514   : > { %v4286_v32 = vadd.f32 %v4043_v11, %v3863_v53 }
 0x515   : > { %v4433_v4 = vmax.f32 %v4415_v2, %v4417_v37  ;;  %v4318_v16 = vadd.f32 %v4252_v20, %v3895_v22 }
 0x517   : > { %4450 = vst.msk [vmem:[%s8017_s14 + $0x70] sm:$0xff] %vm4435_vm2, %v4433_v4  ;;  %v4350_v30 = vmax.f32 %v4286_v32, %v4318_v16 }
 0x519   : > { %v4386_v0 = vadd.f32 %v7998_v45, %v4350_v30 }
 0x51b   : > { %v4418_v24 = vmax.f32 %v4386_v0, 0.0 }
 0x51d   : > { %v4434_v43 = vmax.f32 %v4416_v31, %v4418_v24 }
 0x51f   : > { %4451 = vst.msk [vmem:[%s8017_s14 + $0x78] sm:$0xff] %vm4435_vm2, %v4434_v43 }
 0x520 PF: > { %s14_s19 = sadd.s32 1, %s5568_s19   ;;  %s8725_s15 = smov %s5560_s17 }
 0x521   : > { %p11_p7 = scmp.ge.s32.totalorder %s14_s19, 6   ;;  %s8726_s16 = smov %s5564_s18 }
 0x522   : > { %s8727_s17 = smov %s8730_s20  ;;  %s8728_s18 = smov %s8734_s21 }
 0x523   :  { %13 = sbr.rel (!%p11_p7) target bundleno = 3 (0x3), region = 83 }

// kernel: mushroom_cnn_forward.5
= control target key start
LH: loop header
LB: loop body
LE: loop exit
PB: predicated region body
PF: predicated region fallthrough
CT: control target
= control target key end

     0   :  { %s6013_s15 = smov 0   ;;  %s6015_s16 = smov 0   ;;  %s7198_s0 = inlined_call_operand.vmem [shape: bf16[2,2048], index: 0, kind: input, shape index: {}]   ;;  %s7199_s1 = inlined_call_operand.vmem [shape: bf16[2048,512], index: 1, kind: input, shape index: {}]   ;;  %s7200_s2 = inlined_call_operand.vmem [shape: f32[1,512], index: 2, kind: input, shape index: {}]   ;;  %s7201_s3 = inlined_call_operand.vmem [shape: f32[512,10], index: 3, kind: input, shape index: {}]   ;;  %s7202_s4 = inlined_call_operand.vmem [shape: f32[2,2,10], index: 4, kind: output, shape index: {}]  }
   0x1   :  { %s6017_s17 = smov 0   ;;  %s6019_s18 = smov 0  }
   0x2   :  { %s6021_s19 = smov 0  }
   0x3 LB: > { %s26_s20 = sadd.s32 1, %s5981_s18  ;;  %p68_p1 = scmp.ne.s32.totalorder %s5973_s16, %s5969_s15  ;;  %s5985_s19 = sphi %s6021_s19, %s14_s19   ;;  %s5981_s18 = sphi %s6019_s18, %s7206_s18   ;;  %s5977_s17 = sphi %s6017_s17, %s7205_s17   ;;  %s5973_s16 = sphi %s6015_s16, %s7204_s16   ;;  %s5969_s15 = sphi %s6013_s15, %s7203_s15  }
   0x4   : > { %p28_p0 = scmp.ge.s32.totalorder %s26_s20, 2  ;;  %p69_p2 = scmp.eq.s32.totalorder %s5985_s19, 0 }
   0x5   : > { %s61_s22 = sadd.s32 1, %s5973_s16  ;;  %p4605_p5 = scmp.ge.s32.totalorder %s5985_s19, 2 }
   0x6   : > { %s7208_s20 = smov (%p28_p0, %s26_s20), 0  ;;  %p70_p3 = por %p69_p2, %p68_p1 }
   0x7   : > { %s57_s21 = ssub.s32 %s5981_s18, %s7208_s20  ;;  %180 = sbr.rel (%p4605_p5) target bundleno = 272 (0x110), region = 20 }
   0x8   : > { %p59_p4 = scmp.eq.s32.totalorder %s57_s21, 0 }
   0xa   : > { %s6048_s23 = scalar_select %p59_p4, %s5973_s16, %s61_s22  }
   0xc   : > { %183 = sbr.rel (!%p70_p3) target bundleno = 272 (0x110), region = 24  ;;  %s185_s24 = sand.u32 (%p70_p3), 1, %s5973_s16  }
   0xd   : > { %s5641_s25 = sshll.u32 (%p70_p3), %s5981_s18, 3  ;;  %s4606_s26 = sshll.u32 (%p70_p3), %s185_s24, 11 }
   0xe   : > { %s6056_s29 = scalar_lea.vmem (%p70_p3), %s7199_s1, %s5641_s25  ;;  %s6061_s30 = scalar_lea.vmem (%p70_p3), [#allocation3], %s4606_s26 }
   0xf   : > { %v733_v0 = vld [vmem:[%s6056_s29] sm:$0xff] (%p70_p3)  ;;  %v735_v1 = vld [vmem:[%s6056_s29 + $0x10] sm:$0xff] (%p70_p3) }
  0x10   : > { %v737_v2 = vld [vmem:[%s6056_s29 + $0x20] sm:$0xff] (%p70_p3)  ;;  %734 = vst [vmem:[%s6061_s30] sm:$0xff] (%p70_p3), %v733_v0  ;;  %v739_v3 = vld [vmem:[%s6056_s29 + $0x30] sm:$0xff] (%p70_p3) }
  0x11   : > { %736 = vst [vmem:[%s6061_s30 + $0x8] sm:$0xff] %v735_v1  ;;  %v741_v4 = vld [vmem:[%s6056_s29 + $0x40] sm:$0xff]  ;;  %v743_v5 = vld [vmem:[%s6056_s29 + $0x50] sm:$0xff] }
  0x12   : > { %738 = vst [vmem:[%s6061_s30 + $0x10] sm:$0xff] %v737_v2  ;;  %v745_v6 = vld [vmem:[%s6056_s29 + $0x60] sm:$0xff]  ;;  %v747_v7 = vld [vmem:[%s6056_s29 + $0x70] sm:$0xff] }
  0x13   : > { %740 = vst [vmem:[%s6061_s30 + $0x18] sm:$0xff] %v739_v3  ;;  %v749_v8 = vld [vmem:[%s6056_s29 + $0x80] sm:$0xff]  ;;  %v751_v9 = vld [vmem:[%s6056_s29 + $0x90] sm:$0xff] }
  0x14   : > { %742 = vst [vmem:[%s6061_s30 + $0x20] sm:$0xff] %v741_v4  ;;  %v753_v10 = vld [vmem:[%s6056_s29 + $0xa0] sm:$0xff]  ;;  %v755_v11 = vld [vmem:[%s6056_s29 + $0xb0] sm:$0xff] }
  0x15   : > { %744 = vst [vmem:[%s6061_s30 + $0x28] sm:$0xff] %v743_v5  ;;  %v757_v12 = vld [vmem:[%s6056_s29 + $0xc0] sm:$0xff]  ;;  %v759_v13 = vld [vmem:[%s6056_s29 + $0xd0] sm:$0xff] }
  0x16   : > { %746 = vst [vmem:[%s6061_s30 + $0x30] sm:$0xff] %v745_v6  ;;  %v761_v14 = vld [vmem:[%s6056_s29 + $0xe0] sm:$0xff]  ;;  %v763_v15 = vld [vmem:[%s6056_s29 + $0xf0] sm:$0xff] }
  0x17   : > { %748 = vst [vmem:[%s6061_s30 + $0x38] sm:$0xff] %v747_v7  ;;  %v765_v16 = vld [vmem:[%s6056_s29 + $0x100] sm:$0xff]  ;;  %v767_v17 = vld [vmem:[%s6056_s29 + $0x110] sm:$0xff] }
  0x18   : > { %750 = vst [vmem:[%s6061_s30 + $0x40] sm:$0xff] %v749_v8  ;;  %v769_v18 = vld [vmem:[%s6056_s29 + $0x120] sm:$0xff]  ;;  %v771_v19 = vld [vmem:[%s6056_s29 + $0x130] sm:$0xff] }
  0x19   : > { %752 = vst [vmem:[%s6061_s30 + $0x48] sm:$0xff] %v751_v9  ;;  %v773_v20 = vld [vmem:[%s6056_s29 + $0x140] sm:$0xff]  ;;  %v775_v21 = vld [vmem:[%s6056_s29 + $0x150] sm:$0xff] }
  0x1a   : > { %754 = vst [vmem:[%s6061_s30 + $0x50] sm:$0xff] %v753_v10  ;;  %v777_v22 = vld [vmem:[%s6056_s29 + $0x160] sm:$0xff]  ;;  %v779_v23 = vld [vmem:[%s6056_s29 + $0x170] sm:$0xff] }
  0x1b   : > { %756 = vst [vmem:[%s6061_s30 + $0x58] sm:$0xff] %v755_v11  ;;  %v781_v24 = vld [vmem:[%s6056_s29 + $0x180] sm:$0xff]  ;;  %v783_v25 = vld [vmem:[%s6056_s29 + $0x190] sm:$0xff] }
  0x1c   : > { %758 = vst [vmem:[%s6061_s30 + $0x60] sm:$0xff] %v757_v12  ;;  %v785_v26 = vld [vmem:[%s6056_s29 + $0x1a0] sm:$0xff]  ;;  %v787_v27 = vld [vmem:[%s6056_s29 + $0x1b0] sm:$0xff] }
  0x1d   : > { %760 = vst [vmem:[%s6061_s30 + $0x68] sm:$0xff] %v759_v13  ;;  %v789_v28 = vld [vmem:[%s6056_s29 + $0x1c0] sm:$0xff]  ;;  %v791_v29 = vld [vmem:[%s6056_s29 + $0x1d0] sm:$0xff] }
  0x1e   : > { %762 = vst [vmem:[%s6061_s30 + $0x70] sm:$0xff] %v761_v14  ;;  %v793_v30 = vld [vmem:[%s6056_s29 + $0x1e0] sm:$0xff]  ;;  %v795_v31 = vld [vmem:[%s6056_s29 + $0x1f0] sm:$0xff] }
  0x1f   : > { %764 = vst [vmem:[%s6061_s30 + $0x78] sm:$0xff] %v763_v15  ;;  %v797_v32 = vld [vmem:[%s6056_s29 + $0x200] sm:$0xff]  ;;  %v799_v33 = vld [vmem:[%s6056_s29 + $0x210] sm:$0xff] }
  0x20   : > { %766 = vst [vmem:[%s6061_s30 + $0x80] sm:$0xff] %v765_v16  ;;  %v801_v34 = vld [vmem:[%s6056_s29 + $0x220] sm:$0xff]  ;;  %v803_v35 = vld [vmem:[%s6056_s29 + $0x230] sm:$0xff] }
  0x21   : > { %768 = vst [vmem:[%s6061_s30 + $0x88] sm:$0xff] %v767_v17  ;;  %v805_v36 = vld [vmem:[%s6056_s29 + $0x240] sm:$0xff]  ;;  %v807_v37 = vld [vmem:[%s6056_s29 + $0x250] sm:$0xff] }
  0x22   : > { %770 = vst [vmem:[%s6061_s30 + $0x90] sm:$0xff] %v769_v18  ;;  %v809_v38 = vld [vmem:[%s6056_s29 + $0x260] sm:$0xff]  ;;  %v811_v39 = vld [vmem:[%s6056_s29 + $0x270] sm:$0xff] }
  0x23   : > { %772 = vst [vmem:[%s6061_s30 + $0x98] sm:$0xff] %v771_v19  ;;  %v813_v40 = vld [vmem:[%s6056_s29 + $0x280] sm:$0xff]  ;;  %v815_v41 = vld [vmem:[%s6056_s29 + $0x290] sm:$0xff] }
  0x24   : > { %774 = vst [vmem:[%s6061_s30 + $0xa0] sm:$0xff] %v773_v20  ;;  %v817_v42 = vld [vmem:[%s6056_s29 + $0x2a0] sm:$0xff]  ;;  %v819_v43 = vld [vmem:[%s6056_s29 + $0x2b0] sm:$0xff] }
  0x25   : > { %776 = vst [vmem:[%s6061_s30 + $0xa8] sm:$0xff] %v775_v21  ;;  %v821_v44 = vld [vmem:[%s6056_s29 + $0x2c0] sm:$0xff]  ;;  %v823_v45 = vld [vmem:[%s6056_s29 + $0x2d0] sm:$0xff] }
  0x26   : > { %778 = vst [vmem:[%s6061_s30 + $0xb0] sm:$0xff] %v777_v22  ;;  %v825_v46 = vld [vmem:[%s6056_s29 + $0x2e0] sm:$0xff]  ;;  %v827_v47 = vld [vmem:[%s6056_s29 + $0x2f0] sm:$0xff] }
  0x27   : > { %780 = vst [vmem:[%s6061_s30 + $0xb8] sm:$0xff] %v779_v23  ;;  %v829_v48 = vld [vmem:[%s6056_s29 + $0x300] sm:$0xff]  ;;  %v831_v49 = vld [vmem:[%s6056_s29 + $0x310] sm:$0xff] }
  0x28   : > { %782 = vst [vmem:[%s6061_s30 + $0xc0] sm:$0xff] %v781_v24  ;;  %v833_v50 = vld [vmem:[%s6056_s29 + $0x320] sm:$0xff]  ;;  %v835_v51 = vld [vmem:[%s6056_s29 + $0x330] sm:$0xff] }
  0x29   : > { %784 = vst [vmem:[%s6061_s30 + $0xc8] sm:$0xff] %v783_v25  ;;  %v837_v52 = vld [vmem:[%s6056_s29 + $0x340] sm:$0xff]  ;;  %v839_v53 = vld [vmem:[%s6056_s29 + $0x350] sm:$0xff] }
  0x2a   : > { %786 = vst [vmem:[%s6061_s30 + $0xd0] sm:$0xff] %v785_v26  ;;  %v841_v54 = vld [vmem:[%s6056_s29 + $0x360] sm:$0xff]  ;;  %v843_v55 = vld [vmem:[%s6056_s29 + $0x370] sm:$0xff] }
  0x2b   : > { %788 = vst [vmem:[%s6061_s30 + $0xd8] sm:$0xff] %v787_v27  ;;  %v845_v56 = vld [vmem:[%s6056_s29 + $0x380] sm:$0xff]  ;;  %v847_v57 = vld [vmem:[%s6056_s29 + $0x390] sm:$0xff] }
  0x2c   : > { %790 = vst [vmem:[%s6061_s30 + $0xe0] sm:$0xff] %v789_v28  ;;  %v849_v58 = vld [vmem:[%s6056_s29 + $0x3a0] sm:$0xff]  ;;  %v851_v59 = vld [vmem:[%s6056_s29 + $0x3b0] sm:$0xff] }
  0x2d   : > { %792 = vst [vmem:[%s6061_s30 + $0xe8] sm:$0xff] %v791_v29  ;;  %v853_v60 = vld [vmem:[%s6056_s29 + $0x3c0] sm:$0xff]  ;;  %v855_v61 = vld [vmem:[%s6056_s29 + $0x3d0] sm:$0xff] }
  0x2e   : > { %794 = vst [vmem:[%s6061_s30 + $0xf0] sm:$0xff] %v793_v30  ;;  %v857_v62 = vld [vmem:[%s6056_s29 + $0x3e0] sm:$0xff]  ;;  %v859_v63 = vld [vmem:[%s6056_s29 + $0x3f0] sm:$0xff] }
  0x2f   : > { %796 = vst [vmem:[%s6061_s30 + $0xf8] sm:$0xff] %v795_v31  ;;  %v861_v0 = vld [vmem:[%s6056_s29 + $0x400] sm:$0xff]  ;;  %v863_v1 = vld [vmem:[%s6056_s29 + $0x410] sm:$0xff] }
  0x30   : > { %798 = vst [vmem:[%s6061_s30 + $0x100] sm:$0xff] %v797_v32  ;;  %v865_v2 = vld [vmem:[%s6056_s29 + $0x420] sm:$0xff]  ;;  %v867_v3 = vld [vmem:[%s6056_s29 + $0x430] sm:$0xff] }
  0x31   : > { %800 = vst [vmem:[%s6061_s30 + $0x108] sm:$0xff] %v799_v33  ;;  %v869_v4 = vld [vmem:[%s6056_s29 + $0x440] sm:$0xff]  ;;  %v871_v5 = vld [vmem:[%s6056_s29 + $0x450] sm:$0xff] }
  0x32   : > { %802 = vst [vmem:[%s6061_s30 + $0x110] sm:$0xff] %v801_v34  ;;  %v873_v6 = vld [vmem:[%s6056_s29 + $0x460] sm:$0xff]  ;;  %v875_v7 = vld [vmem:[%s6056_s29 + $0x470] sm:$0xff] }
  0x33   : > { %804 = vst [vmem:[%s6061_s30 + $0x118] sm:$0xff] %v803_v35  ;;  %v877_v8 = vld [vmem:[%s6056_s29 + $0x480] sm:$0xff]  ;;  %v879_v9 = vld [vmem:[%s6056_s29 + $0x490] sm:$0xff] }
  0x34   : > { %806 = vst [vmem:[%s6061_s30 + $0x120] sm:$0xff] %v805_v36  ;;  %v881_v10 = vld [vmem:[%s6056_s29 + $0x4a0] sm:$0xff]  ;;  %v883_v11 = vld [vmem:[%s6056_s29 + $0x4b0] sm:$0xff] }
  0x35   : > { %808 = vst [vmem:[%s6061_s30 + $0x128] sm:$0xff] %v807_v37  ;;  %v885_v12 = vld [vmem:[%s6056_s29 + $0x4c0] sm:$0xff]  ;;  %v887_v13 = vld [vmem:[%s6056_s29 + $0x4d0] sm:$0xff] }
  0x36   : > { %810 = vst [vmem:[%s6061_s30 + $0x130] sm:$0xff] %v809_v38  ;;  %v889_v14 = vld [vmem:[%s6056_s29 + $0x4e0] sm:$0xff]  ;;  %v891_v15 = vld [vmem:[%s6056_s29 + $0x4f0] sm:$0xff] }
  0x37   : > { %812 = vst [vmem:[%s6061_s30 + $0x138] sm:$0xff] %v811_v39  ;;  %v893_v16 = vld [vmem:[%s6056_s29 + $0x500] sm:$0xff]  ;;  %v895_v17 = vld [vmem:[%s6056_s29 + $0x510] sm:$0xff] }
  0x38   : > { %814 = vst [vmem:[%s6061_s30 + $0x140] sm:$0xff] %v813_v40  ;;  %v897_v18 = vld [vmem:[%s6056_s29 + $0x520] sm:$0xff]  ;;  %v899_v19 = vld [vmem:[%s6056_s29 + $0x530] sm:$0xff] }
  0x39   : > { %816 = vst [vmem:[%s6061_s30 + $0x148] sm:$0xff] %v815_v41  ;;  %v901_v20 = vld [vmem:[%s6056_s29 + $0x540] sm:$0xff]  ;;  %v903_v21 = vld [vmem:[%s6056_s29 + $0x550] sm:$0xff] }
  0x3a   : > { %818 = vst [vmem:[%s6061_s30 + $0x150] sm:$0xff] %v817_v42  ;;  %v905_v22 = vld [vmem:[%s6056_s29 + $0x560] sm:$0xff]  ;;  %v907_v23 = vld [vmem:[%s6056_s29 + $0x570] sm:$0xff] }
  0x3b   : > { %820 = vst [vmem:[%s6061_s30 + $0x158] sm:$0xff] %v819_v43  ;;  %v909_v24 = vld [vmem:[%s6056_s29 + $0x580] sm:$0xff]  ;;  %v911_v25 = vld [vmem:[%s6056_s29 + $0x590] sm:$0xff] }
  0x3c   : > { %822 = vst [vmem:[%s6061_s30 + $0x160] sm:$0xff] %v821_v44  ;;  %v913_v26 = vld [vmem:[%s6056_s29 + $0x5a0] sm:$0xff]  ;;  %v915_v27 = vld [vmem:[%s6056_s29 + $0x5b0] sm:$0xff] }
  0x3d   : > { %824 = vst [vmem:[%s6061_s30 + $0x168] sm:$0xff] %v823_v45  ;;  %v917_v28 = vld [vmem:[%s6056_s29 + $0x5c0] sm:$0xff]  ;;  %v919_v29 = vld [vmem:[%s6056_s29 + $0x5d0] sm:$0xff] }
  0x3e   : > { %826 = vst [vmem:[%s6061_s30 + $0x170] sm:$0xff] %v825_v46  ;;  %v921_v30 = vld [vmem:[%s6056_s29 + $0x5e0] sm:$0xff]  ;;  %v923_v31 = vld [vmem:[%s6056_s29 + $0x5f0] sm:$0xff] }
  0x3f   : > { %828 = vst [vmem:[%s6061_s30 + $0x178] sm:$0xff] %v827_v47  ;;  %v925_v32 = vld [vmem:[%s6056_s29 + $0x600] sm:$0xff]  ;;  %v927_v33 = vld [vmem:[%s6056_s29 + $0x610] sm:$0xff] }
  0x40   : > { %830 = vst [vmem:[%s6061_s30 + $0x180] sm:$0xff] %v829_v48  ;;  %v929_v34 = vld [vmem:[%s6056_s29 + $0x620] sm:$0xff]  ;;  %v931_v35 = vld [vmem:[%s6056_s29 + $0x630] sm:$0xff] }
  0x41   : > { %832 = vst [vmem:[%s6061_s30 + $0x188] sm:$0xff] %v831_v49  ;;  %v933_v36 = vld [vmem:[%s6056_s29 + $0x640] sm:$0xff]  ;;  %v935_v37 = vld [vmem:[%s6056_s29 + $0x650] sm:$0xff] }
  0x42   : > { %834 = vst [vmem:[%s6061_s30 + $0x190] sm:$0xff] %v833_v50  ;;  %v937_v38 = vld [vmem:[%s6056_s29 + $0x660] sm:$0xff]  ;;  %v939_v39 = vld [vmem:[%s6056_s29 + $0x670] sm:$0xff] }
  0x43   : > { %836 = vst [vmem:[%s6061_s30 + $0x198] sm:$0xff] %v835_v51  ;;  %v941_v40 = vld [vmem:[%s6056_s29 + $0x680] sm:$0xff]  ;;  %v943_v41 = vld [vmem:[%s6056_s29 + $0x690] sm:$0xff] }
  0x44   : > { %838 = vst [vmem:[%s6061_s30 + $0x1a0] sm:$0xff] %v837_v52  ;;  %v945_v42 = vld [vmem:[%s6056_s29 + $0x6a0] sm:$0xff]  ;;  %v947_v43 = vld [vmem:[%s6056_s29 + $0x6b0] sm:$0xff] }
  0x45   : > { %840 = vst [vmem:[%s6061_s30 + $0x1a8] sm:$0xff] %v839_v53  ;;  %v949_v44 = vld [vmem:[%s6056_s29 + $0x6c0] sm:$0xff]  ;;  %v951_v45 = vld [vmem:[%s6056_s29 + $0x6d0] sm:$0xff] }
  0x46   : > { %842 = vst [vmem:[%s6061_s30 + $0x1b0] sm:$0xff] %v841_v54  ;;  %v953_v46 = vld [vmem:[%s6056_s29 + $0x6e0] sm:$0xff]  ;;  %v955_v47 = vld [vmem:[%s6056_s29 + $0x6f0] sm:$0xff] }
  0x47   : > { %844 = vst [vmem:[%s6061_s30 + $0x1b8] sm:$0xff] %v843_v55  ;;  %v957_v48 = vld [vmem:[%s6056_s29 + $0x700] sm:$0xff]  ;;  %v959_v49 = vld [vmem:[%s6056_s29 + $0x710] sm:$0xff] }
  0x48   : > { %846 = vst [vmem:[%s6061_s30 + $0x1c0] sm:$0xff] %v845_v56  ;;  %v961_v50 = vld [vmem:[%s6056_s29 + $0x720] sm:$0xff]  ;;  %v963_v51 = vld [vmem:[%s6056_s29 + $0x730] sm:$0xff] }
  0x49   : > { %848 = vst [vmem:[%s6061_s30 + $0x1c8] sm:$0xff] %v847_v57  ;;  %v965_v52 = vld [vmem:[%s6056_s29 + $0x740] sm:$0xff]  ;;  %v967_v53 = vld [vmem:[%s6056_s29 + $0x750] sm:$0xff] }
  0x4a   : > { %850 = vst [vmem:[%s6061_s30 + $0x1d0] sm:$0xff] %v849_v58  ;;  %v969_v54 = vld [vmem:[%s6056_s29 + $0x760] sm:$0xff]  ;;  %v971_v55 = vld [vmem:[%s6056_s29 + $0x770] sm:$0xff] }
  0x4b   : > { %852 = vst [vmem:[%s6061_s30 + $0x1d8] sm:$0xff] %v851_v59  ;;  %v973_v56 = vld [vmem:[%s6056_s29 + $0x780] sm:$0xff]  ;;  %v975_v57 = vld [vmem:[%s6056_s29 + $0x790] sm:$0xff] }
  0x4c   : > { %854 = vst [vmem:[%s6061_s30 + $0x1e0] sm:$0xff] %v853_v60  ;;  %v977_v58 = vld [vmem:[%s6056_s29 + $0x7a0] sm:$0xff]  ;;  %v979_v59 = vld [vmem:[%s6056_s29 + $0x7b0] sm:$0xff] }
  0x4d   : > { %856 = vst [vmem:[%s6061_s30 + $0x1e8] sm:$0xff] %v855_v61  ;;  %v981_v60 = vld [vmem:[%s6056_s29 + $0x7c0] sm:$0xff]  ;;  %v983_v61 = vld [vmem:[%s6056_s29 + $0x7d0] sm:$0xff] }
  0x4e   : > { %858 = vst [vmem:[%s6061_s30 + $0x1f0] sm:$0xff] %v857_v62  ;;  %v985_v62 = vld [vmem:[%s6056_s29 + $0x7e0] sm:$0xff] }
  0x4f   : > { %860 = vst [vmem:[%s6061_s30 + $0x1f8] sm:$0xff] %v859_v63  ;;  %v987_v63 = vld [vmem:[%s6056_s29 + $0x7f0] sm:$0xff] }
  0x50   : > { %862 = vst [vmem:[%s6061_s30 + $0x200] sm:$0xff] %v861_v0  ;;  %v989_v0 = vld [vmem:[%s6056_s29 + $0x800] sm:$0xff] }
  0x51   : > { %864 = vst [vmem:[%s6061_s30 + $0x208] sm:$0xff] %v863_v1  ;;  %v991_v1 = vld [vmem:[%s6056_s29 + $0x810] sm:$0xff] }
  0x52   : > { %866 = vst [vmem:[%s6061_s30 + $0x210] sm:$0xff] %v865_v2  ;;  %v993_v2 = vld [vmem:[%s6056_s29 + $0x820] sm:$0xff] }
  0x53   : > { %868 = vst [vmem:[%s6061_s30 + $0x218] sm:$0xff] %v867_v3  ;;  %v995_v3 = vld [vmem:[%s6056_s29 + $0x830] sm:$0xff] }
  0x54   : > { %870 = vst [vmem:[%s6061_s30 + $0x220] sm:$0xff] %v869_v4  ;;  %v997_v4 = vld [vmem:[%s6056_s29 + $0x840] sm:$0xff] }
  0x55   : > { %872 = vst [vmem:[%s6061_s30 + $0x228] sm:$0xff] %v871_v5  ;;  %v999_v5 = vld [vmem:[%s6056_s29 + $0x850] sm:$0xff] }
  0x56   : > { %874 = vst [vmem:[%s6061_s30 + $0x230] sm:$0xff] %v873_v6  ;;  %v1001_v6 = vld [vmem:[%s6056_s29 + $0x860] sm:$0xff] }
  0x57   : > { %876 = vst [vmem:[%s6061_s30 + $0x238] sm:$0xff] %v875_v7  ;;  %v1003_v7 = vld [vmem:[%s6056_s29 + $0x870] sm:$0xff] }
  0x58   : > { %878 = vst [vmem:[%s6061_s30 + $0x240] sm:$0xff] %v877_v8  ;;  %v1005_v8 = vld [vmem:[%s6056_s29 + $0x880] sm:$0xff] }
  0x59   : > { %880 = vst [vmem:[%s6061_s30 + $0x248] sm:$0xff] %v879_v9  ;;  %v1007_v9 = vld [vmem:[%s6056_s29 + $0x890] sm:$0xff] }
  0x5a   : > { %882 = vst [vmem:[%s6061_s30 + $0x250] sm:$0xff] %v881_v10  ;;  %v1009_v10 = vld [vmem:[%s6056_s29 + $0x8a0] sm:$0xff] }
  0x5b   : > { %884 = vst [vmem:[%s6061_s30 + $0x258] sm:$0xff] %v883_v11  ;;  %v1011_v11 = vld [vmem:[%s6056_s29 + $0x8b0] sm:$0xff] }
  0x5c   : > { %886 = vst [vmem:[%s6061_s30 + $0x260] sm:$0xff] %v885_v12  ;;  %v1013_v12 = vld [vmem:[%s6056_s29 + $0x8c0] sm:$0xff] }
  0x5d   : > { %888 = vst [vmem:[%s6061_s30 + $0x268] sm:$0xff] %v887_v13  ;;  %v1015_v13 = vld [vmem:[%s6056_s29 + $0x8d0] sm:$0xff] }
  0x5e   : > { %890 = vst [vmem:[%s6061_s30 + $0x270] sm:$0xff] %v889_v14  ;;  %v1017_v14 = vld [vmem:[%s6056_s29 + $0x8e0] sm:$0xff] }
  0x5f   : > { %892 = vst [vmem:[%s6061_s30 + $0x278] sm:$0xff] %v891_v15  ;;  %v1019_v15 = vld [vmem:[%s6056_s29 + $0x8f0] sm:$0xff] }
  0x60   : > { %894 = vst [vmem:[%s6061_s30 + $0x280] sm:$0xff] %v893_v16  ;;  %v1021_v16 = vld [vmem:[%s6056_s29 + $0x900] sm:$0xff] }
  0x61   : > { %896 = vst [vmem:[%s6061_s30 + $0x288] sm:$0xff] %v895_v17  ;;  %v1023_v17 = vld [vmem:[%s6056_s29 + $0x910] sm:$0xff] }
  0x62   : > { %898 = vst [vmem:[%s6061_s30 + $0x290] sm:$0xff] %v897_v18  ;;  %v1025_v18 = vld [vmem:[%s6056_s29 + $0x920] sm:$0xff] }
  0x63   : > { %900 = vst [vmem:[%s6061_s30 + $0x298] sm:$0xff] %v899_v19  ;;  %v1027_v19 = vld [vmem:[%s6056_s29 + $0x930] sm:$0xff] }
  0x64   : > { %902 = vst [vmem:[%s6061_s30 + $0x2a0] sm:$0xff] %v901_v20  ;;  %v1029_v20 = vld [vmem:[%s6056_s29 + $0x940] sm:$0xff] }
  0x65   : > { %904 = vst [vmem:[%s6061_s30 + $0x2a8] sm:$0xff] %v903_v21  ;;  %v1031_v21 = vld [vmem:[%s6056_s29 + $0x950] sm:$0xff] }
  0x66   : > { %906 = vst [vmem:[%s6061_s30 + $0x2b0] sm:$0xff] %v905_v22  ;;  %v1033_v22 = vld [vmem:[%s6056_s29 + $0x960] sm:$0xff] }
  0x67   : > { %908 = vst [vmem:[%s6061_s30 + $0x2b8] sm:$0xff] %v907_v23  ;;  %v1035_v23 = vld [vmem:[%s6056_s29 + $0x970] sm:$0xff] }
  0x68   : > { %910 = vst [vmem:[%s6061_s30 + $0x2c0] sm:$0xff] %v909_v24  ;;  %v1037_v24 = vld [vmem:[%s6056_s29 + $0x980] sm:$0xff] }
  0x69   : > { %912 = vst [vmem:[%s6061_s30 + $0x2c8] sm:$0xff] %v911_v25  ;;  %v1039_v25 = vld [vmem:[%s6056_s29 + $0x990] sm:$0xff] }
  0x6a   : > { %914 = vst [vmem:[%s6061_s30 + $0x2d0] sm:$0xff] %v913_v26  ;;  %v1041_v26 = vld [vmem:[%s6056_s29 + $0x9a0] sm:$0xff] }
  0x6b   : > { %916 = vst [vmem:[%s6061_s30 + $0x2d8] sm:$0xff] %v915_v27  ;;  %v1043_v27 = vld [vmem:[%s6056_s29 + $0x9b0] sm:$0xff] }
  0x6c   : > { %918 = vst [vmem:[%s6061_s30 + $0x2e0] sm:$0xff] %v917_v28  ;;  %v1045_v28 = vld [vmem:[%s6056_s29 + $0x9c0] sm:$0xff] }
  0x6d   : > { %920 = vst [vmem:[%s6061_s30 + $0x2e8] sm:$0xff] %v919_v29  ;;  %v1047_v29 = vld [vmem:[%s6056_s29 + $0x9d0] sm:$0xff] }
  0x6e   : > { %922 = vst [vmem:[%s6061_s30 + $0x2f0] sm:$0xff] %v921_v30  ;;  %v1049_v30 = vld [vmem:[%s6056_s29 + $0x9e0] sm:$0xff] }
  0x6f   : > { %924 = vst [vmem:[%s6061_s30 + $0x2f8] sm:$0xff] %v923_v31  ;;  %v1051_v31 = vld [vmem:[%s6056_s29 + $0x9f0] sm:$0xff] }
  0x70   : > { %926 = vst [vmem:[%s6061_s30 + $0x300] sm:$0xff] %v925_v32  ;;  %v1053_v32 = vld [vmem:[%s6056_s29 + $0xa00] sm:$0xff] }
  0x71   : > { %928 = vst [vmem:[%s6061_s30 + $0x308] sm:$0xff] %v927_v33  ;;  %v1055_v33 = vld [vmem:[%s6056_s29 + $0xa10] sm:$0xff] }
  0x72   : > { %930 = vst [vmem:[%s6061_s30 + $0x310] sm:$0xff] %v929_v34  ;;  %v1057_v34 = vld [vmem:[%s6056_s29 + $0xa20] sm:$0xff] }
  0x73   : > { %932 = vst [vmem:[%s6061_s30 + $0x318] sm:$0xff] %v931_v35  ;;  %v1059_v35 = vld [vmem:[%s6056_s29 + $0xa30] sm:$0xff] }
  0x74   : > { %934 = vst [vmem:[%s6061_s30 + $0x320] sm:$0xff] %v933_v36  ;;  %v1061_v36 = vld [vmem:[%s6056_s29 + $0xa40] sm:$0xff] }
  0x75   : > { %936 = vst [vmem:[%s6061_s30 + $0x328] sm:$0xff] %v935_v37  ;;  %v1063_v37 = vld [vmem:[%s6056_s29 + $0xa50] sm:$0xff] }
  0x76   : > { %938 = vst [vmem:[%s6061_s30 + $0x330] sm:$0xff] %v937_v38  ;;  %v1065_v38 = vld [vmem:[%s6056_s29 + $0xa60] sm:$0xff] }
  0x77   : > { %940 = vst [vmem:[%s6061_s30 + $0x338] sm:$0xff] %v939_v39  ;;  %v1067_v39 = vld [vmem:[%s6056_s29 + $0xa70] sm:$0xff] }
  0x78   : > { %942 = vst [vmem:[%s6061_s30 + $0x340] sm:$0xff] %v941_v40  ;;  %v1069_v40 = vld [vmem:[%s6056_s29 + $0xa80] sm:$0xff] }
  0x79   : > { %944 = vst [vmem:[%s6061_s30 + $0x348] sm:$0xff] %v943_v41  ;;  %v1071_v41 = vld [vmem:[%s6056_s29 + $0xa90] sm:$0xff] }
  0x7a   : > { %946 = vst [vmem:[%s6061_s30 + $0x350] sm:$0xff] %v945_v42  ;;  %v1073_v42 = vld [vmem:[%s6056_s29 + $0xaa0] sm:$0xff] }
  0x7b   : > { %948 = vst [vmem:[%s6061_s30 + $0x358] sm:$0xff] %v947_v43  ;;  %v1075_v43 = vld [vmem:[%s6056_s29 + $0xab0] sm:$0xff] }
  0x7c   : > { %950 = vst [vmem:[%s6061_s30 + $0x360] sm:$0xff] %v949_v44  ;;  %v1077_v44 = vld [vmem:[%s6056_s29 + $0xac0] sm:$0xff] }
  0x7d   : > { %952 = vst [vmem:[%s6061_s30 + $0x368] sm:$0xff] %v951_v45  ;;  %v1079_v45 = vld [vmem:[%s6056_s29 + $0xad0] sm:$0xff] }
  0x7e   : > { %954 = vst [vmem:[%s6061_s30 + $0x370] sm:$0xff] %v953_v46  ;;  %v1081_v46 = vld [vmem:[%s6056_s29 + $0xae0] sm:$0xff] }
  0x7f   : > { %956 = vst [vmem:[%s6061_s30 + $0x378] sm:$0xff] %v955_v47  ;;  %v1083_v47 = vld [vmem:[%s6056_s29 + $0xaf0] sm:$0xff] }
  0x80   : > { %958 = vst [vmem:[%s6061_s30 + $0x380] sm:$0xff] %v957_v48  ;;  %v1085_v48 = vld [vmem:[%s6056_s29 + $0xb00] sm:$0xff] }
  0x81   : > { %960 = vst [vmem:[%s6061_s30 + $0x388] sm:$0xff] %v959_v49  ;;  %v1087_v49 = vld [vmem:[%s6056_s29 + $0xb10] sm:$0xff] }
  0x82   : > { %962 = vst [vmem:[%s6061_s30 + $0x390] sm:$0xff] %v961_v50  ;;  %v1089_v50 = vld [vmem:[%s6056_s29 + $0xb20] sm:$0xff] }
  0x83   : > { %964 = vst [vmem:[%s6061_s30 + $0x398] sm:$0xff] %v963_v51  ;;  %v1091_v51 = vld [vmem:[%s6056_s29 + $0xb30] sm:$0xff] }
  0x84   : > { %966 = vst [vmem:[%s6061_s30 + $0x3a0] sm:$0xff] %v965_v52  ;;  %v1093_v52 = vld [vmem:[%s6056_s29 + $0xb40] sm:$0xff] }
  0x85   : > { %968 = vst [vmem:[%s6061_s30 + $0x3a8] sm:$0xff] %v967_v53  ;;  %v1095_v53 = vld [vmem:[%s6056_s29 + $0xb50] sm:$0xff] }
  0x86   : > { %970 = vst [vmem:[%s6061_s30 + $0x3b0] sm:$0xff] %v969_v54  ;;  %v1097_v54 = vld [vmem:[%s6056_s29 + $0xb60] sm:$0xff] }
  0x87   : > { %972 = vst [vmem:[%s6061_s30 + $0x3b8] sm:$0xff] %v971_v55  ;;  %v1099_v55 = vld [vmem:[%s6056_s29 + $0xb70] sm:$0xff] }
  0x88   : > { %974 = vst [vmem:[%s6061_s30 + $0x3c0] sm:$0xff] %v973_v56  ;;  %v1101_v56 = vld [vmem:[%s6056_s29 + $0xb80] sm:$0xff] }
  0x89   : > { %976 = vst [vmem:[%s6061_s30 + $0x3c8] sm:$0xff] %v975_v57  ;;  %v1103_v57 = vld [vmem:[%s6056_s29 + $0xb90] sm:$0xff] }
  0x8a   : > { %978 = vst [vmem:[%s6061_s30 + $0x3d0] sm:$0xff] %v977_v58  ;;  %v1105_v58 = vld [vmem:[%s6056_s29 + $0xba0] sm:$0xff] }
  0x8b   : > { %980 = vst [vmem:[%s6061_s30 + $0x3d8] sm:$0xff] %v979_v59  ;;  %v1107_v59 = vld [vmem:[%s6056_s29 + $0xbb0] sm:$0xff] }
  0x8c   : > { %982 = vst [vmem:[%s6061_s30 + $0x3e0] sm:$0xff] %v981_v60  ;;  %v1109_v60 = vld [vmem:[%s6056_s29 + $0xbc0] sm:$0xff] }
  0x8d   : > { %984 = vst [vmem:[%s6061_s30 + $0x3e8] sm:$0xff] %v983_v61  ;;  %v1111_v61 = vld [vmem:[%s6056_s29 + $0xbd0] sm:$0xff] }
  0x8e   : > { %986 = vst [vmem:[%s6061_s30 + $0x3f0] sm:$0xff] %v985_v62  ;;  %v1113_v62 = vld [vmem:[%s6056_s29 + $0xbe0] sm:$0xff] }
  0x8f   : > { %988 = vst [vmem:[%s6061_s30 + $0x3f8] sm:$0xff] %v987_v63  ;;  %v1115_v63 = vld [vmem:[%s6056_s29 + $0xbf0] sm:$0xff] }
  0x90   : > { %990 = vst [vmem:[%s6061_s30 + $0x400] sm:$0xff] %v989_v0  ;;  %v1117_v0 = vld [vmem:[%s6056_s29 + $0xc00] sm:$0xff] }
  0x91   : > { %992 = vst [vmem:[%s6061_s30 + $0x408] sm:$0xff] %v991_v1  ;;  %v1119_v1 = vld [vmem:[%s6056_s29 + $0xc10] sm:$0xff] }
  0x92   : > { %994 = vst [vmem:[%s6061_s30 + $0x410] sm:$0xff] %v993_v2  ;;  %v1121_v2 = vld [vmem:[%s6056_s29 + $0xc20] sm:$0xff] }
  0x93   : > { %996 = vst [vmem:[%s6061_s30 + $0x418] sm:$0xff] %v995_v3  ;;  %v1123_v3 = vld [vmem:[%s6056_s29 + $0xc30] sm:$0xff] }
  0x94   : > { %998 = vst [vmem:[%s6061_s30 + $0x420] sm:$0xff] %v997_v4  ;;  %v1125_v4 = vld [vmem:[%s6056_s29 + $0xc40] sm:$0xff] }
  0x95   : > { %1000 = vst [vmem:[%s6061_s30 + $0x428] sm:$0xff] %v999_v5  ;;  %v1127_v5 = vld [vmem:[%s6056_s29 + $0xc50] sm:$0xff] }
  0x96   : > { %1002 = vst [vmem:[%s6061_s30 + $0x430] sm:$0xff] %v1001_v6  ;;  %v1129_v6 = vld [vmem:[%s6056_s29 + $0xc60] sm:$0xff] }
  0x97   : > { %1004 = vst [vmem:[%s6061_s30 + $0x438] sm:$0xff] %v1003_v7  ;;  %v1131_v7 = vld [vmem:[%s6056_s29 + $0xc70] sm:$0xff] }
  0x98   : > { %1006 = vst [vmem:[%s6061_s30 + $0x440] sm:$0xff] %v1005_v8  ;;  %v1133_v8 = vld [vmem:[%s6056_s29 + $0xc80] sm:$0xff] }
  0x99   : > { %1008 = vst [vmem:[%s6061_s30 + $0x448] sm:$0xff] %v1007_v9  ;;  %v1135_v9 = vld [vmem:[%s6056_s29 + $0xc90] sm:$0xff] }
  0x9a   : > { %1010 = vst [vmem:[%s6061_s30 + $0x450] sm:$0xff] %v1009_v10  ;;  %v1137_v10 = vld [vmem:[%s6056_s29 + $0xca0] sm:$0xff] }
  0x9b   : > { %1012 = vst [vmem:[%s6061_s30 + $0x458] sm:$0xff] %v1011_v11  ;;  %v1139_v11 = vld [vmem:[%s6056_s29 + $0xcb0] sm:$0xff] }
  0x9c   : > { %1014 = vst [vmem:[%s6061_s30 + $0x460] sm:$0xff] %v1013_v12  ;;  %v1141_v12 = vld [vmem:[%s6056_s29 + $0xcc0] sm:$0xff] }
  0x9d   : > { %1016 = vst [vmem:[%s6061_s30 + $0x468] sm:$0xff] %v1015_v13  ;;  %v1143_v13 = vld [vmem:[%s6056_s29 + $0xcd0] sm:$0xff] }
  0x9e   : > { %1018 = vst [vmem:[%s6061_s30 + $0x470] sm:$0xff] %v1017_v14  ;;  %v1145_v14 = vld [vmem:[%s6056_s29 + $0xce0] sm:$0xff] }
  0x9f   : > { %1020 = vst [vmem:[%s6061_s30 + $0x478] sm:$0xff] %v1019_v15  ;;  %v1147_v15 = vld [vmem:[%s6056_s29 + $0xcf0] sm:$0xff] }
  0xa0   : > { %1022 = vst [vmem:[%s6061_s30 + $0x480] sm:$0xff] %v1021_v16  ;;  %v1149_v16 = vld [vmem:[%s6056_s29 + $0xd00] sm:$0xff] }
  0xa1   : > { %1024 = vst [vmem:[%s6061_s30 + $0x488] sm:$0xff] %v1023_v17  ;;  %v1151_v17 = vld [vmem:[%s6056_s29 + $0xd10] sm:$0xff] }
  0xa2   : > { %1026 = vst [vmem:[%s6061_s30 + $0x490] sm:$0xff] %v1025_v18  ;;  %v1153_v18 = vld [vmem:[%s6056_s29 + $0xd20] sm:$0xff] }
  0xa3   : > { %1028 = vst [vmem:[%s6061_s30 + $0x498] sm:$0xff] %v1027_v19  ;;  %v1155_v19 = vld [vmem:[%s6056_s29 + $0xd30] sm:$0xff] }
  0xa4   : > { %1030 = vst [vmem:[%s6061_s30 + $0x4a0] sm:$0xff] %v1029_v20  ;;  %v1157_v20 = vld [vmem:[%s6056_s29 + $0xd40] sm:$0xff] }
  0xa5   : > { %1032 = vst [vmem:[%s6061_s30 + $0x4a8] sm:$0xff] %v1031_v21  ;;  %v1159_v21 = vld [vmem:[%s6056_s29 + $0xd50] sm:$0xff] }
  0xa6   : > { %1034 = vst [vmem:[%s6061_s30 + $0x4b0] sm:$0xff] %v1033_v22  ;;  %v1161_v22 = vld [vmem:[%s6056_s29 + $0xd60] sm:$0xff] }
  0xa7   : > { %1036 = vst [vmem:[%s6061_s30 + $0x4b8] sm:$0xff] %v1035_v23  ;;  %v1163_v23 = vld [vmem:[%s6056_s29 + $0xd70] sm:$0xff] }
  0xa8   : > { %1038 = vst [vmem:[%s6061_s30 + $0x4c0] sm:$0xff] %v1037_v24  ;;  %v1165_v24 = vld [vmem:[%s6056_s29 + $0xd80] sm:$0xff] }
  0xa9   : > { %1040 = vst [vmem:[%s6061_s30 + $0x4c8] sm:$0xff] %v1039_v25  ;;  %v1167_v25 = vld [vmem:[%s6056_s29 + $0xd90] sm:$0xff] }
  0xaa   : > { %1042 = vst [vmem:[%s6061_s30 + $0x4d0] sm:$0xff] %v1041_v26  ;;  %v1169_v26 = vld [vmem:[%s6056_s29 + $0xda0] sm:$0xff] }
  0xab   : > { %1044 = vst [vmem:[%s6061_s30 + $0x4d8] sm:$0xff] %v1043_v27  ;;  %v1171_v27 = vld [vmem:[%s6056_s29 + $0xdb0] sm:$0xff] }
  0xac   : > { %1046 = vst [vmem:[%s6061_s30 + $0x4e0] sm:$0xff] %v1045_v28  ;;  %v1173_v28 = vld [vmem:[%s6056_s29 + $0xdc0] sm:$0xff] }
  0xad   : > { %1048 = vst [vmem:[%s6061_s30 + $0x4e8] sm:$0xff] %v1047_v29  ;;  %v1175_v29 = vld [vmem:[%s6056_s29 + $0xdd0] sm:$0xff] }
  0xae   : > { %1050 = vst [vmem:[%s6061_s30 + $0x4f0] sm:$0xff] %v1049_v30  ;;  %v1177_v30 = vld [vmem:[%s6056_s29 + $0xde0] sm:$0xff] }
  0xaf   : > { %1052 = vst [vmem:[%s6061_s30 + $0x4f8] sm:$0xff] %v1051_v31  ;;  %v1179_v31 = vld [vmem:[%s6056_s29 + $0xdf0] sm:$0xff] }
  0xb0   : > { %1054 = vst [vmem:[%s6061_s30 + $0x500] sm:$0xff] %v1053_v32  ;;  %v1181_v32 = vld [vmem:[%s6056_s29 + $0xe00] sm:$0xff] }
  0xb1   : > { %1056 = vst [vmem:[%s6061_s30 + $0x508] sm:$0xff] %v1055_v33  ;;  %v1183_v33 = vld [vmem:[%s6056_s29 + $0xe10] sm:$0xff] }
  0xb2   : > { %1058 = vst [vmem:[%s6061_s30 + $0x510] sm:$0xff] %v1057_v34  ;;  %v1185_v34 = vld [vmem:[%s6056_s29 + $0xe20] sm:$0xff] }
  0xb3   : > { %1060 = vst [vmem:[%s6061_s30 + $0x518] sm:$0xff] %v1059_v35  ;;  %v1187_v35 = vld [vmem:[%s6056_s29 + $0xe30] sm:$0xff] }
  0xb4   : > { %1062 = vst [vmem:[%s6061_s30 + $0x520] sm:$0xff] %v1061_v36  ;;  %v1189_v36 = vld [vmem:[%s6056_s29 + $0xe40] sm:$0xff] }
  0xb5   : > { %1064 = vst [vmem:[%s6061_s30 + $0x528] sm:$0xff] %v1063_v37  ;;  %v1191_v37 = vld [vmem:[%s6056_s29 + $0xe50] sm:$0xff] }
  0xb6   : > { %1066 = vst [vmem:[%s6061_s30 + $0x530] sm:$0xff] %v1065_v38  ;;  %v1193_v38 = vld [vmem:[%s6056_s29 + $0xe60] sm:$0xff] }
  0xb7   : > { %1068 = vst [vmem:[%s6061_s30 + $0x538] sm:$0xff] %v1067_v39  ;;  %v1195_v39 = vld [vmem:[%s6056_s29 + $0xe70] sm:$0xff] }
  0xb8   : > { %1070 = vst [vmem:[%s6061_s30 + $0x540] sm:$0xff] %v1069_v40  ;;  %v1197_v40 = vld [vmem:[%s6056_s29 + $0xe80] sm:$0xff] }
  0xb9   : > { %1072 = vst [vmem:[%s6061_s30 + $0x548] sm:$0xff] %v1071_v41  ;;  %v1199_v41 = vld [vmem:[%s6056_s29 + $0xe90] sm:$0xff] }
  0xba   : > { %1074 = vst [vmem:[%s6061_s30 + $0x550] sm:$0xff] %v1073_v42  ;;  %v1201_v42 = vld [vmem:[%s6056_s29 + $0xea0] sm:$0xff] }
  0xbb   : > { %1076 = vst [vmem:[%s6061_s30 + $0x558] sm:$0xff] %v1075_v43  ;;  %v1203_v43 = vld [vmem:[%s6056_s29 + $0xeb0] sm:$0xff] }
  0xbc   : > { %1078 = vst [vmem:[%s6061_s30 + $0x560] sm:$0xff] %v1077_v44  ;;  %v1205_v44 = vld [vmem:[%s6056_s29 + $0xec0] sm:$0xff] }
  0xbd   : > { %1080 = vst [vmem:[%s6061_s30 + $0x568] sm:$0xff] %v1079_v45  ;;  %v1207_v45 = vld [vmem:[%s6056_s29 + $0xed0] sm:$0xff] }
  0xbe   : > { %1082 = vst [vmem:[%s6061_s30 + $0x570] sm:$0xff] %v1081_v46  ;;  %v1209_v46 = vld [vmem:[%s6056_s29 + $0xee0] sm:$0xff] }
  0xbf   : > { %1084 = vst [vmem:[%s6061_s30 + $0x578] sm:$0xff] %v1083_v47  ;;  %v1211_v47 = vld [vmem:[%s6056_s29 + $0xef0] sm:$0xff] }
  0xc0   : > { %1086 = vst [vmem:[%s6061_s30 + $0x580] sm:$0xff] %v1085_v48  ;;  %v1213_v48 = vld [vmem:[%s6056_s29 + $0xf00] sm:$0xff] }
  0xc1   : > { %1088 = vst [vmem:[%s6061_s30 + $0x588] sm:$0xff] %v1087_v49  ;;  %v1215_v49 = vld [vmem:[%s6056_s29 + $0xf10] sm:$0xff] }
  0xc2   : > { %1090 = vst [vmem:[%s6061_s30 + $0x590] sm:$0xff] %v1089_v50  ;;  %v1217_v50 = vld [vmem:[%s6056_s29 + $0xf20] sm:$0xff] }
  0xc3   : > { %1092 = vst [vmem:[%s6061_s30 + $0x598] sm:$0xff] %v1091_v51  ;;  %v1219_v51 = vld [vmem:[%s6056_s29 + $0xf30] sm:$0xff] }
  0xc4   : > { %1094 = vst [vmem:[%s6061_s30 + $0x5a0] sm:$0xff] %v1093_v52  ;;  %v1221_v52 = vld [vmem:[%s6056_s29 + $0xf40] sm:$0xff] }
  0xc5   : > { %1096 = vst [vmem:[%s6061_s30 + $0x5a8] sm:$0xff] %v1095_v53  ;;  %v1223_v53 = vld [vmem:[%s6056_s29 + $0xf50] sm:$0xff] }
  0xc6   : > { %1098 = vst [vmem:[%s6061_s30 + $0x5b0] sm:$0xff] %v1097_v54  ;;  %v1225_v54 = vld [vmem:[%s6056_s29 + $0xf60] sm:$0xff] }
  0xc7   : > { %1100 = vst [vmem:[%s6061_s30 + $0x5b8] sm:$0xff] %v1099_v55  ;;  %v1227_v55 = vld [vmem:[%s6056_s29 + $0xf70] sm:$0xff] }
  0xc8   : > { %1102 = vst [vmem:[%s6061_s30 + $0x5c0] sm:$0xff] %v1101_v56  ;;  %v1229_v56 = vld [vmem:[%s6056_s29 + $0xf80] sm:$0xff] }
  0xc9   : > { %1104 = vst [vmem:[%s6061_s30 + $0x5c8] sm:$0xff] %v1103_v57  ;;  %v1231_v57 = vld [vmem:[%s6056_s29 + $0xf90] sm:$0xff] }
  0xca   : > { %1106 = vst [vmem:[%s6061_s30 + $0x5d0] sm:$0xff] %v1105_v58  ;;  %v1233_v58 = vld [vmem:[%s6056_s29 + $0xfa0] sm:$0xff] }
  0xcb   : > { %1108 = vst [vmem:[%s6061_s30 + $0x5d8] sm:$0xff] %v1107_v59  ;;  %v1235_v59 = vld [vmem:[%s6056_s29 + $0xfb0] sm:$0xff] }
  0xcc   : > { %1110 = vst [vmem:[%s6061_s30 + $0x5e0] sm:$0xff] %v1109_v60  ;;  %v1237_v60 = vld [vmem:[%s6056_s29 + $0xfc0] sm:$0xff] }
  0xcd   : > { %1112 = vst [vmem:[%s6061_s30 + $0x5e8] sm:$0xff] %v1111_v61  ;;  %v1239_v61 = vld [vmem:[%s6056_s29 + $0xfd0] sm:$0xff] }
  0xce   : > { %1114 = vst [vmem:[%s6061_s30 + $0x5f0] sm:$0xff] %v1113_v62  ;;  %v1241_v62 = vld [vmem:[%s6056_s29 + $0xfe0] sm:$0xff] }
  0xcf   : > { %1116 = vst [vmem:[%s6061_s30 + $0x5f8] sm:$0xff] %v1115_v63  ;;  %v1243_v63 = vld [vmem:[%s6056_s29 + $0xff0] sm:$0xff] }
  0xd0   : > { %1118 = vst [vmem:[%s6061_s30 + $0x600] sm:$0xff] %v1117_v0 }
  0xd1   : > { %1120 = vst [vmem:[%s6061_s30 + $0x608] sm:$0xff] %v1119_v1 }
  0xd2   : > { %1122 = vst [vmem:[%s6061_s30 + $0x610] sm:$0xff] %v1121_v2 }
  0xd3   : > { %1124 = vst [vmem:[%s6061_s30 + $0x618] sm:$0xff] %v1123_v3 }
  0xd4   : > { %1126 = vst [vmem:[%s6061_s30 + $0x620] sm:$0xff] %v1125_v4 }
  0xd5   : > { %1128 = vst [vmem:[%s6061_s30 + $0x628] sm:$0xff] %v1127_v5 }
  0xd6   : > { %1130 = vst [vmem:[%s6061_s30 + $0x630] sm:$0xff] %v1129_v6 }
  0xd7   : > { %1132 = vst [vmem:[%s6061_s30 + $0x638] sm:$0xff] %v1131_v7 }
  0xd8   : > { %1134 = vst [vmem:[%s6061_s30 + $0x640] sm:$0xff] %v1133_v8 }
  0xd9   : > { %1136 = vst [vmem:[%s6061_s30 + $0x648] sm:$0xff] %v1135_v9 }
  0xda   : > { %1138 = vst [vmem:[%s6061_s30 + $0x650] sm:$0xff] %v1137_v10 }
  0xdb   : > { %1140 = vst [vmem:[%s6061_s30 + $0x658] sm:$0xff] %v1139_v11 }
  0xdc   : > { %1142 = vst [vmem:[%s6061_s30 + $0x660] sm:$0xff] %v1141_v12 }
  0xdd   : > { %1144 = vst [vmem:[%s6061_s30 + $0x668] sm:$0xff] %v1143_v13 }
  0xde   : > { %1146 = vst [vmem:[%s6061_s30 + $0x670] sm:$0xff] %v1145_v14 }
  0xdf   : > { %1148 = vst [vmem:[%s6061_s30 + $0x678] sm:$0xff] %v1147_v15 }
  0xe0   : > { %1150 = vst [vmem:[%s6061_s30 + $0x680] sm:$0xff] %v1149_v16 }
  0xe1   : > { %1152 = vst [vmem:[%s6061_s30 + $0x688] sm:$0xff] %v1151_v17 }
  0xe2   : > { %1154 = vst [vmem:[%s6061_s30 + $0x690] sm:$0xff] %v1153_v18 }
  0xe3   : > { %1156 = vst [vmem:[%s6061_s30 + $0x698] sm:$0xff] %v1155_v19 }
  0xe4   : > { %1158 = vst [vmem:[%s6061_s30 + $0x6a0] sm:$0xff] %v1157_v20 }
  0xe5   : > { %1160 = vst [vmem:[%s6061_s30 + $0x6a8] sm:$0xff] %v1159_v21 }
  0xe6   : > { %1162 = vst [vmem:[%s6061_s30 + $0x6b0] sm:$0xff] %v1161_v22 }
  0xe7   : > { %1164 = vst [vmem:[%s6061_s30 + $0x6b8] sm:$0xff] %v1163_v23 }
  0xe8   : > { %1166 = vst [vmem:[%s6061_s30 + $0x6c0] sm:$0xff] %v1165_v24 }
  0xe9   : > { %1168 = vst [vmem:[%s6061_s30 + $0x6c8] sm:$0xff] %v1167_v25 }
  0xea   : > { %1170 = vst [vmem:[%s6061_s30 + $0x6d0] sm:$0xff] %v1169_v26 }
  0xeb   : > { %1172 = vst [vmem:[%s6061_s30 + $0x6d8] sm:$0xff] %v1171_v27 }
  0xec   : > { %1174 = vst [vmem:[%s6061_s30 + $0x6e0] sm:$0xff] %v1173_v28 }
  0xed   : > { %1176 = vst [vmem:[%s6061_s30 + $0x6e8] sm:$0xff] %v1175_v29 }
  0xee   : > { %1178 = vst [vmem:[%s6061_s30 + $0x6f0] sm:$0xff] %v1177_v30 }
  0xef   : > { %1180 = vst [vmem:[%s6061_s30 + $0x6f8] sm:$0xff] %v1179_v31 }
  0xf0   : > { %1182 = vst [vmem:[%s6061_s30 + $0x700] sm:$0xff] %v1181_v32 }
  0xf1   : > { %1184 = vst [vmem:[%s6061_s30 + $0x708] sm:$0xff] %v1183_v33 }
  0xf2   : > { %1186 = vst [vmem:[%s6061_s30 + $0x710] sm:$0xff] %v1185_v34 }
  0xf3   : > { %1188 = vst [vmem:[%s6061_s30 + $0x718] sm:$0xff] %v1187_v35 }
  0xf4   : > { %1190 = vst [vmem:[%s6061_s30 + $0x720] sm:$0xff] %v1189_v36 }
  0xf5   : > { %1192 = vst [vmem:[%s6061_s30 + $0x728] sm:$0xff] %v1191_v37 }
  0xf6   : > { %1194 = vst [vmem:[%s6061_s30 + $0x730] sm:$0xff] %v1193_v38 }
  0xf7   : > { %1196 = vst [vmem:[%s6061_s30 + $0x738] sm:$0xff] %v1195_v39 }
  0xf8   : > { %1198 = vst [vmem:[%s6061_s30 + $0x740] sm:$0xff] %v1197_v40 }
  0xf9   : > { %1200 = vst [vmem:[%s6061_s30 + $0x748] sm:$0xff] %v1199_v41 }
  0xfa   : > { %1202 = vst [vmem:[%s6061_s30 + $0x750] sm:$0xff] %v1201_v42 }
  0xfb   : > { %1204 = vst [vmem:[%s6061_s30 + $0x758] sm:$0xff] %v1203_v43 }
  0xfc   : > { %1206 = vst [vmem:[%s6061_s30 + $0x760] sm:$0xff] %v1205_v44 }
  0xfd   : > { %1208 = vst [vmem:[%s6061_s30 + $0x768] sm:$0xff] %v1207_v45 }
  0xfe   : > { %1210 = vst [vmem:[%s6061_s30 + $0x770] sm:$0xff] %v1209_v46 }
  0xff   : > { %1212 = vst [vmem:[%s6061_s30 + $0x778] sm:$0xff] %v1211_v47 }
 0x100   : > { %1214 = vst [vmem:[%s6061_s30 + $0x780] sm:$0xff] %v1213_v48 }
 0x101   : > { %1216 = vst [vmem:[%s6061_s30 + $0x788] sm:$0xff] %v1215_v49 }
 0x102   : > { %1218 = vst [vmem:[%s6061_s30 + $0x790] sm:$0xff] %v1217_v50 }
 0x103   : > { %1220 = vst [vmem:[%s6061_s30 + $0x798] sm:$0xff] %v1219_v51 }
 0x104   : > { %1222 = vst [vmem:[%s6061_s30 + $0x7a0] sm:$0xff] %v1221_v52 }
 0x105   : > { %1224 = vst [vmem:[%s6061_s30 + $0x7a8] sm:$0xff] %v1223_v53 }
 0x106   : > { %1226 = vst [vmem:[%s6061_s30 + $0x7b0] sm:$0xff] %v1225_v54 }
 0x107   : > { %1228 = vst [vmem:[%s6061_s30 + $0x7b8] sm:$0xff] %v1227_v55 }
 0x108   : > { %1230 = vst [vmem:[%s6061_s30 + $0x7c0] sm:$0xff] %v1229_v56 }
 0x109   : > { %1232 = vst [vmem:[%s6061_s30 + $0x7c8] sm:$0xff] %v1231_v57 }
 0x10a   : > { %1234 = vst [vmem:[%s6061_s30 + $0x7d0] sm:$0xff] %v1233_v58 }
 0x10b   : > { %1236 = vst [vmem:[%s6061_s30 + $0x7d8] sm:$0xff] %v1235_v59 }
 0x10c   : > { %1238 = vst [vmem:[%s6061_s30 + $0x7e0] sm:$0xff] %v1237_v60 }
 0x10d   : > { %1240 = vst [vmem:[%s6061_s30 + $0x7e8] sm:$0xff] %v1239_v61 }
 0x10e   : > { %1242 = vst [vmem:[%s6061_s30 + $0x7f0] sm:$0xff] %v1241_v62 }
 0x10f   : > { %1244 = vst [vmem:[%s6061_s30 + $0x7f8] sm:$0xff] %v1243_v63 }
 0x110 PF: > { %p4609_p6 = scmp.ge.s32.totalorder %s5985_s19, 1  ;;  %p2325_p7 = scmp.lt.s32.totalorder %s5985_s19, 3 }
 0x112   : > { %p2326_p8 = pnand %p4609_p6, %p2325_p7 }
 0x113   : > { %s2332_s5 = sand.u32 (!%p2326_p8), 1, %s5969_s15   ;;  %s4612_s12 = sshll.u32 (!%p2326_p8), %s5977_s17, 5 }
 0x114   : > { %2329 = sbr.rel (%p2326_p8) target bundleno = 831 (0x33f), region = 84  ;;  %s4610_s6 = sshll.u32 (!%p2326_p8), %s2332_s5, 11 }
 0x115   : > { %s6575_s7 = scalar_lea.vmem (!%p2326_p8), [#allocation3], %s4610_s6  ;;  %p2382_p9 = scmp.lt.s32.totalorder (!%p2326_p8), %s4612_s12, 63 }
 0x116   : > { %s4611_s22 = sshll.u32 (!%p2326_p8), %s5977_s17, 1  ;;  %p2387_p11 = scmp.lt.s32.totalorder (!%p2326_p8), %s5977_s17, 1 }
 0x117   : > { %p2377_p10 = scmp.lt.s32.totalorder (!%p2326_p8), %s4611_s22, 3 }
 0x119   : > { %v4673_v0 = vld [vmem:[%s6575_s7 + $0x70] sm:$0xf]  ;;  %v5657_v1 = vld [vmem:[%s6575_s7 + $0x74] sm:$0xf0]  ;;  %v4665_v11 = vld [vmem:[%s6575_s7 + $0x60] sm:$0xf] }
 0x11a   : > { %v4737_v2 = vld [vmem:[%s6575_s7 + $0xf0] sm:$0xf]  ;;  %v4674_v3 = vor.u32 %v5657_v1, %v4673_v0  ;;  %v5673_v4 = vld [vmem:[%s6575_s7 + $0xf4] sm:$0xf0]  ;;  %v5655_v13 = vld [vmem:[%s6575_s7 + $0x64] sm:$0xf0] }
 0x11b   : > { %v4801_v5 = vld [vmem:[%s6575_s7 + $0x170] sm:$0xf]  ;;  %v5689_v6 = vld [vmem:[%s6575_s7 + $0x174] sm:$0xf0]  ;;  %v4738_v7 = vor.u32 %v5673_v4, %v4737_v2  ;;  %v4729_v14 = vld [vmem:[%s6575_s7 + $0xe0] sm:$0xf]  ;;  %v4666_v16 = vor.u32 %v5655_v13, %v4665_v11 }
 0x11c   : > { %v4802_v8 = vor.u32 %v5689_v6, %v4801_v5  ;;  %v4865_v9 = vld [vmem:[%s6575_s7 + $0x1f0] sm:$0xf]  ;;  %v5705_v10 = vld [vmem:[%s6575_s7 + $0x1f4] sm:$0xf0]  ;;  %3971 = vmatpush.bf16.msra.mxu0 %v4674_v3  ;;  %v5671_v15 = vld [vmem:[%s6575_s7 + $0xe4] sm:$0xf0] }
 0x11d   : > { %v4866_v12 = vor.u32 %v5705_v10, %v4865_v9  ;;  %3984 = vmatpush.bf16.msra.mxu1 %v4738_v7  ;;  %v4730_v17 = vor.u32 %v5671_v15, %v4729_v14  ;;  %v4793_v18 = vld [vmem:[%s6575_s7 + $0x160] sm:$0xf]  ;;  %v5687_v19 = vld [vmem:[%s6575_s7 + $0x164] sm:$0xf0]  ;;  %v4657_v23 = vld [vmem:[%s6575_s7 + $0x50] sm:$0xf] }
 0x11e   : > { %3997 = vmatpush.bf16.msra.mxu2 %v4802_v8  ;;  %v4857_v20 = vld [vmem:[%s6575_s7 + $0x1e0] sm:$0xf]  ;;  %v4794_v21 = vor.u32 %v5687_v19, %v4793_v18  ;;  %v5703_v22 = vld [vmem:[%s6575_s7 + $0x1e4] sm:$0xf0]  ;;  %v5653_v24 = vld [vmem:[%s6575_s7 + $0x54] sm:$0xf0] }
 0x11f   : > { %4010 = vmatpush.bf16.msra.mxu3 %v4866_v12  ;;  %v4858_v25 = vor.u32 %v5703_v22, %v4857_v20  ;;  %v4721_v26 = vld [vmem:[%s6575_s7 + $0xd0] sm:$0xf]  ;;  %v5669_v27 = vld [vmem:[%s6575_s7 + $0xd4] sm:$0xf0]  ;;  %v4658_v29 = vor.u32 %v5653_v24, %v4657_v23  ;;  %v4649_v35 = vld [vmem:[%s6575_s7 + $0x40] sm:$0xf] }
 0x120   : > { %v4785_v28 = vld [vmem:[%s6575_s7 + $0x150] sm:$0xf]  ;;  %3972 = vmatpush.bf16.msra.mxu0 %v4666_v16  ;;  %v5685_v30 = vld [vmem:[%s6575_s7 + $0x154] sm:$0xf0]  ;;  %v4722_v33 = vor.u32 %v5669_v27, %v4721_v26  ;;  %v5651_v36 = vld [vmem:[%s6575_s7 + $0x44] sm:$0xf0] }
 0x121   : > { %v4849_v31 = vld [vmem:[%s6575_s7 + $0x1d0] sm:$0xf]  ;;  %v5701_v32 = vld [vmem:[%s6575_s7 + $0x1d4] sm:$0xf0]  ;;  %3985 = vmatpush.bf16.msra.mxu1 %v4730_v17  ;;  %v4786_v34 = vor.u32 %v5685_v30, %v4785_v28  ;;  %v4713_v37 = vld [vmem:[%s6575_s7 + $0xc0] sm:$0xf]  ;;  %v4650_v44 = vor.u32 %v5651_v36, %v4649_v35 }
 0x122   : > { %3998 = vmatpush.bf16.msra.mxu2 %v4794_v21  ;;  %v4850_v38 = vor.u32 %v5701_v32, %v4849_v31  ;;  %v5667_v39 = vld [vmem:[%s6575_s7 + $0xc4] sm:$0xf0]  ;;  %v4777_v40 = vld [vmem:[%s6575_s7 + $0x140] sm:$0xf]  ;;  %v4641_v47 = vld [vmem:[%s6575_s7 + $0x30] sm:$0xf] }
 0x123   : > { %4011 = vmatpush.bf16.msra.mxu3 %v4858_v25  ;;  %v5683_v41 = vld [vmem:[%s6575_s7 + $0x144] sm:$0xf0]  ;;  %v4841_v42 = vld [vmem:[%s6575_s7 + $0x1c0] sm:$0xf]  ;;  %v4714_v45 = vor.u32 %v5667_v39, %v4713_v37  ;;  %v5649_v48 = vld [vmem:[%s6575_s7 + $0x34] sm:$0xf0] }
 0x124   : > { %v5699_v43 = vld [vmem:[%s6575_s7 + $0x1c4] sm:$0xf0]  ;;  %3973 = vmatpush.bf16.msra.mxu0 %v4658_v29  ;;  %v4778_v46 = vor.u32 %v5683_v41, %v4777_v40  ;;  %v4705_v49 = vld [vmem:[%s6575_s7 + $0xb0] sm:$0xf]  ;;  %v5665_v51 = vld [vmem:[%s6575_s7 + $0xb4] sm:$0xf0]  ;;  %v4642_v56 = vor.u32 %v5649_v48, %v4641_v47 }
 0x125   : > { %3986 = vmatpush.bf16.msra.mxu1 %v4722_v33  ;;  %v4842_v50 = vor.u32 %v5699_v43, %v4841_v42  ;;  %v4769_v52 = vld [vmem:[%s6575_s7 + $0x130] sm:$0xf]  ;;  %v5681_v53 = vld [vmem:[%s6575_s7 + $0x134] sm:$0xf0]  ;;  %v4706_v57 = vor.u32 %v5665_v51, %v4705_v49  ;;  %v4633_v59 = vld [vmem:[%s6575_s7 + $0x20] sm:$0xf] }
 0x126   : > { %3999 = vmatpush.bf16.msra.mxu2 %v4786_v34  ;;  %v4833_v54 = vld [vmem:[%s6575_s7 + $0x1b0] sm:$0xf]  ;;  %v5697_v55 = vld [vmem:[%s6575_s7 + $0x1b4] sm:$0xf0]  ;;  %v4770_v58 = vor.u32 %v5681_v53, %v4769_v52  ;;  %v5647_v60 = vld [vmem:[%s6575_s7 + $0x24] sm:$0xf0] }
 0x127   : > { %4012 = vmatpush.bf16.msra.mxu3 %v4850_v38  ;;  %v4697_v61 = vld [vmem:[%s6575_s7 + $0xa0] sm:$0xf]  ;;  %v4834_v62 = vor.u32 %v5697_v55, %v4833_v54  ;;  %v5663_v63 = vld [vmem:[%s6575_s7 + $0xa4] sm:$0xf0]  ;;  %v4634_v4 = vor.u32 %v5647_v60, %v4633_v59  ;;  %v4625_v7 = vld [vmem:[%s6575_s7 + $0x10] sm:$0xf] }
 0x128   : > { %3974 = vmatpush.bf16.msra.mxu0 %v4650_v44  ;;  %v4761_v0 = vld [vmem:[%s6575_s7 + $0x120] sm:$0xf]  ;;  %v5679_v1 = vld [vmem:[%s6575_s7 + $0x124] sm:$0xf0]  ;;  %v4698_v5 = vor.u32 %v5663_v63, %v4697_v61  ;;  %v5645_v8 = vld [vmem:[%s6575_s7 + $0x14] sm:$0xf0] }
 0x129   : > { %3987 = vmatpush.bf16.msra.mxu1 %v4714_v45  ;;  %v4825_v2 = vld [vmem:[%s6575_s7 + $0x1a0] sm:$0xf]  ;;  %v5695_v3 = vld [vmem:[%s6575_s7 + $0x1a4] sm:$0xf0]  ;;  %v4762_v6 = vor.u32 %v5679_v1, %v4761_v0  ;;  %v4689_v9 = vld [vmem:[%s6575_s7 + $0x90] sm:$0xf]  ;;  %v4626_v16 = vor.u32 %v5645_v8, %v4625_v7 }
 0x12a   : > { %4000 = vmatpush.bf16.msra.mxu2 %v4778_v46  ;;  %v4826_v10 = vor.u32 %v5695_v3, %v4825_v2  ;;  %v5661_v11 = vld [vmem:[%s6575_s7 + $0x94] sm:$0xf0]  ;;  %v4753_v12 = vld [vmem:[%s6575_s7 + $0x110] sm:$0xf]  ;;  %v4617_v17 = vld [vmem:[%s6575_s7] sm:$0xf] }
 0x12b   : > { %4013 = vmatpush.bf16.msra.mxu3 %v4842_v50  ;;  %v5677_v13 = vld [vmem:[%s6575_s7 + $0x114] sm:$0xf0]  ;;  %v4817_v14 = vld [vmem:[%s6575_s7 + $0x190] sm:$0xf]  ;;  %v5643_v18 = vld [vmem:[%s6575_s7 + $0x4] sm:$0xf0]  ;;  %v4690_v19 = vor.u32 %v5661_v11, %v4689_v9 }
 0x12c   : > { %3975 = vmatpush.bf16.msra.mxu0 %v4642_v56  ;;  %v5693_v15 = vld [vmem:[%s6575_s7 + $0x194] sm:$0xf0]  ;;  %v4754_v20 = vor.u32 %v5677_v13, %v4753_v12  ;;  %v4681_v21 = vld [vmem:[%s6575_s7 + $0x80] sm:$0xf]  ;;  %v5659_v22 = vld [vmem:[%s6575_s7 + $0x84] sm:$0xf0]  ;;  %v4618_v31 = vor.u32 %v5643_v18, %v4617_v17 }
 0x12d   : > { %3988 = vmatpush.bf16.msra.mxu1 %v4706_v57  ;;  %v4745_v23 = vld [vmem:[%s6575_s7 + $0x100] sm:$0xf]  ;;  %v4818_v24 = vor.u32 %v5693_v15, %v4817_v14  ;;  %v5675_v25 = vld [vmem:[%s6575_s7 + $0x104] sm:$0xf0]  ;;  %v4929_v28 = vld [vmem:[%s6575_s7 + $0x270] sm:$0xf]  ;;  %v4682_v35 = vor.u32 %v5659_v22, %v4681_v21 }
 0x12e   : > { %4001 = vmatpush.bf16.msra.mxu2 %v4770_v58  ;;  %v4809_v26 = vld [vmem:[%s6575_s7 + $0x180] sm:$0xf]  ;;  %v5691_v27 = vld [vmem:[%s6575_s7 + $0x184] sm:$0xf0]  ;;  %v5721_v29 = vld [vmem:[%s6575_s7 + $0x274] sm:$0xf0]  ;;  %v4746_v36 = vor.u32 %v5675_v25, %v4745_v23 }
 0x12f   : > { %4014 = vmatpush.bf16.msra.mxu3 %v4834_v62  ;;  %v4993_v30 = vld [vmem:[%s6575_s7 + $0x2f0] sm:$0xf]  ;;  %v5737_v32 = vld [vmem:[%s6575_s7 + $0x2f4] sm:$0xf0]  ;;  %v4810_v39 = vor.u32 %v5691_v27, %v4809_v26  ;;  %v4930_v40 = vor.u32 %v5721_v29, %v4929_v28  ;;  %v4921_v43 = vld [vmem:[%s6575_s7 + $0x260] sm:$0xf] }
 0x130   : > { %3976 = vmatpush.bf16.msra.mxu0 %v4634_v4  ;;  %v5057_v33 = vld [vmem:[%s6575_s7 + $0x370] sm:$0xf]  ;;  %v5753_v34 = vld [vmem:[%s6575_s7 + $0x374] sm:$0xf0]  ;;  %v4994_v41 = vor.u32 %v5737_v32, %v4993_v30  ;;  %v5719_v44 = vld [vmem:[%s6575_s7 + $0x264] sm:$0xf0] }
 0x131   : > { %3989 = vmatpush.bf16.msra.mxu1 %v4698_v5  ;;  %v5121_v37 = vld [vmem:[%s6575_s7 + $0x3f0] sm:$0xf]  ;;  %v5769_v38 = vld [vmem:[%s6575_s7 + $0x3f4] sm:$0xf0]  ;;  %v5058_v42 = vor.u32 %v5753_v34, %v5057_v33  ;;  %v4985_v45 = vld [vmem:[%s6575_s7 + $0x2e0] sm:$0xf]  ;;  %v4922_v52 = vor.u32 %v5719_v44, %v4921_v43 }
 0x132   : > { %4002 = vmatpush.bf16.msra.mxu2 %v4762_v6  ;;  %v5122_v46 = vor.u32 %v5769_v38, %v5121_v37  ;;  %v5735_v47 = vld [vmem:[%s6575_s7 + $0x2e4] sm:$0xf0]  ;;  %v5049_v48 = vld [vmem:[%s6575_s7 + $0x360] sm:$0xf]  ;;  %v4913_v53 = vld [vmem:[%s6575_s7 + $0x250] sm:$0xf] }
 0x133   : > { %4015 = vmatpush.bf16.msra.mxu3 %v4826_v10  ;;  %v5751_v49 = vld [vmem:[%s6575_s7 + $0x364] sm:$0xf0]  ;;  %v5113_v50 = vld [vmem:[%s6575_s7 + $0x3e0] sm:$0xf]  ;;  %v5717_v54 = vld [vmem:[%s6575_s7 + $0x254] sm:$0xf0]  ;;  %v4986_v55 = vor.u32 %v5735_v47, %v4985_v45 }
 0x134   : > { %3977 = vmatpush.bf16.msra.mxu0 %v4626_v16  ;;  %v5767_v51 = vld [vmem:[%s6575_s7 + $0x3e4] sm:$0xf0]  ;;  %v5050_v56 = vor.u32 %v5751_v49, %v5049_v48  ;;  %v4977_v57 = vld [vmem:[%s6575_s7 + $0x2d0] sm:$0xf]  ;;  %v5733_v58 = vld [vmem:[%s6575_s7 + $0x2d4] sm:$0xf0]  ;;  %v4914_v1 = vor.u32 %v5717_v54, %v4913_v53 }
 0x135   : > { %3990 = vmatpush.bf16.msra.mxu1 %v4690_v19  ;;  %v2397_v59 = vld [vmem:[%s7198_s0] sm:$0xff]  ;;  %v5114_v60 = vor.u32 %v5767_v51, %v5113_v50  ;;  %v5041_v61 = vld [vmem:[%s6575_s7 + $0x350] sm:$0xf]  ;;  %v4978_v2 = vor.u32 %v5733_v58, %v4977_v57  ;;  %v4905_v4 = vld [vmem:[%s6575_s7 + $0x240] sm:$0xf]  ;;  %s7210_s12 = smov (!%p2382_p9, %s4612_s12), 63 }
 0x136   : > { %4003 = vmatpush.bf16.msra.mxu2 %v4754_v20  ;;  %v5749_v62 = vld [vmem:[%s6575_s7 + $0x354] sm:$0xf0]  ;;  %2656 = vst [vmem:[#allocation1] ss:$9 sm:$0xff] %v2397_v59  ;;  %v5105_v63 = vld [vmem:[%s6575_s7 + $0x3d0] sm:$0xf] }
 0x137   : > { %4016 = vmatpush.bf16.msra.mxu3 %v4818_v24  ;;  %v5765_v0 = vld [vmem:[%s6575_s7 + $0x3d4] sm:$0xf0]  ;;  %v5042_v3 = vor.u32 %v5749_v62, %v5041_v61  ;;  %v5715_v5 = vld [vmem:[%s6575_s7 + $0x244] sm:$0xf0]  ;;  %v4969_v6 = vld [vmem:[%s6575_s7 + $0x2c0] sm:$0xf] }
 0x138   : > { %3978 = vmatpush.bf16.msra.mxu0 %v4618_v31  ;;  %v5106_v7 = vor.u32 %v5765_v0, %v5105_v63  ;;  %v5731_v8 = vld [vmem:[%s6575_s7 + $0x2c4] sm:$0xf0]  ;;  %v5033_v9 = vld [vmem:[%s6575_s7 + $0x340] sm:$0xf]  ;;  %v4897_v13 = vld [vmem:[%s6575_s7 + $0x230] sm:$0xf]  ;;  %v4906_v14 = vor.u32 %v5715_v5, %v4905_v4 }
 0x139   : > { %3991 = vmatpush.bf16.msra.mxu1 %v4682_v35  ;;  %v5747_v10 = vld [vmem:[%s6575_s7 + $0x344] sm:$0xf0]  ;;  %v5097_v11 = vld [vmem:[%s6575_s7 + $0x3c0] sm:$0xf]  ;;  %v5713_v15 = vld [vmem:[%s6575_s7 + $0x234] sm:$0xf0]  ;;  %v4970_v18 = vor.u32 %v5731_v8, %v4969_v6 }
 0x13a   : > { %4004 = vmatpush.bf16.msra.mxu2 %v4746_v36  ;;  %v5763_v12 = vld [vmem:[%s6575_s7 + $0x3c4] sm:$0xf0]  ;;  %v4961_v16 = vld [vmem:[%s6575_s7 + $0x2b0] sm:$0xf]  ;;  %v5729_v17 = vld [vmem:[%s6575_s7 + $0x2b4] sm:$0xf0]  ;;  %v5034_v19 = vor.u32 %v5747_v10, %v5033_v9  ;;  %v4898_v29 = vor.u32 %v5713_v15, %v4897_v13 }
 0x13b   : > { %4017 = vmatpush.bf16.msra.mxu3 %v4810_v39  ;;  %v5098_v23 = vor.u32 %v5763_v12, %v5097_v11  ;;  %v5025_v24 = vld [vmem:[%s6575_s7 + $0x330] sm:$0xf]  ;;  %v5745_v25 = vld [vmem:[%s6575_s7 + $0x334] sm:$0xf0]  ;;  %v4962_v30 = vor.u32 %v5729_v17, %v4961_v16  ;;  %v4889_v32 = vld [vmem:[%s6575_s7 + $0x220] sm:$0xf] }
 0x13c   : > { %4023 = vmatpush.bf16.msrb.mxu0 %v4930_v40  ;;  %v5089_v27 = vld [vmem:[%s6575_s7 + $0x3b0] sm:$0xf]  ;;  %v5761_v28 = vld [vmem:[%s6575_s7 + $0x3b4] sm:$0xf0]  ;;  %v5026_v31 = vor.u32 %v5745_v25, %v5025_v24  ;;  %v5711_v33 = vld [vmem:[%s6575_s7 + $0x224] sm:$0xf0] }
 0x13d   : > { %4036 = vmatpush.bf16.msrb.mxu1 %v4994_v41  ;;  %v6680_v20 = vld [vmem:[#allocation1 + $0x12] sm:$0xff]  ;;  %v6682_v21 = vld [vmem:[#allocation1] sm:$0xff]  ;;  %v6689_v26 = vld [vmem:[#allocation1 + $0x9] sm:$0xff]  ;;  %v5090_v35 = vor.u32 %v5761_v28, %v5089_v27  ;;  %v4890_v41 = vor.u32 %v5711_v33, %v4889_v32  ;;  %s4613_s13 = sshll.u32 %s7210_s12, 3  ;;  %s7212_s22 = smov (!%p2377_p10, %s4611_s22), 3  ;;  %vm4390_vm0 = vcmask 1041408  }
 0x13e   : > { %4049 = vmatpush.bf16.msrb.mxu2 %v5058_v42  ;;  %v6684_v22 = vld [vmem:[#allocation1 + $0x1b] sm:$0xff]  ;;  %3979 = vmatmul.bf16.vlgmr.msra.gmra.mxu0 %v6682_v21  ;;  %v4953_v34 = vld [vmem:[%s6575_s7 + $0x2a0] sm:$0xf]  ;;  %v5727_v36 = vld [vmem:[%s6575_s7 + $0x2a4] sm:$0xf0]  ;;  %s7139_s21 = scalar_lea.vmem %s7201_s3, %s4613_s13  ;;  %s2379_s26 = scalar_lea.vmem %s7200_s2, %s7212_s22  ;;  %vm4486_vm1 = vcmask 74752  }
 0x13f   : > { %4062 = vmatpush.bf16.msrb.mxu3 %v5122_v46  ;;  %4005 = vmatmul.bf16.vlgmr.msra.gmra.mxu2 %v6680_v20  ;;  %v5017_v37 = vld [vmem:[%s6575_s7 + $0x320] sm:$0xf]  ;;  %v5743_v38 = vld [vmem:[%s6575_s7 + $0x324] sm:$0xf0]  ;;  %v4881_v42 = vld [vmem:[%s6575_s7 + $0x210] sm:$0xf]  ;;  %v4954_v43 = vor.u32 %v5727_v36, %v4953_v34 }
 0x140   : > { %4024 = vmatpush.bf16.msrb.mxu0 %v4922_v52  ;;  %4018 = vmatmul.bf16.vlgmr.msra.gmra.mxu3 %v6684_v22  ;;  %v5081_v39 = vld [vmem:[%s6575_s7 + $0x3a0] sm:$0xf]  ;;  %v5759_v40 = vld [vmem:[%s6575_s7 + $0x3a4] sm:$0xf0]  ;;  %v5018_v44 = vor.u32 %v5743_v38, %v5017_v37  ;;  %v5709_v45 = vld [vmem:[%s6575_s7 + $0x214] sm:$0xf0] }
 0x141   : > { %4037 = vmatpush.bf16.msrb.mxu1 %v4986_v55  ;;  %v4945_v46 = vld [vmem:[%s6575_s7 + $0x290] sm:$0xf]  ;;  %v5725_v47 = vld [vmem:[%s6575_s7 + $0x294] sm:$0xf0]  ;;  %v5082_v48 = vor.u32 %v5759_v40, %v5081_v39  ;;  %v4873_v53 = vld [vmem:[%s6575_s7 + $0x200] sm:$0xf]  ;;  %v4882_v55 = vor.u32 %v5709_v45, %v4881_v42 }
 0x142   : > { %4050 = vmatpush.bf16.msrb.mxu2 %v5050_v56  ;;  %3992 = vmatmul.bf16.vlgmr.msra.gmra.mxu1 %v6689_v26  ;;  %v5009_v49 = vld [vmem:[%s6575_s7 + $0x310] sm:$0xf]  ;;  %v5741_v50 = vld [vmem:[%s6575_s7 + $0x314] sm:$0xf0]  ;;  %v5707_v54 = vld [vmem:[%s6575_s7 + $0x204] sm:$0xf0]  ;;  %v4946_v62 = vor.u32 %v5725_v47, %v4945_v46 }
 0x143   : > { %4063 = vmatpush.bf16.msrb.mxu3 %v5114_v60  ;;  %v5073_v51 = vld [vmem:[%s6575_s7 + $0x390] sm:$0xf]  ;;  %v5757_v52 = vld [vmem:[%s6575_s7 + $0x394] sm:$0xf0]  ;;  %v4937_v56 = vld [vmem:[%s6575_s7 + $0x280] sm:$0xf]  ;;  %v5010_v63 = vor.u32 %v5741_v50, %v5009_v49  ;;  %v4874_v9 = vor.u32 %v5707_v54, %v4873_v53 }
 0x144   : > { %4025 = vmatpush.bf16.msrb.mxu0 %v4914_v1  ;;  %v5723_v57 = vld [vmem:[%s6575_s7 + $0x284] sm:$0xf0]  ;;  %v5001_v58 = vld [vmem:[%s6575_s7 + $0x300] sm:$0xf]  ;;  %v6723_v0 = vld [vmem:[#allocation1 + $0x24] sm:$0xff]  ;;  %s7214_s17 = smov (!%p2387_p11, %s5977_s17), 1 }
 0x145   : > { %4038 = vmatpush.bf16.msrb.mxu1 %v4978_v2  ;;  %v5739_v59 = vld [vmem:[%s6575_s7 + $0x304] sm:$0xf0]  ;;  %v2398_v61 = vld [vmem:[%s7198_s0 + $0x8] sm:$0xff]  ;;  %v6725_v1 = vld [vmem:[#allocation1 + $0x3f] sm:$0xff]  ;;  %v4938_v13 = vor.u32 %v5723_v57, %v4937_v56  ;;  %s4614_s27 = sshll.u32 %s7214_s17, 1 }
 0x146   : > { %4051 = vmatpush.bf16.msrb.mxu2 %v5042_v3  ;;  %v6718_v60 = vld [vmem:[#allocation1 + $0x36] sm:$0xff]  ;;  %v6727_v2 = vld [vmem:[#allocation1 + $0x2d] sm:$0xff]  ;;  %v5074_v3 = vor.u32 %v5757_v52, %v5073_v51  ;;  %v5801_v10 = vld [vmem:[%s6575_s7 + $0x4f4] sm:$0xf0]  ;;  %s2390_s30 = scalar_lea.vmem %s7202_s4, %s4614_s27 }
 0x147   : > { %4064 = vmatpush.bf16.msrb.mxu3 %v5106_v7  ;;  %v5065_v4 = vld [vmem:[%s6575_s7 + $0x380] sm:$0xf]  ;;  %v5755_v5 = vld [vmem:[%s6575_s7 + $0x384] sm:$0xf0]  ;;  %2666 = vst [vmem:[#allocation1] ss:$9 sm:$0xff] %v2398_v61 }
 0x148   : > { %4026 = vmatpush.bf16.msrb.mxu0 %v4906_v14  ;;  %v5185_v6 = vld [vmem:[%s6575_s7 + $0x470] sm:$0xf]  ;;  %v5785_v7 = vld [vmem:[%s6575_s7 + $0x474] sm:$0xf0]  ;;  %v5002_v14 = vor.u32 %v5739_v59, %v5001_v58  ;;  %v5066_v17 = vor.u32 %v5755_v5, %v5065_v4  ;;  %v5177_v24 = vld [vmem:[%s6575_s7 + $0x460] sm:$0xf] }
 0x149   : > { %4039 = vmatpush.bf16.msrb.mxu1 %v4970_v18  ;;  %v5249_v8 = vld [vmem:[%s6575_s7 + $0x4f0] sm:$0xf]  ;;  %v5817_v12 = vld [vmem:[%s6575_s7 + $0x574] sm:$0xf0]  ;;  %v5186_v18 = vor.u32 %v5785_v7, %v5185_v6  ;;  %v5783_v25 = vld [vmem:[%s6575_s7 + $0x464] sm:$0xf0] }
 0x14a   : > { %4052 = vmatpush.bf16.msrb.mxu2 %v5034_v19  ;;  %v5313_v11 = vld [vmem:[%s6575_s7 + $0x570] sm:$0xf]  ;;  %v5833_v16 = vld [vmem:[%s6575_s7 + $0x5f4] sm:$0xf0]  ;;  %v5250_v19 = vor.u32 %v5801_v10, %v5249_v8  ;;  %v5241_v27 = vld [vmem:[%s6575_s7 + $0x4e0] sm:$0xf]  ;;  %v5178_v34 = vor.u32 %v5783_v25, %v5177_v24 }
 0x14b   : > { %4065 = vmatpush.bf16.msrb.mxu3 %v5098_v23  ;;  %v5377_v15 = vld [vmem:[%s6575_s7 + $0x5f0] sm:$0xf]  ;;  %v5314_v23 = vor.u32 %v5817_v12, %v5313_v11  ;;  %v5369_v32 = vld [vmem:[%s6575_s7 + $0x5e0] sm:$0xf]  ;;  %v5831_v33 = vld [vmem:[%s6575_s7 + $0x5e4] sm:$0xf0] }
 0x14c   : > { %4027 = vmatpush.bf16.msrb.mxu0 %v4898_v29  ;;  %v5378_v28 = vor.u32 %v5833_v16, %v5377_v15  ;;  %v5799_v29 = vld [vmem:[%s6575_s7 + $0x4e4] sm:$0xf0]  ;;  %v5169_v37 = vld [vmem:[%s6575_s7 + $0x450] sm:$0xf]  ;;  %v5781_v38 = vld [vmem:[%s6575_s7 + $0x454] sm:$0xf0]  ;;  %v5370_v40 = vor.u32 %v5831_v33, %v5369_v32 }
 0x14d   : > { %4040 = vmatpush.bf16.msrb.mxu1 %v4962_v30  ;;  %v5305_v30 = vld [vmem:[%s6575_s7 + $0x560] sm:$0xf]  ;;  %v5233_v39 = vld [vmem:[%s6575_s7 + $0x4d0] sm:$0xf]  ;;  %v5829_v45 = vld [vmem:[%s6575_s7 + $0x5d4] sm:$0xf0]  ;;  %v5170_v46 = vor.u32 %v5781_v38, %v5169_v37 }
 0x14e   : > { %4053 = vmatpush.bf16.msrb.mxu2 %v5026_v31  ;;  %v5815_v31 = vld [vmem:[%s6575_s7 + $0x564] sm:$0xf0]  ;;  %v5297_v42 = vld [vmem:[%s6575_s7 + $0x550] sm:$0xf]  ;;  %v5161_v49 = vld [vmem:[%s6575_s7 + $0x440] sm:$0xf] }
 0x14f   : > { %4066 = vmatpush.bf16.msrb.mxu3 %v5090_v35  ;;  %v5242_v35 = vor.u32 %v5799_v29, %v5241_v27  ;;  %v5306_v36 = vor.u32 %v5815_v31, %v5305_v30  ;;  %v5779_v50 = vld [vmem:[%s6575_s7 + $0x444] sm:$0xf0]  ;;  %v5225_v51 = vld [vmem:[%s6575_s7 + $0x4c0] sm:$0xf]  ;;  %v5793_v5 = vld [vmem:[%s6575_s7 + $0x4b4] sm:$0xf0] }
 0x150   : > { %4028 = vmatpush.bf16.msrb.mxu0 %v4890_v41  ;;  %v5797_v41 = vld [vmem:[%s6575_s7 + $0x4d4] sm:$0xf0]  ;;  %v5795_v53 = vld [vmem:[%s6575_s7 + $0x4c4] sm:$0xf0]  ;;  %v5289_v54 = vld [vmem:[%s6575_s7 + $0x540] sm:$0xf]  ;;  %v5162_v58 = vor.u32 %v5779_v50, %v5161_v49 }
 0x151   : > { %4041 = vmatpush.bf16.msrb.mxu1 %v4954_v43  ;;  %v5813_v43 = vld [vmem:[%s6575_s7 + $0x554] sm:$0xf0]  ;;  %v5234_v47 = vor.u32 %v5797_v41, %v5233_v39  ;;  %v5353_v56 = vld [vmem:[%s6575_s7 + $0x5c0] sm:$0xf]  ;;  %v5827_v57 = vld [vmem:[%s6575_s7 + $0x5c4] sm:$0xf0]  ;;  %v5226_v59 = vor.u32 %v5795_v53, %v5225_v51 }
 0x152   : > { %4054 = vmatpush.bf16.msrb.mxu2 %v5018_v44  ;;  %v5361_v44 = vld [vmem:[%s6575_s7 + $0x5d0] sm:$0xf]  ;;  %v5354_v4 = vor.u32 %v5827_v57, %v5353_v56  ;;  %v5809_v7 = vld [vmem:[%s6575_s7 + $0x534] sm:$0xf0]  ;;  %v5209_v15 = vld [vmem:[%s6575_s7 + $0x4a0] sm:$0xf] }
 0x153   : > { %4067 = vmatpush.bf16.msrb.mxu3 %v5082_v48  ;;  %v5298_v48 = vor.u32 %v5813_v43, %v5297_v42  ;;  %v5362_v52 = vor.u32 %v5829_v45, %v5361_v44  ;;  %v5281_v6 = vld [vmem:[%s6575_s7 + $0x530] sm:$0xf]  ;;  %v5823_v24 = vld [vmem:[%s6575_s7 + $0x5a4] sm:$0xf0]  ;;  %v5773_v30 = vld [vmem:[%s6575_s7 + $0x414] sm:$0xf0] }
 0x154   : > { %4029 = vmatpush.bf16.msrb.mxu0 %v4882_v55  ;;  %v5811_v55 = vld [vmem:[%s6575_s7 + $0x544] sm:$0xf0]  ;;  %v5345_v8 = vld [vmem:[%s6575_s7 + $0x5b0] sm:$0xf]  ;;  %v5282_v12 = vor.u32 %v5809_v7, %v5281_v6  ;;  %v5789_v33 = vld [vmem:[%s6575_s7 + $0x494] sm:$0xf0] }
 0x155   : > { %4042 = vmatpush.bf16.msrb.mxu1 %v4946_v62  ;;  %v5290_v61 = vor.u32 %v5811_v55, %v5289_v54  ;;  %v5153_v62 = vld [vmem:[%s6575_s7 + $0x430] sm:$0xf]  ;;  %v5821_v37 = vld [vmem:[%s6575_s7 + $0x594] sm:$0xf0]  ;;  %v5129_v39 = vld [vmem:[%s6575_s7 + $0x400] sm:$0xf] }
 0x156   : > { %4055 = vmatpush.bf16.msrb.mxu2 %v5010_v63  ;;  %v5777_v63 = vld [vmem:[%s6575_s7 + $0x434] sm:$0xf0]  ;;  %v5137_v29 = vld [vmem:[%s6575_s7 + $0x410] sm:$0xf]  ;;  %v5193_v43 = vld [vmem:[%s6575_s7 + $0x480] sm:$0xf] }
 0x157   : > { %4068 = vmatpush.bf16.msrb.mxu3 %v5074_v3  ;;  %v5217_v3 = vld [vmem:[%s6575_s7 + $0x4b0] sm:$0xf]  ;;  %v5154_v10 = vor.u32 %v5777_v63, %v5153_v62  ;;  %v5138_v38 = vor.u32 %v5773_v30, %v5137_v29  ;;  %v5787_v44 = vld [vmem:[%s6575_s7 + $0x484] sm:$0xf0]  ;;  %v5257_v45 = vld [vmem:[%s6575_s7 + $0x500] sm:$0xf] }
 0x158   : > { %4030 = vmatpush.bf16.msrb.mxu0 %v4874_v9  ;;  %v5825_v9 = vld [vmem:[%s6575_s7 + $0x5b4] sm:$0xf0]  ;;  %v5218_v11 = vor.u32 %v5793_v5, %v5217_v3  ;;  %v5201_v31 = vld [vmem:[%s6575_s7 + $0x490] sm:$0xf]  ;;  %v5819_v49 = vld [vmem:[%s6575_s7 + $0x584] sm:$0xf0]  ;;  %v5194_v57 = vor.u32 %v5787_v44, %v5193_v43 }
 0x159   : > { %4043 = vmatpush.bf16.msrb.mxu1 %v4938_v13  ;;  %v5145_v13 = vld [vmem:[%s6575_s7 + $0x420] sm:$0xf]  ;;  %v5346_v16 = vor.u32 %v5825_v9, %v5345_v8  ;;  %v5202_v41 = vor.u32 %v5789_v33, %v5201_v31  ;;  %v5441_v50 = vld [vmem:[%s6575_s7 + $0x670] sm:$0xf]  ;;  %v5849_v51 = vld [vmem:[%s6575_s7 + $0x674] sm:$0xf0] }
 0x15a   : > { %4056 = vmatpush.bf16.msrb.mxu2 %v5002_v14  ;;  %v5775_v14 = vld [vmem:[%s6575_s7 + $0x424] sm:$0xf0]  ;;  %v5865_v54 = vld [vmem:[%s6575_s7 + $0x6f4] sm:$0xf0]  ;;  %v5569_v55 = vld [vmem:[%s6575_s7 + $0x770] sm:$0xf]  ;;  %v5442_v63 = vor.u32 %v5849_v51, %v5441_v50 }
 0x15b   : > { %4069 = vmatpush.bf16.msrb.mxu3 %v5066_v17  ;;  %4031 = vmatmul.bf16.vlgmr.msrb.gmra.mxu0 %v6723_v0  ;;  %v5791_v17 = vld [vmem:[%s6575_s7 + $0x4a4] sm:$0xf0]  ;;  %v5146_v25 = vor.u32 %v5775_v14, %v5145_v13  ;;  %v5881_v56 = vld [vmem:[%s6575_s7 + $0x774] sm:$0xf0]  ;;  %v5433_v5 = vld [vmem:[%s6575_s7 + $0x660] sm:$0xf] }
 0x15c   : > { %4075 = vmatpush.bf16.msra.mxu0 %v5186_v18  ;;  %4044 = vmatmul.bf16.vlgmr.msrb.gmra.mxu1 %v6727_v2  ;;  %v5273_v18 = vld [vmem:[%s6575_s7 + $0x520] sm:$0xf]  ;;  %v5210_v27 = vor.u32 %v5791_v17, %v5209_v15  ;;  %v5847_v6 = vld [vmem:[%s6575_s7 + $0x664] sm:$0xf0]  ;;  %v2670_v17 = vld [vmem:[#allocation1 + $0x1b] sm:$0xff] }
 0x15d   : > { %4088 = vmatpush.bf16.msra.mxu1 %v5250_v19  ;;  %4057 = vmatmul.bf16.vlgmr.msrb.gmra.mxu2 %v6718_v60  ;;  %v5807_v19 = vld [vmem:[%s6575_s7 + $0x524] sm:$0xf0]  ;;  %v5497_v7 = vld [vmem:[%s6575_s7 + $0x6e0] sm:$0xf]  ;;  %v5861_v29 = vld [vmem:[%s6575_s7 + $0x6d4] sm:$0xf0] }
 0x15e   : > { %4101 = vmatpush.bf16.msra.mxu2 %v5314_v23  ;;  %4070 = vmatmul.bf16.vlgmr.msrb.gmra.mxu3 %v6725_v1  ;;  %v5337_v23 = vld [vmem:[%s6575_s7 + $0x5a0] sm:$0xf]  ;;  %v5863_v9 = vld [vmem:[%s6575_s7 + $0x6e4] sm:$0xf0]  ;;  %v5553_v30 = vld [vmem:[%s6575_s7 + $0x750] sm:$0xf] }
 0x15f   : > { %4114 = vmatpush.bf16.msra.mxu3 %v5378_v28  ;;  %v5274_v28 = vor.u32 %v5807_v19, %v5273_v18  ;;  %v5338_v32 = vor.u32 %v5823_v24, %v5337_v23  ;;  %v5625_v13 = vld [vmem:[%s6575_s7 + $0x7e0] sm:$0xf]  ;;  %v5895_v14 = vld [vmem:[%s6575_s7 + $0x7e4] sm:$0xf0]  ;;  %v5434_v18 = vor.u32 %v5847_v6, %v5433_v5  ;;  %v5498_v19 = vor.u32 %v5863_v9, %v5497_v7  ;;  %v5425_v24 = vld [vmem:[%s6575_s7 + $0x650] sm:$0xf] }
 0x160   : > { %4076 = vmatpush.bf16.msra.mxu0 %v5178_v34  ;;  %v5265_v34 = vld [vmem:[%s6575_s7 + $0x510] sm:$0xf]  ;;  %v2669_v15 = vld [vmem:[#allocation1 + $0x12] sm:$0xff]  ;;  %v5877_v31 = vld [vmem:[%s6575_s7 + $0x754] sm:$0xf0] }
 0x161   : > { %4089 = vmatpush.bf16.msra.mxu1 %v5242_v35  ;;  %v5805_v35 = vld [vmem:[%s6575_s7 + $0x514] sm:$0xf0]  ;;  %v5875_v43 = vld [vmem:[%s6575_s7 + $0x744] sm:$0xf0]  ;;  %v5609_v44 = vld [vmem:[%s6575_s7 + $0x7c0] sm:$0xf] }
 0x162   : > { %4102 = vmatpush.bf16.msra.mxu2 %v5306_v36  ;;  %v5329_v36 = vld [vmem:[%s6575_s7 + $0x590] sm:$0xf]  ;;  %v5266_v42 = vor.u32 %v5805_v35, %v5265_v34  ;;  %v5893_v33 = vld [vmem:[%s6575_s7 + $0x7d4] sm:$0xf0]  ;;  %v5855_v5 = vld [vmem:[%s6575_s7 + $0x6a4] sm:$0xf0] }
 0x163   : > { %4115 = vmatpush.bf16.msra.mxu3 %v5370_v40  ;;  %v5771_v40 = vld [vmem:[%s6575_s7 + $0x404] sm:$0xf0]  ;;  %v5841_v50 = vld [vmem:[%s6575_s7 + $0x634] sm:$0xf0]  ;;  %v5473_v51 = vld [vmem:[%s6575_s7 + $0x6b0] sm:$0xf] }
 0x164   : > { %4077 = vmatpush.bf16.msra.mxu0 %v5170_v46  ;;  %v5330_v46 = vor.u32 %v5821_v37, %v5329_v36  ;;  %v5130_v53 = vor.u32 %v5771_v40, %v5129_v39  ;;  %v5554_v36 = vor.u32 %v5877_v31, %v5553_v30  ;;  %v5417_v37 = vld [vmem:[%s6575_s7 + $0x640] sm:$0xf]  ;;  %v5871_v7 = vld [vmem:[%s6575_s7 + $0x724] sm:$0xf0] }
 0x165   : > { %4090 = vmatpush.bf16.msra.mxu1 %v5234_v47  ;;  %v5803_v47 = vld [vmem:[%s6575_s7 + $0x504] sm:$0xf0]  ;;  %v5481_v39 = vld [vmem:[%s6575_s7 + $0x6c0] sm:$0xf] }
 0x166   : > { %4103 = vmatpush.bf16.msra.mxu2 %v5298_v48  ;;  %v5321_v48 = vld [vmem:[%s6575_s7 + $0x580] sm:$0xf]  ;;  %v5887_v9 = vld [vmem:[%s6575_s7 + $0x7a4] sm:$0xf0] }
 0x167   : > { %4116 = vmatpush.bf16.msra.mxu3 %v5362_v52  ;;  %v5505_v52 = vld [vmem:[%s6575_s7 + $0x6f0] sm:$0xf]  ;;  %v5322_v62 = vor.u32 %v5819_v49, %v5321_v48  ;;  %v5529_v6 = vld [vmem:[%s6575_s7 + $0x720] sm:$0xf] }
 0x168   : > { %4078 = vmatpush.bf16.msra.mxu0 %v5162_v58  ;;  %v5258_v58 = vor.u32 %v5803_v47, %v5257_v45  ;;  %v5506_v3 = vor.u32 %v5865_v54, %v5505_v52  ;;  %v5891_v45 = vld [vmem:[%s6575_s7 + $0x7c4] sm:$0xf0]  ;;  %v5409_v49 = vld [vmem:[%s6575_s7 + $0x630] sm:$0xf]  ;;  %v5449_v31 = vld [vmem:[%s6575_s7 + $0x680] sm:$0xf] }
 0x169   : > { %4091 = vmatpush.bf16.msra.mxu1 %v5226_v59  ;;  %v5633_v59 = vld [vmem:[%s6575_s7 + $0x7f0] sm:$0xf]  ;;  %v5610_v52 = vor.u32 %v5891_v45, %v5609_v44  ;;  %v4803_v44 = vld [vmem:[%s6575_s7 + $0x178] sm:$0xf0] }
 0x16a   : > { %4104 = vmatpush.bf16.msra.mxu2 %v5290_v61  ;;  %v5897_v61 = vld [vmem:[%s6575_s7 + $0x7f4] sm:$0xf0]  ;;  %v5537_v54 = vld [vmem:[%s6575_s7 + $0x730] sm:$0xf] }
 0x16b   : > { %4117 = vmatpush.bf16.msra.mxu3 %v5354_v4  ;;  %v5570_v4 = vor.u32 %v5881_v56, %v5569_v55  ;;  %v5634_v8 = vor.u32 %v5897_v61, %v5633_v59  ;;  %v5873_v55 = vld [vmem:[%s6575_s7 + $0x734] sm:$0xf0]  ;;  %v5601_v56 = vld [vmem:[%s6575_s7 + $0x7b0] sm:$0xf] }
 0x16c   : > { %4079 = vmatpush.bf16.msra.mxu0 %v5154_v10  ;;  %v5561_v10 = vld [vmem:[%s6575_s7 + $0x760] sm:$0xf]  ;;  %v5538_v61 = vor.u32 %v5873_v55, %v5537_v54  ;;  %v4667_v54 = vld [vmem:[%s6575_s7 + $0x68] sm:$0xf0]  ;;  %v5670_v55 = vld [vmem:[%s6575_s7 + $0xe4] sm:$0xf] }
 0x16d   : > { %4092 = vmatpush.bf16.msra.mxu1 %v5218_v11  ;;  %v5879_v11 = vld [vmem:[%s6575_s7 + $0x764] sm:$0xf0] }
 0x16e   : > { %4105 = vmatpush.bf16.msra.mxu2 %v5282_v12  ;;  %v2667_v12 = vld [vmem:[#allocation1] sm:$0xff]  ;;  %v5562_v23 = vor.u32 %v5879_v11, %v5561_v10 }
 0x16f   : > { %4118 = vmatpush.bf16.msra.mxu3 %v5346_v16  ;;  %v2668_v16 = vld [vmem:[#allocation1 + $0x9] sm:$0xff] }
 0x170   : > { %4080 = vmatpush.bf16.msra.mxu0 %v5146_v25  ;;  %v5845_v25 = vld [vmem:[%s6575_s7 + $0x654] sm:$0xf0] }
 0x171   : > { %4093 = vmatpush.bf16.msra.mxu1 %v5210_v27  ;;  %v5489_v27 = vld [vmem:[%s6575_s7 + $0x6d0] sm:$0xf]  ;;  %v5426_v34 = vor.u32 %v5845_v25, %v5425_v24  ;;  %v5885_v24 = vld [vmem:[%s6575_s7 + $0x794] sm:$0xf0] }
 0x172   : > { %4106 = vmatpush.bf16.msra.mxu2 %v5274_v28  ;;  %v5626_v28 = vor.u32 %v5895_v14, %v5625_v13  ;;  %v5490_v35 = vor.u32 %v5861_v29, %v5489_v27  ;;  %v5393_v13 = vld [vmem:[%s6575_s7 + $0x610] sm:$0xf]  ;;  %v5837_v14 = vld [vmem:[%s6575_s7 + $0x614] sm:$0xf0]  ;;  %v5385_v27 = vld [vmem:[%s6575_s7 + $0x600] sm:$0xf] }
 0x173   : > { %4119 = vmatpush.bf16.msra.mxu3 %v5338_v32  ;;  %v5617_v32 = vld [vmem:[%s6575_s7 + $0x7d0] sm:$0xf]  ;;  %v5394_v25 = vor.u32 %v5837_v14, %v5393_v13  ;;  %v4723_v13 = vld [vmem:[%s6575_s7 + $0xd8] sm:$0xf0]  ;;  %v5684_v14 = vld [vmem:[%s6575_s7 + $0x154] sm:$0xf] }
 0x174   : > { %4081 = vmatpush.bf16.msra.mxu0 %v5138_v38  ;;  %v5843_v38 = vld [vmem:[%s6575_s7 + $0x644] sm:$0xf0]  ;;  %v5618_v40 = vor.u32 %v5893_v33, %v5617_v32  ;;  %v5513_v33 = vld [vmem:[%s6575_s7 + $0x700] sm:$0xf] }
 0x175   : > { %4094 = vmatpush.bf16.msra.mxu1 %v5202_v41  ;;  %v5859_v41 = vld [vmem:[%s6575_s7 + $0x6c4] sm:$0xf0] }
 0x176   : > { %4107 = vmatpush.bf16.msra.mxu2 %v5266_v42  ;;  %v5545_v42 = vld [vmem:[%s6575_s7 + $0x740] sm:$0xf]  ;;  %v5482_v47 = vor.u32 %v5859_v41, %v5481_v39  ;;  %v5851_v32 = vld [vmem:[%s6575_s7 + $0x684] sm:$0xf0]  ;;  %v4675_v39 = vld [vmem:[%s6575_s7 + $0x78] sm:$0xf0] }
 0x177   : > { %4120 = vmatpush.bf16.msra.mxu3 %v5330_v46  ;;  %v5418_v46 = vor.u32 %v5843_v38, %v5417_v37  ;;  %v5546_v48 = vor.u32 %v5875_v43, %v5545_v42  ;;  %v5883_v37 = vld [vmem:[%s6575_s7 + $0x784] sm:$0xf0]  ;;  %v5656_v38 = vld [vmem:[%s6575_s7 + $0x74] sm:$0xf]  ;;  %v4739_v42 = vld [vmem:[%s6575_s7 + $0xf8] sm:$0xf0]  ;;  %v5450_v45 = vor.u32 %v5851_v32, %v5449_v31 }
 0x178   : > { %4082 = vmatpush.bf16.msra.mxu0 %v5130_v53  ;;  %v5857_v53 = vld [vmem:[%s6575_s7 + $0x6b4] sm:$0xf0]  ;;  %v5688_v43 = vld [vmem:[%s6575_s7 + $0x174] sm:$0xf]  ;;  %v4779_v31 = vld [vmem:[%s6575_s7 + $0x148] sm:$0xf0] }
 0x179   : > { %4095 = vmatpush.bf16.msra.mxu1 %v5194_v57  ;;  %v5889_v57 = vld [vmem:[%s6575_s7 + $0x7b4] sm:$0xf0]  ;;  %v5474_v59 = vor.u32 %v5857_v53, %v5473_v51  ;;  %v5654_v53 = vld [vmem:[%s6575_s7 + $0x64] sm:$0xf] }
 0x17a   : > { %4108 = vmatpush.bf16.msra.mxu2 %v5258_v58  ;;  %v5410_v58 = vor.u32 %v5841_v50, %v5409_v49  ;;  %v4678_v50 = vor.u32 %v5656_v38, %v4675_v39  ;;  %v5698_v32 = vld [vmem:[%s6575_s7 + $0x1c4] sm:$0xf]  ;;  %v4643_v38 = vld [vmem:[%s6575_s7 + $0x38] sm:$0xf0]  ;;  %v5664_v39 = vld [vmem:[%s6575_s7 + $0xb4] sm:$0xf] }
 0x17b   : > { %4121 = vmatpush.bf16.msra.mxu3 %v5322_v62  ;;  %4083 = vmatmul.bf16.vlgmr.msra.gmra.mxu0 %v2667_v12  ;;  %v5401_v62 = vld [vmem:[%s6575_s7 + $0x620] sm:$0xf]  ;;  %v5530_v12 = vor.u32 %v5871_v7, %v5529_v6  ;;  %v4670_v6 = vor.u32 %v5654_v53, %v4667_v54  ;;  %v4699_v53 = vld [vmem:[%s6575_s7 + $0xa8] sm:$0xf0]  ;;  %v5678_v54 = vld [vmem:[%s6575_s7 + $0x124] sm:$0xf] }
 0x17c   : > { %4127 = vmatpush.bf16.msrb.mxu0 %v5442_v63  ;;  %4096 = vmatmul.bf16.vlgmr.msra.gmra.mxu1 %v2668_v16  ;;  %v5839_v63 = vld [vmem:[%s6575_s7 + $0x624] sm:$0xf0] }
 0x17d   : > { %4140 = vmatpush.bf16.msrb.mxu1 %v5506_v3  ;;  %4109 = vmatmul.bf16.vlgmr.msra.gmra.mxu2 %v2669_v15  ;;  %v5465_v3 = vld [vmem:[%s6575_s7 + $0x6a0] sm:$0xf]  ;;  %v5402_v10 = vor.u32 %v5839_v63, %v5401_v62  ;;  %v5457_v15 = vld [vmem:[%s6575_s7 + $0x690] sm:$0xf]  ;;  %v5702_v62 = vld [vmem:[%s6575_s7 + $0x1e4] sm:$0xf] }
 0x17e   : > { %4153 = vmatpush.bf16.msrb.mxu2 %v5570_v4  ;;  %4122 = vmatmul.bf16.vlgmr.msra.gmra.mxu3 %v2670_v17  ;;  %v5602_v4 = vor.u32 %v5889_v57, %v5601_v56  ;;  %v5466_v11 = vor.u32 %v5855_v5, %v5465_v3  ;;  %v5853_v17 = vld [vmem:[%s6575_s7 + $0x694] sm:$0xf0]  ;;  %v4731_v57 = vld [vmem:[%s6575_s7 + $0xe8] sm:$0xf0] }
 0x17f   : > { %4166 = vmatpush.bf16.msrb.mxu3 %v5634_v8  ;;  %v5593_v8 = vld [vmem:[%s6575_s7 + $0x7a0] sm:$0xf]  ;;  %v5458_v29 = vor.u32 %v5853_v17, %v5457_v15  ;;  %v4859_v63 = vld [vmem:[%s6575_s7 + $0x1e8] sm:$0xf0]  ;;  %v2674_v5 = vld [vmem:[#allocation1 + $0x3f] sm:$0xff]  ;;  %v4734_v7 = vor.u32 %v5670_v55, %v4731_v57 }
 0x180   : > { %4128 = vmatpush.bf16.msrb.mxu0 %v5434_v18  ;;  %v5594_v16 = vor.u32 %v5887_v9, %v5593_v8  ;;  %v5521_v18 = vld [vmem:[%s6575_s7 + $0x710] sm:$0xf]  ;;  %v5652_v9 = vld [vmem:[%s6575_s7 + $0x54] sm:$0xf]  ;;  %v4787_v15 = vld [vmem:[%s6575_s7 + $0x158] sm:$0xf0] }
 0x181   : > { %4141 = vmatpush.bf16.msrb.mxu1 %v5498_v19  ;;  %v5869_v19 = vld [vmem:[%s6575_s7 + $0x714] sm:$0xf0]  ;;  %v2673_v3 = vld [vmem:[#allocation1 + $0x36] sm:$0xff]  ;;  %v4851_v17 = vld [vmem:[%s6575_s7 + $0x1d8] sm:$0xf0] }
 0x182   : > { %4154 = vmatpush.bf16.msrb.mxu2 %v5562_v23  ;;  %v5585_v23 = vld [vmem:[%s6575_s7 + $0x790] sm:$0xf]  ;;  %v5522_v30 = vor.u32 %v5869_v19, %v5521_v18  ;;  %v4763_v55 = vld [vmem:[%s6575_s7 + $0x128] sm:$0xf0] }
 0x183   : > { %4167 = vmatpush.bf16.msrb.mxu3 %v5626_v28  ;;  %v5835_v28 = vld [vmem:[%s6575_s7 + $0x604] sm:$0xf0]  ;;  %v4827_v57 = vld [vmem:[%s6575_s7 + $0x1a8] sm:$0xf0] }
 0x184   : > { %4129 = vmatpush.bf16.msrb.mxu0 %v5426_v34  ;;  %v5586_v34 = vor.u32 %v5885_v24, %v5585_v23  ;;  %v5386_v41 = vor.u32 %v5835_v28, %v5385_v27  ;;  %v4790_v23 = vor.u32 %v5684_v14, %v4787_v15  ;;  %v5650_v24 = vld [vmem:[%s6575_s7 + $0x44] sm:$0xf] }
 0x185   : > { %4142 = vmatpush.bf16.msrb.mxu1 %v5490_v35  ;;  %v5867_v35 = vld [vmem:[%s6575_s7 + $0x704] sm:$0xf0]  ;;  %v5666_v27 = vld [vmem:[%s6575_s7 + $0xc4] sm:$0xf] }
 0x186   : > { %4155 = vmatpush.bf16.msrb.mxu2 %v5554_v36  ;;  %v5577_v36 = vld [vmem:[%s6575_s7 + $0x780] sm:$0xf]  ;;  %v5658_v15 = vld [vmem:[%s6575_s7 + $0x84] sm:$0xf] }
 0x187   : > { %4168 = vmatpush.bf16.msrb.mxu3 %v5618_v40  ;;  %v5672_v40 = vld [vmem:[%s6575_s7 + $0xf4] sm:$0xf]  ;;  %v5578_v49 = vor.u32 %v5883_v37, %v5577_v36 }
 0x188   : > { %4130 = vmatpush.bf16.msrb.mxu0 %v5418_v46  ;;  %v5514_v46 = vor.u32 %v5867_v35, %v5513_v33  ;;  %v4742_v51 = vor.u32 %v5672_v40, %v4739_v42  ;;  %v4843_v33 = vld [vmem:[%s6575_s7 + $0x1c8] sm:$0xf0]  ;;  %v5648_v37 = vld [vmem:[%s6575_s7 + $0x34] sm:$0xf] }
 0x189   : > { %4143 = vmatpush.bf16.msrb.mxu1 %v5482_v47  ;;  %v5704_v47 = vld [vmem:[%s6575_s7 + $0x1f4] sm:$0xf]  ;;  %v4846_v40 = vor.u32 %v5698_v32, %v4843_v33  ;;  %v5059_v32 = vld [vmem:[%s6575_s7 + $0x378] sm:$0xf0] }
 0x18a   : > { %4156 = vmatpush.bf16.msrb.mxu2 %v5546_v48  ;;  %v4867_v48 = vld [vmem:[%s6575_s7 + $0x1f8] sm:$0xf0]  ;;  %v5680_v42 = vld [vmem:[%s6575_s7 + $0x134] sm:$0xf] }
 0x18b   : > { %4169 = vmatpush.bf16.msrb.mxu3 %v5610_v52  ;;  %v4806_v52 = vor.u32 %v5688_v43, %v4803_v44  ;;  %v4870_v56 = vor.u32 %v5704_v47, %v4867_v48  ;;  %v4771_v43 = vld [vmem:[%s6575_s7 + $0x138] sm:$0xf0]  ;;  %v5696_v44 = vld [vmem:[%s6575_s7 + $0x1b4] sm:$0xf] }
 0x18c   : > { %4131 = vmatpush.bf16.msrb.mxu0 %v5410_v58  ;;  %v5686_v58 = vld [vmem:[%s6575_s7 + $0x164] sm:$0xf]  ;;  %v4774_v48 = vor.u32 %v5680_v42, %v4771_v43  ;;  %v4923_v42 = vld [vmem:[%s6575_s7 + $0x268] sm:$0xf0] }
 0x18d   : > { %4144 = vmatpush.bf16.msrb.mxu1 %v5474_v59  ;;  %v4795_v59 = vld [vmem:[%s6575_s7 + $0x168] sm:$0xf0]  ;;  %v5734_v43 = vld [vmem:[%s6575_s7 + $0x2e4] sm:$0xf] }
 0x18e   : > { %4157 = vmatpush.bf16.msrb.mxu2 %v5538_v61  ;;  %v2671_v61 = vld [vmem:[#allocation1 + $0x24] sm:$0xff]  ;;  %v4798_v8 = vor.u32 %v5686_v58, %v4795_v59 }
 0x18f   : > { %4170 = vmatpush.bf16.msrb.mxu3 %v5602_v4  ;;  %v2672_v4 = vld [vmem:[#allocation1 + $0x2d] sm:$0xff] }
 0x190   : > { %4132 = vmatpush.bf16.msrb.mxu0 %v5402_v10  ;;  %v4659_v10 = vld [vmem:[%s6575_s7 + $0x58] sm:$0xf0] }
 0x191   : > { %4145 = vmatpush.bf16.msrb.mxu1 %v5466_v11  ;;  %v5668_v11 = vld [vmem:[%s6575_s7 + $0xd4] sm:$0xf]  ;;  %v4662_v18 = vor.u32 %v5652_v9, %v4659_v10  ;;  %v4819_v9 = vld [vmem:[%s6575_s7 + $0x198] sm:$0xf0] }
 0x192   : > { %4158 = vmatpush.bf16.msrb.mxu2 %v5530_v12  ;;  %v4862_v12 = vor.u32 %v5702_v62, %v4859_v63  ;;  %v4726_v19 = vor.u32 %v5668_v11, %v4723_v13  ;;  %v5644_v62 = vld [vmem:[%s6575_s7 + $0x14] sm:$0xf]  ;;  %v4627_v63 = vld [vmem:[%s6575_s7 + $0x18] sm:$0xf0]  ;;  %v5642_v11 = vld [vmem:[%s6575_s7 + $0x4] sm:$0xf] }
 0x193   : > { %4171 = vmatpush.bf16.msrb.mxu3 %v5594_v16  ;;  %v5700_v16 = vld [vmem:[%s6575_s7 + $0x1d4] sm:$0xf]  ;;  %v4630_v10 = vor.u32 %v5644_v62, %v4627_v63  ;;  %v5107_v62 = vld [vmem:[%s6575_s7 + $0x3d8] sm:$0xf0] }
 0x194   : > { %4133 = vmatpush.bf16.msrb.mxu0 %v5394_v25  ;;  %v4651_v25 = vld [vmem:[%s6575_s7 + $0x48] sm:$0xf0]  ;;  %v4854_v28 = vor.u32 %v5700_v16, %v4851_v17  ;;  %v5674_v17 = vld [vmem:[%s6575_s7 + $0x104] sm:$0xf] }
 0x195   : > { %4146 = vmatpush.bf16.msrb.mxu1 %v5458_v29  ;;  %v4715_v29 = vld [vmem:[%s6575_s7 + $0xc8] sm:$0xf0] }
 0x196   : > { %4159 = vmatpush.bf16.msrb.mxu2 %v5522_v30  ;;  %v5682_v30 = vld [vmem:[%s6575_s7 + $0x144] sm:$0xf]  ;;  %v4718_v35 = vor.u32 %v5666_v27, %v4715_v29  ;;  %v4683_v16 = vld [vmem:[%s6575_s7 + $0x88] sm:$0xf0]  ;;  %v4931_v27 = vld [vmem:[%s6575_s7 + $0x278] sm:$0xf0] }
 0x197   : > { %4172 = vmatpush.bf16.msrb.mxu3 %v5586_v34  ;;  %v4654_v34 = vor.u32 %v5650_v24, %v4651_v25  ;;  %v4782_v36 = vor.u32 %v5682_v30, %v4779_v31  ;;  %v4811_v24 = vld [vmem:[%s6575_s7 + $0x188] sm:$0xf0]  ;;  %v5720_v25 = vld [vmem:[%s6575_s7 + $0x274] sm:$0xf]  ;;  %v4995_v30 = vld [vmem:[%s6575_s7 + $0x2f8] sm:$0xf0]  ;;  %v4686_v33 = vor.u32 %v5658_v15, %v4683_v16 }
 0x198   : > { %4134 = vmatpush.bf16.msrb.mxu0 %v5386_v41  ;;  %v4707_v41 = vld [vmem:[%s6575_s7 + $0xb8] sm:$0xf0]  ;;  %v5752_v31 = vld [vmem:[%s6575_s7 + $0x374] sm:$0xf] }
 0x199   : > { %4147 = vmatpush.bf16.msrb.mxu1 %v5450_v45  ;;  %v4835_v45 = vld [vmem:[%s6575_s7 + $0x1b8] sm:$0xf0]  ;;  %v4710_v47 = vor.u32 %v5664_v39, %v4707_v41  ;;  %v5718_v41 = vld [vmem:[%s6575_s7 + $0x264] sm:$0xf]  ;;  %v5728_v15 = vld [vmem:[%s6575_s7 + $0x2b4] sm:$0xf] }
 0x19a   : > { %4160 = vmatpush.bf16.msrb.mxu2 %v5514_v46  ;;  %v4646_v46 = vor.u32 %v5648_v37, %v4643_v38  ;;  %v4934_v38 = vor.u32 %v5720_v25, %v4931_v27 }
 0x19b   : > { %4173 = vmatpush.bf16.msrb.mxu3 %v5578_v49  ;;  %4135 = vmatmul.bf16.vlgmr.msrb.gmra.mxu0 %v2671_v61  ;;  %v5646_v49 = vld [vmem:[%s6575_s7 + $0x24] sm:$0xf]  ;;  %v4766_v61 = vor.u32 %v5678_v54, %v4763_v55  ;;  %v4915_v54 = vld [vmem:[%s6575_s7 + $0x258] sm:$0xf0]  ;;  %v5732_v55 = vld [vmem:[%s6575_s7 + $0x2d4] sm:$0xf] }
 0x19c   : > { %4179 = vmatpush.bf16.msra.mxu0 %v4678_v50  ;;  %4148 = vmatmul.bf16.vlgmr.msrb.gmra.mxu1 %v2672_v4  ;;  %v4635_v50 = vld [vmem:[%s6575_s7 + $0x28] sm:$0xf0] }
 0x19d   : > { %4192 = vmatpush.bf16.msra.mxu1 %v4742_v51  ;;  %4161 = vmatmul.bf16.vlgmr.msrb.gmra.mxu2 %v2673_v3  ;;  %v5662_v51 = vld [vmem:[%s6575_s7 + $0xa4] sm:$0xf]  ;;  %v4638_v58 = vor.u32 %v5646_v49, %v4635_v50  ;;  %v5660_v3 = vld [vmem:[%s6575_s7 + $0x94] sm:$0xf]  ;;  %v5115_v49 = vld [vmem:[%s6575_s7 + $0x3e8] sm:$0xf0]  ;;  %v4926_v50 = vor.u32 %v5718_v41, %v4923_v42 }
 0x19e   : > { %4205 = vmatpush.bf16.msra.mxu2 %v4806_v52  ;;  %4174 = vmatmul.bf16.vlgmr.msrb.gmra.mxu3 %v2674_v5  ;;  %v4838_v52 = vor.u32 %v5696_v44, %v4835_v45  ;;  %v4702_v59 = vor.u32 %v5662_v51, %v4699_v53  ;;  %v4691_v5 = vld [vmem:[%s6575_s7 + $0x98] sm:$0xf0]  ;;  %v4987_v45 = vld [vmem:[%s6575_s7 + $0x2e8] sm:$0xf0]  ;;  %v5716_v53 = vld [vmem:[%s6575_s7 + $0x254] sm:$0xf] }
 0x19f   : > { %4218 = vmatpush.bf16.msra.mxu3 %v4870_v56  ;;  %v5694_v56 = vld [vmem:[%s6575_s7 + $0x1a4] sm:$0xf]  ;;  %v4694_v13 = vor.u32 %v5660_v3, %v4691_v5  ;;  %v4990_v51 = vor.u32 %v5734_v43, %v4987_v45  ;;  %v4918_v63 = vor.u32 %v5716_v53, %v4915_v54  ;;  %v4907_v5 = vld [vmem:[%s6575_s7 + $0x248] sm:$0xf0]  ;;  %v5708_v42 = vld [vmem:[%s6575_s7 + $0x214] sm:$0xf] }
 0x1a0   : > { %4180 = vmatpush.bf16.msra.mxu0 %v4670_v6  ;;  %v4830_v4 = vor.u32 %v5694_v56, %v4827_v57  ;;  %v5676_v6 = vld [vmem:[%s6575_s7 + $0x114] sm:$0xf]  ;;  %v4979_v57 = vld [vmem:[%s6575_s7 + $0x2d8] sm:$0xf0]  ;;  %v5706_v54 = vld [vmem:[%s6575_s7 + $0x204] sm:$0xf] }
 0x1a1   : > { %4193 = vmatpush.bf16.msra.mxu1 %v4734_v7  ;;  %v4755_v7 = vld [vmem:[%s6575_s7 + $0x118] sm:$0xf0]  ;;  %v4982_v3 = vor.u32 %v5732_v55, %v4979_v57  ;;  %v4875_v55 = vld [vmem:[%s6575_s7 + $0x208] sm:$0xf0] }
 0x1a2   : > { %4206 = vmatpush.bf16.msra.mxu2 %v4798_v8  ;;  %v5692_v8 = vld [vmem:[%s6575_s7 + $0x194] sm:$0xf]  ;;  %v4758_v14 = vor.u32 %v5676_v6, %v4755_v7  ;;  %v5730_v6 = vld [vmem:[%s6575_s7 + $0x2c4] sm:$0xf]  ;;  %v4971_v7 = vld [vmem:[%s6575_s7 + $0x2c8] sm:$0xf0] }
 0x1a3   : > { %4219 = vmatpush.bf16.msra.mxu3 %v4862_v12  ;;  %v4619_v12 = vld [vmem:[%s6575_s7 + $0x8] sm:$0xf0]  ;;  %v4883_v43 = vld [vmem:[%s6575_s7 + $0x218] sm:$0xf0] }
 0x1a4   : > { %4181 = vmatpush.bf16.msra.mxu0 %v4662_v18  ;;  %v4822_v18 = vor.u32 %v5692_v8, %v4819_v9  ;;  %v4622_v29 = vor.u32 %v5642_v11, %v4619_v12  ;;  %v5035_v8 = vld [vmem:[%s6575_s7 + $0x348] sm:$0xf0]  ;;  %v5762_v9 = vld [vmem:[%s6575_s7 + $0x3c4] sm:$0xf]  ;;  %v4974_v11 = vor.u32 %v5730_v6, %v4971_v7  ;;  %v4886_v53 = vor.u32 %v5708_v42, %v4883_v43  ;;  %v5187_v7 = vld [vmem:[%s6575_s7 + $0x478] sm:$0xf0] }
 0x1a5   : > { %4194 = vmatpush.bf16.msra.mxu1 %v4726_v19  ;;  %v4747_v19 = vld [vmem:[%s6575_s7 + $0x108] sm:$0xf0]  ;;  %v5796_v42 = vld [vmem:[%s6575_s7 + $0x4d4] sm:$0xf] }
 0x1a6   : > { %4207 = vmatpush.bf16.msra.mxu2 %v4790_v23  ;;  %v5690_v23 = vld [vmem:[%s6575_s7 + $0x184] sm:$0xf] }
 0x1a7   : > { %4220 = vmatpush.bf16.msra.mxu3 %v4854_v28  ;;  %v5736_v28 = vld [vmem:[%s6575_s7 + $0x2f4] sm:$0xf]  ;;  %v4814_v37 = vor.u32 %v5690_v23, %v4811_v24  ;;  %v5091_v24 = vld [vmem:[%s6575_s7 + $0x3b8] sm:$0xf0] }
 0x1a8   : > { %4182 = vmatpush.bf16.msra.mxu0 %v4654_v34  ;;  %v4750_v34 = vor.u32 %v5674_v17, %v4747_v19  ;;  %v4998_v39 = vor.u32 %v5736_v28, %v4995_v30  ;;  %v4963_v17 = vld [vmem:[%s6575_s7 + $0x2b8] sm:$0xf0]  ;;  %v5760_v23 = vld [vmem:[%s6575_s7 + $0x3b4] sm:$0xf]  ;;  %v4891_v30 = vld [vmem:[%s6575_s7 + $0x228] sm:$0xf0] }
 0x1a9   : > { %4195 = vmatpush.bf16.msra.mxu1 %v4718_v35  ;;  %v5768_v35 = vld [vmem:[%s6575_s7 + $0x3f4] sm:$0xf]  ;;  %v5027_v19 = vld [vmem:[%s6575_s7 + $0x338] sm:$0xf0]  ;;  %v4966_v27 = vor.u32 %v5728_v15, %v4963_v17 }
 0x1aa   : > { %4208 = vmatpush.bf16.msra.mxu2 %v4782_v36  ;;  %v5123_v36 = vld [vmem:[%s6575_s7 + $0x3f8] sm:$0xf0]  ;;  %v5832_v15 = vld [vmem:[%s6575_s7 + $0x5f4] sm:$0xf] }
 0x1ab   : > { %4221 = vmatpush.bf16.msra.mxu3 %v4846_v40  ;;  %v5062_v40 = vor.u32 %v5752_v31, %v5059_v32  ;;  %v5126_v44 = vor.u32 %v5768_v35, %v5123_v36  ;;  %v5726_v31 = vld [vmem:[%s6575_s7 + $0x2a4] sm:$0xf]  ;;  %v5094_v32 = vor.u32 %v5760_v23, %v5091_v24  ;;  %v5019_v35 = vld [vmem:[%s6575_s7 + $0x328] sm:$0xf0] }
 0x1ac   : > { %4183 = vmatpush.bf16.msra.mxu0 %v4646_v46  ;;  %v5750_v46 = vld [vmem:[%s6575_s7 + $0x364] sm:$0xf] }
 0x1ad   : > { %4196 = vmatpush.bf16.msra.mxu1 %v4710_v47  ;;  %v5051_v47 = vld [vmem:[%s6575_s7 + $0x368] sm:$0xf0]  ;;  %v5758_v36 = vld [vmem:[%s6575_s7 + $0x3a4] sm:$0xf] }
 0x1ae   : > { %4209 = vmatpush.bf16.msra.mxu2 %v4774_v48  ;;  %v5766_v48 = vld [vmem:[%s6575_s7 + $0x3e4] sm:$0xf] }
 0x1af   : > { %4222 = vmatpush.bf16.msra.mxu3 %v4838_v52  ;;  %v5054_v52 = vor.u32 %v5750_v46, %v5051_v47  ;;  %v5118_v56 = vor.u32 %v5766_v48, %v5115_v49  ;;  %v4947_v47 = vld [vmem:[%s6575_s7 + $0x298] sm:$0xf0]  ;;  %v5740_v48 = vld [vmem:[%s6575_s7 + $0x314] sm:$0xf] }
 0x1b0   : > { %4184 = vmatpush.bf16.msra.mxu0 %v4638_v58  ;;  %v5748_v58 = vld [vmem:[%s6575_s7 + $0x354] sm:$0xf]  ;;  %v5011_v49 = vld [vmem:[%s6575_s7 + $0x318] sm:$0xf0] }
 0x1b1   : > { %4197 = vmatpush.bf16.msra.mxu1 %v4702_v59  ;;  %v5043_v59 = vld [vmem:[%s6575_s7 + $0x358] sm:$0xf0]  ;;  %v5014_v57 = vor.u32 %v5740_v48, %v5011_v49 }
 0x1b2   : > { %4210 = vmatpush.bf16.msra.mxu2 %v4766_v61  ;;  %v5764_v61 = vld [vmem:[%s6575_s7 + $0x3d4] sm:$0xf]  ;;  %v5363_v48 = vld [vmem:[%s6575_s7 + $0x5d8] sm:$0xf0] }
 0x1b3   : > { %4223 = vmatpush.bf16.msra.mxu3 %v4830_v4  ;;  %v5046_v4 = vor.u32 %v5748_v58, %v5043_v59  ;;  %v5722_v58 = vld [vmem:[%s6575_s7 + $0x284] sm:$0xf]  ;;  %v4939_v59 = vld [vmem:[%s6575_s7 + $0x288] sm:$0xf0] }
 0x1b4   : > { %4185 = vmatpush.bf16.msra.mxu0 %v4630_v10 }
 0x1b5   : > { %4198 = vmatpush.bf16.msra.mxu1 %v4694_v13  ;;  %v5712_v13 = vld [vmem:[%s6575_s7 + $0x234] sm:$0xf] }
 0x1b6   : > { %4211 = vmatpush.bf16.msra.mxu2 %v4758_v14  ;;  %v4899_v14 = vld [vmem:[%s6575_s7 + $0x238] sm:$0xf0] }
 0x1b7   : > { %4224 = vmatpush.bf16.msra.mxu3 %v4822_v18  ;;  %v5744_v18 = vld [vmem:[%s6575_s7 + $0x334] sm:$0xf]  ;;  %v4902_v25 = vor.u32 %v5712_v13, %v4899_v14  ;;  %v4942_v13 = vor.u32 %v5722_v58, %v4939_v59 }
 0x1b8   : > { %4186 = vmatpush.bf16.msra.mxu0 %v4622_v29  ;;  %v5030_v28 = vor.u32 %v5744_v18, %v5027_v19  ;;  %v5710_v29 = vld [vmem:[%s6575_s7 + $0x224] sm:$0xf] }
 0x1b9   : > { %4199 = vmatpush.bf16.msra.mxu1 %v4686_v33  ;;  %v4955_v33 = vld [vmem:[%s6575_s7 + $0x2a8] sm:$0xf0] }
 0x1ba   : > { %4212 = vmatpush.bf16.msra.mxu2 %v4750_v34  ;;  %v5742_v34 = vld [vmem:[%s6575_s7 + $0x324] sm:$0xf] }
 0x1bb   : > { %4225 = vmatpush.bf16.msra.mxu3 %v4814_v37  ;;  %4187 = vmatmul.bf16.vlgmr.msra.gmra.mxu0 %v6682_v21  ;;  %v5110_v21 = vor.u32 %v5764_v61, %v5107_v62  ;;  %v5083_v37 = vld [vmem:[%s6575_s7 + $0x3a8] sm:$0xf0]  ;;  %v5022_v41 = vor.u32 %v5742_v34, %v5019_v35  ;;  %v5738_v61 = vld [vmem:[%s6575_s7 + $0x304] sm:$0xf] }
 0x1bc   : > { %4231 = vmatpush.bf16.msrb.mxu0 %v4934_v38  ;;  %4200 = vmatmul.bf16.vlgmr.msra.gmra.mxu1 %v6689_v26  ;;  %v5099_v26 = vld [vmem:[%s6575_s7 + $0x3c8] sm:$0xf0]  ;;  %v4894_v38 = vor.u32 %v5710_v29, %v4891_v30  ;;  %v5086_v46 = vor.u32 %v5758_v36, %v5083_v37 }
 0x1bd   : > { %4244 = vmatpush.bf16.msrb.mxu1 %v4998_v39  ;;  %4213 = vmatmul.bf16.vlgmr.msra.gmra.mxu2 %v6680_v20  ;;  %v5714_v20 = vld [vmem:[%s6575_s7 + $0x244] sm:$0xf]  ;;  %v5102_v16 = vor.u32 %v5762_v9, %v5099_v26  ;;  %v3980_v39 = vpop.f32.mrf.mxu0  ;;  %v5251_v9 = vld [vmem:[%s6575_s7 + $0x4f8] sm:$0xf0]  ;;  %v5816_v26 = vld [vmem:[%s6575_s7 + $0x574] sm:$0xf] }
 0x1be   : > { %4257 = vmatpush.bf16.msrb.mxu2 %v5062_v40  ;;  %4226 = vmatmul.bf16.vlgmr.msra.gmra.mxu3 %v6684_v22  ;;  %v5746_v22 = vld [vmem:[%s6575_s7 + $0x344] sm:$0xf]  ;;  %v4910_v10 = vor.u32 %v5714_v20, %v4907_v5  ;;  %v4958_v40 = vor.u32 %v5726_v31, %v4955_v33  ;;  %v5067_v20 = vld [vmem:[%s6575_s7 + $0x388] sm:$0xf0] }
 0x1bf   : > { %4270 = vmatpush.bf16.msrb.mxu3 %v5126_v44  ;;  %v5038_v12 = vor.u32 %v5746_v22, %v5035_v8  ;;  %v5724_v44 = vld [vmem:[%s6575_s7 + $0x294] sm:$0xf]  ;;  %v3993_v45 = vpop.f32.mrf.mxu1  ;;  %v4878_v8 = vor.u32 %v5706_v54, %v4875_v55  ;;  %v5243_v30 = vld [vmem:[%s6575_s7 + $0x4e8] sm:$0xf0]  ;;  %v5814_v31 = vld [vmem:[%s6575_s7 + $0x564] sm:$0xf] }
 0x1c0   : > { %4232 = vmatpush.bf16.msrb.mxu0 %v4926_v50  ;;  %v3994_v50 = vadd.f32 %v3993_v45, %v3980_v39  ;;  %v5800_v22 = vld [vmem:[%s6575_s7 + $0x4f4] sm:$0xf]  ;;  %v5830_v33 = vld [vmem:[%s6575_s7 + $0x5e4] sm:$0xf]  ;;  %v5371_v34 = vld [vmem:[%s6575_s7 + $0x5e8] sm:$0xf0] }
 0x1c1   : > { %4245 = vmatpush.bf16.msrb.mxu1 %v4990_v51  ;;  %v5756_v51 = vld [vmem:[%s6575_s7 + $0x394] sm:$0xf]  ;;  %v5254_v23 = vor.u32 %v5800_v22, %v5251_v9  ;;  %v5374_v43 = vor.u32 %v5830_v33, %v5371_v34  ;;  %v5810_v54 = vld [vmem:[%s6575_s7 + $0x544] sm:$0xf]  ;;  %v5291_v55 = vld [vmem:[%s6575_s7 + $0x548] sm:$0xf0] }
 0x1c2   : > { %4258 = vmatpush.bf16.msrb.mxu2 %v5054_v52  ;;  %v5075_v52 = vld [vmem:[%s6575_s7 + $0x398] sm:$0xf0]  ;;  %v4006_v62 = vpop.f32.mrf.mxu2  ;;  %v5812_v45 = vld [vmem:[%s6575_s7 + $0x554] sm:$0xf] }
 0x1c3   : > { %4271 = vmatpush.bf16.msrb.mxu3 %v5118_v56  ;;  %v4950_v56 = vor.u32 %v5724_v44, %v4947_v47  ;;  %v4007_v5 = vadd.f32 %v4006_v62, %v3994_v50  ;;  %v4019_v6 = vpop.f32.mrf.mxu3  ;;  %v5235_v44 = vld [vmem:[%s6575_s7 + $0x4d8] sm:$0xf0]  ;;  %v5828_v47 = vld [vmem:[%s6575_s7 + $0x5d4] sm:$0xf] }
 0x1c4   : > { %4233 = vmatpush.bf16.msrb.mxu0 %v4918_v63  ;;  %v5078_v63 = vor.u32 %v5756_v51, %v5075_v52  ;;  %v5778_v51 = vld [vmem:[%s6575_s7 + $0x444] sm:$0xf]  ;;  %v5163_v52 = vld [vmem:[%s6575_s7 + $0x448] sm:$0xf0]  ;;  %v5776_v62 = vld [vmem:[%s6575_s7 + $0x434] sm:$0xf] }
 0x1c5   : > { %4246 = vmatpush.bf16.msrb.mxu1 %v4982_v3  ;;  %v5003_v3 = vld [vmem:[%s6575_s7 + $0x308] sm:$0xf0]  ;;  %v5824_v22 = vld [vmem:[%s6575_s7 + $0x5b4] sm:$0xf]  ;;  %v5139_v34 = vld [vmem:[%s6575_s7 + $0x418] sm:$0xf0] }
 0x1c6   : > { %4259 = vmatpush.bf16.msrb.mxu2 %v5046_v4  ;;  %v5754_v4 = vld [vmem:[%s6575_s7 + $0x384] sm:$0xf]  ;;  %v5006_v14 = vor.u32 %v5738_v61, %v5003_v3  ;;  %v5294_v61 = vor.u32 %v5810_v54, %v5291_v55  ;;  %v5792_v3 = vld [vmem:[%s6575_s7 + $0x4b4] sm:$0xf]  ;;  %v5443_v55 = vld [vmem:[%s6575_s7 + $0x678] sm:$0xf0] }
 0x1c7   : > { %4272 = vmatpush.bf16.msrb.mxu3 %v5110_v21  ;;  %v5784_v21 = vld [vmem:[%s6575_s7 + $0x474] sm:$0xf]  ;;  %v3995_v17 = vpop.f32.mrf.mxu1  ;;  %v5070_v18 = vor.u32 %v5754_v4, %v5067_v20 }
 0x1c8   : > { %4234 = vmatpush.bf16.msrb.mxu0 %v4910_v10  ;;  %v5315_v10 = vld [vmem:[%s6575_s7 + $0x578] sm:$0xf0]  ;;  %v5190_v19 = vor.u32 %v5784_v21, %v5187_v7  ;;  %v5808_v21 = vld [vmem:[%s6575_s7 + $0x534] sm:$0xf]  ;;  %v5211_v17 = vld [vmem:[%s6575_s7 + $0x4a8] sm:$0xf0] }
 0x1c9   : > { %4247 = vmatpush.bf16.msrb.mxu1 %v4974_v11  ;;  %v7001_v11 = vadd.f32 %v4019_v6, %v4007_v5  ;;  %v5318_v24 = vor.u32 %v5816_v26, %v5315_v10  ;;  %v5219_v6 = vld [vmem:[%s6575_s7 + $0x4b8] sm:$0xf0]  ;;  %v5772_v33 = vld [vmem:[%s6575_s7 + $0x414] sm:$0xf] }
 0x1ca   : > { %4260 = vmatpush.bf16.msrb.mxu2 %v5038_v12  ;;  %v3982_v12 = vpop.f32.mrf.mxu0  ;;  %v4008_v35 = vpop.f32.mrf.mxu2  ;;  %v5283_v7 = vld [vmem:[%s6575_s7 + $0x538] sm:$0xf0]  ;;  %v5222_v10 = vor.u32 %v5792_v3, %v5219_v6  ;;  %v5848_v54 = vld [vmem:[%s6575_s7 + $0x674] sm:$0xf] }
 0x1cb   : > { %4273 = vmatpush.bf16.msrb.mxu3 %v5102_v16  ;;  %v5379_v16 = vld [vmem:[%s6575_s7 + $0x5f8] sm:$0xf0]  ;;  %v4021_v37 = vpop.f32.mrf.mxu3  ;;  %v5774_v12 = vld [vmem:[%s6575_s7 + $0x424] sm:$0xf]  ;;  %v5788_v35 = vld [vmem:[%s6575_s7 + $0x494] sm:$0xf] }
 0x1cc   : > { %4235 = vmatpush.bf16.msrb.mxu0 %v4902_v25  ;;  %v5782_v25 = vld [vmem:[%s6575_s7 + $0x464] sm:$0xf]  ;;  %v5382_v29 = vor.u32 %v5832_v15, %v5379_v16  ;;  %v5635_v3 = vld [vmem:[%s6575_s7 + $0x7f8] sm:$0xf0] }
 0x1cd   : > { %4248 = vmatpush.bf16.msrb.mxu1 %v4966_v27  ;;  %v5179_v27 = vld [vmem:[%s6575_s7 + $0x468] sm:$0xf0] }
 0x1ce   : > { %4261 = vmatpush.bf16.msrb.mxu2 %v5030_v28  ;;  %v5798_v28 = vld [vmem:[%s6575_s7 + $0x4e4] sm:$0xf]  ;;  %v5182_v36 = vor.u32 %v5782_v25, %v5179_v27  ;;  %v5339_v27 = vld [vmem:[%s6575_s7 + $0x5a8] sm:$0xf0] }
 0x1cf   : > { %4274 = vmatpush.bf16.msrb.mxu3 %v5094_v32  ;;  %v5307_v32 = vld [vmem:[%s6575_s7 + $0x568] sm:$0xf0]  ;;  %v5822_v25 = vld [vmem:[%s6575_s7 + $0x5a4] sm:$0xf] }
 0x1d0   : > { %4236 = vmatpush.bf16.msrb.mxu0 %v4894_v38  ;;  %v5246_v38 = vor.u32 %v5798_v28, %v5243_v30  ;;  %v5310_v39 = vor.u32 %v5814_v31, %v5307_v32  ;;  %v5342_v37 = vor.u32 %v5822_v25, %v5339_v27  ;;  %v5876_v25 = vld [vmem:[%s6575_s7 + $0x754] sm:$0xf]  ;;  %v5555_v27 = vld [vmem:[%s6575_s7 + $0x758] sm:$0xf0] }
 0x1d1   : > { %4249 = vmatpush.bf16.msrb.mxu1 %v4958_v40  ;;  %v5780_v40 = vld [vmem:[%s6575_s7 + $0x454] sm:$0xf] }
 0x1d2   : > { %4262 = vmatpush.bf16.msrb.mxu2 %v5022_v41  ;;  %v5171_v41 = vld [vmem:[%s6575_s7 + $0x458] sm:$0xf0] }
 0x1d3   : > { %4275 = vmatpush.bf16.msrb.mxu3 %v5086_v46  ;;  %v5299_v46 = vld [vmem:[%s6575_s7 + $0x558] sm:$0xf0]  ;;  %v5174_v49 = vor.u32 %v5780_v40, %v5171_v41  ;;  %v5820_v41 = vld [vmem:[%s6575_s7 + $0x594] sm:$0xf] }
 0x1d4   : > { %4237 = vmatpush.bf16.msrb.mxu0 %v4886_v53  ;;  %v5302_v50 = vor.u32 %v5812_v45, %v5299_v46  ;;  %v5227_v53 = vld [vmem:[%s6575_s7 + $0x4c8] sm:$0xf0]  ;;  %v5267_v40 = vld [vmem:[%s6575_s7 + $0x518] sm:$0xf0] }
 0x1d5   : > { %4250 = vmatpush.bf16.msrb.mxu1 %v4950_v56  ;;  %v5826_v56 = vld [vmem:[%s6575_s7 + $0x5c4] sm:$0xf]  ;;  %v5131_v45 = vld [vmem:[%s6575_s7 + $0x408] sm:$0xf0] }
 0x1d6   : > { %4263 = vmatpush.bf16.msrb.mxu2 %v5014_v57  ;;  %v5355_v57 = vld [vmem:[%s6575_s7 + $0x5c8] sm:$0xf0] }
 0x1d7   : > { %4276 = vmatpush.bf16.msrb.mxu3 %v5078_v63  ;;  %v5155_v63 = vld [vmem:[%s6575_s7 + $0x438] sm:$0xf0]  ;;  %v5358_v5 = vor.u32 %v5826_v56, %v5355_v57  ;;  %v5864_v56 = vld [vmem:[%s6575_s7 + $0x6f4] sm:$0xf] }
 0x1d8   : > { %4238 = vmatpush.bf16.msrb.mxu0 %v4878_v8  ;;  %v4032_v58 = vpop.f32.mrf.mxu0  ;;  %v5347_v8 = vld [vmem:[%s6575_s7 + $0x5b8] sm:$0xf0]  ;;  %v5158_v26 = vor.u32 %v5776_v62, %v5155_v63  ;;  %v5896_v63 = vld [vmem:[%s6575_s7 + $0x7f4] sm:$0xf] }
 0x1d9   : > { %4251 = vmatpush.bf16.msrb.mxu1 %v4942_v13  ;;  %v4033_v4 = vadd.f32 %v4032_v58, %v7001_v11  ;;  %v4045_v20 = vpop.f32.mrf.mxu1  ;;  %v5286_v11 = vor.u32 %v5808_v21, %v5283_v7  ;;  %v5147_v13 = vld [vmem:[%s6575_s7 + $0x428] sm:$0xf0]  ;;  %v5350_v16 = vor.u32 %v5824_v22, %v5347_v8  ;;  %v5880_v58 = vld [vmem:[%s6575_s7 + $0x774] sm:$0xf]  ;;  %v5846_v21 = vld [vmem:[%s6575_s7 + $0x664] sm:$0xf]  ;;  %v5638_v8 = vor.u32 %v5896_v63, %v5635_v3 }
 0x1da   : > { %4264 = vmatpush.bf16.msrb.mxu2 %v5006_v14  ;;  %v5790_v14 = vld [vmem:[%s6575_s7 + $0x4a4] sm:$0xf]  ;;  %v5150_v28 = vor.u32 %v5774_v12, %v5147_v13  ;;  %v5435_v7 = vld [vmem:[%s6575_s7 + $0x668] sm:$0xf0] }
 0x1db   : > { %4277 = vmatpush.bf16.msrb.mxu3 %v5070_v18  ;;  %4239 = vmatmul.bf16.vlgmr.msrb.gmra.mxu0 %v6723_v0  ;;  %v5794_v0 = vld [vmem:[%s6575_s7 + $0x4c4] sm:$0xf]  ;;  %v4046_v9 = vadd.f32 %v4045_v20, %v4033_v4  ;;  %v5214_v31 = vor.u32 %v5790_v14, %v5211_v17  ;;  %v5446_v20 = vor.u32 %v5848_v54, %v5443_v55  ;;  %v5627_v12 = vld [vmem:[%s6575_s7 + $0x7e8] sm:$0xf0]  ;;  %v5427_v17 = vld [vmem:[%s6575_s7 + $0x658] sm:$0xf0] }
 0x1dc   : > { %4283 = vmatpush.bf16.msra.mxu0 %v5190_v19  ;;  %4252 = vmatmul.bf16.vlgmr.msrb.gmra.mxu1 %v6727_v2  ;;  %v5166_v2 = vor.u32 %v5778_v51, %v5163_v52  ;;  %v5230_v59 = vor.u32 %v5794_v0, %v5227_v53  ;;  %v5806_v18 = vld [vmem:[%s6575_s7 + $0x524] sm:$0xf]  ;;  %v5275_v19 = vld [vmem:[%s6575_s7 + $0x528] sm:$0xf0]  ;;  %v5438_v13 = vor.u32 %v5846_v21, %v5435_v7  ;;  %v5475_v54 = vld [vmem:[%s6575_s7 + $0x6b8] sm:$0xf0] }
 0x1dd   : > { %4296 = vmatpush.bf16.msra.mxu1 %v5254_v23  ;;  %4265 = vmatmul.bf16.vlgmr.msrb.gmra.mxu2 %v6718_v60  ;;  %v5238_v60 = vor.u32 %v5796_v42, %v5235_v44  ;;  %v5278_v32 = vor.u32 %v5806_v18, %v5275_v19  ;;  %v5331_v42 = vld [vmem:[%s6575_s7 + $0x598] sm:$0xf0]  ;;  %v5770_v44 = vld [vmem:[%s6575_s7 + $0x404] sm:$0xf]  ;;  %v5259_v52 = vld [vmem:[%s6575_s7 + $0x508] sm:$0xf0] }
 0x1de   : > { %4309 = vmatpush.bf16.msra.mxu2 %v5318_v24  ;;  %4278 = vmatmul.bf16.vlgmr.msrb.gmra.mxu3 %v6725_v1  ;;  %v5366_v1 = vor.u32 %v5828_v47, %v5363_v48  ;;  %v5786_v48 = vld [vmem:[%s6575_s7 + $0x484] sm:$0xf]  ;;  %v5334_v51 = vor.u32 %v5820_v41, %v5331_v42  ;;  %v5134_v57 = vor.u32 %v5770_v44, %v5131_v45  ;;  %v5860_v18 = vld [vmem:[%s6575_s7 + $0x6d4] sm:$0xf]  ;;  %v5483_v41 = vld [vmem:[%s6575_s7 + $0x6c8] sm:$0xf0] }
 0x1df   : > { %4322 = vmatpush.bf16.msra.mxu3 %v5382_v29  ;;  %v5818_v0 = vld [vmem:[%s6575_s7 + $0x584] sm:$0xf]  ;;  %v5939_v19 = vld [vmem:[#allocation1] sm:$0xff] }
 0x1e0   : > { %4284 = vmatpush.bf16.msra.mxu0 %v5182_v36  ;;  %v4058_v15 = vpop.f32.mrf.mxu2  ;;  %v4034_v30 = vpop.f32.mrf.mxu0  ;;  %v5862_v22 = vld [vmem:[%s6575_s7 + $0x6e4] sm:$0xf]  ;;  %v5872_v55 = vld [vmem:[%s6575_s7 + $0x734] sm:$0xf] }
 0x1e1   : > { %4297 = vmatpush.bf16.msra.mxu1 %v5246_v38  ;;  %v4059_v23 = vadd.f32 %v4058_v15, %v4046_v9  ;;  %v4071_v24 = vpop.f32.mrf.mxu3  ;;  %v4047_v36 = vpop.f32.mrf.mxu1  ;;  %v5203_v38 = vld [vmem:[%s6575_s7 + $0x498] sm:$0xf0]  ;;  %v5499_v9 = vld [vmem:[%s6575_s7 + $0x6e8] sm:$0xf0]  ;;  %v5874_v42 = vld [vmem:[%s6575_s7 + $0x744] sm:$0xf] }
 0x1e2   : > { %4310 = vmatpush.bf16.msra.mxu2 %v5310_v39  ;;  %v5804_v39 = vld [vmem:[%s6575_s7 + $0x514] sm:$0xf]  ;;  %v5206_v46 = vor.u32 %v5788_v35, %v5203_v38  ;;  %v5502_v14 = vor.u32 %v5862_v22, %v5499_v9  ;;  %v5941_v30 = vld [vmem:[#allocation1 + $0x9] sm:$0xff]  ;;  %v5558_v36 = vor.u32 %v5876_v25, %v5555_v27  ;;  %v5419_v38 = vld [vmem:[%s6575_s7 + $0x648] sm:$0xf0] }
 0x1e3   : > { %4323 = vmatpush.bf16.msra.mxu3 %v5374_v43  ;;  %v7050_v29 = vadd.f32 %v4071_v24, %v4059_v23  ;;  %v5142_v43 = vor.u32 %v5772_v33, %v5139_v34  ;;  %v5270_v47 = vor.u32 %v5804_v39, %v5267_v40  ;;  %v5491_v24 = vld [vmem:[%s6575_s7 + $0x6d8] sm:$0xf0]  ;;  %v5942_v33 = vld [vmem:[#allocation1 + $0x1b] sm:$0xff]  ;;  %v5858_v39 = vld [vmem:[%s6575_s7 + $0x6c4] sm:$0xf] }
 0x1e4   : > { %4285 = vmatpush.bf16.msra.mxu0 %v5174_v49  ;;  %v5195_v49 = vld [vmem:[%s6575_s7 + $0x488] sm:$0xf0]  ;;  %v5494_v35 = vor.u32 %v5860_v18, %v5491_v24  ;;  %v5890_v45 = vld [vmem:[%s6575_s7 + $0x7c4] sm:$0xf]  ;;  %v5459_v18 = vld [vmem:[%s6575_s7 + $0x698] sm:$0xf0] }
 0x1e5   : > { %4298 = vmatpush.bf16.msra.mxu1 %v5238_v60  ;;  %v5802_v60 = vld [vmem:[%s6575_s7 + $0x504] sm:$0xf]  ;;  %v5884_v24 = vld [vmem:[%s6575_s7 + $0x794] sm:$0xf]  ;;  %v5587_v25 = vld [vmem:[%s6575_s7 + $0x798] sm:$0xf0] }
 0x1e6   : > { %4311 = vmatpush.bf16.msra.mxu2 %v5302_v50  ;;  %v5262_v62 = vor.u32 %v5802_v60, %v5259_v52  ;;  %v5486_v60 = vor.u32 %v5858_v39, %v5483_v41  ;;  %v5411_v52 = vld [vmem:[%s6575_s7 + $0x638] sm:$0xf0]  ;;  %v5854_v63 = vld [vmem:[%s6575_s7 + $0x6a4] sm:$0xf] }
 0x1e7   : > { %4324 = vmatpush.bf16.msra.mxu3 %v5366_v1  ;;  %v5323_v1 = vld [vmem:[%s6575_s7 + $0x588] sm:$0xf0]  ;;  %v5886_v22 = vld [vmem:[%s6575_s7 + $0x7a4] sm:$0xf] }
 0x1e8   : > { %4286 = vmatpush.bf16.msra.mxu0 %v5166_v2  ;;  %v4060_v50 = vpop.f32.mrf.mxu2  ;;  %v5507_v2 = vld [vmem:[%s6575_s7 + $0x6f8] sm:$0xf0]  ;;  %v5326_v4 = vor.u32 %v5818_v0, %v5323_v1  ;;  %v5856_v0 = vld [vmem:[%s6575_s7 + $0x6b4] sm:$0xf]  ;;  %v5882_v39 = vld [vmem:[%s6575_s7 + $0x784] sm:$0xf] }
 0x1e9   : > { %4299 = vmatpush.bf16.msra.mxu1 %v5230_v59  ;;  %v4073_v53 = vpop.f32.mrf.mxu3  ;;  %v5571_v59 = vld [vmem:[%s6575_s7 + $0x778] sm:$0xf0] }
 0x1ea   : > { %4312 = vmatpush.bf16.msra.mxu2 %v5294_v61  ;;  %v5198_v61 = vor.u32 %v5786_v48, %v5195_v49  ;;  %v5574_v6 = vor.u32 %v5880_v58, %v5571_v59  ;;  %v5478_v58 = vor.u32 %v5856_v0, %v5475_v54 }
 0x1eb   : > { %4325 = vmatpush.bf16.msra.mxu3 %v5358_v5  ;;  %v5510_v5 = vor.u32 %v5864_v56, %v5507_v2  ;;  %v5888_v56 = vld [vmem:[%s6575_s7 + $0x7b4] sm:$0xf] }
 0x1ec   : > { %4287 = vmatpush.bf16.msra.mxu0 %v5158_v26  ;;  %v5878_v26 = vld [vmem:[%s6575_s7 + $0x764] sm:$0xf] }
 0x1ed   : > { %4300 = vmatpush.bf16.msra.mxu1 %v5222_v10  ;;  %v5563_v10 = vld [vmem:[%s6575_s7 + $0x768] sm:$0xf0] }
 0x1ee   : > { %4313 = vmatpush.bf16.msra.mxu2 %v5286_v11  ;;  %v5894_v11 = vld [vmem:[%s6575_s7 + $0x7e4] sm:$0xf]  ;;  %v5566_v15 = vor.u32 %v5878_v26, %v5563_v10 }
 0x1ef   : > { %4326 = vmatpush.bf16.msra.mxu3 %v5350_v16  ;;  %v5844_v16 = vld [vmem:[%s6575_s7 + $0x654] sm:$0xf]  ;;  %v5630_v23 = vor.u32 %v5894_v11, %v5627_v12 }
 0x1f0   : > { %4288 = vmatpush.bf16.msra.mxu0 %v5150_v28  ;;  %v5940_v28 = vld [vmem:[#allocation1 + $0x12] sm:$0xff]  ;;  %v5430_v34 = vor.u32 %v5844_v16, %v5427_v17  ;;  %v5852_v16 = vld [vmem:[%s6575_s7 + $0x694] sm:$0xf] }
 0x1f1   : > { %4301 = vmatpush.bf16.msra.mxu1 %v5214_v31  ;;  %v5892_v31 = vld [vmem:[%s6575_s7 + $0x7d4] sm:$0xf] }
 0x1f2   : > { %4314 = vmatpush.bf16.msra.mxu2 %v5278_v32  ;;  %v5619_v32 = vld [vmem:[%s6575_s7 + $0x7d8] sm:$0xf0] }
 0x1f3   : > { %4327 = vmatpush.bf16.msra.mxu3 %v5342_v37  ;;  %v5842_v37 = vld [vmem:[%s6575_s7 + $0x644] sm:$0xf]  ;;  %v5622_v40 = vor.u32 %v5892_v31, %v5619_v32  ;;  %v5387_v32 = vld [vmem:[%s6575_s7 + $0x608] sm:$0xf0] }
 0x1f4   : > { %4289 = vmatpush.bf16.msra.mxu0 %v5142_v43  ;;  %v5547_v43 = vld [vmem:[%s6575_s7 + $0x748] sm:$0xf0]  ;;  %v5422_v48 = vor.u32 %v5842_v37, %v5419_v38  ;;  %v5834_v31 = vld [vmem:[%s6575_s7 + $0x604] sm:$0xf] }
 0x1f5   : > { %4302 = vmatpush.bf16.msra.mxu1 %v5206_v46  ;;  %v5611_v46 = vld [vmem:[%s6575_s7 + $0x7c8] sm:$0xf0]  ;;  %v5550_v50 = vor.u32 %v5874_v42, %v5547_v43  ;;  %v5390_v42 = vor.u32 %v5834_v31, %v5387_v32  ;;  %v4420_v32 = vld [vmem:[%s7139_s21 + $0x60] sm:$0xff] }
 0x1f6   : > { %4315 = vmatpush.bf16.msra.mxu2 %v5270_v47  ;;  %v5614_v1 = vor.u32 %v5890_v45, %v5611_v46  ;;  %v5515_v37 = vld [vmem:[%s6575_s7 + $0x708] sm:$0xf0]  ;;  %v5943_v46 = vld [vmem:[#allocation1 + $0x24] sm:$0xff] }
 0x1f7   : > { %4328 = vmatpush.bf16.msra.mxu3 %v5334_v51  ;;  %v5840_v51 = vld [vmem:[%s6575_s7 + $0x634] sm:$0xf] }
 0x1f8   : > { %4290 = vmatpush.bf16.msra.mxu0 %v5134_v57  ;;  %v4084_v44 = vpop.f32.mrf.mxu0  ;;  %v5603_v57 = vld [vmem:[%s6575_s7 + $0x7b8] sm:$0xf0]  ;;  %v5414_v2 = vor.u32 %v5840_v51, %v5411_v52 }
 0x1f9   : > { %4303 = vmatpush.bf16.msra.mxu1 %v5198_v61  ;;  %v4085_v47 = vadd.f32 %v4084_v44, %v7050_v29  ;;  %v4097_v49 = vpop.f32.mrf.mxu1  ;;  %v5539_v29 = vld [vmem:[%s6575_s7 + $0x738] sm:$0xf0]  ;;  %v5838_v61 = vld [vmem:[%s6575_s7 + $0x624] sm:$0xf]  ;;  %v5606_v3 = vor.u32 %v5888_v56, %v5603_v57 }
 0x1fa   : > { %4316 = vmatpush.bf16.msra.mxu2 %v5262_v62  ;;  %v5542_v59 = vor.u32 %v5872_v55, %v5539_v29  ;;  %v5403_v62 = vld [vmem:[%s6575_s7 + $0x628] sm:$0xf0] }
 0x1fb   : > { %4329 = vmatpush.bf16.msra.mxu3 %v5326_v4  ;;  %4291 = vmatmul.bf16.vlgmr.msra.gmra.mxu0 %v5939_v19  ;;  %v4098_v53 = vadd.f32 %v4097_v49, %v4085_v47  ;;  %v5406_v26 = vor.u32 %v5838_v61, %v5403_v62  ;;  %v5868_v19 = vld [vmem:[%s6575_s7 + $0x714] sm:$0xf]  ;;  %v5944_v47 = vld [vmem:[#allocation1 + $0x2d] sm:$0xff] }
 0x1fc   : > { %4335 = vmatpush.bf16.msrb.mxu0 %v5446_v20  ;;  %4304 = vmatmul.bf16.vlgmr.msra.gmra.mxu1 %v5941_v30  ;;  %v5467_v20 = vld [vmem:[%s6575_s7 + $0x6a8] sm:$0xf0]  ;;  %v5946_v49 = vld [vmem:[#allocation1 + $0x3f] sm:$0xff] }
 0x1fd   : > { %4348 = vmatpush.bf16.msrb.mxu1 %v5510_v5  ;;  %4317 = vmatmul.bf16.vlgmr.msra.gmra.mxu2 %v5940_v28  ;;  %v5870_v5 = vld [vmem:[%s6575_s7 + $0x724] sm:$0xf]  ;;  %v5470_v12 = vor.u32 %v5854_v63, %v5467_v20  ;;  %v5462_v28 = vor.u32 %v5852_v16, %v5459_v18 }
 0x1fe   : > { %4361 = vmatpush.bf16.msrb.mxu2 %v5574_v6  ;;  %4330 = vmatmul.bf16.vlgmr.msra.gmra.mxu3 %v5942_v33  ;;  %v5531_v6 = vld [vmem:[%s6575_s7 + $0x728] sm:$0xf0]  ;;  %v5850_v33 = vld [vmem:[%s6575_s7 + $0x684] sm:$0xf] }
 0x1ff   : > { %4374 = vmatpush.bf16.msrb.mxu3 %v5638_v8  ;;  %v5595_v8 = vld [vmem:[%s6575_s7 + $0x7a8] sm:$0xf0]  ;;  %v4422_v18 = vld [vmem:[%s7139_s21 + $0x70] sm:$0xff] }
 0x200   : > { %4336 = vmatpush.bf16.msrb.mxu0 %v5438_v13  ;;  %v4110_v4 = vpop.f32.mrf.mxu2  ;;  %v4086_v9 = vpop.f32.mrf.mxu0  ;;  %v5534_v13 = vor.u32 %v5870_v5, %v5531_v6  ;;  %v5598_v17 = vor.u32 %v5886_v22, %v5595_v8 }
 0x201   : > { %4349 = vmatpush.bf16.msrb.mxu1 %v5502_v14  ;;  %v4111_v21 = vadd.f32 %v4110_v4, %v4098_v53  ;;  %v4123_v7 = vpop.f32.mrf.mxu3  ;;  %v4099_v10 = vpop.f32.mrf.mxu1  ;;  %v5836_v14 = vld [vmem:[%s6575_s7 + $0x614] sm:$0xf] }
 0x202   : > { %4362 = vmatpush.bf16.msrb.mxu2 %v5566_v15  ;;  %v5395_v15 = vld [vmem:[%s6575_s7 + $0x618] sm:$0xf0] }
 0x203   : > { %4375 = vmatpush.bf16.msrb.mxu3 %v5630_v23  ;;  %v4124_v11 = vadd.f32 %v4123_v7, %v4111_v21  ;;  %v5523_v23 = vld [vmem:[%s6575_s7 + $0x718] sm:$0xf0]  ;;  %v5398_v27 = vor.u32 %v5836_v14, %v5395_v15  ;;  %v4439_v14 = vld [vmem:[%s7139_s21 + $0xf8] sm:$0xff] }
 0x204   : > { %4337 = vmatpush.bf16.msrb.mxu0 %v5430_v34  ;;  %v5526_v30 = vor.u32 %v5868_v19, %v5523_v23  ;;  %v5590_v34 = vor.u32 %v5884_v24, %v5587_v25  ;;  %v4438_v19 = vld [vmem:[%s7139_s21 + $0xf0] sm:$0xff]  ;;  %v4421_v24 = vld [vmem:[%s7139_s21 + $0x68] sm:$0xff] }
 0x205   : > { %4350 = vmatpush.bf16.msrb.mxu1 %v5494_v35  ;;  %v5451_v35 = vld [vmem:[%s6575_s7 + $0x688] sm:$0xf0]  ;;  %v4437_v25 = vld [vmem:[%s7139_s21 + $0xe8] sm:$0xff] }
 0x206   : > { %4363 = vmatpush.bf16.msrb.mxu2 %v5558_v36  ;;  %v5866_v36 = vld [vmem:[%s6575_s7 + $0x704] sm:$0xf]  ;;  %v5454_v43 = vor.u32 %v5850_v33, %v5451_v35  ;;  %v4436_v33 = vld [vmem:[%s7139_s21 + $0xe0] sm:$0xff]  ;;  %v4435_v35 = vld [vmem:[%s7139_s21 + $0xd8] sm:$0xff] }
 0x207   : > { %4376 = vmatpush.bf16.msrb.mxu3 %v5622_v40  ;;  %v5579_v40 = vld [vmem:[%s6575_s7 + $0x788] sm:$0xf0]  ;;  %v5518_v44 = vor.u32 %v5866_v36, %v5515_v37  ;;  %v4418_v37 = vld [vmem:[%s7139_s21 + $0x50] sm:$0xff] }
 0x208   : > { %4338 = vmatpush.bf16.msrb.mxu0 %v5422_v48  ;;  %v4112_v38 = vpop.f32.mrf.mxu2  ;;  %v5582_v45 = vor.u32 %v5882_v39, %v5579_v40  ;;  %v5945_v48 = vld [vmem:[#allocation1 + $0x36] sm:$0xff]  ;;  %v4417_v40 = vld [vmem:[%s7139_s21 + $0x48] sm:$0xff] }
 0x209   : > { %4351 = vmatpush.bf16.msrb.mxu1 %v5486_v60  ;;  %v4125_v41 = vpop.f32.mrf.mxu3  ;;  %v4434_v38 = vld [vmem:[%s7139_s21 + $0xd0] sm:$0xff] }
 0x20a   : > { %4364 = vmatpush.bf16.msrb.mxu2 %v5550_v50  ;;  %v4433_v41 = vld [vmem:[%s7139_s21 + $0xc8] sm:$0xff] }
 0x20b   : > { %4377 = vmatpush.bf16.msrb.mxu3 %v5614_v1 }
 0x20c   : > { %4339 = vmatpush.bf16.msrb.mxu0 %v5414_v2 }
 0x20d   : > { %4352 = vmatpush.bf16.msrb.mxu1 %v5478_v58 }
 0x20e   : > { %4365 = vmatpush.bf16.msrb.mxu2 %v5542_v59 }
 0x20f   : > { %4378 = vmatpush.bf16.msrb.mxu3 %v5606_v3 }
 0x210   : > { %4340 = vmatpush.bf16.msrb.mxu0 %v5406_v26 }
 0x211   : > { %4353 = vmatpush.bf16.msrb.mxu1 %v5470_v12 }
 0x212   : > { %4366 = vmatpush.bf16.msrb.mxu2 %v5534_v13  ;;  %v4423_v13 = vld [vmem:[%s7139_s21 + $0x78] sm:$0xff] }
 0x213   : > { %4379 = vmatpush.bf16.msrb.mxu3 %v5598_v17  ;;  %v5987_v17 = vmov 0.0  }
 0x214   : > { %4341 = vmatpush.bf16.msrb.mxu0 %v5398_v27  ;;  %2395 = vst [vmem:[#allocation2] sm:$0xf] %v5987_v17 }
 0x215   : > { %4354 = vmatpush.bf16.msrb.mxu1 %v5462_v28 }
 0x216   : > { %4367 = vmatpush.bf16.msrb.mxu2 %v5526_v30 }
 0x217   : > { %4380 = vmatpush.bf16.msrb.mxu3 %v5590_v34  ;;  %v4419_v34 = vld [vmem:[%s7139_s21 + $0x58] sm:$0xff] }
 0x218   : > { %4342 = vmatpush.bf16.msrb.mxu0 %v5390_v42  ;;  %v4136_v60 = vpop.f32.mrf.mxu0 }
 0x219   : > { %4355 = vmatpush.bf16.msrb.mxu1 %v5454_v43  ;;  %v4137_v50 = vadd.f32 %v4136_v60, %v4124_v11  ;;  %v4149_v51 = vpop.f32.mrf.mxu1  ;;  %v4430_v60 = vld [vmem:[%s7139_s21 + $0xb0] sm:$0xff] }
 0x21a   : > { %4368 = vmatpush.bf16.msrb.mxu2 %v5518_v44  ;;  %v4416_v44 = vld [vmem:[%s7139_s21 + $0x40] sm:$0xff] }
 0x21b   : > { %4381 = vmatpush.bf16.msrb.mxu3 %v5582_v45  ;;  %4343 = vmatmul.bf16.vlgmr.msrb.gmra.mxu0 %v5943_v46  ;;  %v4150_v52 = vadd.f32 %v4149_v51, %v4137_v50  ;;  %v4432_v45 = vld [vmem:[%s7139_s21 + $0xc0] sm:$0xff]  ;;  %v4413_v51 = vld [vmem:[%s7139_s21 + $0x28] sm:$0xff] }
 0x21c   : > { %4356 = vmatmul.bf16.vlgmr.msrb.gmra.mxu1 %v5944_v47  ;;  %4446 = vmatpush.msra.mxu0 %v4423_v13  ;;  %v4415_v47 = vld [vmem:[%s7139_s21 + $0x38] sm:$0xff] }
 0x21d   : > { %4369 = vmatmul.bf16.vlgmr.msrb.gmra.mxu2 %v5945_v48  ;;  %4466 = vmatpush.msra.mxu1 %v4439_v14  ;;  %v4431_v48 = vld [vmem:[%s7139_s21 + $0xb8] sm:$0xff] }
 0x21e   : > { %4382 = vmatmul.bf16.vlgmr.msrb.gmra.mxu3 %v5946_v49  ;;  %4447 = vmatpush.msra.mxu0 %v4422_v18  ;;  %v4414_v49 = vld [vmem:[%s7139_s21 + $0x30] sm:$0xff] }
 0x21f   : > { %4467 = vmatpush.msra.mxu1 %v4438_v19 }
 0x220   : > { %v4162_v0 = vpop.f32.mrf.mxu2  ;;  %v4138_v54 = vpop.f32.mrf.mxu0  ;;  %4448 = vmatpush.msra.mxu0 %v4421_v24 }
 0x221   : > { %v4163_v1 = vadd.f32 %v4162_v0, %v4150_v52  ;;  %v4175_v53 = vpop.f32.mrf.mxu3  ;;  %v4151_v55 = vpop.f32.mrf.mxu1  ;;  %4468 = vmatpush.msra.mxu1 %v4437_v25  ;;  %v4429_v52 = vld [vmem:[%s7139_s21 + $0xa8] sm:$0xff]  ;;  %v4411_v54 = vld [vmem:[%s7139_s21 + $0x18] sm:$0xff] }
 0x222   : > { %4449 = vmatpush.msra.mxu0 %v4420_v32  ;;  %v4427_v55 = vld [vmem:[%s7139_s21 + $0x98] sm:$0xff] }
 0x223   : > { %v7133_v29 = vadd.f32 %v4175_v53, %v4163_v1  ;;  %4469 = vmatpush.msra.mxu1 %v4436_v33  ;;  %v4412_v1 = vld [vmem:[%s7139_s21 + $0x20] sm:$0xff] }
 0x224   : > { %4450 = vmatpush.msra.mxu0 %v4419_v34  ;;  %v4428_v53 = vld [vmem:[%s7139_s21 + $0xa0] sm:$0xff] }
 0x225   : > { %4470 = vmatpush.msra.mxu1 %v4435_v35 }
 0x226   : > { %4451 = vmatpush.msra.mxu0 %v4418_v37 }
 0x227   : > { %4471 = vmatpush.msra.mxu1 %v4434_v38 }
 0x228   : > { %v4164_v56 = vpop.f32.mrf.mxu2  ;;  %4452 = vmatpush.msra.mxu0 %v4417_v40 }
 0x229   : > { %v4177_v57 = vpop.f32.mrf.mxu3  ;;  %4472 = vmatpush.msra.mxu1 %v4433_v41  ;;  %v4410_v56 = vld [vmem:[%s7139_s21 + $0x10] sm:$0xff] }
 0x22a   : > { %4453 = vmatpush.msra.mxu0 %v4416_v44  ;;  %v4426_v57 = vld [vmem:[%s7139_s21 + $0x90] sm:$0xff] }
 0x22b   : > { %4473 = vmatpush.msra.mxu1 %v4432_v45 }
 0x22c   : > { %4454 = vmatpush.msra.mxu0 %v4415_v47 }
 0x22d   : > { %4474 = vmatpush.msra.mxu1 %v4431_v48 }
 0x22e   : > { %4455 = vmatpush.msra.mxu0 %v4414_v49 }
 0x22f   : > { %4475 = vmatpush.msra.mxu1 %v4430_v60 }
 0x230   : > { %4456 = vmatpush.msra.mxu0 %v4413_v51 }
 0x231   : > { %4476 = vmatpush.msra.mxu1 %v4429_v52 }
 0x232   : > { %4457 = vmatpush.msra.mxu0 %v4412_v1 }
 0x233   : > { %4477 = vmatpush.msra.mxu1 %v4428_v53 }
 0x234   : > { %4458 = vmatpush.msra.mxu0 %v4411_v54 }
 0x235   : > { %4478 = vmatpush.msra.mxu1 %v4427_v55 }
 0x236   : > { %4459 = vmatpush.msra.mxu0 %v4410_v56 }
 0x237   : > { %4479 = vmatpush.msra.mxu1 %v4426_v57 }
 0x238   : > { %v4188_v2 = vpop.f32.mrf.mxu0 }
 0x239   : > { %v4201_v58 = vpop.f32.mrf.mxu1 }
 0x23a   : > { %v4202_v59 = vadd.f32 %v4201_v58, %v4188_v2 }
 0x240   : > { %v4214_v61 = vpop.f32.mrf.mxu2  ;;  %v4190_v4 = vpop.f32.mrf.mxu0 }
 0x241   : > { %v4215_v62 = vadd.f32 %v4214_v61, %v4202_v59  ;;  %v4227_v63 = vpop.f32.mrf.mxu3  ;;  %v4203_v20 = vpop.f32.mrf.mxu1  ;;  %v4409_v59 = vld [vmem:[%s7139_s21 + $0x8] sm:$0xff]  ;;  %v4424_v4 = vld [vmem:[%s7139_s21 + $0x80] sm:$0xff] }
 0x242   : > { %v4425_v61 = vld [vmem:[%s7139_s21 + $0x88] sm:$0xff]  ;;  %4460 = vmatpush.msra.mxu0 %v4409_v59 }
 0x243   : > { %v4228_v3 = vadd.f32 %v4227_v63, %v4215_v62  ;;  %4480 = vmatpush.msra.mxu1 %v4425_v61 }
 0x245   : > { %4481 = vmatpush.msra.mxu1 %v4424_v4 }
 0x248   : > { %v4216_v5 = vpop.f32.mrf.mxu2 }
 0x249   : > { %v4229_v6 = vpop.f32.mrf.mxu3 }
 0x258   : > { %v4240_v21 = vpop.f32.mrf.mxu0 }
 0x259   : > { %v4253_v7 = vpop.f32.mrf.mxu1  ;;  %v4241_v16 = vadd.f32 %v4240_v21, %v4228_v3  ;;  %v4408_v3 = vld [vmem:[%s7139_s21] sm:$0xff] }
 0x25a   : > { %4461 = vmatpush.msra.mxu0 %v4408_v3 }
 0x25b   : > { %v4254_v30 = vadd.f32 %v4253_v7, %v4241_v16 }
 0x260   : > { %v4266_v22 = vpop.f32.mrf.mxu2  ;;  %v4242_v9 = vpop.f32.mrf.mxu0 }
 0x261   : > { %v4279_v8 = vpop.f32.mrf.mxu3  ;;  %v4255_v26 = vpop.f32.mrf.mxu1  ;;  %v4267_v36 = vadd.f32 %v4266_v22, %v4254_v30  ;;  %v4399_v9 = vld [vmem:[%s2379_s26] sm:$0x3] }
 0x262   : > { %v2396_v26 = vld [vmem:[#allocation2] sm:$0xf]  ;;  %v4401_v16 = vperm.slane %v4399_v9, 0 }
 0x263   : > { %v4280_v43 = vadd.f32 %v4279_v8, %v4267_v36 }
 0x268   : > { %v4268_v10 = vpop.f32.mrf.mxu2 }
 0x269   : > { %v4281_v11 = vpop.f32.mrf.mxu3 }
 0x278   : > { %v4292_v12 = vpop.f32.mrf.mxu0 }
 0x279   : > { %v4305_v15 = vpop.f32.mrf.mxu1  ;;  %v4293_v46 = vadd.f32 %v4292_v12, %v4280_v43  ;;  %v4402_v12 = vperm.slane %v4399_v9, 1 }
 0x27b   : > { %v4306_v50 = vadd.f32 %v4305_v15, %v4293_v46  ;;  %v4403_v17 = vrot.slane %v4402_v12, 6 }
 0x27d   : > { %v4404_v18 = vsel %vm4390_vm0, %v4401_v16, %v4403_v17 }
 0x280   : > { %v4318_v23 = vpop.f32.mrf.mxu2  ;;  %v4294_v28 = vpop.f32.mrf.mxu0 }
 0x281   : > { %v4331_v27 = vpop.f32.mrf.mxu3  ;;  %v4307_v31 = vpop.f32.mrf.mxu1  ;;  %v4319_v0 = vadd.f32 %v4318_v23, %v4306_v50 }
 0x283   : > { %v4332_v2 = vadd.f32 %v4331_v27, %v4319_v0 }
 0x288   : > { %v4320_v39 = vpop.f32.mrf.mxu2 }
 0x289   : > { %v4333_v42 = vpop.f32.mrf.mxu3 }
 0x298   : > { %v4344_v58 = vpop.f32.mrf.mxu0 }
 0x299   : > { %v4357_v62 = vpop.f32.mrf.mxu1  ;;  %v4345_v63 = vadd.f32 %v4344_v58, %v4332_v2 }
 0x29b   : > { %v4358_v20 = vadd.f32 %v4357_v62, %v4345_v63 }
 0x2a0   : > { %v4370_v5 = vpop.f32.mrf.mxu2  ;;  %v4346_v7 = vpop.f32.mrf.mxu0 }
 0x2a1   : > { %v4371_v6 = vadd.f32 %v4370_v5, %v4358_v20  ;;  %v4383_v21 = vpop.f32.mrf.mxu3  ;;  %v4359_v22 = vpop.f32.mrf.mxu1 }
 0x2a3   : > { %v4384_v8 = vadd.f32 %v4383_v21, %v4371_v6 }
 0x2a5   : > { %v4389_v10 = vrot.slane %v4384_v8, 6 }
 0x2a7   : > { %v4391_v11 = vsel %vm4390_vm0, %v7133_v29, %v4389_v10 }
 0x2a8   : > { %v4393_v13 = vadd.f32 %v4391_v11, %v2396_v26  ;;  %v4372_v14 = vpop.f32.mrf.mxu2 }
 0x2a9   : > { %v4385_v15 = vpop.f32.mrf.mxu3 }
 0x2aa   : > { %4394 = vst [vmem:[#allocation2] sm:$0xf] %v4393_v13 }
 0x2b1   : > { %v4398_v19 = vld [vmem:[#allocation2] sm:$0xf] }
 0x2b2   : > { %v4406_v23 = vadd.f32 %v4404_v18, %v4398_v19 }
 0x2b4   : > { %v4407_v24 = vmax.f32 %v4406_v23, 0.0 }
 0x2b6   : > { %4441 = vst [vmem:[#allocation1] ss:$4 sm:$0xff] %v4407_v24 }
 0x2bd   : > { %v4442_v25 = vld.sshfl [vmem:[#allocation1] sm:$0xff pattern:$0x73625140]  ;;  %v4443_v27 = vld.sshfl [vmem:[#allocation1 + $0x8] sm:$0xff pattern:$0x73625140] }
 0x2be   : > { %4462 = vmatmul.f32.vlgmr.msra.gmra.mxu0 %v4442_v25  ;;  %4482 = vmatmul.f32.vlgmr.msra.gmra.mxu1 %v4443_v27 }
 0x33b   : > { %v4463_v29 = vpop.f32.mrf.mxu0  ;;  %v4483_v28 = vpop.f32.mrf.mxu1 }
 0x33c   : > { %v4484_v30 = vadd.f32 %v4483_v28, %v4463_v29 }
 0x33e   : > { %4487 = vst.msk [vmem:[%s2390_s30] sm:$0x3] %vm4486_vm1, %v4484_v30 }
 0x33f PF: > { %s14_s19 = sadd.s32 1, %s5985_s19   ;;  %s7203_s15 = smov %s5973_s16 }
 0x340   : > { %p11_p12 = scmp.ge.s32.totalorder %s14_s19, 4   ;;  %s7204_s16 = smov %s6048_s23 }
 0x341   : > { %s7205_s17 = smov %s5981_s18  ;;  %s7206_s18 = smov %s7208_s20 }
 0x342   :  { %13 = sbr.rel (!%p11_p12) target bundleno = 3 (0x3), region = 146 }

</bundles_post_ra>
